<compile_context>
chip_gen: v6e
topology: v6e:2x2x1
jax: 0.10.0
libtpu: 0.0.40
codegen_flags: <defaults>
</compile_context>

<pallas_src>
import jax
import jax.numpy as jnp
from jax.experimental import pallas as pl
from jax.experimental.pallas import tpu as pltpu

# --- small but structurally faithful hyper-parameters ---
VOCAB = 256
HIDDEN = 128          # "hidden_size"
N_LAYERS = 2          # "num_hidden_layers"
N_HEADS = 4           # "num_attention_heads"
N_KV_HEADS = 2        # fixed default inside GroupedQueryAttention
HEAD_DIM = 64         # fixed default inside GroupedQueryAttention
FFN_DIM = 256         # "intermediate_size"
EPS = 1e-6
B = 2
L = 8


# ----------------------------------------------------------------------------
# Fused whole-model Pallas kernel
# ----------------------------------------------------------------------------
def llama_forward_kernel(x_ref, rope_ref, wqkv_ref, wo_ref, w12_ref, w3_ref,
                         wlm_ref, out_ref):
    """Entire LlamaModel forward for all tokens (kept resident in VMEM).

    x_ref:    (T, HIDDEN)                 f32   embedded tokens (T = B*L)
    rope_ref: (T, 2*HEAD_DIM)             f32   [cos | sign-folded sin]
    wqkv_ref: (N_LAYERS, HIDDEN, 512)     bf16  [Wq | Wk | Wv], norm1 folded in
    wo_ref:   (N_LAYERS, 256, HIDDEN)     bf16
    w12_ref:  (N_LAYERS, HIDDEN, 512)     bf16  [W1 | W2], norm2 folded in
    w3_ref:   (N_LAYERS, FFN_DIM, HIDDEN) bf16
    wlm_ref:  (HIDDEN, VOCAB)             bf16  final norm folded in
    out_ref:  (T, VOCAB)                  f32   logits
    """
    x = x_ref[...]                                   # (T, D) f32 residual stream
    rope_tab = rope_ref[...]
    cos = rope_tab[:, :HEAD_DIM]                     # (T, dh)
    sin_signed = rope_tab[:, HEAD_DIM:]              # (T, dh) sign-folded sin
    half = HEAD_DIM // 2
    group = N_HEADS // N_KV_HEADS
    scale = HEAD_DIM ** -0.5

    def rmsnorm(v):
        # RMSNorm scale weights are folded into the downstream matmul weights.
        return v * jax.lax.rsqrt(jnp.mean(v * v, axis=-1, keepdims=True) + EPS)

    def rope(t):
        # q*cos + rotate_half(q)*sin ; rotate_half(q) == sign * roll(q, half)
        return t * cos + pltpu.roll(t, half, 1) * sin_signed

    for layer in range(N_LAYERS):
        # ----- grouped-query attention branch -----
        h = rmsnorm(x).astype(jnp.bfloat16)
        qkv = jnp.dot(h, wqkv_ref[layer],
                      preferred_element_type=jnp.float32)       # (T, 512) f32

        def head(i):                                             # (T, HEAD_DIM)
            return qkv[:, i * HEAD_DIM:(i + 1) * HEAD_DIM]

        k_heads = [rope(head(N_HEADS + g)) for g in range(N_KV_HEADS)]
        v_heads = [head(N_HEADS + N_KV_HEADS + g) for g in range(N_KV_HEADS)]
        q3 = jnp.stack([rope(head(hq)) for hq in range(N_HEADS)], axis=1)        # (T,H,dh)
        # repeat_interleave of kv heads (reference quirk: head mixing softmax)
        k3 = jnp.stack([k_heads[hq // group] for hq in range(N_HEADS)], axis=1)  # (T,H,dh)
        v3 = jnp.stack([v_heads[hq // group] for hq in range(N_HEADS)], axis=1)  # (T,H,dh)

        # per-position head-vs-head scores: (T, H, H)
        scores = jnp.sum(q3[:, :, None, :] * k3[:, None, :, :], axis=-1) * scale
        m = jnp.max(scores, axis=-1, keepdims=True)
        e = jnp.exp(scores - m)
        attn = e * pl.reciprocal(jnp.sum(e, axis=-1, keepdims=True), approx=True)
        ctx3 = jnp.sum(attn[:, :, :, None] * v3[:, None, :, :], axis=2)          # (T,H,dh)
        ctx = jnp.concatenate([ctx3[:, hq, :] for hq in range(N_HEADS)], axis=-1)

        x = x + jnp.dot(ctx.astype(jnp.bfloat16), wo_ref[layer],
                        preferred_element_type=jnp.float32)      # residual 1

        # ----- SwiGLU feed-forward branch -----
        h2 = rmsnorm(x).astype(jnp.bfloat16)
        ab = jnp.dot(h2, w12_ref[layer],
                     preferred_element_type=jnp.float32)         # (T, 2*FFN)
        a = ab[:, :FFN_DIM]
        b = ab[:, FFN_DIM:]
        gated = (a * jax.nn.sigmoid(a) * b).astype(jnp.bfloat16)  # SiLU(w1) * w2
        x = x + jnp.dot(gated, w3_ref[layer],
                        preferred_element_type=jnp.float32)      # residual 2

    # ----- final RMSNorm + lm_head -----
    hf = rmsnorm(x).astype(jnp.bfloat16)
    out_ref[...] = jnp.dot(hf, wlm_ref[...], preferred_element_type=jnp.float32)


# ----------------------------------------------------------------------------
# Pallas call wrapper
# ----------------------------------------------------------------------------
def _full_spec(arr):
    ndim = arr.ndim
    return pl.BlockSpec(arr.shape, lambda i, _n=ndim: (0,) * _n)


def run_llama(x_tok, rope_tab, fused):
    n_tok = x_tok.shape[0]
    args = (x_tok, rope_tab, fused["wqkv"], fused["wo"], fused["w12"],
            fused["w3"], fused["wlm"])
    return pl.pallas_call(
        llama_forward_kernel,
        out_shape=jax.ShapeDtypeStruct((n_tok, VOCAB), jnp.float32),
        grid=(1,),
        in_specs=[_full_spec(a) for a in args],
        out_specs=pl.BlockSpec((n_tok, VOCAB), lambda i: (0, 0)),
        compiler_params=pltpu.CompilerParams(dimension_semantics=("arbitrary",)),
    )(*args)


# ----------------------------------------------------------------------------
# Model glue (embedding gather, RoPE tables, parameter init / fusion)
# ----------------------------------------------------------------------------
def rope_table(seq_len, batch):
    half = HEAD_DIM // 2
    inv_freq = 1.0 / (
        10000.0 ** (jnp.arange(0, HEAD_DIM, 2, dtype=jnp.float32) / HEAD_DIM)
    )
    t = jnp.arange(seq_len, dtype=jnp.float32)
    freqs = jnp.einsum("i,j->ij", t, inv_freq)                  # (L, dh/2)
    emb = jnp.concatenate([freqs, freqs], axis=-1)              # (L, dh)
    cos = jnp.cos(emb)
    # fold rotate_half's sign into sin so the kernel only needs a lane roll:
    sign = jnp.concatenate(
        [-jnp.ones((half,), jnp.float32), jnp.ones((half,), jnp.float32)]
    )
    sin_signed = jnp.sin(emb) * sign
    table = jnp.concatenate([cos, sin_signed], axis=-1)         # (L, 128) packed
    # flattened-token table: position of row (b*L + l) is l
    return jnp.tile(table, (batch, 1))


def init_params(key):
    scale = 0.02
    keys = jax.random.split(key, N_LAYERS + 2)
    embed = jax.random.normal(keys[0], (VOCAB, HIDDEN), jnp.float32) * scale
    layers = []
    for layer in range(N_LAYERS):
        ks = jax.random.split(keys[1 + layer], 7)
        layers.append(
            dict(
                n1=jnp.ones((HIDDEN,), jnp.float32),
                wq=jax.random.normal(ks[0], (HIDDEN, N_HEADS * HEAD_DIM), jnp.float32) * scale,
                wk=jax.random.normal(ks[1], (HIDDEN, N_KV_HEADS * HEAD_DIM), jnp.float32) * scale,
                wv=jax.random.normal(ks[2], (HIDDEN, N_KV_HEADS * HEAD_DIM), jnp.float32) * scale,
                wo=jax.random.normal(ks[3], (N_HEADS * HEAD_DIM, HIDDEN), jnp.float32) * scale,
                n2=jnp.ones((HIDDEN,), jnp.float32),
                w1=jax.random.normal(ks[4], (HIDDEN, FFN_DIM), jnp.float32) * scale,
                w2=jax.random.normal(ks[5], (HIDDEN, FFN_DIM), jnp.float32) * scale,
                w3=jax.random.normal(ks[6], (FFN_DIM, HIDDEN), jnp.float32) * scale,
            )
        )
    norm_f = jnp.ones((HIDDEN,), jnp.float32)
    w_lm = jax.random.normal(keys[-1], (HIDDEN, VOCAB), jnp.float32) * scale
    return embed, layers, norm_f, w_lm


def prepare_params(layers, norm_f, w_lm):
    """Fuse projections, fold RMSNorm weights into downstream matmuls, cast bf16.

    (w * x_normed) @ W == x_normed @ (diag(w) @ W), an exact transform.
    """
    wqkv, wo, w12, w3 = [], [], [], []
    for p in layers:
        wqkv.append(
            jnp.concatenate([p["wq"], p["wk"], p["wv"]], axis=1) * p["n1"][:, None])
        wo.append(p["wo"])
        w12.append(jnp.concatenate([p["w1"], p["w2"]], axis=1) * p["n2"][:, None])
        w3.append(p["w3"])
    return dict(
        wqkv=jnp.stack(wqkv).astype(jnp.bfloat16),               # (NL, 128, 512)
        wo=jnp.stack(wo).astype(jnp.bfloat16),                   # (NL, 256, 128)
        w12=jnp.stack(w12).astype(jnp.bfloat16),                 # (NL, 128, 512)
        w3=jnp.stack(w3).astype(jnp.bfloat16),                   # (NL, 256, 128)
        wlm=(w_lm * norm_f[:, None]).astype(jnp.bfloat16),       # (128, 256)
    )


def llama_forward(input_ids, embed, fused):
    batch, seq = input_ids.shape
    x = embed[input_ids.reshape(-1)]                 # embedding gather (glue), (B*L, D)
    rope = rope_table(seq, batch)                    # (B*L, 2*HEAD_DIM)
    logits = run_llama(x, rope, fused)               # (B*L, VOCAB)
    return logits.reshape(batch, seq, VOCAB)


if __name__ == "__main__":
    key = jax.random.PRNGKey(0)
    pkey, ikey = jax.random.split(key)
    embed, layers, norm_f, w_lm = init_params(pkey)
    fused = prepare_params(layers, norm_f, w_lm)
    input_ids = jax.random.randint(ikey, (B, L), 0, VOCAB, dtype=jnp.int32)

    logits = llama_forward(input_ids, embed, fused)
    logits = jax.block_until_ready(logits)

    assert logits.shape == (B, L, VOCAB), logits.shape
    assert jnp.all(jnp.isfinite(logits))
    print("KERNEL_OK")
</pallas_src>

<mosaic_0001>
module attributes {stable_mosaic.version = 11 : i64} {
  func.func @llama_forward_kernel(%arg0: i32, %arg1: memref<16x128xf32, #tpu.memory_space<vmem>>, %arg2: memref<16x128xf32, #tpu.memory_space<vmem>>, %arg3: memref<2x128x512xbf16, #tpu.memory_space<vmem>>, %arg4: memref<2x256x128xbf16, #tpu.memory_space<vmem>>, %arg5: memref<2x128x512xbf16, #tpu.memory_space<vmem>>, %arg6: memref<2x256x128xbf16, #tpu.memory_space<vmem>>, %arg7: memref<128x256xbf16, #tpu.memory_space<vmem>>, %arg8: memref<16x256xf32, #tpu.memory_space<vmem>>) attributes {dimension_semantics = [#tpu.dimension_semantics<arbitrary>], iteration_bounds = array<i64: 1>, scalar_prefetch = 0 : i64, scratch_operands = 0 : i64, tpu.core_type = #tpu.core_type<tc>, window_params = [{pipeline_mode = #tpu.pipeline_mode<synchronous>, transform_indices = @transform_0, window_bounds = array<i64: 16, 128>}, {pipeline_mode = #tpu.pipeline_mode<synchronous>, transform_indices = @transform_1, window_bounds = array<i64: 16, 128>}, {pipeline_mode = #tpu.pipeline_mode<synchronous>, transform_indices = @transform_2, window_bounds = array<i64: 2, 128, 512>}, {pipeline_mode = #tpu.pipeline_mode<synchronous>, transform_indices = @transform_3, window_bounds = array<i64: 2, 256, 128>}, {pipeline_mode = #tpu.pipeline_mode<synchronous>, transform_indices = @transform_4, window_bounds = array<i64: 2, 128, 512>}, {pipeline_mode = #tpu.pipeline_mode<synchronous>, transform_indices = @transform_5, window_bounds = array<i64: 2, 256, 128>}, {pipeline_mode = #tpu.pipeline_mode<synchronous>, transform_indices = @transform_6, window_bounds = array<i64: 128, 256>}, {pipeline_mode = #tpu.pipeline_mode<synchronous>, transform_indices = @transform_7, window_bounds = array<i64: 16, 256>}]} {
    %c0 = arith.constant 0 : index
    %c0_0 = arith.constant 0 : index
    %0 = vector.load %arg1[%c0, %c0_0] : memref<16x128xf32, #tpu.memory_space<vmem>>, vector<16x128xf32>
    %c0_1 = arith.constant 0 : index
    %c0_2 = arith.constant 0 : index
    %1 = vector.load %arg2[%c0_1, %c0_2] : memref<16x128xf32, #tpu.memory_space<vmem>>, vector<16x128xf32>
    %2 = vector.extract_strided_slice %1 {offsets = [0, 0], sizes = [16, 64], strides = [1, 1]} : vector<16x128xf32> to vector<16x64xf32>
    %3 = vector.extract_strided_slice %1 {offsets = [0, 64], sizes = [16, 64], strides = [1, 1]} : vector<16x128xf32> to vector<16x64xf32>
    %4 = arith.mulf %0, %0 : vector<16x128xf32>
    %cst = arith.constant dense<0.000000e+00> : vector<16xf32>
    %5 = vector.multi_reduction <add>, %4, %cst [1] : vector<16x128xf32> to vector<16xf32>
    %6 = vector.shape_cast %5 : vector<16xf32> to vector<16x1xf32>
    %cst_3 = arith.constant 1.280000e+02 : f32
    %7 = vector.broadcast %cst_3 : f32 to vector<16x1xf32>
    %8 = arith.divf %6, %7 : vector<16x1xf32>
    %cst_4 = arith.constant 9.99999997E-7 : f32
    %9 = vector.broadcast %cst_4 : f32 to vector<16x1xf32>
    %10 = arith.addf %8, %9 : vector<16x1xf32>
    %11 = math.rsqrt %10 : vector<16x1xf32>
    %12 = vector.broadcast %11 : vector<16x1xf32> to vector<16x128xf32>
    %13 = arith.mulf %0, %12 : vector<16x128xf32>
    %14 = arith.truncf %13 : vector<16x128xf32> to vector<16x128xbf16>
    %c0_5 = arith.constant 0 : index
    %c0_6 = arith.constant 0 : index
    %c0_7 = arith.constant 0 : index
    %15 = vector.load %arg3[%c0_5, %c0_6, %c0_7] : memref<2x128x512xbf16, #tpu.memory_space<vmem>>, vector<1x128x512xbf16>
    %16 = vector.shape_cast %15 : vector<1x128x512xbf16> to vector<128x512xbf16>
    %cst_8 = arith.constant dense<0.000000e+00> : vector<16x512xf32>
    %17 = tpu.matmul %14, %16, %cst_8 {dimension_numbers = #tpu.dot_dimension_numbers<[1], [0], [0], [1], [0, 0, 1, 1], [], []>} : vector<16x128xbf16>, vector<128x512xbf16>, vector<16x512xf32> -> vector<16x512xf32>
    %18 = vector.extract_strided_slice %17 {offsets = [0, 256], sizes = [16, 64], strides = [1, 1]} : vector<16x512xf32> to vector<16x64xf32>
    %19 = arith.mulf %18, %2 : vector<16x64xf32>
    %c32_i32 = arith.constant 32 : i32
    %20 = tpu.dynamic_rotate %18 by %c32_i32 dim 1 : vector<16x64xf32>, i32 -> vector<16x64xf32>
    %21 = arith.mulf %20, %3 : vector<16x64xf32>
    %22 = arith.addf %19, %21 : vector<16x64xf32>
    %23 = vector.extract_strided_slice %17 {offsets = [0, 320], sizes = [16, 64], strides = [1, 1]} : vector<16x512xf32> to vector<16x64xf32>
    %24 = arith.mulf %23, %2 : vector<16x64xf32>
    %c32_i32_9 = arith.constant 32 : i32
    %25 = tpu.dynamic_rotate %23 by %c32_i32_9 dim 1 : vector<16x64xf32>, i32 -> vector<16x64xf32>
    %26 = arith.mulf %25, %3 : vector<16x64xf32>
    %27 = arith.addf %24, %26 : vector<16x64xf32>
    %28 = vector.extract_strided_slice %17 {offsets = [0, 384], sizes = [16, 64], strides = [1, 1]} : vector<16x512xf32> to vector<16x64xf32>
    %29 = vector.extract_strided_slice %17 {offsets = [0, 448], sizes = [16, 64], strides = [1, 1]} : vector<16x512xf32> to vector<16x64xf32>
    %30 = vector.extract_strided_slice %17 {offsets = [0, 0], sizes = [16, 64], strides = [1, 1]} : vector<16x512xf32> to vector<16x64xf32>
    %31 = arith.mulf %30, %2 : vector<16x64xf32>
    %c32_i32_10 = arith.constant 32 : i32
    %32 = tpu.dynamic_rotate %30 by %c32_i32_10 dim 1 : vector<16x64xf32>, i32 -> vector<16x64xf32>
    %33 = arith.mulf %32, %3 : vector<16x64xf32>
    %34 = arith.addf %31, %33 : vector<16x64xf32>
    %35 = vector.extract_strided_slice %17 {offsets = [0, 64], sizes = [16, 64], strides = [1, 1]} : vector<16x512xf32> to vector<16x64xf32>
    %36 = arith.mulf %35, %2 : vector<16x64xf32>
    %c32_i32_11 = arith.constant 32 : i32
    %37 = tpu.dynamic_rotate %35 by %c32_i32_11 dim 1 : vector<16x64xf32>, i32 -> vector<16x64xf32>
    %38 = arith.mulf %37, %3 : vector<16x64xf32>
    %39 = arith.addf %36, %38 : vector<16x64xf32>
    %40 = vector.extract_strided_slice %17 {offsets = [0, 128], sizes = [16, 64], strides = [1, 1]} : vector<16x512xf32> to vector<16x64xf32>
    %41 = arith.mulf %40, %2 : vector<16x64xf32>
    %c32_i32_12 = arith.constant 32 : i32
    %42 = tpu.dynamic_rotate %40 by %c32_i32_12 dim 1 : vector<16x64xf32>, i32 -> vector<16x64xf32>
    %43 = arith.mulf %42, %3 : vector<16x64xf32>
    %44 = arith.addf %41, %43 : vector<16x64xf32>
    %45 = vector.extract_strided_slice %17 {offsets = [0, 192], sizes = [16, 64], strides = [1, 1]} : vector<16x512xf32> to vector<16x64xf32>
    %46 = arith.mulf %45, %2 : vector<16x64xf32>
    %c32_i32_13 = arith.constant 32 : i32
    %47 = tpu.dynamic_rotate %45 by %c32_i32_13 dim 1 : vector<16x64xf32>, i32 -> vector<16x64xf32>
    %48 = arith.mulf %47, %3 : vector<16x64xf32>
    %49 = arith.addf %46, %48 : vector<16x64xf32>
    %50 = vector.shape_cast %34 : vector<16x64xf32> to vector<16x1x64xf32>
    %51 = vector.shape_cast %39 : vector<16x64xf32> to vector<16x1x64xf32>
    %52 = vector.shape_cast %44 : vector<16x64xf32> to vector<16x1x64xf32>
    %53 = vector.shape_cast %49 : vector<16x64xf32> to vector<16x1x64xf32>
    %54 = tpu.concatenate %50, %51, %52, %53 in 1 : vector<16x1x64xf32>, vector<16x1x64xf32>, vector<16x1x64xf32>, vector<16x1x64xf32> -> vector<16x4x64xf32>
    %55 = vector.shape_cast %22 : vector<16x64xf32> to vector<16x1x64xf32>
    %56 = vector.shape_cast %22 : vector<16x64xf32> to vector<16x1x64xf32>
    %57 = vector.shape_cast %27 : vector<16x64xf32> to vector<16x1x64xf32>
    %58 = vector.shape_cast %27 : vector<16x64xf32> to vector<16x1x64xf32>
    %59 = tpu.concatenate %55, %56, %57, %58 in 1 : vector<16x1x64xf32>, vector<16x1x64xf32>, vector<16x1x64xf32>, vector<16x1x64xf32> -> vector<16x4x64xf32>
    %60 = vector.shape_cast %28 : vector<16x64xf32> to vector<16x1x64xf32>
    %61 = vector.shape_cast %28 : vector<16x64xf32> to vector<16x1x64xf32>
    %62 = vector.shape_cast %29 : vector<16x64xf32> to vector<16x1x64xf32>
    %63 = vector.shape_cast %29 : vector<16x64xf32> to vector<16x1x64xf32>
    %64 = tpu.concatenate %60, %61, %62, %63 in 1 : vector<16x1x64xf32>, vector<16x1x64xf32>, vector<16x1x64xf32>, vector<16x1x64xf32> -> vector<16x4x64xf32>
    %65 = vector.shape_cast %54 : vector<16x4x64xf32> to vector<16x4x1x64xf32>
    %66 = vector.shape_cast %59 : vector<16x4x64xf32> to vector<16x1x4x64xf32>
    %67 = vector.broadcast %65 : vector<16x4x1x64xf32> to vector<16x4x4x64xf32>
    %68 = vector.broadcast %66 : vector<16x1x4x64xf32> to vector<16x4x4x64xf32>
    %69 = arith.mulf %67, %68 : vector<16x4x4x64xf32>
    %cst_14 = arith.constant dense<0.000000e+00> : vector<16x4x4xf32>
    %70 = vector.multi_reduction <add>, %69, %cst_14 [3] : vector<16x4x4x64xf32> to vector<16x4x4xf32>
    %cst_15 = arith.constant 1.250000e-01 : f32
    %71 = vector.broadcast %cst_15 : f32 to vector<16x4x4xf32>
    %72 = arith.mulf %70, %71 : vector<16x4x4xf32>
    %cst_16 = arith.constant dense<0xFF800000> : vector<16x4xf32>
    %73 = vector.multi_reduction <maximumf>, %72, %cst_16 [2] : vector<16x4x4xf32> to vector<16x4xf32>
    %74 = vector.shape_cast %73 : vector<16x4xf32> to vector<16x4x1xf32>
    %75 = vector.broadcast %74 : vector<16x4x1xf32> to vector<16x4x4xf32>
    %76 = arith.subf %72, %75 : vector<16x4x4xf32>
    %77 = math.exp %76 : vector<16x4x4xf32>
    %cst_17 = arith.constant dense<0.000000e+00> : vector<16x4xf32>
    %78 = vector.multi_reduction <add>, %77, %cst_17 [2] : vector<16x4x4xf32> to vector<16x4xf32>
    %79 = vector.shape_cast %78 : vector<16x4xf32> to vector<16x4x1xf32>
    %80 = tpu.reciprocal %79 {approx = true} : vector<16x4x1xf32> -> vector<16x4x1xf32>
    %81 = vector.broadcast %80 : vector<16x4x1xf32> to vector<16x4x4xf32>
    %82 = arith.mulf %77, %81 : vector<16x4x4xf32>
    %83 = vector.shape_cast %82 : vector<16x4x4xf32> to vector<16x4x4x1xf32>
    %84 = vector.shape_cast %64 : vector<16x4x64xf32> to vector<16x1x4x64xf32>
    %85 = vector.broadcast %83 : vector<16x4x4x1xf32> to vector<16x4x4x64xf32>
    %86 = vector.broadcast %84 : vector<16x1x4x64xf32> to vector<16x4x4x64xf32>
    %87 = arith.mulf %85, %86 : vector<16x4x4x64xf32>
    %cst_18 = arith.constant dense<0.000000e+00> : vector<16x4x64xf32>
    %88 = vector.multi_reduction <add>, %87, %cst_18 [2] : vector<16x4x4x64xf32> to vector<16x4x64xf32>
    %89 = vector.extract_strided_slice %88 {offsets = [0, 0, 0], sizes = [16, 1, 64], strides = [1, 1, 1]} : vector<16x4x64xf32> to vector<16x1x64xf32>
    %90 = vector.shape_cast %89 : vector<16x1x64xf32> to vector<16x64xf32>
    %91 = vector.extract_strided_slice %88 {offsets = [0, 1, 0], sizes = [16, 1, 64], strides = [1, 1, 1]} : vector<16x4x64xf32> to vector<16x1x64xf32>
    %92 = vector.shape_cast %91 : vector<16x1x64xf32> to vector<16x64xf32>
    %93 = vector.extract_strided_slice %88 {offsets = [0, 2, 0], sizes = [16, 1, 64], strides = [1, 1, 1]} : vector<16x4x64xf32> to vector<16x1x64xf32>
    %94 = vector.shape_cast %93 : vector<16x1x64xf32> to vector<16x64xf32>
    %95 = vector.extract_strided_slice %88 {offsets = [0, 3, 0], sizes = [16, 1, 64], strides = [1, 1, 1]} : vector<16x4x64xf32> to vector<16x1x64xf32>
    %96 = vector.shape_cast %95 : vector<16x1x64xf32> to vector<16x64xf32>
    %97 = tpu.concatenate %90, %92, %94, %96 in 1 : vector<16x64xf32>, vector<16x64xf32>, vector<16x64xf32>, vector<16x64xf32> -> vector<16x256xf32>
    %98 = arith.truncf %97 : vector<16x256xf32> to vector<16x256xbf16>
    %c0_19 = arith.constant 0 : index
    %c0_20 = arith.constant 0 : index
    %c0_21 = arith.constant 0 : index
    %99 = vector.load %arg4[%c0_19, %c0_20, %c0_21] : memref<2x256x128xbf16, #tpu.memory_space<vmem>>, vector<1x256x128xbf16>
    %100 = vector.shape_cast %99 : vector<1x256x128xbf16> to vector<256x128xbf16>
    %cst_22 = arith.constant dense<0.000000e+00> : vector<16x128xf32>
    %101 = tpu.matmul %98, %100, %cst_22 {dimension_numbers = #tpu.dot_dimension_numbers<[1], [0], [0], [1], [0, 0, 1, 1], [], []>} : vector<16x256xbf16>, vector<256x128xbf16>, vector<16x128xf32> -> vector<16x128xf32>
    %102 = arith.addf %0, %101 : vector<16x128xf32>
    %103 = arith.mulf %102, %102 : vector<16x128xf32>
    %cst_23 = arith.constant dense<0.000000e+00> : vector<16xf32>
    %104 = vector.multi_reduction <add>, %103, %cst_23 [1] : vector<16x128xf32> to vector<16xf32>
    %105 = vector.shape_cast %104 : vector<16xf32> to vector<16x1xf32>
    %cst_24 = arith.constant 1.280000e+02 : f32
    %106 = vector.broadcast %cst_24 : f32 to vector<16x1xf32>
    %107 = arith.divf %105, %106 : vector<16x1xf32>
    %cst_25 = arith.constant 9.99999997E-7 : f32
    %108 = vector.broadcast %cst_25 : f32 to vector<16x1xf32>
    %109 = arith.addf %107, %108 : vector<16x1xf32>
    %110 = math.rsqrt %109 : vector<16x1xf32>
    %111 = vector.broadcast %110 : vector<16x1xf32> to vector<16x128xf32>
    %112 = arith.mulf %102, %111 : vector<16x128xf32>
    %113 = arith.truncf %112 : vector<16x128xf32> to vector<16x128xbf16>
    %c0_26 = arith.constant 0 : index
    %c0_27 = arith.constant 0 : index
    %c0_28 = arith.constant 0 : index
    %114 = vector.load %arg5[%c0_26, %c0_27, %c0_28] : memref<2x128x512xbf16, #tpu.memory_space<vmem>>, vector<1x128x512xbf16>
    %115 = vector.shape_cast %114 : vector<1x128x512xbf16> to vector<128x512xbf16>
    %cst_29 = arith.constant dense<0.000000e+00> : vector<16x512xf32>
    %116 = tpu.matmul %113, %115, %cst_29 {dimension_numbers = #tpu.dot_dimension_numbers<[1], [0], [0], [1], [0, 0, 1, 1], [], []>} : vector<16x128xbf16>, vector<128x512xbf16>, vector<16x512xf32> -> vector<16x512xf32>
    %117 = vector.extract_strided_slice %116 {offsets = [0, 0], sizes = [16, 256], strides = [1, 1]} : vector<16x512xf32> to vector<16x256xf32>
    %118 = vector.extract_strided_slice %116 {offsets = [0, 256], sizes = [16, 256], strides = [1, 1]} : vector<16x512xf32> to vector<16x256xf32>
    %119 = arith.negf %117 : vector<16x256xf32>
    %120 = math.exp %119 : vector<16x256xf32>
    %cst_30 = arith.constant 1.000000e+00 : f32
    %121 = vector.broadcast %cst_30 : f32 to vector<16x256xf32>
    %122 = arith.addf %121, %120 : vector<16x256xf32>
    %123 = arith.divf %121, %122 : vector<16x256xf32>
    %124 = arith.mulf %117, %123 : vector<16x256xf32>
    %125 = arith.mulf %124, %118 : vector<16x256xf32>
    %126 = arith.truncf %125 : vector<16x256xf32> to vector<16x256xbf16>
    %c0_31 = arith.constant 0 : index
    %c0_32 = arith.constant 0 : index
    %c0_33 = arith.constant 0 : index
    %127 = vector.load %arg6[%c0_31, %c0_32, %c0_33] : memref<2x256x128xbf16, #tpu.memory_space<vmem>>, vector<1x256x128xbf16>
    %128 = vector.shape_cast %127 : vector<1x256x128xbf16> to vector<256x128xbf16>
    %cst_34 = arith.constant dense<0.000000e+00> : vector<16x128xf32>
    %129 = tpu.matmul %126, %128, %cst_34 {dimension_numbers = #tpu.dot_dimension_numbers<[1], [0], [0], [1], [0, 0, 1, 1], [], []>} : vector<16x256xbf16>, vector<256x128xbf16>, vector<16x128xf32> -> vector<16x128xf32>
    %130 = arith.addf %102, %129 : vector<16x128xf32>
    %131 = arith.mulf %130, %130 : vector<16x128xf32>
    %cst_35 = arith.constant dense<0.000000e+00> : vector<16xf32>
    %132 = vector.multi_reduction <add>, %131, %cst_35 [1] : vector<16x128xf32> to vector<16xf32>
    %133 = vector.shape_cast %132 : vector<16xf32> to vector<16x1xf32>
    %cst_36 = arith.constant 1.280000e+02 : f32
    %134 = vector.broadcast %cst_36 : f32 to vector<16x1xf32>
    %135 = arith.divf %133, %134 : vector<16x1xf32>
    %cst_37 = arith.constant 9.99999997E-7 : f32
    %136 = vector.broadcast %cst_37 : f32 to vector<16x1xf32>
    %137 = arith.addf %135, %136 : vector<16x1xf32>
    %138 = math.rsqrt %137 : vector<16x1xf32>
    %139 = vector.broadcast %138 : vector<16x1xf32> to vector<16x128xf32>
    %140 = arith.mulf %130, %139 : vector<16x128xf32>
    %141 = arith.truncf %140 : vector<16x128xf32> to vector<16x128xbf16>
    %c1 = arith.constant 1 : index
    %c0_38 = arith.constant 0 : index
    %c0_39 = arith.constant 0 : index
    %142 = vector.load %arg3[%c1, %c0_38, %c0_39] : memref<2x128x512xbf16, #tpu.memory_space<vmem>>, vector<1x128x512xbf16>
    %143 = vector.shape_cast %142 : vector<1x128x512xbf16> to vector<128x512xbf16>
    %cst_40 = arith.constant dense<0.000000e+00> : vector<16x512xf32>
    %144 = tpu.matmul %141, %143, %cst_40 {dimension_numbers = #tpu.dot_dimension_numbers<[1], [0], [0], [1], [0, 0, 1, 1], [], []>} : vector<16x128xbf16>, vector<128x512xbf16>, vector<16x512xf32> -> vector<16x512xf32>
    %145 = vector.extract_strided_slice %144 {offsets = [0, 256], sizes = [16, 64], strides = [1, 1]} : vector<16x512xf32> to vector<16x64xf32>
    %146 = arith.mulf %145, %2 : vector<16x64xf32>
    %c32_i32_41 = arith.constant 32 : i32
    %147 = tpu.dynamic_rotate %145 by %c32_i32_41 dim 1 : vector<16x64xf32>, i32 -> vector<16x64xf32>
    %148 = arith.mulf %147, %3 : vector<16x64xf32>
    %149 = arith.addf %146, %148 : vector<16x64xf32>
    %150 = vector.extract_strided_slice %144 {offsets = [0, 320], sizes = [16, 64], strides = [1, 1]} : vector<16x512xf32> to vector<16x64xf32>
    %151 = arith.mulf %150, %2 : vector<16x64xf32>
    %c32_i32_42 = arith.constant 32 : i32
    %152 = tpu.dynamic_rotate %150 by %c32_i32_42 dim 1 : vector<16x64xf32>, i32 -> vector<16x64xf32>
    %153 = arith.mulf %152, %3 : vector<16x64xf32>
    %154 = arith.addf %151, %153 : vector<16x64xf32>
    %155 = vector.extract_strided_slice %144 {offsets = [0, 384], sizes = [16, 64], strides = [1, 1]} : vector<16x512xf32> to vector<16x64xf32>
    %156 = vector.extract_strided_slice %144 {offsets = [0, 448], sizes = [16, 64], strides = [1, 1]} : vector<16x512xf32> to vector<16x64xf32>
    %157 = vector.extract_strided_slice %144 {offsets = [0, 0], sizes = [16, 64], strides = [1, 1]} : vector<16x512xf32> to vector<16x64xf32>
    %158 = arith.mulf %157, %2 : vector<16x64xf32>
    %c32_i32_43 = arith.constant 32 : i32
    %159 = tpu.dynamic_rotate %157 by %c32_i32_43 dim 1 : vector<16x64xf32>, i32 -> vector<16x64xf32>
    %160 = arith.mulf %159, %3 : vector<16x64xf32>
    %161 = arith.addf %158, %160 : vector<16x64xf32>
    %162 = vector.extract_strided_slice %144 {offsets = [0, 64], sizes = [16, 64], strides = [1, 1]} : vector<16x512xf32> to vector<16x64xf32>
    %163 = arith.mulf %162, %2 : vector<16x64xf32>
    %c32_i32_44 = arith.constant 32 : i32
    %164 = tpu.dynamic_rotate %162 by %c32_i32_44 dim 1 : vector<16x64xf32>, i32 -> vector<16x64xf32>
    %165 = arith.mulf %164, %3 : vector<16x64xf32>
    %166 = arith.addf %163, %165 : vector<16x64xf32>
    %167 = vector.extract_strided_slice %144 {offsets = [0, 128], sizes = [16, 64], strides = [1, 1]} : vector<16x512xf32> to vector<16x64xf32>
    %168 = arith.mulf %167, %2 : vector<16x64xf32>
    %c32_i32_45 = arith.constant 32 : i32
    %169 = tpu.dynamic_rotate %167 by %c32_i32_45 dim 1 : vector<16x64xf32>, i32 -> vector<16x64xf32>
    %170 = arith.mulf %169, %3 : vector<16x64xf32>
    %171 = arith.addf %168, %170 : vector<16x64xf32>
    %172 = vector.extract_strided_slice %144 {offsets = [0, 192], sizes = [16, 64], strides = [1, 1]} : vector<16x512xf32> to vector<16x64xf32>
    %173 = arith.mulf %172, %2 : vector<16x64xf32>
    %c32_i32_46 = arith.constant 32 : i32
    %174 = tpu.dynamic_rotate %172 by %c32_i32_46 dim 1 : vector<16x64xf32>, i32 -> vector<16x64xf32>
    %175 = arith.mulf %174, %3 : vector<16x64xf32>
    %176 = arith.addf %173, %175 : vector<16x64xf32>
    %177 = vector.shape_cast %161 : vector<16x64xf32> to vector<16x1x64xf32>
    %178 = vector.shape_cast %166 : vector<16x64xf32> to vector<16x1x64xf32>
    %179 = vector.shape_cast %171 : vector<16x64xf32> to vector<16x1x64xf32>
    %180 = vector.shape_cast %176 : vector<16x64xf32> to vector<16x1x64xf32>
    %181 = tpu.concatenate %177, %178, %179, %180 in 1 : vector<16x1x64xf32>, vector<16x1x64xf32>, vector<16x1x64xf32>, vector<16x1x64xf32> -> vector<16x4x64xf32>
    %182 = vector.shape_cast %149 : vector<16x64xf32> to vector<16x1x64xf32>
    %183 = vector.shape_cast %149 : vector<16x64xf32> to vector<16x1x64xf32>
    %184 = vector.shape_cast %154 : vector<16x64xf32> to vector<16x1x64xf32>
    %185 = vector.shape_cast %154 : vector<16x64xf32> to vector<16x1x64xf32>
    %186 = tpu.concatenate %182, %183, %184, %185 in 1 : vector<16x1x64xf32>, vector<16x1x64xf32>, vector<16x1x64xf32>, vector<16x1x64xf32> -> vector<16x4x64xf32>
    %187 = vector.shape_cast %155 : vector<16x64xf32> to vector<16x1x64xf32>
    %188 = vector.shape_cast %155 : vector<16x64xf32> to vector<16x1x64xf32>
    %189 = vector.shape_cast %156 : vector<16x64xf32> to vector<16x1x64xf32>
    %190 = vector.shape_cast %156 : vector<16x64xf32> to vector<16x1x64xf32>
    %191 = tpu.concatenate %187, %188, %189, %190 in 1 : vector<16x1x64xf32>, vector<16x1x64xf32>, vector<16x1x64xf32>, vector<16x1x64xf32> -> vector<16x4x64xf32>
    %192 = vector.shape_cast %181 : vector<16x4x64xf32> to vector<16x4x1x64xf32>
    %193 = vector.shape_cast %186 : vector<16x4x64xf32> to vector<16x1x4x64xf32>
    %194 = vector.broadcast %192 : vector<16x4x1x64xf32> to vector<16x4x4x64xf32>
    %195 = vector.broadcast %193 : vector<16x1x4x64xf32> to vector<16x4x4x64xf32>
    %196 = arith.mulf %194, %195 : vector<16x4x4x64xf32>
    %cst_47 = arith.constant dense<0.000000e+00> : vector<16x4x4xf32>
    %197 = vector.multi_reduction <add>, %196, %cst_47 [3] : vector<16x4x4x64xf32> to vector<16x4x4xf32>
    %cst_48 = arith.constant 1.250000e-01 : f32
    %198 = vector.broadcast %cst_48 : f32 to vector<16x4x4xf32>
    %199 = arith.mulf %197, %198 : vector<16x4x4xf32>
    %cst_49 = arith.constant dense<0xFF800000> : vector<16x4xf32>
    %200 = vector.multi_reduction <maximumf>, %199, %cst_49 [2] : vector<16x4x4xf32> to vector<16x4xf32>
    %201 = vector.shape_cast %200 : vector<16x4xf32> to vector<16x4x1xf32>
    %202 = vector.broadcast %201 : vector<16x4x1xf32> to vector<16x4x4xf32>
    %203 = arith.subf %199, %202 : vector<16x4x4xf32>
    %204 = math.exp %203 : vector<16x4x4xf32>
    %cst_50 = arith.constant dense<0.000000e+00> : vector<16x4xf32>
    %205 = vector.multi_reduction <add>, %204, %cst_50 [2] : vector<16x4x4xf32> to vector<16x4xf32>
    %206 = vector.shape_cast %205 : vector<16x4xf32> to vector<16x4x1xf32>
    %207 = tpu.reciprocal %206 {approx = true} : vector<16x4x1xf32> -> vector<16x4x1xf32>
    %208 = vector.broadcast %207 : vector<16x4x1xf32> to vector<16x4x4xf32>
    %209 = arith.mulf %204, %208 : vector<16x4x4xf32>
    %210 = vector.shape_cast %209 : vector<16x4x4xf32> to vector<16x4x4x1xf32>
    %211 = vector.shape_cast %191 : vector<16x4x64xf32> to vector<16x1x4x64xf32>
    %212 = vector.broadcast %210 : vector<16x4x4x1xf32> to vector<16x4x4x64xf32>
    %213 = vector.broadcast %211 : vector<16x1x4x64xf32> to vector<16x4x4x64xf32>
    %214 = arith.mulf %212, %213 : vector<16x4x4x64xf32>
    %cst_51 = arith.constant dense<0.000000e+00> : vector<16x4x64xf32>
    %215 = vector.multi_reduction <add>, %214, %cst_51 [2] : vector<16x4x4x64xf32> to vector<16x4x64xf32>
    %216 = vector.extract_strided_slice %215 {offsets = [0, 0, 0], sizes = [16, 1, 64], strides = [1, 1, 1]} : vector<16x4x64xf32> to vector<16x1x64xf32>
    %217 = vector.shape_cast %216 : vector<16x1x64xf32> to vector<16x64xf32>
    %218 = vector.extract_strided_slice %215 {offsets = [0, 1, 0], sizes = [16, 1, 64], strides = [1, 1, 1]} : vector<16x4x64xf32> to vector<16x1x64xf32>
    %219 = vector.shape_cast %218 : vector<16x1x64xf32> to vector<16x64xf32>
    %220 = vector.extract_strided_slice %215 {offsets = [0, 2, 0], sizes = [16, 1, 64], strides = [1, 1, 1]} : vector<16x4x64xf32> to vector<16x1x64xf32>
    %221 = vector.shape_cast %220 : vector<16x1x64xf32> to vector<16x64xf32>
    %222 = vector.extract_strided_slice %215 {offsets = [0, 3, 0], sizes = [16, 1, 64], strides = [1, 1, 1]} : vector<16x4x64xf32> to vector<16x1x64xf32>
    %223 = vector.shape_cast %222 : vector<16x1x64xf32> to vector<16x64xf32>
    %224 = tpu.concatenate %217, %219, %221, %223 in 1 : vector<16x64xf32>, vector<16x64xf32>, vector<16x64xf32>, vector<16x64xf32> -> vector<16x256xf32>
    %225 = arith.truncf %224 : vector<16x256xf32> to vector<16x256xbf16>
    %c1_52 = arith.constant 1 : index
    %c0_53 = arith.constant 0 : index
    %c0_54 = arith.constant 0 : index
    %226 = vector.load %arg4[%c1_52, %c0_53, %c0_54] : memref<2x256x128xbf16, #tpu.memory_space<vmem>>, vector<1x256x128xbf16>
    %227 = vector.shape_cast %226 : vector<1x256x128xbf16> to vector<256x128xbf16>
    %cst_55 = arith.constant dense<0.000000e+00> : vector<16x128xf32>
    %228 = tpu.matmul %225, %227, %cst_55 {dimension_numbers = #tpu.dot_dimension_numbers<[1], [0], [0], [1], [0, 0, 1, 1], [], []>} : vector<16x256xbf16>, vector<256x128xbf16>, vector<16x128xf32> -> vector<16x128xf32>
    %229 = arith.addf %130, %228 : vector<16x128xf32>
    %230 = arith.mulf %229, %229 : vector<16x128xf32>
    %cst_56 = arith.constant dense<0.000000e+00> : vector<16xf32>
    %231 = vector.multi_reduction <add>, %230, %cst_56 [1] : vector<16x128xf32> to vector<16xf32>
    %232 = vector.shape_cast %231 : vector<16xf32> to vector<16x1xf32>
    %cst_57 = arith.constant 1.280000e+02 : f32
    %233 = vector.broadcast %cst_57 : f32 to vector<16x1xf32>
    %234 = arith.divf %232, %233 : vector<16x1xf32>
    %cst_58 = arith.constant 9.99999997E-7 : f32
    %235 = vector.broadcast %cst_58 : f32 to vector<16x1xf32>
    %236 = arith.addf %234, %235 : vector<16x1xf32>
    %237 = math.rsqrt %236 : vector<16x1xf32>
    %238 = vector.broadcast %237 : vector<16x1xf32> to vector<16x128xf32>
    %239 = arith.mulf %229, %238 : vector<16x128xf32>
    %240 = arith.truncf %239 : vector<16x128xf32> to vector<16x128xbf16>
    %c1_59 = arith.constant 1 : index
    %c0_60 = arith.constant 0 : index
    %c0_61 = arith.constant 0 : index
    %241 = vector.load %arg5[%c1_59, %c0_60, %c0_61] : memref<2x128x512xbf16, #tpu.memory_space<vmem>>, vector<1x128x512xbf16>
    %242 = vector.shape_cast %241 : vector<1x128x512xbf16> to vector<128x512xbf16>
    %cst_62 = arith.constant dense<0.000000e+00> : vector<16x512xf32>
    %243 = tpu.matmul %240, %242, %cst_62 {dimension_numbers = #tpu.dot_dimension_numbers<[1], [0], [0], [1], [0, 0, 1, 1], [], []>} : vector<16x128xbf16>, vector<128x512xbf16>, vector<16x512xf32> -> vector<16x512xf32>
    %244 = vector.extract_strided_slice %243 {offsets = [0, 0], sizes = [16, 256], strides = [1, 1]} : vector<16x512xf32> to vector<16x256xf32>
    %245 = vector.extract_strided_slice %243 {offsets = [0, 256], sizes = [16, 256], strides = [1, 1]} : vector<16x512xf32> to vector<16x256xf32>
    %246 = arith.negf %244 : vector<16x256xf32>
    %247 = math.exp %246 : vector<16x256xf32>
    %cst_63 = arith.constant 1.000000e+00 : f32
    %248 = vector.broadcast %cst_63 : f32 to vector<16x256xf32>
    %249 = arith.addf %248, %247 : vector<16x256xf32>
    %250 = arith.divf %248, %249 : vector<16x256xf32>
    %251 = arith.mulf %244, %250 : vector<16x256xf32>
    %252 = arith.mulf %251, %245 : vector<16x256xf32>
    %253 = arith.truncf %252 : vector<16x256xf32> to vector<16x256xbf16>
    %c1_64 = arith.constant 1 : index
    %c0_65 = arith.constant 0 : index
    %c0_66 = arith.constant 0 : index
    %254 = vector.load %arg6[%c1_64, %c0_65, %c0_66] : memref<2x256x128xbf16, #tpu.memory_space<vmem>>, vector<1x256x128xbf16>
    %255 = vector.shape_cast %254 : vector<1x256x128xbf16> to vector<256x128xbf16>
    %cst_67 = arith.constant dense<0.000000e+00> : vector<16x128xf32>
    %256 = tpu.matmul %253, %255, %cst_67 {dimension_numbers = #tpu.dot_dimension_numbers<[1], [0], [0], [1], [0, 0, 1, 1], [], []>} : vector<16x256xbf16>, vector<256x128xbf16>, vector<16x128xf32> -> vector<16x128xf32>
    %257 = arith.addf %229, %256 : vector<16x128xf32>
    %258 = arith.mulf %257, %257 : vector<16x128xf32>
    %cst_68 = arith.constant dense<0.000000e+00> : vector<16xf32>
    %259 = vector.multi_reduction <add>, %258, %cst_68 [1] : vector<16x128xf32> to vector<16xf32>
    %260 = vector.shape_cast %259 : vector<16xf32> to vector<16x1xf32>
    %cst_69 = arith.constant 1.280000e+02 : f32
    %261 = vector.broadcast %cst_69 : f32 to vector<16x1xf32>
    %262 = arith.divf %260, %261 : vector<16x1xf32>
    %cst_70 = arith.constant 9.99999997E-7 : f32
    %263 = vector.broadcast %cst_70 : f32 to vector<16x1xf32>
    %264 = arith.addf %262, %263 : vector<16x1xf32>
    %265 = math.rsqrt %264 : vector<16x1xf32>
    %266 = vector.broadcast %265 : vector<16x1xf32> to vector<16x128xf32>
    %267 = arith.mulf %257, %266 : vector<16x128xf32>
    %268 = arith.truncf %267 : vector<16x128xf32> to vector<16x128xbf16>
    %c0_71 = arith.constant 0 : index
    %c0_72 = arith.constant 0 : index
    %269 = vector.load %arg7[%c0_71, %c0_72] : memref<128x256xbf16, #tpu.memory_space<vmem>>, vector<128x256xbf16>
    %cst_73 = arith.constant dense<0.000000e+00> : vector<16x256xf32>
    %270 = tpu.matmul %268, %269, %cst_73 {dimension_numbers = #tpu.dot_dimension_numbers<[1], [0], [0], [1], [0, 0, 1, 1], [], []>} : vector<16x128xbf16>, vector<128x256xbf16>, vector<16x256xf32> -> vector<16x256xf32>
    %c0_74 = arith.constant 0 : index
    %c0_75 = arith.constant 0 : index
    %271 = vector.load %arg8[%c0_74, %c0_75] : memref<16x256xf32, #tpu.memory_space<vmem>>, vector<16x256xf32>
    tpu.vector_store %arg8[%c0_74, %c0_75], %270 {strides = array<i32>} : memref<16x256xf32, #tpu.memory_space<vmem>>, vector<16x256xf32>,
    return
  }
  func.func @transform_0(%arg0: i32) -> (i32, i32) {
    %c0_i32 = arith.constant 0 : i32
    %c0_i32_0 = arith.constant 0 : i32
    %c0_i32_1 = arith.constant 0 : i32
    return %c0_i32, %c0_i32_0 : i32, i32
  }
  func.func @transform_1(%arg0: i32) -> (i32, i32) {
    %c0_i32 = arith.constant 0 : i32
    %c0_i32_0 = arith.constant 0 : i32
    %c0_i32_1 = arith.constant 0 : i32
    return %c0_i32, %c0_i32_0 : i32, i32
  }
  func.func @transform_2(%arg0: i32) -> (i32, i32, i32) {
    %c0_i32 = arith.constant 0 : i32
    %c0_i32_0 = arith.constant 0 : i32
    %c0_i32_1 = arith.constant 0 : i32
    %c0_i32_2 = arith.constant 0 : i32
    return %c0_i32, %c0_i32_0, %c0_i32_1 : i32, i32, i32
  }
  func.func @transform_3(%arg0: i32) -> (i32, i32, i32) {
    %c0_i32 = arith.constant 0 : i32
    %c0_i32_0 = arith.constant 0 : i32
    %c0_i32_1 = arith.constant 0 : i32
    %c0_i32_2 = arith.constant 0 : i32
    return %c0_i32, %c0_i32_0, %c0_i32_1 : i32, i32, i32
  }
  func.func @transform_4(%arg0: i32) -> (i32, i32, i32) {
    %c0_i32 = arith.constant 0 : i32
    %c0_i32_0 = arith.constant 0 : i32
    %c0_i32_1 = arith.constant 0 : i32
    %c0_i32_2 = arith.constant 0 : i32
    return %c0_i32, %c0_i32_0, %c0_i32_1 : i32, i32, i32
  }
  func.func @transform_5(%arg0: i32) -> (i32, i32, i32) {
    %c0_i32 = arith.constant 0 : i32
    %c0_i32_0 = arith.constant 0 : i32
    %c0_i32_1 = arith.constant 0 : i32
    %c0_i32_2 = arith.constant 0 : i32
    return %c0_i32, %c0_i32_0, %c0_i32_1 : i32, i32, i32
  }
  func.func @transform_6(%arg0: i32) -> (i32, i32) {
    %c0_i32 = arith.constant 0 : i32
    %c0_i32_0 = arith.constant 0 : i32
    %c0_i32_1 = arith.constant 0 : i32
    return %c0_i32, %c0_i32_0 : i32, i32
  }
  func.func @transform_7(%arg0: i32) -> (i32, i32) {
    %c0_i32 = arith.constant 0 : i32
    %c0_i32_0 = arith.constant 0 : i32
    %c0_i32_1 = arith.constant 0 : i32
    return %c0_i32, %c0_i32_0 : i32, i32
  }
}

</mosaic_0001>

<bundles_post_ra>
// kernel: tpu_custom_call.1
= control target key start
LH: loop header
LB: loop body
LE: loop exit
PB: predicated region body
PF: predicated region fallthrough
CT: control target
= control target key end

     0   :  { %12 = vsyncpa [#allocation3], 0  ;;  %s20974_s0 = inlined_call_operand.hbm [shape: f32[16,128], index: 0, kind: input, shape index: {}]   ;;  %s20975_s1 = inlined_call_operand.hbm [shape: f32[16,128], index: 1, kind: input, shape index: {}]   ;;  %s20976_s2 = inlined_call_operand.hbm [shape: bf16[2,128,512], index: 2, kind: input, shape index: {}]   ;;  %s20977_s3 = inlined_call_operand.hbm [shape: bf16[2,256,128], index: 3, kind: input, shape index: {}]   ;;  %s20978_s4 = inlined_call_operand.hbm [shape: bf16[2,128,512], index: 4, kind: input, shape index: {}]   ;;  %s20979_s5 = inlined_call_operand.hbm [shape: bf16[2,256,128], index: 5, kind: input, shape index: {}]   ;;  %s20980_s6 = inlined_call_operand.hbm [shape: bf16[128,256], index: 6, kind: input, shape index: {}]   ;;  %s20981_s7 = inlined_call_operand.hbm [shape: f32[16,256], index: 7, kind: output, shape index: {}]  }
   0x1   :  { %13 = vsyncpa [#allocation6], 0 }
   0x2   :  { %14 = vsyncpa [#allocation9], 0 }
   0x3   :  { %15 = vsyncpa [#allocation12], 0 }
   0x4   :  { %16 = vsyncpa [#allocation4], 0  ;;  %s14856_s24 = smov [#allocation5]   ;;  %s14857_s26 = smov [#allocation8]  }
   0x5   :  { %s34_s25 = sshll.u32 %s14856_s24, 4  ;;  %s58_s27 = sshll.u32 %s14857_s26, 4  ;;  %s35_s25 = int_to_ptr.vmem [resolvable:$true] %s34_s25  ;;  %s59_s27 = int_to_ptr.vmem [resolvable:$true] %s58_s27 }
   0x6   :  { %s14694_s28 = scalar_lea.vmem %s35_s25, 256  ;;  %p14699_p1 = scmp.lt.s32.totalorder %s35_s25, %s35_s25 }
   0x7   :  { %p14695_p0 = scmp.ne.s32.totalorder %s35_s25, %s14694_s28  ;;  %p14700_p2 = scmp.lt.s32.totalorder %s14694_s28, %s14694_s28 }
   0x9   :  { %p14701_p3 = por %p14700_p2, %p14699_p1 }
   0xb   :  { %p14702_p4 = pnand %p14701_p3, %p14695_p0 }
   0xd   :  { %14705 = shalt.err (!%p14702_p4)
}
   0xe   :  { %s14858_s29 = smov 128   ;;  %s14859_s30 = smov 8  }
   0xf   :  { %40 = dma.hbm_to_vmem [thread:$0]  %s20975_s1, 256, %s35_s25, [#allocation6], %s14858_s29, %s14858_s29, %s14859_s30  }
  0x10   :  { %s14714_s10 = scalar_lea.vmem %s59_s27, 4096  ;;  %p14719_p6 = scmp.lt.s32.totalorder %s59_s27, %s59_s27 }
  0x11   :  { %p14715_p5 = scmp.ne.s32.totalorder %s59_s27, %s14714_s10  ;;  %p14720_p7 = scmp.lt.s32.totalorder %s14714_s10, %s14714_s10 }
  0x13   :  { %p14721_p8 = por %p14720_p7, %p14719_p6 }
  0x15   :  { %p14722_p9 = pnand %p14721_p8, %p14715_p5 }
  0x17   :  { %14725 = shalt.err (!%p14722_p9)
}
  0x18   :  { %s14860_s11 = smov 64   ;;  %s14861_s12 = smov 4  }
  0x19   :  { %64 = dma.hbm_to_vmem [thread:$0]  %s20977_s3, 4096, %s59_s27, [#allocation9], %s14860_s11, %s14860_s11, %s14861_s12  }
  0x1a   :  { %s14862_s15 = smov [#allocation11]   ;;  %s14863_s17 = smov [#allocation2]  }
  0x1b   :  { %s82_s16 = sshll.u32 %s14862_s15, 4  ;;  %s22_s18 = sshll.u32 %s14863_s17, 4  ;;  %s83_s16 = int_to_ptr.vmem [resolvable:$true] %s82_s16  ;;  %s23_s18 = int_to_ptr.vmem [resolvable:$true] %s22_s18 }
  0x1c   :  { %s14734_s1 = scalar_lea.vmem %s83_s16, 4096  ;;  %p14739_p11 = scmp.lt.s32.totalorder %s83_s16, %s83_s16 }
  0x1d   :  { %p14735_p10 = scmp.ne.s32.totalorder %s83_s16, %s14734_s1  ;;  %p14740_p12 = scmp.lt.s32.totalorder %s14734_s1, %s14734_s1 }
  0x1f   :  { %p14741_p13 = por %p14740_p12, %p14739_p11 }
  0x21   :  { %p14742_p0 = pnand %p14741_p13, %p14735_p10 }
  0x23   :  { %14745 = shalt.err (!%p14742_p0)
}
  0x24   :  { %88 = dma.hbm_to_vmem [thread:$0]  %s20979_s5, 4096, %s83_s16, [#allocation12], %s14860_s11, %s14860_s11, %s14861_s12  }
  0x25   :  { %s14754_s3 = scalar_lea.vmem %s23_s18, 256  ;;  %p14759_p2 = scmp.lt.s32.totalorder %s23_s18, %s23_s18 }
  0x26   :  { %p14755_p1 = scmp.ne.s32.totalorder %s23_s18, %s14754_s3  ;;  %p14760_p3 = scmp.lt.s32.totalorder %s14754_s3, %s14754_s3 }
  0x28   :  { %p14761_p4 = por %p14760_p3, %p14759_p2 }
  0x2a   :  { %p14762_p5 = pnand %p14761_p4, %p14755_p1 }
  0x2c   :  { %14765 = shalt.err (!%p14762_p5)
}
  0x2d   :  { %28 = dma.hbm_to_vmem [thread:$0]  %s20974_s0, 256, %s23_s18, [#allocation3], %s14858_s29, %s14858_s29, %s14859_s30  }
  0x2e   :  { %s14864_s23 = smov [#allocation7]  }
  0x2f   :  { %s46_s24 = sshll.u32 %s14864_s23, 4  ;;  %s47_s24 = int_to_ptr.vmem [resolvable:$true] %s46_s24 }
  0x30   :  { %s14774_s25 = scalar_lea.vmem %s47_s24, 8192  ;;  %p14779_p7 = scmp.lt.s32.totalorder %s47_s24, %s47_s24 }
  0x31   :  { %p14775_p6 = scmp.ne.s32.totalorder %s47_s24, %s14774_s25  ;;  %p14780_p8 = scmp.lt.s32.totalorder %s14774_s25, %s14774_s25 }
  0x33   :  { %p14781_p9 = por %p14780_p8, %p14779_p7 }
  0x35   :  { %p14782_p10 = pnand %p14781_p9, %p14775_p6 }
  0x37   :  { %14785 = shalt.err (!%p14782_p10)
}
  0x38   :  { %s14865_s5 = smov 256   ;;  %s14866_s26 = smov 16  }
  0x39   :  { %52 = dma.hbm_to_vmem [thread:$0]  %s20976_s2, 8192, %s47_s24, [#allocation6], %s14865_s5, %s14865_s5, %s14866_s26  }
  0x3a   :  { %s14867_s0 = smov [#allocation10]   ;;  %s14868_s9 = smov [#allocation13]  }
  0x3b   :  { %s70_s8 = sshll.u32 %s14867_s0, 4  ;;  %s94_s10 = sshll.u32 %s14868_s9, 4  ;;  %s71_s8 = int_to_ptr.vmem [resolvable:$true] %s70_s8  ;;  %s95_s10 = int_to_ptr.vmem [resolvable:$true] %s94_s10 }
  0x3c   :  { %s14794_s12 = scalar_lea.vmem %s71_s8, 8192  ;;  %p14799_p12 = scmp.lt.s32.totalorder %s71_s8, %s71_s8 }
  0x3d   :  { %p14795_p11 = scmp.ne.s32.totalorder %s71_s8, %s14794_s12  ;;  %p14800_p13 = scmp.lt.s32.totalorder %s14794_s12, %s14794_s12 }
  0x3f   :  { %p14801_p0 = por %p14800_p13, %p14799_p12 }
  0x41   :  { %p14802_p1 = pnand %p14801_p0, %p14795_p11 }
  0x43   :  { %14805 = shalt.err (!%p14802_p1)
}
  0x44   :  { %76 = dma.hbm_to_vmem [thread:$0]  %s20978_s4, 8192, %s71_s8, [#allocation9], %s14865_s5, %s14865_s5, %s14866_s26  }
  0x45   :  { %s14814_s2 = scalar_lea.vmem %s95_s10, 2048  ;;  %p14819_p3 = scmp.lt.s32.totalorder %s95_s10, %s95_s10 }
  0x46   :  { %p14815_p2 = scmp.ne.s32.totalorder %s95_s10, %s14814_s2  ;;  %p14820_p4 = scmp.lt.s32.totalorder %s14814_s2, %s14814_s2 }
  0x48   :  { %p14821_p5 = por %p14820_p4, %p14819_p3 }
  0x4a   :  { %p14822_p6 = pnand %p14821_p5, %p14815_p2 }
  0x4c   :  { %14825 = shalt.err (!%p14822_p6)
}
  0x4d   :  { %100 = dma.hbm_to_vmem [thread:$0]  %s20980_s6, 2048, %s95_s10, [#allocation12], %s14858_s29, %s14858_s29, %s14859_s30  }
  0x4e   :  { %14846 = dma.done.wait [#allocation3], 256  }
  0x4f   :  { %14847 = vsyncadd [#allocation3], 4294967040 }
  0x50   :  { %14848 = dma.done.wait [#allocation6], 8448  }
  0x51   :  { %14849 = vsyncadd [#allocation6], 4294958848 }
  0x52   :  { %14850 = dma.done.wait [#allocation9], 12288  }
  0x53   :  { %14851 = vsyncadd [#allocation9], 4294955008 }
  0x54   :  { %14852 = dma.done.wait [#allocation12], 6144  }
  0x55   :  { %14853 = vsyncadd [#allocation12], 4294961152  ;;  %v14954_v0 = vld [vmem:[#allocation2] sm:$0xff]  ;;  %v14956_v1 = vld [vmem:[#allocation2 + $0x8] sm:$0xff]  ;;  %v20982_v34 = vmov 0   ;;  %s14870_s4 = smov 96   ;;  %v20984_v52 = vlaneseq }
  0x56   :  { %v127_v2 = vmul.f32 %v14954_v0, %v14954_v0  ;;  %v14028_v3 = vld [vmem:[#allocation7 + $0xe4] ss:$16 sps:$4 sm:$0xff]   ;;  %v14030_v4 = vld [vmem:[#allocation7 + $0xec] ss:$16 sps:$4 sm:$0xff]   ;;  %v14032_v5 = vld [vmem:[#allocation7 + $0xe0] ss:$16 sps:$4 sm:$0xff]   ;;  %v128_v6 = vmul.f32 %v14956_v1, %v14956_v1  ;;  %367 = vmatprep.mubr.bf16.mxu0 %v20982_v34  ;;  %410 = vmatprep.mubr.bf16.mxu1 %v20982_v34 }
  0x57   :  { %335 = vmatprep.subr.bf16.mxu0 %v14028_v3  ;;  %v14033_v7 = vld [vmem:[#allocation7 + $0xe8] ss:$16 sps:$4 sm:$0xff]   ;;  %378 = vmatprep.subr.bf16.mxu1 %v14030_v4  ;;  %v14034_v8 = vld [vmem:[#allocation7 + $0xc4] ss:$16 sps:$4 sm:$0xff]   ;;  %v14036_v9 = vld [vmem:[#allocation7 + $0xcc] ss:$16 sps:$4 sm:$0xff]  }
  0x58   :  { %129 = vadd.xlane.f32.xlu0 %v127_v2  ;;  %336 = vmatpush1.bf16.msra.mxu0 %v14032_v5  ;;  %v14038_v10 = vld [vmem:[#allocation7 + $0xc0] ss:$16 sps:$4 sm:$0xff]   ;;  %v14039_v11 = vld [vmem:[#allocation7 + $0xc8] ss:$16 sps:$4 sm:$0xff]   ;;  %v14040_v12 = vld [vmem:[#allocation7 + $0xa4] ss:$16 sps:$4 sm:$0xff]  }
  0x59   :  { %379 = vmatpush1.bf16.msra.mxu1 %v14033_v7  ;;  %337 = vmatprep.subr.bf16.mxu0 %v14034_v8  ;;  %v14042_v13 = vld [vmem:[#allocation7 + $0xac] ss:$16 sps:$4 sm:$0xff]   ;;  %v14044_v14 = vld [vmem:[#allocation7 + $0xa0] ss:$16 sps:$4 sm:$0xff]   ;;  %v14045_v15 = vld [vmem:[#allocation7 + $0xa8] ss:$16 sps:$4 sm:$0xff]  }
  0x5a   :  { %380 = vmatprep.subr.bf16.mxu1 %v14036_v9  ;;  %v14046_v16 = vld [vmem:[#allocation7 + $0x84] ss:$16 sps:$4 sm:$0xff]   ;;  %v14048_v17 = vld [vmem:[#allocation7 + $0x8c] ss:$16 sps:$4 sm:$0xff]   ;;  %v14050_v18 = vld [vmem:[#allocation7 + $0x80] ss:$16 sps:$4 sm:$0xff]   ;;  %14007 = vset.pattern.permute.xlu1 %v20982_v34 }
  0x5b   :  { %v14051_v19 = vld [vmem:[#allocation7 + $0x88] ss:$16 sps:$4 sm:$0xff]   ;;  %v14052_v20 = vld [vmem:[#allocation7 + $0x64] ss:$16 sps:$4 sm:$0xff]   ;;  %v14054_v21 = vld [vmem:[#allocation7 + $0x6c] ss:$16 sps:$4 sm:$0xff]   ;;  %14006 = vset.pattern.permute.xlu0 %v20982_v34 }
  0x5c   :  { %131 = vadd.xlane.f32.xlu0 %v128_v6  ;;  %338 = vmatpush1.bf16.msra.mxu0 %v14038_v10  ;;  %v14056_v22 = vld [vmem:[#allocation7 + $0x60] ss:$16 sps:$4 sm:$0xff]   ;;  %v14057_v23 = vld [vmem:[#allocation7 + $0x68] ss:$16 sps:$4 sm:$0xff]   ;;  %v14058_v24 = vld [vmem:[#allocation7 + $0x44] ss:$16 sps:$4 sm:$0xff]  }
  0x5d   :  { %381 = vmatpush1.bf16.msra.mxu1 %v14039_v11  ;;  %339 = vmatprep.subr.bf16.mxu0 %v14040_v12  ;;  %v14060_v25 = vld [vmem:[#allocation7 + $0x4c] ss:$16 sps:$4 sm:$0xff]   ;;  %v14062_v26 = vld [vmem:[#allocation7 + $0x40] ss:$16 sps:$4 sm:$0xff]   ;;  %v14063_v27 = vld [vmem:[#allocation7 + $0x48] ss:$16 sps:$4 sm:$0xff]  }
  0x5e   :  { %382 = vmatprep.subr.bf16.mxu1 %v14042_v13  ;;  %v14064_v28 = vld [vmem:[#allocation7 + $0x24] ss:$16 sps:$4 sm:$0xff]   ;;  %v14066_v29 = vld [vmem:[#allocation7 + $0x2c] ss:$16 sps:$4 sm:$0xff]   ;;  %v14068_v30 = vld [vmem:[#allocation7 + $0x20] ss:$16 sps:$4 sm:$0xff]  }
  0x5f   :  { %v14069_v31 = vld [vmem:[#allocation7 + $0x28] ss:$16 sps:$4 sm:$0xff]   ;;  %v14070_v32 = vld [vmem:[#allocation7 + $0x4] ss:$16 sps:$4 sm:$0xff]   ;;  %v14072_v33 = vld [vmem:[#allocation7 + $0xc] ss:$16 sps:$4 sm:$0xff]  }
  0x60   :  { %340 = vmatpush1.bf16.msra.mxu0 %v14044_v14  ;;  %v14074_v35 = vld [vmem:[#allocation7] ss:$16 sps:$4 sm:$0xff]   ;;  %v14075_v36 = vld [vmem:[#allocation7 + $0x8] ss:$16 sps:$4 sm:$0xff]   ;;  %v14871_v50 = vmov 1966171168  }
  0x61   :  { %383 = vmatpush1.bf16.msra.mxu1 %v14045_v15  ;;  %341 = vmatprep.subr.bf16.mxu0 %v14046_v16  ;;  %v125_v37 = vld [vmem:[#allocation5] sm:$0xff]  ;;  %v126_v38 = vld [vmem:[#allocation5 + $0x8] sm:$0xff]  ;;  %v620_v51 = vunpack.c.l.s4 %v14871_v50  ;;  %v14974_v54 = vshrl.u32 %v20984_v52, 7  ;;  %vm1336_vm0 = vcmask 1040384   ;;  %vm423_vm1 = vcmask 1048064   ;;  %s14872_s6 = smov 32  }
  0x62   :  { %384 = vmatprep.subr.bf16.mxu1 %v14048_v17  ;;  %438 = vrot.lane.b32.xlu1 %v125_v37, %s14870_s4  ;;  %vm1353_vm2 = vcmask 1041408   ;;  %vm1370_vm3 = vcmask 1042432   ;;  %vm2919_vm4 = vcmask 519168   ;;  %vm3498_vm5 = vcmask 1041409   ;;  %s14873_s29 = smov [#allocation14]  }
  0x63   :  { %v621_v53 = vunpack.c.0.s8 %v620_v51  ;;  %21187 = vst [vmem:[#allocation20_spill] sm:$0xff] %v14974_v54  ;;  %v14993_v63 = vsub.s32 0, %v14974_v54  ;;  %vm3502_vm6 = vcmask 1043459   ;;  %vm3500_vm7 = vcmask 1042434   ;;  %s13669_s30 = sshll.u32 %s14873_s29, 4  ;;  %s13670_s30 = int_to_ptr.vmem [resolvable:$true] %s13669_s30 }
  0x64   :  { %342 = vmatpush1.bf16.msra.mxu0 %v14050_v18  ;;  %vm3565_vm8 = vcmask 27648   ;;  %vm6033_vm9 = vcmask 1044484   ;;  %vm6035_vm10 = vcmask 1045509   ;;  %vm6037_vm11 = vcmask 1046534   ;;  %p14831_p8 = scmp.lt.s32.totalorder %s13670_s30, %s13670_s30 }
  0x65   :  { %385 = vmatpush1.bf16.msra.mxu1 %v14051_v19  ;;  %343 = vmatprep.subr.bf16.mxu0 %v14052_v20  ;;  %v14977_v55 = vsub.s32 %v621_v53, %v14974_v54  ;;  %21189 = vst [vmem:[#allocation22_spill] sm:$0xff] %v14993_v63  ;;  %vm6039_vm12 = vcmask 1047559   ;;  %vm6154_vm13 = vcmask 523264  }
  0x66   :  { %386 = vmatprep.subr.bf16.mxu1 %v14054_v21  ;;  %456 = vrot.lane.b32.xlu1 %v125_v37, %s14860_s11 }
  0x67   :  { %21188 = vst [vmem:[#allocation21_spill] sm:$0xff] %v14977_v55 }
  0x68   :  { %344 = vmatpush1.bf16.msra.mxu0 %v14056_v22 }
  0x69   :  { %387 = vmatpush1.bf16.msra.mxu1 %v14057_v23  ;;  %345 = vmatprep.subr.bf16.mxu0 %v14058_v24 }
  0x6a   :  { %388 = vmatprep.subr.bf16.mxu1 %v14060_v25 }
  0x6c   :  { %346 = vmatpush1.bf16.msra.mxu0 %v14062_v26 }
  0x6d   :  { %389 = vmatpush1.bf16.msra.mxu1 %v14063_v27  ;;  %347 = vmatprep.subr.bf16.mxu0 %v14064_v28 }
  0x6e   :  { %390 = vmatprep.subr.bf16.mxu1 %v14066_v29 }
  0x70   :  { %348 = vmatpush1.bf16.msra.mxu0 %v14068_v30 }
  0x71   :  { %391 = vmatpush1.bf16.msra.mxu1 %v14069_v31  ;;  %349 = vmatprep.subr.bf16.mxu0 %v14070_v32 }
  0x72   :  { %392 = vmatprep.subr.bf16.mxu1 %v14072_v33  ;;  %440 = vrot.lane.b32.xlu0 %v126_v38, %s14870_s4 }
  0x74   :  { %350 = vmatpush1.bf16.msra.mxu0 %v14074_v35 }
  0x75   :  { %393 = vmatpush1.bf16.msra.mxu1 %v14075_v36 }
  0x76   :  { %458 = vrot.lane.b32.xlu0 %v126_v38, %s14860_s11 }
  0xe1   :  { %v130_v39 = vpop.xlane.xlu0 %129 }
  0xe2   :  { %v134_v40 = vmul.f32 0.0078125, %v130_v39 }
  0xe4   :  { %v136_v41 = vadd.f32 1e-06, %v134_v40  ;;  %v15092_v40 = vpop.permute.xlu1 %438 }
  0xe5   :  { %v132_v42 = vpop.xlane.xlu0 %131  ;;  %21204 = vst [vmem:[#allocation37_spill] sm:$0xff] %v15092_v40 }
  0xe6   :  { %v135_v43 = vmul.f32 0.0078125, %v132_v42  ;;  %14308 = vrsqrt.f32 %v136_v41 }
  0xe8   :  { %v137_v44 = vadd.f32 1e-06, %v135_v43  ;;  %v15094_v41 = vpop.permute.xlu1 %456 }
  0xe9   :  { %21205 = vst [vmem:[#allocation38_spill] sm:$0xff] %v15094_v41 }
  0xea   :  { %14310 = vrsqrt.f32 %v137_v44  ;;  %v15104_v44 = vpop.permute.xlu0 %440 }
  0xeb   :  { %21206 = vst [vmem:[#allocation39_spill] sm:$0xff] %v15104_v44 }
  0xf3   :  { %v14309_v45 = vpop.eup %14308 }
  0xf4   :  { %v140_v47 = vmul.f32 %v14309_v45, %v14954_v0 }
  0xf7   :  { %v14311_v46 = vpop.eup %14310 }
  0xf8   :  { %v141_v48 = vmul.f32 %v14311_v46, %v14956_v1 }
  0xfa   :  { %v142_v49 = vpack.c.bf16 %v141_v48, %v140_v47  ;;  %v15109_v48 = vpop.permute.xlu0 %458 }
  0xfb   :  { %21207 = vst [vmem:[#allocation40_spill] sm:$0xff] %v15109_v48 }
  0xfc   :  { %368 = vmatmul.mubr.bf16.vlgmr.msra.gmra.mxu0 %v142_v49  ;;  %411 = vmatmul.mubr.bf16.vlgmr.msra.gmra.mxu1 %v142_v49 }
  0xfd   :  { %6571 = vmatprep.mubr.bf16.mxu1 %v20982_v34 }
 0x1bc   :  { %v14979_v56 = vpop.f32.mrf.mxu0  ;;  %v14981_v57 = vpop.f32.mrf.mxu1 }
 0x1bd   :  { %526 = vrot.lane.b32.xlu1 %v14979_v56, %s14860_s11 }
 0x1be   :  { %v14985_v58 = vpop.f32.mrf.mxu0  ;;  %v414_v59 = vpop.f32.mrf.mxu1 }
 0x1bf   :  { %v1845_v60 = vcombine.high %v414_v59, %v414_v59  ;;  %v1852_v61 = vrot.slane %v414_v59, %v14977_v55  ;;  %586 = vrot.lane.b32.xlu0 %v14985_v58, %s14860_s11 }
 0x1c0   :  { %v14990_v62 = vpop.f32.mrf.mxu1  ;;  %v15001_v3 = vpop.f32.mrf.mxu0 }
 0x1c1   :  { %v14996_v0 = vrot.slane %v1845_v60, %v14977_v55  ;;  %v1860_v1 = vcombine.high %v1852_v61, %v1852_v61  ;;  %v1868_v2 = vrot.slane %v1852_v61, %v14977_v55  ;;  %466 = vrot.lane.b32.xlu1 %v14981_v57, %s14860_s11 }
 0x1c2   :  { %v418_v4 = vpop.f32.mrf.mxu1  ;;  %v15048_v28 = vpop.f32.mrf.mxu0 }
 0x1c3   :  { %21190 = vst [vmem:[#allocation23_spill] sm:$0xff] %v14996_v0  ;;  %v15005_v5 = vrot.slane %v14996_v0, %v14977_v55  ;;  %v1882_v6 = vrot.slane %v1860_v1, %v14977_v55  ;;  %v1894_v7 = vcombine.high %v418_v4, %v418_v4  ;;  %501 = vrot.lane.b32.xlu0 %v15001_v3, %s14860_s11 }
 0x1c4   :  { %v1901_v8 = vrot.slane %v418_v4, %v14977_v55  ;;  %v1962_v9 = vrot.slane %v1868_v2, %v14993_v63  ;;  %v1890_v10 = vcombine.high %v1868_v2, %v1868_v2 }
 0x1c5   :  { %21191 = vst [vmem:[#allocation24_spill] sm:$0xff] %v15005_v5  ;;  %v15013_v11 = vrot.slane %v1894_v7, %v14977_v55  ;;  %498 = vrot.lane.b32.xlu1 %v14979_v56, %s14860_s11  ;;  %v1978_v12 = vrot.slane %v15005_v5, %v14993_v63  ;;  %v1966_v13 = vrot.slane %v1882_v6, %v14993_v63 }
 0x1c6   :  { %v1909_v14 = vcombine.high %v1901_v8, %v1901_v8  ;;  %v1917_v15 = vrot.slane %v1901_v8, %v14977_v55  ;;  %v1970_v16 = vrot.slane %v1890_v10, %v14993_v63  ;;  %v1892_v17 = vcombine.high %v1882_v6, %v1882_v6 }
 0x1c7   :  { %21192 = vst [vmem:[#allocation25_spill] sm:$0xff] %v15013_v11  ;;  %v15024_v18 = vrot.slane %v15013_v11, %v14977_v55  ;;  %427 = vrot.lane.b32.xlu0 %v14990_v62, %s14860_s11  ;;  %v15029_v19 = vsel %vm1336_vm0, %v1868_v2, %v1962_v9  ;;  %v15033_v20 = vsel %vm1336_vm0, %v15005_v5, %v1978_v12 }
 0x1c8   :  { %21194 = vst [vmem:[#allocation27_spill] sm:$0xff] %v15029_v19  ;;  %21195 = vst [vmem:[#allocation28_spill] sm:$0xff] %v15033_v20  ;;  %v1931_v21 = vrot.slane %v1909_v14, %v14977_v55  ;;  %v1994_v22 = vrot.slane %v1917_v15, %v14993_v63  ;;  %v1974_v23 = vrot.slane %v1892_v17, %v14993_v63 }
 0x1c9   :  { %21193 = vst [vmem:[#allocation26_spill] sm:$0xff] %v15024_v18  ;;  %v1939_v24 = vcombine.high %v1917_v15, %v1917_v15  ;;  %424 = vrot.lane.b32.xlu1 %v14981_v57, %s14860_s11  ;;  %v2010_v25 = vrot.slane %v15024_v18, %v14993_v63  ;;  %v15043_v26 = vsel %vm1336_vm0, %v1890_v10, %v1970_v16 }
 0x1ca   :  { %21196 = vst [vmem:[#allocation29_spill] sm:$0xff] %v15043_v26  ;;  %v15046_v27 = vsel %vm1336_vm0, %v1882_v6, %v1966_v13  ;;  %v1998_v29 = vrot.slane %v1931_v21, %v14993_v63  ;;  %v1941_v31 = vcombine.high %v1931_v21, %v1931_v21  ;;  %v15053_v32 = vsel %vm1336_vm0, %v1917_v15, %v1994_v22 }
 0x1cb   :  { %21197 = vst [vmem:[#allocation30_spill] sm:$0xff] %v15046_v27  ;;  %v2002_v30 = vrot.slane %v1939_v24, %v14993_v63  ;;  %21198 = vst [vmem:[#allocation31_spill] sm:$0xff] %v15053_v32  ;;  %561 = vrot.lane.b32.xlu0 %v15048_v28, %s14860_s11  ;;  %v15058_v33 = vsel %vm1336_vm0, %v1892_v17, %v1974_v23  ;;  %v15062_v35 = vsel %vm1336_vm0, %v15024_v18, %v2010_v25 }
 0x1cc   :  { %21199 = vst [vmem:[#allocation32_spill] sm:$0xff] %v15058_v33  ;;  %21200 = vst [vmem:[#allocation33_spill] sm:$0xff] %v15062_v35  ;;  %v2006_v36 = vrot.slane %v1941_v31, %v14993_v63  ;;  %v15066_v37 = vsel %vm1336_vm0, %v1931_v21, %v1998_v29 }
 0x1cd   :  { %21201 = vst [vmem:[#allocation34_spill] sm:$0xff] %v15066_v37  ;;  %v15069_v38 = vsel %vm1336_vm0, %v1939_v24, %v2002_v30  ;;  %558 = vrot.lane.b32.xlu1 %v14985_v58, %s14860_s11 }
 0x1ce   :  { %21202 = vst [vmem:[#allocation35_spill] sm:$0xff] %v15069_v38  ;;  %v15074_v39 = vsel %vm1336_vm0, %v1941_v31, %v2006_v36 }
 0x1cf   :  { %21203 = vst [vmem:[#allocation36_spill] sm:$0xff] %v15074_v39  ;;  %2039 = vrot.lane.b32.xlu0 %v1962_v9, %s14860_s11 }
 0x1d1   :  { %528 = vrot.lane.b32.xlu1 %v15001_v3, %s14860_s11 }
 0x1d3   :  { %2043 = vrot.lane.b32.xlu0 %v1970_v16, %s14860_s11 }
 0x1d5   :  { %468 = vrot.lane.b32.xlu1 %v14990_v62, %s14860_s11 }
 0x1d7   :  { %2047 = vrot.lane.b32.xlu0 %v1978_v12, %s14860_s11 }
 0x1d9   :  { %588 = vrot.lane.b32.xlu1 %v15048_v28, %s14860_s11 }
 0x1db   :  { %2055 = vrot.lane.b32.xlu0 %v1994_v22, %s14860_s11 }
 0x1dd   :  { %2041 = vrot.lane.b32.xlu1 %v1966_v13, %s14860_s11 }
 0x1df   :  { %2045 = vrot.lane.b32.xlu0 %v1974_v23, %s14860_s11 }
 0x1e1   :  { %2057 = vrot.lane.b32.xlu1 %v1998_v29, %s14860_s11 }
 0x1e5   :  { %2059 = vrot.lane.b32.xlu1 %v2002_v30, %s14860_s11 }
 0x1e9   :  { %2063 = vrot.lane.b32.xlu1 %v2010_v25, %s14860_s11 }
 0x1ed   :  { %2061 = vrot.lane.b32.xlu1 %v2006_v36, %s14860_s11 }
 0x22f   :  { %v15096_v42 = vpop.permute.xlu1 %526 }
 0x230   :  { %532 = vrot.lane.b32.xlu1 %v15096_v42, %s14860_s11 }
 0x231   :  { %v15114_v51 = vpop.permute.xlu0 %586 }
 0x233   :  { %v15100_v43 = vpop.permute.xlu1 %466 }
 0x234   :  { %472 = vrot.lane.b32.xlu1 %v15100_v43, %s14860_s11 }
 0x235   :  { %v502_v60 = vpop.permute.xlu0 %501 }
 0x236   :  { %v503_v1 = vsel %vm423_vm1, %v502_v60, %v15001_v3 }
 0x237   :  { %v499_v45 = vpop.permute.xlu1 %498 }
 0x238   :  { %v500_v46 = vsel %vm423_vm1, %v499_v45, %v14979_v56 }
 0x239   :  { %504 = vrot.lane.b32.xlu1 %v500_v46, %s14860_s11  ;;  %v428_v2 = vpop.permute.xlu0 %427 }
 0x23a   :  { %v429_v4 = vsel %vm423_vm1, %v428_v2, %v14990_v62 }
 0x23b   :  { %v425_v47 = vpop.permute.xlu1 %424 }
 0x23c   :  { %v426_v49 = vsel %vm423_vm1, %v425_v47, %v14981_v57 }
 0x23d   :  { %430 = vrot.lane.b32.xlu1 %v426_v49, %s14860_s11  ;;  %v562_v7 = vpop.permute.xlu0 %561 }
 0x23e   :  { %v563_v8 = vsel %vm423_vm1, %v562_v7, %v15048_v28 }
 0x23f   :  { %v559_v50 = vpop.permute.xlu1 %558 }
 0x240   :  { %v560_v59 = vsel %vm423_vm1, %v559_v50, %v14985_v58 }
 0x241   :  { %592 = vrot.lane.b32.xlu1 %v15114_v51, %s14860_s11  ;;  %v15150_v14 = vpop.permute.xlu0 %2039 }
 0x242   :  { %21212 = vst [vmem:[#allocation45_spill] sm:$0xff] %v15150_v14 }
 0x243   :  { %v15118_v53 = vpop.permute.xlu1 %528 }
 0x245   :  { %564 = vrot.lane.b32.xlu1 %v560_v59, %s14860_s11  ;;  %v15156_v21 = vpop.permute.xlu0 %2043 }
 0x246   :  { %21214 = vst [vmem:[#allocation47_spill] sm:$0xff] %v15156_v21 }
 0x247   :  { %v15123_v61 = vpop.permute.xlu1 %468 }
 0x248   :  { %475 = vrot.lane.b32.xlu0 %v15123_v61, %s14860_s11 }
 0x249   :  { %535 = vrot.lane.b32.xlu1 %v15118_v53, %s14860_s11  ;;  %v15162_v24 = vpop.permute.xlu0 %2047 }
 0x24a   :  { %21215 = vst [vmem:[#allocation48_spill] sm:$0xff] %v15162_v24 }
 0x24b   :  { %v15135_v6 = vpop.permute.xlu1 %588 }
 0x24c   :  { %506 = vrot.lane.b32.xlu0 %v503_v1, %s14860_s11 }
 0x24d   :  { %v15164_v30 = vpop.permute.xlu0 %2055 }
 0x24e   :  { %21216 = vst [vmem:[#allocation49_spill] sm:$0xff] %v15164_v30 }
 0x24f   :  { %v15142_v9 = vpop.permute.xlu1 %2041 }
 0x250   :  { %432 = vrot.lane.b32.xlu0 %v429_v4, %s14860_s11  ;;  %21208 = vst [vmem:[#allocation41_spill] sm:$0xff] %v15142_v9 }
 0x251   :  { %v15171_v46 = vpop.permute.xlu0 %2045 }
 0x252   :  { %21217 = vst [vmem:[#allocation50_spill] sm:$0xff] %v15171_v46 }
 0x253   :  { %v15144_v10 = vpop.permute.xlu1 %2057 }
 0x254   :  { %595 = vrot.lane.b32.xlu0 %v15135_v6, %s14860_s11  ;;  %21209 = vst [vmem:[#allocation42_spill] sm:$0xff] %v15144_v10 }
 0x257   :  { %v15146_v12 = vpop.permute.xlu1 %2059 }
 0x258   :  { %566 = vrot.lane.b32.xlu0 %v563_v8, %s14860_s11  ;;  %21210 = vst [vmem:[#allocation43_spill] sm:$0xff] %v15146_v12 }
 0x25b   :  { %v15148_v13 = vpop.permute.xlu1 %2063 }
 0x25c   :  { %21211 = vst [vmem:[#allocation44_spill] sm:$0xff] %v15148_v13 }
 0x25f   :  { %v15152_v15 = vpop.permute.xlu1 %2061 }
 0x260   :  { %21213 = vst [vmem:[#allocation46_spill] sm:$0xff] %v15152_v15 }
 0x2a2   :  { %v533_v16 = vpop.permute.xlu1 %532 }
 0x2a3   :  { %v534_v17 = vsel %vm423_vm1, %v533_v16, %v15096_v42 }
 0x2a4   :  { %538 = vrot.lane.b32.xlu1 %v534_v17, %s14860_s11 }
 0x2a6   :  { %v473_v22 = vpop.permute.xlu1 %472 }
 0x2a7   :  { %v474_v23 = vsel %vm423_vm1, %v473_v22, %v15100_v43 }
 0x2a8   :  { %478 = vrot.lane.b32.xlu1 %v474_v23, %s14860_s11 }
 0x2ab   :  { %v505_v25 = vpop.permute.xlu1 %504 }
 0x2ac   :  { %v508_v36 = vsel %vm423_vm1, %v505_v25, %v14979_v56 }
 0x2ad   :  { %v510_v47 = vmul.f32 %v508_v36, %v15092_v40 }
 0x2af   :  { %v431_v29 = vpop.permute.xlu1 %430 }
 0x2b0   :  { %v434_v50 = vsel %vm423_vm1, %v431_v29, %v14981_v57 }
 0x2b1   :  { %v444_v60 = vmul.f32 %v15092_v40, %v434_v50 }
 0x2b3   :  { %v593_v31 = vpop.permute.xlu1 %592 }
 0x2b4   :  { %v594_v45 = vsel %vm423_vm1, %v593_v31, %v15114_v51 }
 0x2b5   :  { %598 = vrot.lane.b32.xlu1 %v594_v45, %s14860_s11 }
 0x2b7   :  { %v565_v49 = vpop.permute.xlu1 %564 }
 0x2b8   :  { %v568_v2 = vsel %vm423_vm1, %v565_v49, %v14985_v58 }
 0x2b9   :  { %514 = vrot.lane.b32.xlu1 %v510_v47, %s14870_s4  ;;  %v570_v8 = vmul.f32 %v568_v2, %v15092_v40 }
 0x2ba   :  { %v476_v59 = vpop.permute.xlu0 %475 }
 0x2bb   :  { %v536_v1 = vpop.permute.xlu1 %535  ;;  %v477_v16 = vsel %vm423_vm1, %v476_v59, %v15123_v61 }
 0x2bc   :  { %v537_v4 = vsel %vm423_vm1, %v536_v1, %v15118_v53 }
 0x2bd   :  { %448 = vrot.lane.b32.xlu1 %v444_v60, %s14870_s4  ;;  %540 = vrot.lane.b32.xlu0 %v537_v4, %s14860_s11 }
 0x2be   :  { %v507_v7 = vpop.permute.xlu0 %506 }
 0x2bf   :  { %v509_v23 = vsel %vm423_vm1, %v507_v7, %v15001_v3 }
 0x2c0   :  { %v511_v29 = vmul.f32 %v509_v23, %v15104_v44 }
 0x2c1   :  { %574 = vrot.lane.b32.xlu1 %v570_v8, %s14870_s4  ;;  %480 = vrot.lane.b32.xlu0 %v477_v16, %s14860_s11 }
 0x2c2   :  { %v433_v17 = vpop.permute.xlu0 %432 }
 0x2c3   :  { %v435_v31 = vsel %vm423_vm1, %v433_v17, %v14990_v62 }
 0x2c4   :  { %v445_v45 = vmul.f32 %v15104_v44, %v435_v31 }
 0x2c6   :  { %v596_v22 = vpop.permute.xlu0 %595 }
 0x2c7   :  { %v597_v25 = vsel %vm423_vm1, %v596_v22, %v15135_v6 }
 0x2c8   :  { %600 = vrot.lane.b32.xlu0 %v597_v25, %s14860_s11 }
 0x2ca   :  { %v567_v36 = vpop.permute.xlu0 %566 }
 0x2cb   :  { %v569_v47 = vsel %vm423_vm1, %v567_v36, %v15048_v28 }
 0x2cc   :  { %516 = vrot.lane.b32.xlu0 %v511_v29, %s14870_s4  ;;  %v571_v49 = vmul.f32 %v569_v47, %v15104_v44 }
 0x2d0   :  { %450 = vrot.lane.b32.xlu0 %v445_v45, %s14870_s4 }
 0x2d4   :  { %576 = vrot.lane.b32.xlu0 %v571_v49, %s14870_s4 }
 0x316   :  { %v539_v50 = vpop.permute.xlu1 %538 }
 0x317   :  { %v542_v59 = vsel %vm423_vm1, %v539_v50, %v15096_v42 }
 0x318   :  { %v544_v60 = vmul.f32 %v542_v59, %v15092_v40 }
 0x31a   :  { %548 = vrot.lane.b32.xlu1 %v544_v60, %s14872_s6  ;;  %v479_v1 = vpop.permute.xlu1 %478 }
 0x31b   :  { %v482_v2 = vsel %vm423_vm1, %v479_v1, %v15100_v43 }
 0x31c   :  { %v484_v4 = vmul.f32 %v482_v2, %v15092_v40 }
 0x31e   :  { %488 = vrot.lane.b32.xlu1 %v484_v4, %s14872_s6 }
 0x327   :  { %v599_v7 = vpop.permute.xlu1 %598 }
 0x328   :  { %v602_v8 = vsel %vm423_vm1, %v599_v7, %v15114_v51 }
 0x329   :  { %v604_v16 = vmul.f32 %v602_v8, %v15092_v40 }
 0x32b   :  { %608 = vrot.lane.b32.xlu1 %v604_v16, %s14872_s6 }
 0x32f   :  { %v541_v42 = vpop.permute.xlu0 %540 }
 0x330   :  { %v543_v17 = vsel %vm423_vm1, %v541_v42, %v15118_v53  ;;  %v15228_v53 = vpop.permute.xlu1 %514 }
 0x331   :  { %v545_v22 = vmul.f32 %v543_v17, %v15104_v44 }
 0x333   :  { %v481_v23 = vpop.permute.xlu0 %480  ;;  %550 = vrot.lane.b32.xlu0 %v545_v22, %s14872_s6 }
 0x334   :  { %v483_v43 = vsel %vm423_vm1, %v481_v23, %v15123_v61  ;;  %v15230_v36 = vpop.permute.xlu1 %448  ;;  %v522_v61 = vmul.f32 %v15094_v41, %v14979_v56 }
 0x335   :  { %v485_v25 = vmul.f32 %v483_v43, %v15104_v44 }
 0x337   :  { %490 = vrot.lane.b32.xlu0 %v485_v25, %s14872_s6 }
 0x338   :  { %v15232_v45 = vpop.permute.xlu1 %574 }
 0x33a   :  { %v601_v51 = vpop.permute.xlu0 %600 }
 0x33b   :  { %v603_v29 = vsel %vm423_vm1, %v601_v51, %v15135_v6  ;;  %v462_v6 = vmul.f32 %v15094_v41, %v14981_v57 }
 0x33c   :  { %v605_v31 = vmul.f32 %v603_v29, %v15104_v44 }
 0x33e   :  { %610 = vrot.lane.b32.xlu0 %v605_v31, %s14872_s6  ;;  %v15249_v22 = vpop.permute.xlu0 %516 }
 0x342   :  { %v15261_v31 = vpop.permute.xlu0 %450 }
 0x38c   :  { %v549_v47 = vpop.permute.xlu1 %548 }
 0x38d   :  { %v554_v49 = vadd.f32 %v549_v47, %v522_v61  ;;  %v582_v47 = vmul.f32 %v15094_v41, %v14985_v58 }
 0x38f   :  { %v741_v50 = vrot.slane %v554_v49, %v14977_v55  ;;  %v734_v61 = vcombine.high %v554_v49, %v554_v49 }
 0x390   :  { %v489_v59 = vpop.permute.xlu1 %488 }
 0x391   :  { %v494_v60 = vadd.f32 %v489_v59, %v462_v6  ;;  %v757_v1 = vrot.slane %v741_v50, %v14977_v55  ;;  %v749_v2 = vcombine.high %v741_v50, %v741_v50 }
 0x393   :  { %v1512_v4 = vrot.slane %v494_v60, %v14977_v55  ;;  %v1035_v7 = vrot.slane %v757_v1, %v14993_v63  ;;  %v15243_v8 = vrot.slane %v749_v2, %v14977_v55  ;;  %v779_v25 = vcombine.high %v757_v1, %v757_v1  ;;  %v15271_v2 = vpop.permute.xlu0 %576 }
 0x394   :  { %v748_v1 = vrot.slane %v734_v61, %v14977_v55 }
 0x395   :  { %1096 = vrot.lane.b32.xlu1 %v1035_v7, %s14860_s11  ;;  %v1039_v16 = vrot.slane %v15243_v8, %v14993_v63  ;;  %v1528_v42 = vrot.slane %v1512_v4, %v14977_v55  ;;  %v1520_v17 = vcombine.high %v1512_v4, %v1512_v4  ;;  %v1043_v29 = vrot.slane %v779_v25, %v14993_v63 }
 0x396   :  { %v523_v25 = vmul.f32 %v15109_v48, %v15001_v3  ;;  %v750_v15 = vcombine.high %v748_v1, %v748_v1 }
 0x397   :  { %1098 = vrot.lane.b32.xlu0 %v1039_v16, %s14860_s11  ;;  %v1686_v23 = vrot.slane %v1528_v42, %v14993_v63  ;;  %v15254_v43 = vrot.slane %v1520_v17, %v14977_v55  ;;  %v1505_v16 = vcombine.high %v494_v60, %v494_v60 }
 0x399   :  { %1747 = vrot.lane.b32.xlu1 %v1686_v23, %s14860_s11  ;;  %v1690_v51 = vrot.slane %v15254_v43, %v14993_v63  ;;  %v15279_v23 = vrot.slane %v748_v1, %v14977_v55 }
 0x39b   :  { %1749 = vrot.lane.b32.xlu0 %v1690_v51, %s14860_s11  ;;  %v1051_v60 = vrot.slane %v15279_v23, %v14993_v63 }
 0x39d   :  { %1100 = vrot.lane.b32.xlu1 %v1043_v29, %s14860_s11  ;;  %v609_v50 = vpop.permute.xlu1 %608 }
 0x39e   :  { %v15266_v6 = vadd.f32 %v609_v50, %v582_v47  ;;  %v1550_v47 = vcombine.high %v1528_v42, %v1528_v42  ;;  %v15290_v50 = vrot.slane %v1505_v16, %v14977_v55 }
 0x3a0   :  { %v941_v59 = vrot.slane %v15266_v6, %v14977_v55  ;;  %v15300_v42 = vrot.slane %v15290_v50, %v14977_v55 }
 0x3a2   :  { %v957_v4 = vrot.slane %v941_v59, %v14977_v55  ;;  %v949_v7 = vcombine.high %v941_v59, %v941_v59 }
 0x3a4   :  { %v1227_v49 = vrot.slane %v957_v4, %v14993_v63  ;;  %v15276_v17 = vrot.slane %v949_v7, %v14977_v55  ;;  %v463_v7 = vmul.f32 %v15109_v48, %v14990_v62 }
 0x3a5   :  { %v551_v51 = vpop.permute.xlu0 %550 }
 0x3a6   :  { %1288 = vrot.lane.b32.xlu1 %v1227_v49, %s14860_s11  ;;  %v1231_v29 = vrot.slane %v15276_v17, %v14993_v63  ;;  %v555_v61 = vadd.f32 %v551_v51, %v523_v25 }
 0x3a8   :  { %1290 = vrot.lane.b32.xlu0 %v1231_v29, %s14860_s11  ;;  %v790_v59 = vrot.slane %v555_v61, %v14977_v55  ;;  %v783_v49 = vcombine.high %v555_v61, %v555_v61  ;;  %v1694_v29 = vrot.slane %v1550_v47, %v14993_v63 }
 0x3a9   :  { %v491_v34 = vpop.permute.xlu0 %490 }
 0x3aa   :  { %1104 = vrot.lane.b32.xlu1 %v1051_v60, %s14860_s11  ;;  %v798_v52 = vcombine.high %v790_v59, %v790_v59  ;;  %v806_v25 = vrot.slane %v790_v59, %v14977_v55  ;;  %v495_v51 = vadd.f32 %v491_v34, %v463_v7  ;;  %v15307_v44 = vrot.slane %v783_v49, %v14977_v55 }
 0x3ab   :  { %v1702_v34 = vrot.slane %v15300_v42, %v14993_v63  ;;  %v781_v49 = vcombine.high %v15243_v8, %v15243_v8  ;;  %v583_v8 = vmul.f32 %v15109_v48, %v15048_v28 }
 0x3ac   :  { %v820_v16 = vrot.slane %v798_v52, %v14977_v55  ;;  %v1561_v41 = vrot.slane %v495_v51, %v14977_v55  ;;  %v828_v61 = vcombine.high %v806_v25, %v806_v25  ;;  %v15316_v52 = vrot.slane %v15307_v44, %v14977_v55 }
 0x3ad   :  { %v1067_v7 = vrot.slane %v806_v25, %v14993_v63  ;;  %v1047_v39 = vrot.slane %v781_v49, %v14993_v63  ;;  %v979_v25 = vcombine.high %v957_v4, %v957_v4  ;;  %v15343_v4 = vrot.slane %v750_v15, %v14977_v55 }
 0x3ae   :  { %1751 = vrot.lane.b32.xlu1 %v1694_v29, %s14860_s11  ;;  %v1071_v60 = vrot.slane %v820_v16, %v14993_v63  ;;  %v1075_v47 = vrot.slane %v828_v61, %v14993_v63  ;;  %v1569_v59 = vcombine.high %v1561_v41, %v1561_v41  ;;  %v1554_v29 = vcombine.high %v495_v51, %v495_v51 }
 0x3af   :  { %v1235_v1 = vrot.slane %v979_v25, %v14993_v63  ;;  %v830_v25 = vcombine.high %v820_v16, %v820_v16 }
 0x3b0   :  { %1114 = vrot.lane.b32.xlu0 %v1071_v60, %s14860_s11  ;;  %v1083_v60 = vrot.slane %v15316_v52, %v14993_v63  ;;  %v15326_v61 = vrot.slane %v1569_v59, %v14977_v55  ;;  %v611_v40 = vpop.permute.xlu0 %610 }
 0x3b1   :  { %v615_v51 = vadd.f32 %v611_v40, %v583_v8 }
 0x3b2   :  { %1755 = vrot.lane.b32.xlu1 %v1702_v34, %s14860_s11  ;;  %v1577_v34 = vrot.slane %v1561_v41, %v14977_v55  ;;  %v934_v41 = vcombine.high %v15266_v6, %v15266_v6  ;;  %v1055_v6 = vrot.slane %v15343_v4, %v14993_v63 }
 0x3b4   :  { %1116 = vrot.lane.b32.xlu0 %v1075_v47, %s14860_s11  ;;  %v1722_v47 = vrot.slane %v15326_v61, %v14993_v63  ;;  %v1599_v59 = vcombine.high %v1577_v34, %v1577_v34  ;;  %v948_v15 = vrot.slane %v934_v41, %v14977_v55 }
 0x3b6   :  { %1112 = vrot.lane.b32.xlu1 %v1067_v7, %s14860_s11  ;;  %v15337_v7 = vrot.slane %v1554_v29, %v14977_v55  ;;  %v1726_v40 = vrot.slane %v1599_v59, %v14993_v63  ;;  %v780_v29 = vcombine.high %v15279_v23, %v15279_v23  ;;  %v15364_v59 = vrot.slane %v948_v15, %v14977_v55 }
 0x3b7   :  { %v1079_v23 = vrot.slane %v830_v25, %v14993_v63  ;;  %v1552_v25 = vcombine.high %v15254_v43, %v15254_v43 }
 0x3b8   :  { %1120 = vrot.lane.b32.xlu0 %v1083_v60, %s14860_s11  ;;  %v15351_v49 = vrot.slane %v15337_v7, %v14977_v55 }
 0x3ba   :  { %1102 = vrot.lane.b32.xlu1 %v1047_v39, %s14860_s11  ;;  %v990_v39 = vrot.slane %v615_v51, %v14977_v55  ;;  %v1734_v60 = vrot.slane %v15351_v49, %v14993_v63 }
 0x3bc   :  { %1765 = vrot.lane.b32.xlu0 %v1722_v47, %s14860_s11  ;;  %v998_v8 = vcombine.high %v990_v39, %v990_v39  ;;  %v1059_v47 = vrot.slane %v780_v29, %v14993_v63  ;;  %v799_v29 = vcombine.high %v15307_v44, %v15307_v44 }
 0x3be   :  { %1292 = vrot.lane.b32.xlu1 %v1235_v1, %s14860_s11  ;;  %v1020_v41 = vrot.slane %v998_v8, %v14977_v55  ;;  %v1006_v1 = vrot.slane %v990_v39, %v14977_v55  ;;  %v1521_v39 = vcombine.high %v15290_v50, %v15290_v50  ;;  %v983_v8 = vcombine.high %v615_v51, %v615_v51 }
 0x3bf   :  { %v829_v50 = vcombine.high %v15316_v52, %v15316_v52 }
 0x3c0   :  { %1767 = vrot.lane.b32.xlu0 %v1726_v40, %s14860_s11  ;;  %v1243_v40 = vrot.slane %v15364_v59, %v14993_v63  ;;  %v1263_v16 = vrot.slane %v1020_v41, %v14993_v63  ;;  %v1549_v44 = vrot.slane %v1521_v39, %v14977_v55  ;;  %v981_v39 = vcombine.high %v15276_v17, %v15276_v17 }
 0x3c2   :  { %1106 = vrot.lane.b32.xlu1 %v1055_v6, %s14860_s11  ;;  %v1028_v6 = vcombine.high %v1006_v1, %v1006_v1  ;;  %v1706_v51 = vrot.slane %v1549_v44, %v14993_v63 }
 0x3c4   :  { %1771 = vrot.lane.b32.xlu0 %v1734_v60, %s14860_s11  ;;  %v1718_v60 = vrot.slane %v1577_v34, %v14993_v63  ;;  %v997_v34 = vrot.slane %v983_v8, %v14977_v55  ;;  %v1259_v8 = vrot.slane %v1006_v1, %v14993_v63 }
 0x3c6   :  { %1108 = vrot.lane.b32.xlu1 %v1059_v47, %s14860_s11  ;;  %v1267_v47 = vrot.slane %v1028_v6, %v14993_v63  ;;  %v1091_v6 = vrot.slane %v829_v50, %v14993_v63  ;;  %v1239_v50 = vrot.slane %v981_v39, %v14993_v63 }
 0x3c8   :  { %1118 = vrot.lane.b32.xlu0 %v1079_v23, %s14860_s11  ;;  %v827_v23 = vrot.slane %v799_v29, %v14977_v55  ;;  %v1013_v29 = vrot.slane %v997_v34, %v14977_v55 }
 0x3ca   :  { %1296 = vrot.lane.b32.xlu1 %v1243_v40, %s14860_s11  ;;  %v1698_v40 = vrot.slane %v1552_v25, %v14993_v63  ;;  %v1087_v43 = vrot.slane %v827_v23, %v14993_v63  ;;  %v1275_v52 = vrot.slane %v1013_v29, %v14993_v63  ;;  %v1601_v25 = vcombine.high %v15326_v61, %v15326_v61 }
 0x3cb   :  { %v950_v61 = vcombine.high %v948_v15, %v948_v15  ;;  %v1030_v15 = vcombine.high %v1020_v41, %v1020_v41 }
 0x3cc   :  { %1306 = vrot.lane.b32.xlu0 %v1263_v16, %s14860_s11  ;;  %v1551_v16 = vcombine.high %v15300_v42, %v15300_v42  ;;  %v1570_v42 = vcombine.high %v15337_v7, %v15337_v7  ;;  %v1600_v7 = vcombine.high %v15351_v49, %v15351_v49 }
 0x3cd   :  { %v1271_v49 = vrot.slane %v1030_v15, %v14993_v63 }
 0x3ce   :  { %1763 = vrot.lane.b32.xlu1 %v1718_v60, %s14860_s11  ;;  %v1710_v60 = vrot.slane %v1551_v16, %v14993_v63  ;;  %v980_v16 = vcombine.high %v15364_v59, %v15364_v59 }
 0x3d0   :  { %1308 = vrot.lane.b32.xlu0 %v1267_v47, %s14860_s11  ;;  %v1730_v47 = vrot.slane %v1601_v25, %v14993_v63  ;;  %v1553_v25 = vcombine.high %v1549_v44, %v1549_v44  ;;  %v1029_v44 = vcombine.high %v1013_v29, %v1013_v29  ;;  %v14680_v29 = vld [vmem:[#allocation5] sm:$0xff] }
 0x3d2   :  { %1753 = vrot.lane.b32.xlu1 %v1698_v40, %s14860_s11  ;;  %v1598_v40 = vrot.slane %v1570_v42, %v14977_v55  ;;  %v1251_v42 = vrot.slane %v980_v16, %v14993_v63  ;;  %v1714_v39 = vrot.slane %v1553_v25, %v14993_v63 }
 0x3d4   :  { %1122 = vrot.lane.b32.xlu0 %v1087_v43, %s14860_s11  ;;  %v782_v43 = vcombine.high %v15343_v4, %v15343_v4  ;;  %v1738_v17 = vrot.slane %v1598_v40, %v14993_v63  ;;  %v1742_v4 = vrot.slane %v1600_v7, %v14993_v63  ;;  %v556_v7 = vmul.f32 %v14680_v29, %v14985_v58 }
 0x3d6   :  { %1757 = vrot.lane.b32.xlu1 %v1706_v51, %s14860_s11  ;;  %v1063_v1 = vrot.slane %v782_v43, %v14993_v63  ;;  %v978_v51 = vrot.slane %v950_v61, %v14977_v55  ;;  %v1283_v43 = vrot.slane %v1029_v44, %v14993_v63 }
 0x3d8   :  { %1124 = vrot.lane.b32.xlu0 %v1091_v6, %s14860_s11  ;;  %v1247_v6 = vrot.slane %v978_v51, %v14993_v63 }
 0x3da   :  { %1759 = vrot.lane.b32.xlu1 %v1710_v60, %s14860_s11  ;;  %v831_v60 = vcombine.high %v827_v23, %v827_v23 }
 0x3dc   :  { %1312 = vrot.lane.b32.xlu0 %v1275_v52, %s14860_s11  ;;  %v999_v52 = vcombine.high %v997_v34, %v997_v34  ;;  %v1095_v41 = vrot.slane %v831_v60, %v14993_v63 }
 0x3de   :  { %1304 = vrot.lane.b32.xlu1 %v1259_v8, %s14860_s11  ;;  %v1027_v59 = vrot.slane %v999_v52, %v14977_v55  ;;  %v982_v8 = vcombine.high %v978_v51, %v978_v51  ;;  %v15458_v51 = vadd.f32 %v15232_v45, %v556_v7 }
 0x3e0   :  { %1769 = vrot.lane.b32.xlu0 %v1730_v47, %s14860_s11  ;;  %v1279_v23 = vrot.slane %v1027_v59, %v14993_v63  ;;  %v1255_v34 = vrot.slane %v982_v8, %v14993_v63  ;;  %v1602_v47 = vcombine.high %v1598_v40, %v1598_v40  ;;  %v1031_v61 = vcombine.high %v1027_v59, %v1027_v59 }
 0x3e1   :  { %v421_v40 = vmul.f32 %v14680_v29, %v14981_v57 }
 0x3e2   :  { %1294 = vrot.lane.b32.xlu1 %v1239_v50, %s14860_s11  ;;  %v1746_v50 = vrot.slane %v1602_v47, %v14993_v63 }
 0x3e3   :  { %v15464_v16 = vadd.f32 %v15230_v36, %v421_v40 }
 0x3e4   :  { %1773 = vrot.lane.b32.xlu0 %v1738_v17, %s14860_s11  ;;  %v1287_v17 = vrot.slane %v1031_v61, %v14993_v63 }
 0x3e6   :  { %1110 = vrot.lane.b32.xlu1 %v1063_v1, %s14860_s11  ;;  %v496_v1 = vmul.f32 %v14680_v29, %v14979_v56  ;;  %v1396_v56 = vrot.slane %v15464_v16, %v14977_v55 }
 0x3e8   :  { %1775 = vrot.lane.b32.xlu0 %v1742_v4, %s14860_s11  ;;  %v15461_v15 = vadd.f32 %v15228_v53, %v496_v1  ;;  %v1404_v52 = vcombine.high %v1396_v56, %v1396_v56  ;;  %v15479_v25 = vrot.slane %v1396_v56, %v14977_v55 }
 0x3ea   :  { %1298 = vrot.lane.b32.xlu1 %v1247_v6, %s14860_s11  ;;  %v841_v6 = vrot.slane %v15458_v51, %v14977_v55  ;;  %v625_v58 = vrot.slane %v15461_v15, %v14977_v55  ;;  %v15487_v59 = vrot.slane %v1404_v52, %v14977_v55  ;;  %v1606_v47 = vrot.slane %v15479_v25, %v14993_v63 }
 0x3ec   :  { %1310 = vrot.lane.b32.xlu0 %v1271_v49, %s14860_s11  ;;  %v849_v49 = vcombine.high %v841_v6, %v841_v6  ;;  %v633_v60 = vcombine.high %v625_v58, %v625_v58  ;;  %v15473_v53 = vrot.slane %v841_v6, %v14977_v55  ;;  %v15476_v36 = vrot.slane %v625_v58, %v14977_v55 }
 0x3ee   :  { %1300 = vrot.lane.b32.xlu1 %v1251_v42, %s14860_s11  ;;  %v15482_v42 = vrot.slane %v849_v49, %v14977_v55  ;;  %v15492_v8 = vrot.slane %v633_v60, %v14977_v55 }
 0x3f0   :  { %1126 = vrot.lane.b32.xlu0 %v1095_v41, %s14860_s11 }
 0x3f2   :  { %1761 = vrot.lane.b32.xlu1 %v1714_v39, %s14860_s11 }
 0x3f4   :  { %1314 = vrot.lane.b32.xlu0 %v1279_v23, %s14860_s11  ;;  %v1147_v23 = vrot.slane %v15473_v53, %v14993_v63 }
 0x3f6   :  { %1302 = vrot.lane.b32.xlu1 %v1255_v34, %s14860_s11 }
 0x3f8   :  { %1316 = vrot.lane.b32.xlu0 %v1283_v43, %s14860_s11 }
 0x3fc   :  { %1777 = vrot.lane.b32.xlu0 %v1746_v50, %s14860_s11  ;;  %v1151_v50 = vrot.slane %v15482_v42, %v14993_v63 }
 0x400   :  { %1318 = vrot.lane.b32.xlu0 %v1287_v17, %s14860_s11  ;;  %v1610_v17 = vrot.slane %v15487_v59, %v14993_v63 }
 0x402   :  { %v1796_v52 = vsel %vm1336_vm0, %v15487_v59, %v1610_v17 }
 0x407   :  { %v1097_v4 = vpop.permute.xlu1 %1096 }
 0x408   :  { %v1337_v39 = vsel %vm1336_vm0, %v15476_v36, %v1097_v4  ;;  %v1795_v4 = vsel %vm1336_vm0, %v15479_v25, %v1606_v47 }
 0x409   :  { %v1099_v45 = vpop.permute.xlu0 %1098  ;;  %v1354_v43 = vsel %vm1353_vm2, %v1337_v39, %v1147_v23 }
 0x40a   :  { %v1338_v34 = vsel %vm1336_vm0, %v15492_v8, %v1099_v45 }
 0x40b   :  { %v1748_v57 = vpop.permute.xlu1 %1747  ;;  %v1355_v1 = vsel %vm1353_vm2, %v1338_v34, %v1151_v50 }
 0x40c   :  { %v1811_v58 = vsel %vm1353_vm2, %v1795_v4, %v1748_v57 }
 0x40d   :  { %v1750_v44 = vpop.permute.xlu0 %1749  ;;  %v15523_v47 = vsel %vm1370_vm3, %v1811_v58, %v1748_v57 }
 0x40f   :  { %v15484_v41 = vpop.permute.xlu1 %1100 }
 0x418   :  { %v1289_v61 = vpop.permute.xlu1 %1288 }
 0x419   :  { %v1371_v29 = vsel %vm1370_vm3, %v1354_v43, %v1289_v61  ;;  %v1812_v43 = vsel %vm1353_vm2, %v1796_v52, %v1750_v44 }
 0x41a   :  { %v2157_v7 = vrot.slane %v1371_v29, %v14977_v55  ;;  %v1291_v40 = vpop.permute.xlu0 %1290  ;;  %v1828_v58 = vsel %vm1370_vm3, %v1812_v43, %v1750_v44 }
 0x41b   :  { %v1372_v6 = vsel %vm1370_vm3, %v1355_v1, %v1291_v40 }
 0x41c   :  { %v2158_v56 = vcombine.high %v2157_v7, %v2157_v7  ;;  %v2165_v49 = vrot.slane %v2157_v7, %v14977_v55  ;;  %v2181_v45 = vrot.slane %v1372_v6, %v14977_v55  ;;  %v15514_v60 = vpop.permute.xlu1 %1104 }
 0x41e   :  { %v15519_v39 = vrot.slane %v2158_v56, %v14977_v55  ;;  %v2182_v23 = vcombine.high %v2181_v45, %v2181_v45  ;;  %v2189_v34 = vrot.slane %v2181_v45, %v14977_v55  ;;  %v2173_v61 = vcombine.high %v2165_v49, %v2165_v49 }
 0x41f   :  { %v2538_v50 = vrot.slane %v2165_v49, %v14993_v63 }
 0x420   :  { %v2196_v29 = vrot.slane %v2182_v23, %v14977_v55  ;;  %v2197_v7 = vcombine.high %v2189_v34, %v2189_v34  ;;  %v15528_v1 = vpop.permute.xlu1 %1751  ;;  %v2542_v17 = vrot.slane %v15519_v39, %v14993_v63  ;;  %v2554_v40 = vrot.slane %v2189_v34, %v14993_v63 }
 0x421   :  { %v2855_v4 = vmul.f32 %v2538_v50, %v15523_v47  ;;  %v2546_v50 = vrot.slane %v2173_v61, %v14993_v63  ;;  %v879_v61 = vcombine.high %v15473_v53, %v15473_v53 }
 0x422   :  { %v2856_v57 = vmul.f32 %v2542_v17, %v15523_v47  ;;  %v2558_v6 = vrot.slane %v2196_v29, %v14993_v63  ;;  %v15537_v56 = vpop.permute.xlu0 %1114  ;;  %v2562_v45 = vrot.slane %v2197_v7, %v14993_v63  ;;  %v2859_v48 = vmul.f32 %v2554_v40, %v1828_v58 }
 0x423   :  { %v2920_v49 = vsel %vm2919_vm4, %v2855_v4, 0.0  ;;  %v2198_v35 = vcombine.high %v2196_v29, %v2196_v29  ;;  %v663_v29 = vcombine.high %v15476_v36, %v15476_v36  ;;  %v1155_v36 = vrot.slane %v879_v61, %v14993_v63 }
 0x424   :  { %2921 = vadd.xlane.f32.xlu1 %v2920_v49  ;;  %v15541_v52 = vpop.permute.xlu1 %1755  ;;  %v2923_v23 = vsel %vm2919_vm4, %v2856_v57, 0.0  ;;  %v2860_v34 = vmul.f32 %v2558_v6, %v1828_v58  ;;  %v2861_v43 = vmul.f32 %v2562_v45, %v1828_v58  ;;  %v2932_v7 = vsel %vm2919_vm4, %v2859_v48, 0.0 }
 0x425   :  { %2924 = vadd.xlane.f32.xlu0 %v2923_v23  ;;  %v2857_v49 = vmul.f32 %v2546_v50, %v15523_v47  ;;  %v2566_v57 = vrot.slane %v2198_v35, %v14993_v63  ;;  %v1434_v6 = vcombine.high %v15479_v25, %v15479_v25  ;;  %v1339_v53 = vsel %vm1336_vm0, %v663_v29, %v15484_v41 }
 0x426   :  { %v2935_v17 = vsel %vm2919_vm4, %v2860_v34, 0.0  ;;  %v15546_v44 = vpop.permute.xlu0 %1116  ;;  %v2938_v48 = vsel %vm2919_vm4, %v2861_v43, 0.0  ;;  %v618_v25 = vcombine.high %v15461_v15, %v15461_v15  ;;  %v1389_v34 = vcombine.high %v15464_v16, %v15464_v16 }
 0x427   :  { %v15555_v40 = vmul.f32 %v2566_v57, %v1828_v58  ;;  %v2926_v35 = vsel %vm2919_vm4, %v2857_v49, 0.0  ;;  %v834_v58 = vcombine.high %v15458_v51, %v15458_v51  ;;  %v1614_v50 = vrot.slane %v1434_v6, %v14993_v63 }
 0x428   :  { %2936 = vadd.xlane.f32.xlu1 %v2935_v17  ;;  %v15548_v4 = vpop.permute.xlu1 %1112  ;;  %v1356_v43 = vsel %vm1353_vm2, %v1339_v53, %v1155_v36  ;;  %v15586_v57 = vrot.slane %v618_v25, %v14977_v55  ;;  %v1403_v15 = vrot.slane %v1389_v34, %v14977_v55 }
 0x429   :  { %2933 = vadd.xlane.f32.xlu0 %v2932_v7  ;;  %v15582_v49 = vrot.slane %v834_v58, %v14977_v55  ;;  %v1797_v16 = vsel %vm1336_vm0, %v1434_v6, %v1614_v50 }
 0x42a   :  { %v15561_v45 = vpop.permute.xlu0 %1120  ;;  %v1813_v29 = vsel %vm1353_vm2, %v1797_v16, %v15528_v1  ;;  %v1419_v25 = vrot.slane %v1403_v15, %v14977_v55  ;;  %v15609_v34 = vrot.slane %v15586_v57, %v14977_v55 }
 0x42b   :  { %v15601_v58 = vrot.slane %v15582_v49, %v14977_v55  ;;  %v15613_v50 = vsel %vm1370_vm3, %v1813_v29, %v15528_v1 }
 0x42c   :  { %2939 = vadd.xlane.f32.xlu1 %v2938_v48  ;;  %v15564_v23 = vpop.permute.xlu1 %1102  ;;  %v1341_v16 = vsel %vm1336_vm0, %v15609_v34, %v15514_v60  ;;  %v1622_v29 = vrot.slane %v1419_v25, %v14993_v63 }
 0x42d   :  { %2927 = vadd.xlane.f32.xlu0 %v2926_v35  ;;  %v1163_v38 = vrot.slane %v15601_v58, %v14993_v63  ;;  %v880_v32 = vcombine.high %v15601_v58, %v15601_v58 }
 0x42e   :  { %v15577_v17 = vpop.permute.xlu0 %1765 }
 0x430   :  { %v1293_v7 = vpop.permute.xlu1 %1292 }
 0x431   :  { %v1373_v41 = vsel %vm1370_vm3, %v1356_v43, %v1293_v7 }
 0x432   :  { %v2205_v51 = vrot.slane %v1373_v41, %v14977_v55  ;;  %v15590_v61 = vpop.permute.xlu0 %1767 }
 0x434   :  { %v2206_v48 = vcombine.high %v2205_v51, %v2205_v51  ;;  %v15595_v35 = vrot.slane %v2205_v51, %v14977_v55  ;;  %v15597_v53 = vpop.permute.xlu1 %1106 }
 0x436   :  { %v2220_v36 = vrot.slane %v2206_v48, %v14977_v55  ;;  %v2570_v6 = vrot.slane %v15595_v35, %v14993_v63  ;;  %v15615_v43 = vpop.permute.xlu0 %1771 }
 0x438   :  { %v15617_v7 = vpop.permute.xlu1 %1108  ;;  %v2863_v41 = vmul.f32 %v2570_v6, %v15613_v50  ;;  %v2574_v51 = vrot.slane %v2220_v36, %v14993_v63  ;;  %v2222_v48 = vcombine.high %v2220_v36, %v2220_v36  ;;  %v1358_v6 = vsel %vm1353_vm2, %v1341_v16, %v1163_v38 }
 0x43a   :  { %v2944_v13 = vsel %vm2919_vm4, %v2863_v41, 0.0  ;;  %v2864_v1 = vmul.f32 %v2574_v51, %v15613_v50  ;;  %v2582_v12 = vrot.slane %v2222_v48, %v14993_v63  ;;  %v15632_v33 = vpop.permute.xlu0 %1118  ;;  %v14681_v51 = vld [vmem:[#allocation5 + $0x8] sm:$0xff] }
 0x43b   :  { %2945 = vadd.xlane.f32.xlu0 %v2944_v13  ;;  %v1799_v13 = vsel %vm1336_vm0, %v1419_v25, %v1622_v29  ;;  %v557_v48 = vmul.f32 %v14681_v51, %v15048_v28 }
 0x43c   :  { %v1297_v37 = vpop.permute.xlu1 %1296  ;;  %v2947_v10 = vsel %vm2919_vm4, %v2864_v1, 0.0  ;;  %v15636_v36 = vmul.f32 %v2582_v12, %v15613_v50  ;;  %v1815_v38 = vsel %vm1353_vm2, %v1799_v13, %v15541_v52  ;;  %v422_v12 = vmul.f32 %v14681_v51, %v14990_v62 }
 0x43d   :  { %v1375_v60 = vsel %vm1370_vm3, %v1358_v6, %v1297_v37  ;;  %2948 = vadd.xlane.f32.xlu1 %v2947_v10  ;;  %v497_v10 = vmul.f32 %v14681_v51, %v15001_v3  ;;  %v15654_v1 = vadd.f32 %v15271_v2, %v557_v48  ;;  %v1405_v3 = vcombine.high %v1403_v15, %v1403_v15 }
 0x43e   :  { %v15639_v41 = vrot.slane %v1375_v60, %v14977_v55  ;;  %v15660_v6 = vadd.f32 %v15261_v31, %v422_v12  ;;  %v15664_v60 = vsel %vm1370_vm3, %v1815_v38, %v15541_v52  ;;  %v15666_v13 = vpop.permute.xlu0 %1306  ;;  %v634_v38 = vcombine.high %v15586_v57, %v15586_v57 }
 0x43f   :  { %v521_v28 = vadd.f32 %v15249_v22, %v497_v10  ;;  %v890_v2 = vrot.slane %v15654_v1, %v14977_v55  ;;  %v850_v22 = vcombine.high %v15582_v49, %v15582_v49  ;;  %v15680_v15 = vrot.slane %v1405_v3, %v14977_v55 }
 0x440   :  { %v15647_v16 = vrot.slane %v15639_v41, %v14977_v55  ;;  %v15649_v37 = vpop.permute.xlu1 %1763  ;;  %v1445_v52 = vrot.slane %v15660_v6, %v14977_v55  ;;  %v881_v12 = vcombine.high %v15482_v42, %v15482_v42  ;;  %v1435_v57 = vcombine.high %v1419_v25, %v1419_v25 }
 0x441   :  { %v674_v31 = vrot.slane %v521_v28, %v14977_v55  ;;  %v15691_v49 = vrot.slane %v890_v2, %v14977_v55  ;;  %v1626_v42 = vrot.slane %v15680_v15, %v14993_v63  ;;  %v667_v20 = vcombine.high %v521_v28, %v521_v28 }
 0x442   :  { %v2602_v29 = vrot.slane %v15647_v16, %v14993_v63  ;;  %v15686_v10 = vpop.permute.xlu0 %1308  ;;  %v15716_v24 = vrot.slane %v634_v38, %v14977_v55  ;;  %v1159_v28 = vrot.slane %v881_v12, %v14993_v63  ;;  %v15739_v12 = vrot.slane %v880_v32, %v14993_v63 }
 0x443   :  { %v15699_v3 = vrot.slane %v674_v31, %v14977_v55  ;;  %v1179_v25 = vrot.slane %v15691_v49, %v14993_v63  ;;  %v682_v21 = vcombine.high %v674_v31, %v674_v31  ;;  %v15733_v9 = vsel %vm1336_vm0, %v15680_v15, %v1626_v42 }
 0x444   :  { %v15668_v46 = vpop.permute.xlu1 %1753  ;;  %v2871_v62 = vmul.f32 %v2602_v29, %v15664_v60  ;;  %v1436_v29 = vcombine.high %v15487_v59, %v15487_v59  ;;  %v2174_v31 = vcombine.high %v15519_v39, %v15519_v39  ;;  %v15742_v14 = vrot.slane %v667_v20, %v14977_v55 }
 0x445   :  { %v1345_v59 = vsel %vm1336_vm0, %v15699_v3, %v15548_v4  ;;  %v898_v18 = vcombine.high %v890_v2, %v890_v2  ;;  %v1453_v42 = vcombine.high %v1445_v52, %v1445_v52  ;;  %v15752_v32 = vrot.slane %v682_v21, %v14977_v55 }
 0x446   :  { %v2968_v51 = vsel %vm2919_vm4, %v2871_v62, 0.0  ;;  %v15696_v62 = vrot.slane %v850_v22, %v14977_v55  ;;  %v665_v22 = vcombine.high %v15492_v8, %v15492_v8  ;;  %v1618_v26 = vrot.slane %v1436_v29, %v14993_v63  ;;  %v15726_v27 = vpop.permute.xlu0 %1122 }
 0x447   :  { %2969 = vadd.xlane.f32.xlu0 %v2968_v51  ;;  %v15702_v51 = vrot.slane %v1445_v52, %v14977_v55  ;;  %v1630_v8 = vrot.slane %v1435_v57, %v14993_v63  ;;  %v1362_v58 = vsel %vm1353_vm2, %v1345_v59, %v1179_v25  ;;  %v2254_v59 = vcombine.high %v15639_v41, %v15639_v41 }
 0x448   :  { %v15682_v48 = vpop.permute.xlu1 %1757  ;;  %v1167_v38 = vrot.slane %v15696_v62, %v14993_v63  ;;  %v1340_v11 = vsel %vm1336_vm0, %v665_v22, %v15564_v23  ;;  %v1798_v25 = vsel %vm1336_vm0, %v1436_v29, %v1618_v26  ;;  %v712_v20 = vcombine.high %v15699_v3, %v15699_v3 }
 0x449   :  { %v1638_v4 = vrot.slane %v15702_v51, %v14993_v63  ;;  %v15759_v23 = vsel %vm1336_vm0, %v1435_v57, %v1630_v8  ;;  %v2550_v21 = vrot.slane %v2174_v31, %v14993_v63  ;;  %v15769_v52 = vrot.slane %v898_v18, %v14977_v55 }
 0x44a   :  { %v15773_v29 = vrot.slane %v15742_v14, %v14977_v55  ;;  %v2221_v3 = vcombine.high %v15595_v35, %v15595_v35  ;;  %v15777_v57 = vpop.permute.xlu0 %1124  ;;  %v928_v35 = vcombine.high %v15691_v49, %v15691_v49  ;;  %v1346_v8 = vsel %vm1336_vm0, %v15752_v32, %v15537_v56 }
 0x44b   :  { %v1803_v2 = vsel %vm1336_vm0, %v15702_v51, %v1638_v4  ;;  %v883_v4 = vcombine.high %v15654_v1, %v15654_v1  ;;  %v2858_v49 = vmul.f32 %v2550_v21, %v15523_v47  ;;  %v1342_v56 = vsel %vm1336_vm0, %v15716_v24, %v15597_v53 }
 0x44c   :  { %v15708_v30 = vpop.permute.xlu1 %1759  ;;  %v1347_v53 = vsel %vm1336_vm0, %v712_v20, %v15546_v44  ;;  %v21218_v20 = vcombine.high %v15609_v34, %v15609_v34 }
 0x44d   :  { %v2929_v54 = vsel %vm2919_vm4, %v2858_v49, 0.0 }
 0x450   :  { %v1305_v19 = vpop.permute.xlu1 %1304 }
 0x451   :  { %v1379_v5 = vsel %vm1370_vm3, %v1362_v58, %v1305_v19  ;;  %v1819_v19 = vsel %vm1353_vm2, %v1803_v2, %v15649_v37  ;;  %v15781_v58 = vrot.slane %v1453_v42, %v14977_v55  ;;  %v1814_v42 = vsel %vm1353_vm2, %v1798_v25, %v15668_v46 }
 0x452   :  { %v2349_v39 = vrot.slane %v1379_v5, %v14977_v55  ;;  %v1357_v5 = vsel %vm1353_vm2, %v1340_v11, %v1159_v28  ;;  %v15784_v11 = vrot.slane %v2254_v59, %v14977_v55  ;;  %v15800_v31 = vsel %vm1370_vm3, %v1819_v19, %v15649_v37 }
 0x453   :  { %v2269_v37 = vcombine.high %v15647_v16, %v15647_v16  ;;  %v1183_v25 = vrot.slane %v15769_v52, %v14993_v63  ;;  %v2578_v19 = vrot.slane %v2221_v3, %v14993_v63  ;;  %v1187_v16 = vrot.slane %v928_v35, %v14993_v63 }
 0x454   :  { %v15764_v41 = vrot.slane %v2349_v39, %v14977_v55  ;;  %v1295_v26 = vpop.permute.xlu1 %1294  ;;  %v2606_v47 = vrot.slane %v15784_v11, %v14993_v63  ;;  %v1642_v34 = vrot.slane %v15781_v58, %v14993_v63 }
 0x455   :  { %v1374_v22 = vsel %vm1370_vm3, %v1357_v5, %v1295_v26  ;;  %v2350_v5 = vcombine.high %v2349_v39, %v2349_v39  ;;  %v1363_v21 = vsel %vm1353_vm2, %v1346_v8, %v1183_v25  ;;  %v15833_v39 = vpop.permute.xlu0 %1312  ;;  %v2865_v8 = vmul.f32 %v2578_v19, %v15613_v50 }
 0x456   :  { %v15787_v18 = vrot.slane %v1374_v22, %v14977_v55  ;;  %v2666_v28 = vrot.slane %v15764_v41, %v14993_v63  ;;  %v1380_v3 = vsel %vm1370_vm3, %v1363_v21, %v15666_v13  ;;  %v15855_v25 = vrot.slane %v883_v4, %v14977_v55 }
 0x457   :  { %v15849_v13 = vrot.slane %v2350_v5, %v14977_v55  ;;  %v1364_v50 = vsel %vm1353_vm2, %v1347_v53, %v1187_v16 }
 0x458   :  { %v15806_v59 = vrot.slane %v15787_v18, %v14977_v55  ;;  %v15808_v2 = vpop.permute.xlu1 %1110  ;;  %v2887_v1 = vmul.f32 %v2666_v28, %v15800_v31  ;;  %v15831_v28 = vsel %vm1370_vm3, %v1814_v42, %v15668_v46  ;;  %v1343_v46 = vsel %vm1336_vm0, %v21218_v20, %v15617_v7 }
 0x459   :  { %v2610_v42 = vrot.slane %v2269_v37, %v14993_v63  ;;  %v1816_v7 = vsel %vm1353_vm2, %v15733_v9, %v15682_v48  ;;  %v1360_v4 = vsel %vm1353_vm2, %v1343_v46, %v15739_v12  ;;  %v1381_v5 = vsel %vm1370_vm3, %v1364_v50, %v15686_v10 }
 0x45a   :  { %v3016_v26 = vsel %vm2919_vm4, %v2887_v1, 0.0  ;;  %v2586_v22 = vrot.slane %v15806_v59, %v14993_v63  ;;  %v1359_v1 = vsel %vm1353_vm2, %v1342_v56, %v1167_v38  ;;  %v2872_v56 = vmul.f32 %v2606_v47, %v15664_v60 }
 0x45b   :  { %3017 = vadd.xlane.f32.xlu0 %v3016_v26  ;;  %v15873_v26 = vpop.permute.xlu0 %1769  ;;  %v2873_v47 = vmul.f32 %v2610_v42, %v15664_v60  ;;  %v2670_v21 = vrot.slane %v15849_v13, %v14993_v63  ;;  %v1483_v10 = vcombine.high %v15702_v51, %v15702_v51  ;;  %v2245_v42 = vcombine.high %v15806_v59, %v15806_v59 }
 0x45c   :  { %v1299_v0 = vpop.permute.xlu1 %1298  ;;  %v2867_v44 = vmul.f32 %v2586_v22, %v15831_v28  ;;  %v2950_v22 = vsel %vm2919_vm4, %v2865_v8, 0.0  ;;  %v2971_v53 = vsel %vm2919_vm4, %v2872_v56, 0.0  ;;  %v2365_v50 = vcombine.high %v15764_v41, %v15764_v41 }
 0x45d   :  { %v1376_v35 = vsel %vm1370_vm3, %v1359_v1, %v1299_v0  ;;  %v15860_v0 = vrot.slane %v1380_v3, %v14977_v55  ;;  %v15894_v3 = vsel %vm1370_vm3, %v1816_v7, %v15682_v48  ;;  %v15898_v1 = vrot.slane %v15855_v25, %v14977_v55 }
 0x45e   :  { %v2277_v38 = vrot.slane %v1376_v35, %v14977_v55  ;;  %v2956_v49 = vsel %vm2919_vm4, %v2867_v44, 0.0  ;;  %v1804_v44 = vsel %vm1336_vm0, %v15781_v58, %v1642_v34  ;;  %v15910_v48 = vrot.slane %v1381_v5, %v14977_v55 }
 0x45f   :  { %2930 = vadd.xlane.f32.xlu0 %v2929_v54  ;;  %2957 = vadd.xlane.f32.xlu1 %v2956_v49  ;;  %v15890_v16 = vrot.slane %v15860_v0, %v14977_v55  ;;  %v1820_v46 = vsel %vm1353_vm2, %v1804_v44, %v15577_v17  ;;  %v1817_v35 = vsel %vm1353_vm2, %v15759_v23, %v15708_v30  ;;  %v2974_v8 = vsel %vm2919_vm4, %v2873_v47, 0.0  ;;  %v15922_v7 = vpop.permute.xlu0 %1773 }
 0x460   :  { %v15867_v37 = vrot.slane %v2277_v38, %v14977_v55  ;;  %v1301_v19 = vpop.permute.xlu1 %1300  ;;  %v2278_v49 = vcombine.high %v2277_v38, %v2277_v38  ;;  %v2888_v34 = vmul.f32 %v2670_v21, %v15800_v31  ;;  %v1438_v59 = vcombine.high %v15660_v6, %v15660_v6 }
 0x461   :  { %v1377_v54 = vsel %vm1370_vm3, %v1360_v4, %v1301_v19  ;;  %v2682_v4 = vrot.slane %v15890_v16, %v14993_v63  ;;  %v1646_v38 = vrot.slane %v1483_v10, %v14993_v63  ;;  %v15933_v19 = vsel %vm1370_vm3, %v1817_v35, %v15708_v30 }
 0x462   :  { %v15879_v9 = vrot.slane %v1377_v54, %v14977_v55  ;;  %v2618_v12 = vrot.slane %v15867_v37, %v14993_v63  ;;  %v1437_v41 = vcombine.high %v15680_v15, %v15680_v15  ;;  %v1349_v5 = vsel %vm1336_vm0, %v15773_v29, %v15561_v45 }
 0x463   :  { %2951 = vadd.xlane.f32.xlu0 %v2950_v22  ;;  %2972 = vadd.xlane.f32.xlu1 %v2971_v53  ;;  %v15942_v54 = vsel %vm1370_vm3, %v1820_v46, %v15577_v17  ;;  %v1195_v6 = vrot.slane %v15898_v1, %v14993_v63  ;;  %v15949_v30 = vrot.slane %v15910_v48, %v14977_v55  ;;  %v3019_v15 = vsel %vm2919_vm4, %v2888_v34, 0.0 }
 0x464   :  { %v15904_v51 = vrot.slane %v15879_v9, %v14977_v55  ;;  %v2875_v20 = vmul.f32 %v2618_v12, %v15894_v3  ;;  %v15952_v47 = vrot.slane %v2278_v49, %v14977_v55  ;;  %v2594_v45 = vrot.slane %v2245_v42, %v14993_v63 }
 0x465   :  { %v2230_v17 = vcombine.high %v15787_v18, %v15787_v18  ;;  %v2891_v12 = vmul.f32 %v2682_v4, %v15942_v54  ;;  %v2674_v21 = vrot.slane %v2365_v50, %v14993_v63  ;;  %v15962_v44 = vrot.slane %v1438_v59, %v14977_v55 }
 0x466   :  { %v2980_v56 = vsel %vm2919_vm4, %v2875_v20, 0.0  ;;  %v2634_v23 = vrot.slane %v15904_v51, %v14993_v63  ;;  %v1805_v20 = vsel %vm1336_vm0, %v1483_v10, %v1646_v38  ;;  %v1366_v46 = vsel %vm1353_vm2, %v1349_v5, %v1195_v6 }
 0x467   :  { %2981 = vadd.xlane.f32.xlu0 %v2980_v56  ;;  %2975 = vadd.xlane.f32.xlu1 %v2974_v8  ;;  %v1821_v35 = vsel %vm1353_vm2, %v1805_v20, %v15590_v61  ;;  %v1383_v18 = vsel %vm1370_vm3, %v1366_v46, %v15833_v39  ;;  %v15970_v8 = vpop.permute.xlu0 %1775  ;;  %v1634_v42 = vrot.slane %v1437_v41, %v14993_v63  ;;  %v2941_v49 = vsel %vm2919_vm4, %v15555_v40, 0.0 }
 0x468   :  { %v2879_v22 = vmul.f32 %v2634_v23, %v15933_v19  ;;  %v2293_v56 = vcombine.high %v15867_v37, %v15867_v37  ;;  %v2302_v10 = vcombine.high %v15879_v9, %v15879_v9  ;;  %v2869_v34 = vmul.f32 %v2594_v45, %v15831_v28  ;;  %v15985_v23 = vpop.permute.xlu1 %1761 }
 0x469   :  { %v2622_v50 = vrot.slane %v15952_v47, %v14993_v63  ;;  %v15983_v39 = vrot.slane %v2230_v17, %v14977_v55  ;;  %v3028_v4 = vsel %vm2919_vm4, %v2891_v12, 0.0  ;;  %v2889_v40 = vmul.f32 %v2674_v21, %v15800_v31 }
 0x46a   :  { %v2992_v53 = vsel %vm2919_vm4, %v2879_v22, 0.0  ;;  %v2698_v37 = vrot.slane %v15949_v30, %v14993_v63  ;;  %v15993_v9 = vrot.slane %v15962_v44, %v14977_v55  ;;  %v882_v59 = vcombine.high %v15696_v62, %v15696_v62 }
 0x46b   :  { %3020 = vadd.xlane.f32.xlu1 %v3019_v15  ;;  %2993 = vadd.xlane.f32.xlu0 %v2992_v53  ;;  %v15999_v38 = vsel %vm1370_vm3, %v1821_v35, %v15590_v61  ;;  %v16002_v5 = vrot.slane %v1383_v18, %v14977_v55  ;;  %v666_v6 = vcombine.high %v15716_v24, %v15716_v24  ;;  %v2962_v15 = vsel %vm2919_vm4, %v2869_v34, 0.0  ;;  %v1311_v17 = vpop.permute.xlu0 %1310 }
 0x46c   :  { %v16007_v22 = vrot.slane %v2302_v10, %v14977_v55  ;;  %v2876_v45 = vmul.f32 %v2622_v50, %v15894_v3  ;;  %v2626_v62 = vrot.slane %v2293_v56, %v14993_v63  ;;  %v16013_v53 = vsel %vm1336_vm0, %v1437_v41, %v1634_v42 }
 0x46d   :  { %v3022_v61 = vsel %vm2919_vm4, %v2889_v40, 0.0  ;;  %v2895_v12 = vmul.f32 %v2698_v37, %v15999_v38  ;;  %v2590_v24 = vrot.slane %v15983_v39, %v14993_v63  ;;  %v683_v21 = vcombine.high %v15742_v14, %v15742_v14 }
 0x46e   :  { %v1654_v20 = vrot.slane %v15993_v9, %v14993_v63  ;;  %v1344_v46 = vsel %vm1336_vm0, %v666_v6, %v15808_v2  ;;  %v1175_v41 = vrot.slane %v882_v59, %v14993_v63  ;;  %v930_v35 = vcombine.high %v15769_v52, %v15769_v52 }
 0x46f   :  { %2942 = vadd.xlane.f32.xlu1 %v2941_v49  ;;  %3029 = vadd.xlane.f32.xlu0 %v3028_v4  ;;  %v714_v18 = vcombine.high %v15752_v32, %v15752_v32  ;;  %v2374_v42 = vcombine.high %v15860_v0, %v15860_v0  ;;  %v16034_v14 = vrot.slane %v16002_v5, %v14977_v55  ;;  %v1303_v49 = vpop.permute.xlu1 %1302  ;;  %v2983_v56 = vsel %vm2919_vm4, %v2876_v45, 0.0 }
 0x470   :  { %v2317_v2 = vcombine.high %v15904_v51, %v15904_v51  ;;  %v2877_v10 = vmul.f32 %v2626_v62, %v15894_v3  ;;  %v2638_v52 = vrot.slane %v16007_v22, %v14993_v63  ;;  %v899_v32 = vcombine.high %v15855_v25, %v15855_v25 }
 0x471   :  { %v1361_v0 = vsel %vm1353_vm2, %v1344_v46, %v1175_v41  ;;  %v3040_v34 = vsel %vm2919_vm4, %v2895_v12, 0.0  ;;  %v2868_v50 = vmul.f32 %v2590_v24, %v15831_v28  ;;  %v1807_v51 = vsel %vm1336_vm0, %v15993_v9, %v1654_v20 }
 0x472   :  { %v1348_v4 = vsel %vm1336_vm0, %v714_v18, %v15632_v33  ;;  %v16052_v40 = vrot.slane %v683_v21, %v14977_v55  ;;  %v1378_v37 = vsel %vm1370_vm3, %v1361_v0, %v1303_v49  ;;  %v1823_v25 = vsel %vm1353_vm2, %v1807_v51, %v15615_v43 }
 0x473   :  { %2963 = vadd.xlane.f32.xlu1 %v2962_v15  ;;  %3023 = vadd.xlane.f32.xlu0 %v3022_v61  ;;  %v16058_v59 = vrot.slane %v2374_v42, %v14977_v55  ;;  %v1191_v6 = vrot.slane %v930_v35, %v14993_v63  ;;  %v16061_v15 = vpop.permute.xlu0 %1126  ;;  %v2270_v45 = vcombine.high %v15784_v11, %v15784_v11  ;;  %v2986_v33 = vsel %vm2919_vm4, %v2877_v10, 0.0 }
 0x474   :  { %v2880_v62 = vmul.f32 %v2638_v52, %v15933_v19  ;;  %v2642_v61 = vrot.slane %v2317_v2, %v14993_v63  ;;  %v2730_v12 = vrot.slane %v16034_v14, %v14993_v63  ;;  %v16071_v24 = vrot.slane %v899_v32, %v14977_v55 }
 0x475   :  { %v1365_v21 = vsel %vm1353_vm2, %v1348_v4, %v1191_v6  ;;  %v16075_v20 = vrot.slane %v1378_v37, %v14977_v55  ;;  %v2959_v11 = vsel %vm2919_vm4, %v2868_v50, 0.0  ;;  %v929_v46 = vcombine.high %v15898_v1, %v15898_v1 }
 0x476   :  { %v16082_v41 = vsel %vm1370_vm3, %v1823_v25, %v15615_v43  ;;  %v1485_v35 = vcombine.high %v15781_v58, %v15781_v58  ;;  %v1382_v18 = vsel %vm1370_vm3, %v1365_v21, %v1311_v17  ;;  %v2389_v42 = vcombine.high %v15890_v16, %v15890_v16 }
 0x477   :  { %2984 = vadd.xlane.f32.xlu1 %v2983_v56  ;;  %3041 = vadd.xlane.f32.xlu0 %v3040_v34  ;;  %v2398_v49 = vcombine.high %v15910_v48, %v15910_v48  ;;  %v1350_v1 = vsel %vm1336_vm0, %v16052_v40, %v15726_v27  ;;  %v2686_v43 = vrot.slane %v16058_v59, %v14993_v63  ;;  %v2995_v2 = vsel %vm2919_vm4, %v2880_v62, 0.0  ;;  %v1315_v10 = vpop.permute.xlu0 %1314 }
 0x478   :  { %v2881_v58 = vmul.f32 %v2642_v61, %v15933_v19  ;;  %v2903_v17 = vmul.f32 %v2730_v12, %v16082_v41  ;;  %v2614_v56 = vrot.slane %v2270_v45, %v14993_v63  ;;  %v16101_v16 = vrot.slane %v1382_v18, %v14977_v55 }
 0x479   :  { %v1199_v48 = vrot.slane %v16071_v24, %v14993_v63  ;;  %v16107_v27 = vrot.slane %v16075_v20, %v14977_v55  ;;  %v2953_v52 = vsel %vm2919_vm4, %v15636_v36, 0.0  ;;  %v1454_v32 = vcombine.high %v15962_v44, %v15962_v44 }
 0x47a   :  { %v713_v0 = vcombine.high %v15773_v29, %v15773_v29  ;;  %v1650_v34 = vrot.slane %v1485_v35, %v14993_v63  ;;  %v1203_v50 = vrot.slane %v929_v46, %v14993_v63  ;;  %v16118_v51 = vrot.slane %v2398_v49, %v14977_v55 }
 0x47b   :  { %2987 = vadd.xlane.f32.xlu1 %v2986_v33  ;;  %2960 = vadd.xlane.f32.xlu0 %v2959_v11  ;;  %v1367_v4 = vsel %vm1353_vm2, %v1350_v1, %v1199_v48  ;;  %v2892_v37 = vmul.f32 %v2686_v43, %v15942_v54  ;;  %v2690_v36 = vrot.slane %v2389_v42, %v14993_v63  ;;  %v2998_v25 = vsel %vm2919_vm4, %v2881_v58, 0.0  ;;  %v1317_v21 = vpop.permute.xlu0 %1316 }
 0x47c   :  { %v1351_v44 = vsel %vm1336_vm0, %v713_v0, %v15777_v57  ;;  %v3064_v29 = vsel %vm2919_vm4, %v2903_v17, 0.0  ;;  %v2874_v6 = vmul.f32 %v2614_v56, %v15664_v60  ;;  %v16130_v45 = vrot.slane %v16101_v16, %v14977_v55 }
 0x47d   :  { %v1818_v33 = vsel %vm1353_vm2, %v16013_v53, %v15985_v23  ;;  %v1384_v62 = vsel %vm1370_vm3, %v1367_v4, %v1315_v10  ;;  %v2650_v57 = vrot.slane %v16107_v27, %v14993_v63  ;;  %v16139_v61 = vrot.slane %v1454_v32, %v14977_v55 }
 0x47e   :  { %v1806_v12 = vsel %vm1336_vm0, %v1485_v35, %v1650_v34  ;;  %v1368_v60 = vsel %vm1353_vm2, %v1351_v44, %v1203_v50  ;;  %v3031_v11 = vsel %vm2919_vm4, %v2892_v37, 0.0  ;;  %v2893_v46 = vmul.f32 %v2690_v36, %v15942_v54 }
 0x47f   :  { %2996 = vadd.xlane.f32.xlu1 %v2995_v2  ;;  %2954 = vadd.xlane.f32.xlu0 %v2953_v52  ;;  %v2702_v53 = vrot.slane %v16118_v51, %v14993_v63  ;;  %v16149_v18 = vsel %vm1370_vm3, %v1818_v33, %v15985_v23  ;;  %v16152_v42 = vrot.slane %v1384_v62, %v14977_v55  ;;  %v2977_v35 = vsel %vm2919_vm4, %v2874_v6, 0.0 }
 0x480   :  { %v2366_v49 = vcombine.high %v15849_v13, %v15849_v13  ;;  %v1822_v1 = vsel %vm1353_vm2, %v1806_v12, %v15873_v26  ;;  %v2883_v43 = vmul.f32 %v2650_v57, %v16149_v18  ;;  %v2714_v2 = vrot.slane %v16130_v45, %v14993_v63 }
 0x481   :  { %v2246_v23 = vcombine.high %v15983_v39, %v15983_v39  ;;  %v1658_v58 = vrot.slane %v16139_v61, %v14993_v63  ;;  %v1385_v17 = vsel %vm1370_vm3, %v1368_v60, %v1317_v21  ;;  %v2413_v13 = vcombine.high %v15949_v30, %v15949_v30 }
 0x482   :  { %v2446_v56 = vcombine.high %v16002_v5, %v16002_v5  ;;  %v1484_v48 = vcombine.high %v15993_v9, %v15993_v9  ;;  %v2896_v10 = vmul.f32 %v2702_v53, %v15999_v38  ;;  %v16176_v39 = vsel %vm1370_vm3, %v1822_v1, %v15873_v26 }
 0x483   :  { %2999 = vadd.xlane.f32.xlu1 %v2998_v25  ;;  %3065 = vadd.xlane.f32.xlu0 %v3064_v29  ;;  %v16180_v52 = vrot.slane %v16152_v42, %v14977_v55  ;;  %v3034_v32 = vsel %vm2919_vm4, %v2893_v46, 0.0  ;;  %v2678_v30 = vrot.slane %v2366_v49, %v14993_v63  ;;  %v16185_v0 = vrot.slane %v1385_v17, %v14977_v55 }
 0x484   :  { %v3004_v9 = vsel %vm2919_vm4, %v2883_v43, 0.0  ;;  %v2899_v5 = vmul.f32 %v2714_v2, %v16176_v39  ;;  %v2598_v34 = vrot.slane %v2246_v23, %v14993_v63  ;;  %v16191_v26 = vrot.slane %v2446_v56, %v14977_v55  ;;  %v16240_v23 = vpop.permute.xlu0 %1777 }
 0x485   :  { %v1808_v50 = vsel %vm1336_vm0, %v16139_v61, %v1658_v58  ;;  %v1662_v4 = vrot.slane %v1484_v48, %v14993_v63  ;;  %v2706_v37 = vrot.slane %v2413_v13, %v14993_v63  ;;  %v3043_v44 = vsel %vm2919_vm4, %v2896_v10, 0.0 }
 0x486   :  { %v1824_v36 = vsel %vm1353_vm2, %v1808_v50, %v15922_v7  ;;  %v2890_v25 = vmul.f32 %v2678_v30, %v15800_v31  ;;  %v16203_v29 = vrot.slane %v16185_v0, %v14977_v55  ;;  %v3052_v6 = vsel %vm2919_vm4, %v2899_v5, 0.0 }
 0x487   :  { %3032 = vadd.xlane.f32.xlu1 %v3031_v11  ;;  %2978 = vadd.xlane.f32.xlu0 %v2977_v35  ;;  %v2870_v33 = vmul.f32 %v2598_v34, %v15831_v28  ;;  %v2746_v62 = vrot.slane %v16180_v52, %v14993_v63  ;;  %v2461_v57 = vcombine.high %v16034_v14, %v16034_v14 }
 0x488   :  { %v1809_v12 = vsel %vm1336_vm0, %v1484_v48, %v1662_v4  ;;  %v2897_v31 = vmul.f32 %v2706_v37, %v15999_v38  ;;  %v2734_v60 = vrot.slane %v16191_v26, %v14993_v63  ;;  %v16217_v21 = vsel %vm1370_vm3, %v1824_v36, %v15922_v7  ;;  %v1319_v34 = vpop.permute.xlu0 %1318 }
 0x489   :  { %v1825_v28 = vsel %vm1353_vm2, %v1809_v12, %v15970_v8  ;;  %v2326_v11 = vcombine.high %v16075_v20, %v16075_v20  ;;  %v3025_v46 = vsel %vm2919_vm4, %v2890_v25, 0.0  ;;  %v2965_v14 = vsel %vm2919_vm4, %v2870_v33, 0.0 }
 0x48a   :  { %v2907_v53 = vmul.f32 %v2746_v62, %v16217_v21  ;;  %v2762_v35 = vrot.slane %v16203_v29, %v14993_v63  ;;  %v2294_v7 = vcombine.high %v15952_v47, %v15952_v47  ;;  %v3046_v49 = vsel %vm2919_vm4, %v2897_v31, 0.0 }
 0x48b   :  { %3035 = vadd.xlane.f32.xlu1 %v3034_v32  ;;  %3005 = vadd.xlane.f32.xlu0 %v3004_v9  ;;  %v16233_v1 = vsel %vm1370_vm3, %v1825_v28, %v15970_v8  ;;  %v16236_v20 = vrot.slane %v2326_v11, %v14977_v55  ;;  %v2904_v43 = vmul.f32 %v2734_v60, %v16082_v41 }
 0x48c   :  { %v2738_v2 = vrot.slane %v2461_v57, %v14993_v63  ;;  %v3076_v58 = vsel %vm2919_vm4, %v2907_v53, 0.0  ;;  %v2911_v47 = vmul.f32 %v2762_v35, %v16233_v1  ;;  %v2630_v17 = vrot.slane %v2294_v7, %v14993_v63 }
 0x48d   :  { %v2318_v8 = vcombine.high %v16007_v22, %v16007_v22  ;;  %v2422_v13 = vcombine.high %v16101_v16, %v16101_v16  ;;  %v715_v56 = vcombine.high %v16052_v40, %v16052_v40  ;;  %v931_v48 = vcombine.high %v16071_v24, %v16071_v24 }
 0x48e   :  { %v2341_v10 = vcombine.high %v16107_v27, %v16107_v27  ;;  %v3067_v32 = vsel %vm2919_vm4, %v2904_v43, 0.0  ;;  %v2905_v30 = vmul.f32 %v2738_v2, %v16082_v41  ;;  %v2654_v22 = vrot.slane %v16236_v20, %v14993_v63 }
 0x48f   :  { %3044 = vadd.xlane.f32.xlu1 %v3043_v44  ;;  %3053 = vadd.xlane.f32.xlu0 %v3052_v6  ;;  %v3088_v9 = vsel %vm2919_vm4, %v2911_v47, 0.0  ;;  %v2878_v16 = vmul.f32 %v2630_v17, %v15894_v3  ;;  %v2646_v40 = vrot.slane %v2318_v8, %v14993_v63  ;;  %v2390_v24 = vcombine.high %v16058_v59, %v16058_v59 }
 0x490   :  { %v1352_v27 = vsel %vm1336_vm0, %v715_v56, %v16061_v15  ;;  %v1207_v5 = vrot.slane %v931_v48, %v14993_v63  ;;  %v2414_v50 = vcombine.high %v16118_v51, %v16118_v51  ;;  %v16270_v4 = vrot.slane %v2422_v13, %v14977_v55 }
 0x491   :  { %v3070_v3 = vsel %vm2919_vm4, %v2905_v30, 0.0  ;;  %v2884_v37 = vmul.f32 %v2654_v22, %v16149_v18  ;;  %v2658_v36 = vrot.slane %v2341_v10, %v14993_v63  ;;  %v2989_v15 = vsel %vm2919_vm4, %v2878_v16, 0.0 }
 0x492   :  { %v1369_v59 = vsel %vm1353_vm2, %v1352_v27, %v1207_v5  ;;  %v2882_v44 = vmul.f32 %v2646_v40, %v15933_v19  ;;  %v2694_v25 = vrot.slane %v2390_v24, %v14993_v63  ;;  %v2437_v6 = vcombine.high %v16130_v45, %v16130_v45 }
 0x493   :  { %3026 = vadd.xlane.f32.xlu1 %v3025_v46  ;;  %2966 = vadd.xlane.f32.xlu0 %v2965_v14  ;;  %v1386_v51 = vsel %vm1370_vm3, %v1369_v59, %v1319_v34  ;;  %v1486_v33 = vcombine.high %v16139_v61, %v16139_v61  ;;  %v2710_v62 = vrot.slane %v2414_v50, %v14993_v63  ;;  %v3007_v12 = vsel %vm2919_vm4, %v2884_v37, 0.0 }
 0x494   :  { %v2470_v57 = vcombine.high %v16152_v42, %v16152_v42  ;;  %v2885_v19 = vmul.f32 %v2658_v36, %v16149_v18  ;;  %v2718_v31 = vrot.slane %v16270_v4, %v14993_v63  ;;  %v2517_v60 = vrot.slane %v1386_v51, %v14977_v55 }
 0x495   :  { %v3001_v45 = vsel %vm2919_vm4, %v2882_v44, 0.0  ;;  %v2894_v28 = vmul.f32 %v2694_v25, %v15942_v54  ;;  %v2462_v61 = vcombine.high %v16191_v26, %v16191_v26  ;;  %v1666_v42 = vrot.slane %v1486_v33, %v14993_v63 }
 0x496   :  { %v2484_v11 = vrot.slane %v2470_v57, %v14977_v55  ;;  %v3010_v46 = vsel %vm2919_vm4, %v2885_v19, 0.0  ;;  %v2900_v14 = vmul.f32 %v2718_v31, %v16176_v39  ;;  %v2722_v53 = vrot.slane %v2437_v6, %v14993_v63 }
 0x497   :  { %3047 = vadd.xlane.f32.xlu1 %v3046_v49  ;;  %3077 = vadd.xlane.f32.xlu0 %v3076_v58  ;;  %v16302_v35 = vrot.slane %v2517_v60, %v14977_v55  ;;  %v3037_v54 = vsel %vm2919_vm4, %v2894_v28, 0.0  ;;  %v2898_v7 = vmul.f32 %v2710_v62, %v15999_v38  ;;  %v2742_v26 = vrot.slane %v2462_v61, %v14993_v63 }
 0x498   :  { %v2485_v49 = vcombine.high %v16180_v52, %v16180_v52  ;;  %v2494_v43 = vcombine.high %v16185_v0, %v16185_v0  ;;  %v1810_v2 = vsel %vm1336_vm0, %v1486_v33, %v1666_v42  ;;  %v3055_v47 = vsel %vm2919_vm4, %v2900_v14, 0.0 }
 0x499   :  { %v1826_v58 = vsel %vm1353_vm2, %v1810_v2, %v16240_v23  ;;  %v2901_v17 = vmul.f32 %v2722_v53, %v16176_v39  ;;  %v2750_v38 = vrot.slane %v2484_v11, %v14993_v63  ;;  %v3049_v8 = vsel %vm2919_vm4, %v2898_v7, 0.0 }
 0x49a   :  { %v2906_v13 = vmul.f32 %v2742_v26, %v16082_v41  ;;  %v2778_v52 = vrot.slane %v16302_v35, %v14993_v63  ;;  %v2342_v0 = vcombine.high %v16236_v20, %v16236_v20  ;;  %v2508_v56 = vrot.slane %v2494_v43, %v14977_v55 }
 0x49b   :  { %3068 = vadd.xlane.f32.xlu1 %v3067_v32  ;;  %3089 = vadd.xlane.f32.xlu0 %v3088_v9  ;;  %v1842_v48 = vsel %vm1370_vm3, %v1826_v58, %v16240_v23  ;;  %v3058_v10 = vsel %vm2919_vm4, %v2901_v17, 0.0  ;;  %v2908_v32 = vmul.f32 %v2750_v38, %v16217_v21  ;;  %v2754_v30 = vrot.slane %v2485_v49, %v14993_v63 }
 0x49c   :  { %v3073_v41 = vsel %vm2919_vm4, %v2906_v13, 0.0  ;;  %v2915_v22 = vmul.f32 %v2778_v52, %v1842_v48  ;;  %v2662_v9 = vrot.slane %v2342_v0, %v14993_v63  ;;  %v2438_v20 = vcombine.high %v16270_v4, %v16270_v4  ;;  %v21220_v52 = vld [vmem:[#allocation20_spill] sm:$0xff] }
 0x49d   :  { %v2509_v16 = vcombine.high %v16203_v29, %v16203_v29  ;;  %v2518_v23 = vcombine.high %v2517_v60, %v2517_v60  ;;  %v3079_v40 = vsel %vm2919_vm4, %v2908_v32, 0.0  ;;  %v2909_v24 = vmul.f32 %v2754_v30, %v16217_v21 }
 0x49e   :  { %v2766_v27 = vrot.slane %v2508_v56, %v14993_v63  ;;  %v3100_v5 = vsel %vm2919_vm4, %v2915_v22, 0.0  ;;  %v2886_v34 = vmul.f32 %v2662_v9, %v16149_v18  ;;  %v2726_v50 = vrot.slane %v2438_v20, %v14993_v63 }
 0x49f   :  { %3071 = vadd.xlane.f32.xlu1 %v3070_v3  ;;  %2990 = vadd.xlane.f32.xlu0 %v2989_v15  ;;  %v2486_v3 = vcombine.high %v2484_v11, %v2484_v11  ;;  %v2532_v4 = vrot.slane %v2518_v23, %v14977_v55  ;;  %v3082_v29 = vsel %vm2919_vm4, %v2909_v24, 0.0  ;;  %v2770_v36 = vrot.slane %v2509_v16, %v14993_v63 }
 0x4a0   :  { %v2912_v37 = vmul.f32 %v2766_v27, %v16233_v1  ;;  %v3013_v59 = vsel %vm2919_vm4, %v2886_v34, 0.0  ;;  %v2902_v15 = vmul.f32 %v2726_v50, %v16176_v39  ;;  %v2510_v18 = vcombine.high %v2508_v56, %v2508_v56 }
 0x4a1   :  { %v2758_v44 = vrot.slane %v2486_v3, %v14993_v63  ;;  %v2533_v25 = vcombine.high %v16302_v35, %v16302_v35  ;;  %v2913_v6 = vmul.f32 %v2770_v36, %v16233_v1  ;;  %v2782_v33 = vrot.slane %v2532_v4, %v14993_v63 }
 0x4a2   :  { %v3091_v51 = vsel %vm2919_vm4, %v2912_v37, 0.0  ;;  %v3061_v62 = vsel %vm2919_vm4, %v2902_v15, 0.0  ;;  %v2774_v39 = vrot.slane %v2510_v18, %v14993_v63  ;;  %v2534_v60 = vcombine.high %v2532_v4, %v2532_v4 }
 0x4a3   :  { %3008 = vadd.xlane.f32.xlu1 %v3007_v12  ;;  %3002 = vadd.xlane.f32.xlu0 %v3001_v45  ;;  %v2910_v57 = vmul.f32 %v2758_v44, %v16217_v21  ;;  %v3094_v12 = vsel %vm2919_vm4, %v2913_v6, 0.0  ;;  %v2916_v19 = vmul.f32 %v2782_v33, %v1842_v48  ;;  %v2786_v31 = vrot.slane %v2533_v25, %v14993_v63 }
 0x4a4   :  { %v2914_v28 = vmul.f32 %v2774_v39, %v16233_v1  ;;  %v2790_v21 = vrot.slane %v2534_v60, %v14993_v63  ;;  %v21219_v58 = vlaneseq }
 0x4a5   :  { %v3085_v45 = vsel %vm2919_vm4, %v2910_v57, 0.0  ;;  %v3103_v61 = vsel %vm2919_vm4, %v2916_v19, 0.0  ;;  %v2917_v42 = vmul.f32 %v2786_v31, %v1842_v48 }
 0x4a6   :  { %v3097_v11 = vsel %vm2919_vm4, %v2914_v28, 0.0  ;;  %v2918_v14 = vmul.f32 %v2790_v21, %v1842_v48 }
 0x4a7   :  { %3011 = vadd.xlane.f32.xlu1 %v3010_v46  ;;  %3038 = vadd.xlane.f32.xlu0 %v3037_v54  ;;  %v3106_v46 = vsel %vm2919_vm4, %v2917_v42, 0.0 }
 0x4a8   :  { %v3109_v53 = vsel %vm2919_vm4, %v2918_v14, 0.0 }
 0x4ab   :  { %3056 = vadd.xlane.f32.xlu1 %v3055_v47  ;;  %3050 = vadd.xlane.f32.xlu0 %v3049_v8  ;;  %v3241_v47 = vand.u32 127, %v21219_v58 }
 0x4ad   :  { %v2922_v1 = vpop.xlane.xlu1 %2921  ;;  %v16375_v0 = vsub.s32 %v3241_v47, %v21220_v52 }
 0x4ae   :  { %v2925_v35 = vpop.xlane.xlu0 %2924  ;;  %v16377_v56 = vmul.f32 0.125, %v2922_v1 }
 0x4af   :  { %3059 = vadd.xlane.f32.xlu1 %v3058_v10  ;;  %3074 = vadd.xlane.f32.xlu0 %v3073_v41  ;;  %v16368_v17 = vmul.f32 0.125, %v2925_v35  ;;  %21221 = vst [vmem:[#allocation20_spill] sm:$0xff] %v16375_v0 }
 0x4b0   :  { %v3245_v41 = vrot.slane %v16377_v56, %v16375_v0 }
 0x4b1   :  { %v2937_v26 = vpop.xlane.xlu1 %2936  ;;  %v3249_v48 = vrot.slane %v16368_v17, %v16375_v0 }
 0x4b2   :  { %v2934_v54 = vpop.xlane.xlu0 %2933  ;;  %v16399_v3 = vmul.f32 0.125, %v2937_v26 }
 0x4b3   :  { %3080 = vadd.xlane.f32.xlu1 %v3079_v40  ;;  %3101 = vadd.xlane.f32.xlu0 %v3100_v5  ;;  %v3499_v20 = vsel %vm3498_vm5, %v3249_v48, %v3245_v41  ;;  %v16397_v50 = vmul.f32 0.125, %v2934_v54 }
 0x4b5   :  { %v2940_v43 = vpop.xlane.xlu1 %2939  ;;  %v3261_v37 = vrot.slane %v16397_v50, %v16375_v0 }
 0x4b6   :  { %v2928_v7 = vpop.xlane.xlu0 %2927  ;;  %v16401_v4 = vmul.f32 0.125, %v2940_v43 }
 0x4b7   :  { %3083 = vadd.xlane.f32.xlu1 %v3082_v29  ;;  %3014 = vadd.xlane.f32.xlu0 %v3013_v59  ;;  %v16370_v38 = vmul.f32 0.125, %v2928_v7  ;;  %v3265_v59 = vrot.slane %v16399_v3, %v16375_v0 }
 0x4b8   :  { %v3269_v15 = vrot.slane %v16401_v4, %v16375_v0 }
 0x4b9   :  { %v3253_v10 = vrot.slane %v16370_v38, %v16375_v0 }
 0x4bb   :  { %3092 = vadd.xlane.f32.xlu1 %v3091_v51  ;;  %3062 = vadd.xlane.f32.xlu0 %v3061_v62  ;;  %v3501_v40 = vsel %vm3500_vm7, %v3253_v10, %v3499_v20  ;;  %v3504_v51 = vsel %vm3498_vm5, %v3265_v59, %v3261_v37 }
 0x4bc   :  { %v3505_v62 = vsel %vm3500_vm7, %v3269_v15, %v3504_v51 }
 0x4bf   :  { %3095 = vadd.xlane.f32.xlu1 %v3094_v12  ;;  %3086 = vadd.xlane.f32.xlu0 %v3085_v45 }
 0x4c3   :  { %3104 = vadd.xlane.f32.xlu1 %v3103_v61  ;;  %3098 = vadd.xlane.f32.xlu0 %v3097_v11 }
 0x4c4   :  { %v2946_v49 = vpop.xlane.xlu0 %2945 }
 0x4c5   :  { %v16431_v42 = vmul.f32 0.125, %v2946_v49 }
 0x4c6   :  { %v2949_v8 = vpop.xlane.xlu1 %2948 }
 0x4c7   :  { %3107 = vadd.xlane.f32.xlu1 %v3106_v46  ;;  %v16425_v60 = vmul.f32 0.125, %v2949_v8 }
 0x4c9   :  { %v3281_v21 = vrot.slane %v16425_v60, %v16375_v0 }
 0x4cb   :  { %3110 = vadd.xlane.f32.xlu1 %v3109_v53  ;;  %v3277_v53 = vrot.slane %v16431_v42, %v16375_v0 }
 0x4cd   :  { %v3507_v26 = vsel %vm3498_vm5, %v3281_v21, %v3277_v53 }
 0x4d0   :  { %v16365_v2 = vpop.xlane.xlu0 %2969 }
 0x4d1   :  { %v16456_v47 = vmul.f32 0.125, %v16365_v2 }
 0x4d3   :  { %v3309_v20 = vrot.slane %v16456_v47, %v16375_v0 }
 0x4e4   :  { %v16372_v13 = vpop.xlane.xlu0 %3017 }
 0x4e8   :  { %v16383_v32 = vpop.xlane.xlu1 %2957  ;;  %v2931_v30 = vpop.xlane.xlu0 %2930 }
 0x4e9   :  { %v16387_v22 = vmul.f32 0.125, %v2931_v30 }
 0x4eb   :  { %v3257_v9 = vrot.slane %v16387_v22, %v16375_v0 }
 0x4ec   :  { %v2973_v16 = vpop.xlane.xlu1 %2972  ;;  %v2952_v23 = vpop.xlane.xlu0 %2951 }
 0x4ed   :  { %v3503_v24 = vsel %vm3502_vm6, %v3257_v9, %v3501_v40  ;;  %v16429_v28 = vmul.f32 0.125, %v2952_v23  ;;  %v16443_v54 = vmul.f32 0.125, %v2973_v16 }
 0x4ee   :  { %v3566_v27 = vsel %vm3565_vm8, %v3503_v24, -inf }
 0x4ef   :  { %3567 = vmax.xlane.f32.xlu0 %v3566_v27  ;;  %v3285_v46 = vrot.slane %v16429_v28, %v16375_v0  ;;  %v3313_v10 = vrot.slane %v16443_v54, %v16375_v0 }
 0x4f0   :  { %v2976_v5 = vpop.xlane.xlu1 %2975  ;;  %v16395_v34 = vpop.xlane.xlu0 %2981 }
 0x4f1   :  { %v16450_v49 = vmul.f32 0.125, %v2976_v5  ;;  %v3508_v58 = vsel %vm3500_vm7, %v3285_v46, %v3507_v26  ;;  %v3513_v40 = vsel %vm3498_vm5, %v3313_v10, %v3309_v20 }
 0x4f3   :  { %v3317_v41 = vrot.slane %v16450_v49, %v16375_v0 }
 0x4f4   :  { %v3021_v29 = vpop.xlane.xlu1 %3020  ;;  %v16405_v36 = vpop.xlane.xlu0 %2993 }
 0x4f5   :  { %v3514_v27 = vsel %vm3500_vm7, %v3317_v41, %v3513_v40  ;;  %v16475_v37 = vmul.f32 0.125, %v3021_v29 }
 0x4f7   :  { %v3377_v29 = vrot.slane %v16475_v37, %v16375_v0 }
 0x4f8   :  { %v2943_v44 = vpop.xlane.xlu1 %2942  ;;  %v16413_v25 = vpop.xlane.xlu0 %3029 }
 0x4f9   :  { %v16411_v18 = vmul.f32 0.125, %v2943_v44 }
 0x4fb   :  { %v3273_v6 = vrot.slane %v16411_v18, %v16375_v0 }
 0x4fc   :  { %v2964_v33 = vpop.xlane.xlu1 %2963  ;;  %v3024_v57 = vpop.xlane.xlu0 %3023 }
 0x4fd   :  { %v3506_v39 = vsel %vm3502_vm6, %v3273_v6, %v3505_v62  ;;  %v16480_v44 = vmul.f32 0.125, %v3024_v57  ;;  %v16483_v6 = vmul.f32 0.125, %v16372_v13  ;;  %v16486_v62 = vmul.f32 0.125, %v16383_v32 }
 0x4fe   :  { %v3569_v12 = vsel %vm3565_vm8, %v3506_v39, -inf }
 0x4ff   :  { %3570 = vmax.xlane.f32.xlu1 %v3569_v12  ;;  %v3381_v57 = vrot.slane %v16480_v44, %v16375_v0  ;;  %v3373_v13 = vrot.slane %v16483_v6, %v16375_v0  ;;  %v3293_v32 = vrot.slane %v16486_v62, %v16375_v0 }
 0x500   :  { %v16421_v19 = vpop.xlane.xlu1 %2984  ;;  %v16423_v31 = vpop.xlane.xlu0 %3041 }
 0x504   :  { %v16427_v45 = vpop.xlane.xlu1 %2987  ;;  %v2961_v61 = vpop.xlane.xlu0 %2960 }
 0x505   :  { %v16477_v59 = vmul.f32 0.125, %v2961_v61  ;;  %v16494_v61 = vmul.f32 0.125, %v2964_v33  ;;  %v3525_v33 = vsel %vm3498_vm5, %v3377_v29, %v3373_v13 }
 0x506   :  { %v3526_v10 = vsel %vm3500_vm7, %v3381_v57, %v3525_v33 }
 0x507   :  { %v3297_v12 = vrot.slane %v16477_v59, %v16375_v0 }
 0x508   :  { %v16435_v11 = vpop.xlane.xlu1 %2996  ;;  %v2955_v14 = vpop.xlane.xlu0 %2954 }
 0x509   :  { %v16441_v35 = vmul.f32 0.125, %v2955_v14  ;;  %v3510_v26 = vsel %vm3498_vm5, %v3297_v12, %v3293_v32  ;;  %v16530_v12 = vmul.f32 0.125, %v16395_v34  ;;  %v16536_v13 = vmul.f32 0.125, %v16435_v11 }
 0x50b   :  { %v3289_v1 = vrot.slane %v16441_v35, %v16375_v0  ;;  %v3325_v34 = vrot.slane %v16530_v12, %v16375_v0  ;;  %v3345_v11 = vrot.slane %v16536_v13, %v16375_v0 }
 0x50c   :  { %v16447_v7 = vpop.xlane.xlu1 %2999  ;;  %v16452_v43 = vpop.xlane.xlu0 %3065 }
 0x50d   :  { %v3509_v8 = vsel %vm3502_vm6, %v3289_v1, %v3508_v58  ;;  %v3301_v58 = vrot.slane %v16494_v61, %v16375_v0 }
 0x50e   :  { %v3572_v48 = vsel %vm3565_vm8, %v3509_v8, -inf }
 0x50f   :  { %3573 = vmax.xlane.f32.xlu0 %v3572_v48 }
 0x510   :  { %v3033_v30 = vpop.xlane.xlu1 %3032  ;;  %v2979_v9 = vpop.xlane.xlu0 %2978 }
 0x511   :  { %v16466_v16 = vmul.f32 0.125, %v2979_v9 }
 0x513   :  { %v3321_v2 = vrot.slane %v16466_v16, %v16375_v0 }
 0x514   :  { %v3036_v23 = vpop.xlane.xlu1 %3035  ;;  %v16471_v24 = vpop.xlane.xlu0 %3005 }
 0x515   :  { %v3515_v5 = vsel %vm3502_vm6, %v3321_v2, %v3514_v27  ;;  %v3511_v2 = vsel %vm3500_vm7, %v3301_v58, %v3510_v26  ;;  %v16522_v27 = vmul.f32 0.125, %v16421_v19  ;;  %v16552_v26 = vmul.f32 0.125, %v3033_v30 }
 0x516   :  { %v3578_v15 = vsel %vm3565_vm8, %v3515_v5, -inf  ;;  %v16565_v30 = vmul.f32 0.125, %v16413_v25 }
 0x517   :  { %3579 = vmax.xlane.f32.xlu0 %v3578_v15  ;;  %v16525_v15 = vmul.f32 0.125, %v16427_v45  ;;  %v16541_v45 = vmul.f32 0.125, %v16447_v7  ;;  %21222 = vst [vmem:[#allocation51_spill] sm:$0xff] %v16552_v26 }
 0x518   :  { %v3045_v51 = vpop.xlane.xlu1 %3044  ;;  %v16488_v39 = vpop.xlane.xlu0 %3053 }
 0x519   :  { %v3333_v32 = vrot.slane %v16525_v15, %v16375_v0 }
 0x51c   :  { %v3027_v21 = vpop.xlane.xlu1 %3026  ;;  %v2967_v14 = vpop.xlane.xlu0 %2966 }
 0x51d   :  { %v16502_v46 = vmul.f32 0.125, %v3027_v21  ;;  %v16504_v53 = vmul.f32 0.125, %v2967_v14  ;;  %v3329_v21 = vrot.slane %v16522_v27, %v16375_v0 }
 0x51f   :  { %v3385_v1 = vrot.slane %v16502_v46, %v16375_v0  ;;  %v3305_v8 = vrot.slane %v16504_v53, %v16375_v0  ;;  %v3516_v7 = vsel %vm3498_vm5, %v3329_v21, %v3325_v34 }
 0x520   :  { %v3048_v48 = vpop.xlane.xlu1 %3047  ;;  %v16515_v41 = vpop.xlane.xlu0 %3077 }
 0x521   :  { %v3527_v9 = vsel %vm3502_vm6, %v3385_v1, %v3526_v10  ;;  %v3512_v40 = vsel %vm3502_vm6, %v3305_v8, %v3511_v2  ;;  %v16546_v1 = vmul.f32 0.125, %v16405_v36  ;;  %v3349_v10 = vrot.slane %v16541_v45, %v16375_v0 }
 0x522   :  { %v3590_v20 = vsel %vm3565_vm8, %v3527_v9, -inf  ;;  %v3575_v57 = vsel %vm3565_vm8, %v3512_v40, -inf  ;;  %v16559_v9 = vmul.f32 0.125, %v3036_v23  ;;  %v16573_v23 = vmul.f32 0.125, %v3045_v51 }
 0x523   :  { %3591 = vmax.xlane.f32.xlu0 %v3590_v20  ;;  %v3517_v20 = vsel %vm3500_vm7, %v3333_v32, %v3516_v7  ;;  %v3341_v2 = vrot.slane %v16546_v1, %v16375_v0  ;;  %v16586_v51 = vmul.f32 0.125, %v16423_v31 }
 0x524   :  { %v3069_v5 = vpop.xlane.xlu1 %3068  ;;  %v16527_v29 = vpop.xlane.xlu0 %3089  ;;  %21223 = vst [vmem:[#allocation52_spill] sm:$0xff] %v16559_v9  ;;  %21224 = vst [vmem:[#allocation53_spill] sm:$0xff] %v16573_v23  ;;  %v3397_v25 = vrot.slane %v16559_v9, %v16375_v0 }
 0x525   :  { %v3519_v7 = vsel %vm3498_vm5, %v3345_v11, %v3341_v2  ;;  %v3409_v2 = vrot.slane %v16573_v23, %v16375_v0 }
 0x527   :  { %3576 = vmax.xlane.f32.xlu0 %v3575_v57 }
 0x528   :  { %v3072_v19 = vpop.xlane.xlu1 %3071  ;;  %v2991_v14 = vpop.xlane.xlu0 %2990 }
 0x529   :  { %v16548_v33 = vmul.f32 0.125, %v2991_v14  ;;  %v3393_v14 = vrot.slane %v16552_v26, %v16375_v0 }
 0x52b   :  { %v3337_v58 = vrot.slane %v16548_v33, %v16375_v0 }
 0x52c   :  { %v3009_v8 = vpop.xlane.xlu1 %3008  ;;  %v3003_v36 = vpop.xlane.xlu0 %3002 }
 0x52d   :  { %v16567_v40 = vmul.f32 0.125, %v3003_v36  ;;  %v3518_v57 = vsel %vm3502_vm6, %v3337_v58, %v3517_v20  ;;  %v16580_v36 = vmul.f32 0.125, %v3048_v48  ;;  %v3520_v20 = vsel %vm3500_vm7, %v3349_v10, %v3519_v7 }
 0x52e   :  { %v3581_v21 = vsel %vm3565_vm8, %v3518_v57, -inf  ;;  %v3389_v57 = vrot.slane %v16565_v30, %v16375_v0  ;;  %v16594_v48 = vmul.f32 0.125, %v3069_v5  ;;  %v16607_v5 = vmul.f32 0.125, %v16452_v43 }
 0x52f   :  { %v3353_v32 = vrot.slane %v16567_v40, %v16375_v0  ;;  %3582 = vmax.xlane.f32.xlu0 %v3581_v21  ;;  %21225 = vst [vmem:[#allocation54_spill] sm:$0xff] %v16580_v36  ;;  %v3413_v31 = vrot.slane %v16580_v36, %v16375_v0  ;;  %v16627_v26 = vmul.f32 0.125, %v3009_v8 }
 0x530   :  { %v3012_v34 = vpop.xlane.xlu1 %3011  ;;  %v3039_v58 = vpop.xlane.xlu0 %3038  ;;  %21226 = vst [vmem:[#allocation55_spill] sm:$0xff] %v16594_v48  ;;  %v3528_v9 = vsel %vm3498_vm5, %v3393_v14, %v3389_v57  ;;  %v3441_v57 = vrot.slane %v16594_v48, %v16375_v0 }
 0x531   :  { %v16588_v55 = vmul.f32 0.125, %v3039_v58  ;;  %v3521_v21 = vsel %vm3502_vm6, %v3353_v32, %v3520_v20  ;;  %v16601_v58 = vmul.f32 0.125, %v3072_v19  ;;  %v3529_v20 = vsel %vm3500_vm7, %v3397_v25, %v3528_v9  ;;  %21228 = vst [vmem:[#allocation57_spill] sm:$0xff] %v16627_v26 }
 0x532   :  { %v3584_v11 = vsel %vm3565_vm8, %v3521_v21, -inf  ;;  %v3405_v21 = vrot.slane %v16586_v51, %v16375_v0 }
 0x533   :  { %v3401_v10 = vrot.slane %v16588_v55, %v16375_v0  ;;  %3585 = vmax.xlane.f32.xlu0 %v3584_v11  ;;  %21227 = vst [vmem:[#allocation56_spill] sm:$0xff] %v16601_v58  ;;  %v3445_v43 = vrot.slane %v16601_v58, %v16375_v0  ;;  %v16632_v58 = vmul.f32 0.125, %v3012_v34 }
 0x534   :  { %v3057_v7 = vpop.xlane.xlu1 %3056  ;;  %v3051_v32 = vpop.xlane.xlu0 %3050  ;;  %v3531_v25 = vsel %vm3498_vm5, %v3409_v2, %v3405_v21 }
 0x535   :  { %v16609_v23 = vmul.f32 0.125, %v3051_v32  ;;  %v3530_v11 = vsel %vm3502_vm6, %v3401_v10, %v3529_v20  ;;  %v3532_v32 = vsel %vm3500_vm7, %v3413_v31, %v3531_v25  ;;  %v3437_v10 = vrot.slane %v16607_v5, %v16375_v0  ;;  %21229 = vst [vmem:[#allocation58_spill] sm:$0xff] %v16632_v58 }
 0x536   :  { %v3593_v14 = vsel %vm3565_vm8, %v3530_v11, -inf  ;;  %v3365_v34 = vrot.slane %v16632_v58, %v16375_v0 }
 0x537   :  { %v3417_v19 = vrot.slane %v16609_v23, %v16375_v0  ;;  %3594 = vmax.xlane.f32.xlu1 %v3593_v14  ;;  %v3537_v14 = vsel %vm3498_vm5, %v3441_v57, %v3437_v10  ;;  %v16651_v10 = vmul.f32 0.125, %v16488_v39 }
 0x538   :  { %v3060_v9 = vpop.xlane.xlu1 %3059  ;;  %v3075_v36 = vpop.xlane.xlu0 %3074  ;;  %v3538_v25 = vsel %vm3500_vm7, %v3445_v43, %v3537_v14 }
 0x539   :  { %v16623_v20 = vmul.f32 0.125, %v3075_v36  ;;  %v3533_v11 = vsel %vm3502_vm6, %v3417_v19, %v3532_v32  ;;  %v16636_v36 = vmul.f32 0.125, %v16471_v24  ;;  %v3361_v32 = vrot.slane %v16627_v26, %v16375_v0 }
 0x53a   :  { %v3596_v48 = vsel %vm3565_vm8, %v3533_v11, -inf  ;;  %v16642_v11 = vmul.f32 0.125, %v3057_v7  ;;  %v16646_v57 = vmul.f32 0.125, %v3060_v9  ;;  %v3421_v26 = vrot.slane %v16651_v10, %v16375_v0 }
 0x53b   :  { %v3449_v2 = vrot.slane %v16623_v20, %v16375_v0  ;;  %3597 = vmax.xlane.f32.xlu1 %v3596_v48  ;;  %v3357_v24 = vrot.slane %v16636_v36, %v16375_v0 }
 0x53c   :  { %v3081_v21 = vpop.xlane.xlu1 %3080  ;;  %v3102_v31 = vpop.xlane.xlu0 %3101  ;;  %21230 = vst [vmem:[#allocation59_spill] sm:$0xff] %v16642_v11  ;;  %21231 = vst [vmem:[#allocation60_spill] sm:$0xff] %v16646_v57  ;;  %v3425_v7 = vrot.slane %v16642_v11, %v16375_v0 }
 0x53d   :  { %v3539_v19 = vsel %vm3502_vm6, %v3449_v2, %v3538_v25  ;;  %v16657_v14 = vmul.f32 0.125, %v3081_v21  ;;  %v3522_v9 = vsel %vm3498_vm5, %v3361_v32, %v3357_v24  ;;  %v16670_v21 = vmul.f32 0.125, %v16515_v41 }
 0x53e   :  { %v3602_v8 = vsel %vm3565_vm8, %v3539_v19, -inf }
 0x53f   :  { %3603 = vmax.xlane.f32.xlu1 %v3602_v8  ;;  %21233 = vst [vmem:[#allocation62_spill] sm:$0xff] %v16657_v14  ;;  %v3429_v8 = vrot.slane %v16646_v57, %v16375_v0  ;;  %v3457_v24 = vrot.slane %v16657_v14, %v16375_v0  ;;  %v3534_v57 = vsel %vm3498_vm5, %v3425_v7, %v3421_v26 }
 0x540   :  { %v3084_v48 = vpop.xlane.xlu1 %3083  ;;  %v3015_v43 = vpop.xlane.xlu0 %3014 }
 0x541   :  { %v16653_v2 = vmul.f32 0.125, %v3015_v43  ;;  %v16664_v58 = vmul.f32 0.125, %v3084_v48  ;;  %v3523_v43 = vsel %vm3500_vm7, %v3365_v34, %v3522_v9 }
 0x543   :  { %21232 = vst [vmem:[#allocation61_spill] sm:$0xff] %v16653_v2  ;;  %v3369_v25 = vrot.slane %v16653_v2, %v16375_v0  ;;  %21234 = vst [vmem:[#allocation63_spill] sm:$0xff] %v16664_v58  ;;  %v3461_v41 = vrot.slane %v16664_v58, %v16375_v0 }
 0x544   :  { %v3093_v19 = vpop.xlane.xlu1 %3092  ;;  %v3063_v39 = vpop.xlane.xlu0 %3062 }
 0x545   :  { %v16672_v11 = vmul.f32 0.125, %v3063_v39  ;;  %v3524_v2 = vsel %vm3502_vm6, %v3369_v25, %v3523_v43  ;;  %v16678_v48 = vmul.f32 0.125, %v3093_v19  ;;  %v3453_v43 = vrot.slane %v16670_v21, %v16375_v0 }
 0x546   :  { %v3587_v32 = vsel %vm3565_vm8, %v3524_v2, -inf  ;;  %v3535_v2 = vsel %vm3500_vm7, %v3429_v8, %v3534_v57  ;;  %v16691_v19 = vmul.f32 0.125, %v16527_v29 }
 0x547   :  { %21235 = vst [vmem:[#allocation64_spill] sm:$0xff] %v16678_v48  ;;  %v3433_v34 = vrot.slane %v16672_v11, %v16375_v0  ;;  %3588 = vmax.xlane.f32.xlu0 %v3587_v32  ;;  %v3473_v7 = vrot.slane %v16678_v48, %v16375_v0  ;;  %v3540_v8 = vsel %vm3498_vm5, %v3457_v24, %v3453_v43 }
 0x548   :  { %v3096_v9 = vpop.xlane.xlu1 %3095  ;;  %v3087_v25 = vpop.xlane.xlu0 %3086 }
 0x549   :  { %v16685_v39 = vmul.f32 0.125, %v3096_v9  ;;  %v16693_v14 = vmul.f32 0.125, %v3087_v25  ;;  %v3536_v32 = vsel %vm3502_vm6, %v3433_v34, %v3535_v2  ;;  %v3541_v25 = vsel %vm3500_vm7, %v3461_v41, %v3540_v8 }
 0x54a   :  { %v3599_v26 = vsel %vm3565_vm8, %v3536_v32, -inf  ;;  %v3469_v34 = vrot.slane %v16691_v19, %v16375_v0 }
 0x54b   :  { %21236 = vst [vmem:[#allocation65_spill] sm:$0xff] %v16685_v39  ;;  %21237 = vst [vmem:[#allocation66_spill] sm:$0xff] %v16693_v14  ;;  %v3465_v9 = vrot.slane %v16693_v14, %v16375_v0  ;;  %3600 = vmax.xlane.f32.xlu1 %v3599_v26  ;;  %v3477_v29 = vrot.slane %v16685_v39, %v16375_v0  ;;  %v16716_v14 = vmul.f32 0.125, %v3102_v31 }
 0x54c   :  { %v3105_v57 = vpop.xlane.xlu1 %3104  ;;  %v3099_v58 = vpop.xlane.xlu0 %3098  ;;  %v3543_v39 = vsel %vm3498_vm5, %v3473_v7, %v3469_v34 }
 0x54d   :  { %v16707_v2 = vmul.f32 0.125, %v3099_v58  ;;  %v3542_v32 = vsel %vm3502_vm6, %v3465_v9, %v3541_v25  ;;  %v16710_v48 = vmul.f32 0.125, %v3105_v57  ;;  %v3544_v58 = vsel %vm3500_vm7, %v3477_v29, %v3543_v39 }
 0x54e   :  { %v3605_v26 = vsel %vm3565_vm8, %v3542_v32, -inf  ;;  %v3485_v31 = vrot.slane %v16716_v14, %v16375_v0 }
 0x54f   :  { %21238 = vst [vmem:[#allocation67_spill] sm:$0xff] %v16710_v48  ;;  %v3481_v24 = vrot.slane %v16707_v2, %v16375_v0  ;;  %3606 = vmax.xlane.f32.xlu1 %v3605_v26  ;;  %v3489_v9 = vrot.slane %v16710_v48, %v16375_v0 }
 0x550   :  { %v3108_v43 = vpop.xlane.xlu1 %3107 }
 0x551   :  { %v16718_v41 = vmul.f32 0.125, %v3108_v43  ;;  %v3545_v8 = vsel %vm3502_vm6, %v3481_v24, %v3544_v58  ;;  %v3546_v29 = vsel %vm3498_vm5, %v3489_v9, %v3485_v31  ;;  %v16738_v43 = vsub.s32 1, %v21220_v52 }
 0x552   :  { %v3608_v57 = vsel %vm3565_vm8, %v3545_v8, -inf  ;;  %v16741_v58 = vsub.s32 2, %v21220_v52  ;;  %v16744_v8 = vsub.s32 3, %v21220_v52 }
 0x553   :  { %21239 = vst [vmem:[#allocation68_spill] sm:$0xff] %v16718_v41  ;;  %v3493_v25 = vrot.slane %v16718_v41, %v16375_v0  ;;  %3609 = vmax.xlane.f32.xlu1 %v3608_v57  ;;  %21241 = vst [vmem:[#allocation70_spill] sm:$0xff] %v16738_v43 }
 0x554   :  { %v3111_v32 = vpop.xlane.xlu1 %3110  ;;  %21242 = vst [vmem:[#allocation71_spill] sm:$0xff] %v16741_v58  ;;  %21243 = vst [vmem:[#allocation72_spill] sm:$0xff] %v16744_v8 }
 0x555   :  { %v16729_v7 = vmul.f32 0.125, %v3111_v32  ;;  %v3547_v34 = vsel %vm3500_vm7, %v3493_v25, %v3546_v29 }
 0x557   :  { %21240 = vst [vmem:[#allocation69_spill] sm:$0xff] %v16729_v7  ;;  %v3497_v39 = vrot.slane %v16729_v7, %v16375_v0 }
 0x559   :  { %v3548_v26 = vsel %vm3502_vm6, %v3497_v39, %v3547_v34 }
 0x55a   :  { %v3611_v24 = vsel %vm3565_vm8, %v3548_v26, -inf }
 0x55b   :  { %3612 = vmax.xlane.f32.xlu1 %v3611_v24 }
 0x578   :  { %v3568_v57 = vpop.xlane.xlu0 %3567 }
 0x579   :  { %v3633_v32 = vrot.slane %v3568_v57, %v14993_v63  ;;  %v3637_v9 = vrot.slane %v3568_v57, %v16738_v43  ;;  %v3641_v25 = vrot.slane %v3568_v57, %v16741_v58  ;;  %v3645_v31 = vrot.slane %v3568_v57, %v16744_v8 }
 0x57b   :  { %v3950_v39 = vsub.f32 %v16377_v56, %v3633_v32  ;;  %v3951_v29 = vsub.f32 %v16368_v17, %v3637_v9  ;;  %v3952_v34 = vsub.f32 %v16370_v38, %v3641_v25  ;;  %v3953_v52 = vsub.f32 %v16387_v22, %v3645_v31 }
 0x57d   :  { %v4014_v26 = vmul.f32 1.442695, %v3950_v39  ;;  %v4016_v24 = vmul.f32 1.442695, %v3951_v29  ;;  %v4018_v0 = vmul.f32 1.442695, %v3952_v34 }
 0x57e   :  { %v4020_v7 = vmul.f32 1.442695, %v3953_v52 }
 0x57f   :  { %14312 = vpow2.f32 %v4014_v26 }
 0x580   :  { %14314 = vpow2.f32 %v4016_v24 }
 0x581   :  { %14316 = vpow2.f32 %v4018_v0 }
 0x582   :  { %14318 = vpow2.f32 %v4020_v7 }
 0x588   :  { %v3571_v41 = vpop.xlane.xlu1 %3570 }
 0x589   :  { %v3649_v48 = vrot.slane %v3571_v41, %v14993_v63  ;;  %v3653_v57 = vrot.slane %v3571_v41, %v16738_v43  ;;  %v3657_v56 = vrot.slane %v3571_v41, %v16741_v58 }
 0x58b   :  { %v3954_v17 = vsub.f32 %v16397_v50, %v3649_v48  ;;  %v3955_v38 = vsub.f32 %v16399_v3, %v3653_v57  ;;  %v3956_v0 = vsub.f32 %v16401_v4, %v3657_v56  ;;  %v3661_v48 = vrot.slane %v3571_v41, %v16744_v8 }
 0x58c   :  { %v16759_v32 = vpop.eup %14312 }
 0x58d   :  { %21244 = vst [vmem:[#allocation73_spill] sm:$0xff] %v16759_v32  ;;  %v16761_v22 = vpop.eup %14314  ;;  %v4022_v9 = vmul.f32 1.442695, %v3954_v17  ;;  %4207 = vperm.xlu0 %14006, %v16759_v32   ;;  %v4024_v7 = vmul.f32 1.442695, %v3955_v38  ;;  %v3957_v56 = vsub.f32 %v16411_v18, %v3661_v48 }
 0x58e   :  { %4210 = vperm.xlu1 %14007, %v16761_v22   ;;  %v16766_v25 = vpop.eup %14316  ;;  %v4026_v50 = vmul.f32 1.442695, %v3956_v0 }
 0x58f   :  { %14320 = vpow2.f32 %v4022_v9  ;;  %v16769_v3 = vpop.eup %14318 }
 0x590   :  { %14322 = vpow2.f32 %v4024_v7  ;;  %v4028_v7 = vmul.f32 1.442695, %v3957_v56 }
 0x591   :  { %4213 = vperm.xlu0 %14006, %v16766_v25   ;;  %14324 = vpow2.f32 %v4026_v50 }
 0x595   :  { %4216 = vperm.xlu0 %14006, %v16769_v3  }
 0x598   :  { %v3574_v31 = vpop.xlane.xlu0 %3573 }
 0x599   :  { %v3665_v39 = vrot.slane %v3574_v31, %v14993_v63  ;;  %v3669_v4 = vrot.slane %v3574_v31, %v16738_v43  ;;  %v3673_v29 = vrot.slane %v3574_v31, %v16741_v58  ;;  %v3677_v34 = vrot.slane %v3574_v31, %v16744_v8 }
 0x59b   :  { %v3958_v24 = vsub.f32 %v16431_v42, %v3665_v39  ;;  %v3959_v52 = vsub.f32 %v16425_v60, %v3669_v4  ;;  %v3960_v57 = vsub.f32 %v16429_v28, %v3673_v29  ;;  %v3961_v38 = vsub.f32 %v16441_v35, %v3677_v34 }
 0x59c   :  { %v16777_v26 = vpop.eup %14320 }
 0x59d   :  { %21245 = vst [vmem:[#allocation74_spill] sm:$0xff] %v16777_v26  ;;  %4219 = vperm.xlu1 %14007, %v16777_v26   ;;  %v4030_v41 = vmul.f32 1.442695, %v3958_v24  ;;  %v4032_v17 = vmul.f32 1.442695, %v3959_v52  ;;  %v16785_v9 = vpop.eup %14322 }
 0x59e   :  { %v4034_v0 = vmul.f32 1.442695, %v3960_v57  ;;  %v4036_v42 = vmul.f32 1.442695, %v3961_v38  ;;  %v16791_v48 = vpop.eup %14324 }
 0x59f   :  { %14326 = vpow2.f32 %v4030_v41 }
 0x5a0   :  { %14328 = vpow2.f32 %v4032_v17  ;;  %v3580_v50 = vpop.xlane.xlu0 %3579 }
 0x5a1   :  { %4222 = vperm.xlu1 %14007, %v16785_v9   ;;  %v3697_v60 = vrot.slane %v3580_v50, %v14993_v63  ;;  %v3701_v28 = vrot.slane %v3580_v50, %v16738_v43  ;;  %v3705_v18 = vrot.slane %v3580_v50, %v16741_v58  ;;  %14330 = vpow2.f32 %v4034_v0 }
 0x5a2   :  { %v3709_v35 = vrot.slane %v3580_v50, %v16744_v8  ;;  %14332 = vpow2.f32 %v4028_v7 }
 0x5a3   :  { %v3966_v31 = vsub.f32 %v16456_v47, %v3697_v60  ;;  %v3967_v39 = vsub.f32 %v16443_v54, %v3701_v28  ;;  %v3968_v4 = vsub.f32 %v16450_v49, %v3705_v18  ;;  %14334 = vpow2.f32 %v4036_v42 }
 0x5a4   :  { %v3969_v34 = vsub.f32 %v16466_v16, %v3709_v35 }
 0x5a5   :  { %4225 = vperm.xlu1 %14007, %v16791_v48   ;;  %v4048_v29 = vmul.f32 1.442695, %v3967_v39  ;;  %v4046_v24 = vmul.f32 1.442695, %v3966_v31  ;;  %v4050_v52 = vmul.f32 1.442695, %v3968_v4 }
 0x5a6   :  { %v4052_v57 = vmul.f32 1.442695, %v3969_v34 }
 0x5a7   :  { %14336 = vpow2.f32 %v4048_v29 }
 0x5a8   :  { %14338 = vpow2.f32 %v4046_v24 }
 0x5a9   :  { %14340 = vpow2.f32 %v4050_v52 }
 0x5aa   :  { %14342 = vpow2.f32 %v4052_v57 }
 0x5ac   :  { %v3592_v56 = vpop.xlane.xlu0 %3591  ;;  %v16799_v41 = vpop.eup %14326 }
 0x5ad   :  { %21246 = vst [vmem:[#allocation75_spill] sm:$0xff] %v16799_v41  ;;  %v3761_v54 = vrot.slane %v3592_v56, %v14993_v63  ;;  %v3765_v47 = vrot.slane %v3592_v56, %v16738_v43  ;;  %v3769_v49 = vrot.slane %v3592_v56, %v16741_v58  ;;  %v16804_v17 = vpop.eup %14328  ;;  %4231 = vperm.xlu0 %14006, %v16799_v41  }
 0x5ae   :  { %4234 = vperm.xlu1 %14007, %v16804_v17   ;;  %v16811_v50 = vpop.eup %14330 }
 0x5af   :  { %v3982_v16 = vsub.f32 %v16483_v6, %v3761_v54  ;;  %v3983_v38 = vsub.f32 %v16475_v37, %v3765_v47  ;;  %v3984_v0 = vsub.f32 %v16480_v44, %v3769_v49  ;;  %21247 = vst [vmem:[#allocation76_spill] sm:$0xff] %v16811_v50  ;;  %v16814_v42 = vpop.eup %14332  ;;  %v3773_v37 = vrot.slane %v3592_v56, %v16744_v8 }
 0x5b0   :  { %v3577_v7 = vpop.xlane.xlu0 %3576  ;;  %v16823_v4 = vpop.eup %14334 }
 0x5b1   :  { %v4078_v60 = vmul.f32 1.442695, %v3982_v16  ;;  %v4082_v28 = vmul.f32 1.442695, %v3984_v0  ;;  %v3681_v18 = vrot.slane %v3577_v7, %v14993_v63  ;;  %v3685_v35 = vrot.slane %v3577_v7, %v16738_v43  ;;  %4237 = vperm.xlu0 %14006, %v16811_v50  }
 0x5b2   :  { %v3693_v6 = vrot.slane %v3577_v7, %v16744_v8  ;;  %v4080_v44 = vmul.f32 1.442695, %v3983_v38  ;;  %4228 = vperm.xlu1 %14007, %v16814_v42   ;;  %v3985_v52 = vsub.f32 %v16502_v46, %v3773_v37  ;;  %v3689_v57 = vrot.slane %v3577_v7, %v16741_v58 }
 0x5b3   :  { %14344 = vpow2.f32 %v4078_v60  ;;  %v3962_v31 = vsub.f32 %v16486_v62, %v3681_v18  ;;  %v3963_v39 = vsub.f32 %v16477_v59, %v3685_v35 }
 0x5b4   :  { %14346 = vpow2.f32 %v4082_v28  ;;  %v3965_v29 = vsub.f32 %v16504_v53, %v3693_v6  ;;  %v16826_v34 = vpop.eup %14336  ;;  %v4084_v49 = vmul.f32 1.442695, %v3985_v52  ;;  %v3964_v46 = vsub.f32 %v16494_v61, %v3689_v57 }
 0x5b5   :  { %v4040_v24 = vmul.f32 1.442695, %v3963_v39  ;;  %4240 = vperm.xlu0 %14006, %v16823_v4   ;;  %14348 = vpow2.f32 %v4080_v44  ;;  %v4038_v62 = vmul.f32 1.442695, %v3962_v31  ;;  %v16832_v59 = vpop.eup %14338 }
 0x5b6   :  { %4258 = vperm.xlu1 %14007, %v16826_v34   ;;  %21248 = vst [vmem:[#allocation77_spill] sm:$0xff] %v16832_v59  ;;  %v4044_v56 = vmul.f32 1.442695, %v3965_v29  ;;  %v16834_v47 = vpop.eup %14340  ;;  %v4042_v61 = vmul.f32 1.442695, %v3964_v46 }
 0x5b7   :  { %14350 = vpow2.f32 %v4040_v24  ;;  %21249 = vst [vmem:[#allocation78_spill] sm:$0xff] %v16834_v47  ;;  %v16842_v0 = vpop.eup %14342 }
 0x5b8   :  { %v3583_v54 = vpop.xlane.xlu0 %3582  ;;  %14352 = vpow2.f32 %v4038_v62 }
 0x5b9   :  { %v3713_v53 = vrot.slane %v3583_v54, %v14993_v63  ;;  %4255 = vperm.xlu0 %14006, %v16832_v59   ;;  %v3717_v16 = vrot.slane %v3583_v54, %v16738_v43  ;;  %14354 = vpow2.f32 %v4044_v56  ;;  %v3725_v7 = vrot.slane %v3583_v54, %v16744_v8 }
 0x5ba   :  { %4261 = vperm.xlu1 %14007, %v16834_v47   ;;  %v3721_v28 = vrot.slane %v3583_v54, %v16741_v58  ;;  %14356 = vpow2.f32 %v4084_v49  ;;  %v21294_v47 = vld [vmem:[#allocation69_spill] sm:$0xff] }
 0x5bb   :  { %v3970_v38 = vsub.f32 %v16530_v12, %v3713_v53  ;;  %v3971_v6 = vsub.f32 %v16522_v27, %v3717_v16  ;;  %v3973_v44 = vsub.f32 %v16548_v33, %v3725_v7 }
 0x5bc   :  { %v3586_v60 = vpop.xlane.xlu0 %3585  ;;  %v3972_v24 = vsub.f32 %v16525_v15, %v3721_v28 }
 0x5bd   :  { %v4054_v18 = vmul.f32 1.442695, %v3970_v38  ;;  %v3729_v35 = vrot.slane %v3586_v60, %v14993_v63  ;;  %4264 = vperm.xlu0 %14006, %v16842_v0   ;;  %v3741_v31 = vrot.slane %v3586_v60, %v16744_v8  ;;  %v4056_v27 = vmul.f32 1.442695, %v3971_v6 }
 0x5be   :  { %v3733_v57 = vrot.slane %v3586_v60, %v16738_v43  ;;  %v4060_v62 = vmul.f32 1.442695, %v3973_v44  ;;  %v4058_v15 = vmul.f32 1.442695, %v3972_v24  ;;  %v3737_v53 = vrot.slane %v3586_v60, %v16741_v58 }
 0x5bf   :  { %14358 = vpow2.f32 %v4054_v18  ;;  %v3974_v12 = vsub.f32 %v16546_v1, %v3729_v35  ;;  %v3977_v56 = vsub.f32 %v16567_v40, %v3741_v31 }
 0x5c0   :  { %v16849_v37 = vpop.eup %14344  ;;  %v16854_v39 = vpop.xlane.xlu1 %3594  ;;  %14360 = vpow2.f32 %v4042_v61  ;;  %v3975_v49 = vsub.f32 %v16536_v13, %v3733_v57  ;;  %v3976_v13 = vsub.f32 %v16541_v45, %v3737_v53 }
 0x5c1   :  { %21250 = vst [vmem:[#allocation79_spill] sm:$0xff] %v16849_v37  ;;  %4303 = vperm.xlu1 %14007, %v16849_v37   ;;  %v16857_v29 = vpop.eup %14346  ;;  %v4062_v52 = vmul.f32 1.442695, %v3974_v12  ;;  %v4068_v38 = vmul.f32 1.442695, %v3977_v56  ;;  %v3789_v40 = vrot.slane %v16854_v39, %v16744_v8  ;;  %v3777_v18 = vrot.slane %v16854_v39, %v14993_v63 }
 0x5c2   :  { %21251 = vst [vmem:[#allocation80_spill] sm:$0xff] %v16857_v29  ;;  %4309 = vperm.xlu0 %14006, %v16857_v29   ;;  %v16862_v1 = vpop.eup %14348  ;;  %v4064_v60 = vmul.f32 1.442695, %v3975_v49  ;;  %v4066_v44 = vmul.f32 1.442695, %v3976_v13  ;;  %v3781_v31 = vrot.slane %v16854_v39, %v16738_v43  ;;  %v3785_v56 = vrot.slane %v16854_v39, %v16741_v58  ;;  %v21257_v39 = vld [vmem:[#allocation52_spill] sm:$0xff] }
 0x5c3   :  { %14362 = vpow2.f32 %v4062_v52  ;;  %v3986_v24 = vsub.f32 %v16565_v30, %v3777_v18  ;;  %v21256_v30 = vld [vmem:[#allocation51_spill] sm:$0xff] }
 0x5c4   :  { %v16864_v33 = vpop.eup %14350  ;;  %v16867_v54 = vpop.xlane.xlu1 %3597  ;;  %14364 = vpow2.f32 %v4056_v27  ;;  %v3988_v13 = vsub.f32 %v21257_v39, %v3785_v56 }
 0x5c5   :  { %4306 = vperm.xlu1 %14007, %v16862_v1   ;;  %v3793_v46 = vrot.slane %v16867_v54, %v14993_v63  ;;  %v16875_v16 = vpop.eup %14352  ;;  %14366 = vpow2.f32 %v4060_v62  ;;  %v3805_v6 = vrot.slane %v16867_v54, %v16744_v8  ;;  %v4086_v53 = vmul.f32 1.442695, %v3986_v24 }
 0x5c6   :  { %4246 = vperm.xlu0 %14006, %v16864_v33   ;;  %21252 = vst [vmem:[#allocation81_spill] sm:$0xff] %v16875_v16  ;;  %v16881_v28 = vpop.eup %14354  ;;  %14368 = vpow2.f32 %v4058_v15  ;;  %v3987_v15 = vsub.f32 %v21256_v30, %v3781_v31  ;;  %v3797_v18 = vrot.slane %v16867_v54, %v16738_v43  ;;  %v4090_v31 = vmul.f32 1.442695, %v3988_v13  ;;  %v21263_v13 = vld [vmem:[#allocation61_spill] sm:$0xff] }
 0x5c7   :  { %v3990_v7 = vsub.f32 %v16586_v51, %v3793_v46  ;;  %v16887_v35 = vpop.eup %14356  ;;  %14370 = vpow2.f32 %v4068_v38  ;;  %v3989_v51 = vsub.f32 %v16588_v55, %v3789_v40  ;;  %v3993_v57 = vsub.f32 %v16609_v23, %v3805_v6 }
 0x5c8   :  { %v16895_v45 = vpop.xlane.xlu1 %3603  ;;  %14372 = vpow2.f32 %v4064_v60  ;;  %v4088_v60 = vmul.f32 1.442695, %v3987_v15  ;;  %v3801_v24 = vrot.slane %v16867_v54, %v16741_v58  ;;  %v21261_v54 = vld [vmem:[#allocation54_spill] sm:$0xff] }
 0x5c9   :  { %4243 = vperm.xlu1 %14007, %v16875_v16   ;;  %v4094_v12 = vmul.f32 1.442695, %v3990_v7  ;;  %v4092_v27 = vmul.f32 1.442695, %v3989_v51  ;;  %v3825_v62 = vrot.slane %v16895_v45, %v14993_v63  ;;  %v4100_v46 = vmul.f32 1.442695, %v3993_v57 }
 0x5ca   :  { %4252 = vperm.xlu0 %14006, %v16881_v28   ;;  %v3837_v23 = vrot.slane %v16895_v45, %v16744_v8 }
 0x5cb   :  { %14374 = vpow2.f32 %v4094_v12  ;;  %v3998_v38 = vsub.f32 %v16607_v5, %v3825_v62 }
 0x5cc   :  { %v16889_v61 = vpop.eup %14358  ;;  %14376 = vpow2.f32 %v4066_v44  ;;  %v4001_v5 = vsub.f32 %v16623_v20, %v3837_v23 }
 0x5cd   :  { %21253 = vst [vmem:[#allocation82_spill] sm:$0xff] %v16889_v61  ;;  %4312 = vperm.xlu1 %14007, %v16887_v35   ;;  %v16901_v52 = vpop.eup %14360  ;;  %14378 = vpow2.f32 %v4092_v27  ;;  %v4110_v6 = vmul.f32 1.442695, %v3998_v38  ;;  %v21259_v27 = vld [vmem:[#allocation53_spill] sm:$0xff]  ;;  %v3829_v38 = vrot.slane %v16895_v45, %v16738_v43 }
 0x5ce   :  { %4267 = vperm.xlu0 %14006, %v16889_v61   ;;  %21254 = vst [vmem:[#allocation83_spill] sm:$0xff] %v16901_v52  ;;  %14380 = vpow2.f32 %v4086_v53  ;;  %v3991_v57 = vsub.f32 %v21259_v27, %v3797_v18  ;;  %v4116_v20 = vmul.f32 1.442695, %v4001_v5 }
 0x5cf   :  { %14382 = vpow2.f32 %v4100_v46  ;;  %v3992_v46 = vsub.f32 %v21261_v54, %v3801_v24 }
 0x5d0   :  { %v16903_v55 = vpop.eup %14362  ;;  %v16921_v7 = vpop.xlane.xlu0 %3588  ;;  %14384 = vpow2.f32 %v4088_v60  ;;  %v4096_v23 = vmul.f32 1.442695, %v3991_v57 }
 0x5d1   :  { %21255 = vst [vmem:[#allocation84_spill] sm:$0xff] %v16903_v55  ;;  %4249 = vperm.xlu1 %14007, %v16901_v52   ;;  %v16913_v49 = vpop.eup %14364  ;;  %v3745_v12 = vrot.slane %v16921_v7, %v14993_v63  ;;  %14386 = vpow2.f32 %v4110_v6  ;;  %v3757_v56 = vrot.slane %v16921_v7, %v16744_v8  ;;  %v4098_v6 = vmul.f32 1.442695, %v3992_v46 }
 0x5d2   :  { %4279 = vperm.xlu0 %14006, %v16903_v55   ;;  %v16919_v40 = vpop.eup %14366  ;;  %14388 = vpow2.f32 %v4090_v31  ;;  %v21264_v31 = vld [vmem:[#allocation55_spill] sm:$0xff]  ;;  %v21274_v55 = vld [vmem:[#allocation66_spill] sm:$0xff] }
 0x5d3   :  { %v16927_v51 = vpop.eup %14368  ;;  %v3978_v30 = vsub.f32 %v16636_v36, %v3745_v12  ;;  %14390 = vpow2.f32 %v4116_v20  ;;  %v3981_v36 = vsub.f32 %v21263_v13, %v3757_v56  ;;  %v3833_v12 = vrot.slane %v16895_v45, %v16741_v58  ;;  %v21266_v45 = vld [vmem:[#allocation56_spill] sm:$0xff] }
 0x5d4   :  { %21258 = vst [vmem:[#allocation51_spill] sm:$0xff] %v16927_v51  ;;  %v16933_v44 = vpop.eup %14370  ;;  %v16947_v53 = vpop.xlane.xlu1 %3600  ;;  %14392 = vpow2.f32 %v4096_v23  ;;  %v3999_v24 = vsub.f32 %v21264_v31, %v3829_v38  ;;  %v3749_v38 = vrot.slane %v16921_v7, %v16738_v43  ;;  %v3753_v31 = vrot.slane %v16921_v7, %v16741_v58 }
 0x5d5   :  { %4270 = vperm.xlu1 %14007, %v16913_v49   ;;  %v16939_v62 = vpop.eup %14372  ;;  %v4070_v60 = vmul.f32 1.442695, %v3978_v30  ;;  %v3809_v18 = vrot.slane %v16947_v53, %v14993_v63  ;;  %v4076_v20 = vmul.f32 1.442695, %v3981_v36  ;;  %v3821_v56 = vrot.slane %v16947_v53, %v16744_v8 }
 0x5d6   :  { %4276 = vperm.xlu0 %14006, %v16919_v40   ;;  %v4000_v46 = vsub.f32 %v21266_v45, %v3833_v12  ;;  %v4112_v23 = vmul.f32 1.442695, %v3999_v24  ;;  %v21268_v24 = vld [vmem:[#allocation57_spill] sm:$0xff] }
 0x5d7   :  { %14394 = vpow2.f32 %v4070_v60  ;;  %v3994_v30 = vsub.f32 %v16651_v10, %v3809_v18  ;;  %v3997_v36 = vsub.f32 %v16672_v11, %v3821_v56  ;;  %v3979_v45 = vsub.f32 %v21268_v24, %v3749_v38 }
 0x5d8   :  { %v16945_v15 = vpop.eup %14374  ;;  %v16967_v57 = vpop.xlane.xlu1 %3606  ;;  %14396 = vpow2.f32 %v4098_v6  ;;  %v4114_v12 = vmul.f32 1.442695, %v4000_v46  ;;  %v21270_v46 = vld [vmem:[#allocation58_spill] sm:$0xff]  ;;  %v3813_v38 = vrot.slane %v16947_v53, %v16738_v43  ;;  %v3817_v24 = vrot.slane %v16947_v53, %v16741_v58  ;;  %v21275_v53 = vld [vmem:[#allocation60_spill] sm:$0xff] }
 0x5d9   :  { %4273 = vperm.xlu1 %14007, %v16927_v51   ;;  %21260 = vst [vmem:[#allocation52_spill] sm:$0xff] %v16945_v15  ;;  %v16953_v39 = vpop.eup %14376  ;;  %14398 = vpow2.f32 %v4076_v20  ;;  %v4102_v60 = vmul.f32 1.442695, %v3994_v30  ;;  %v3841_v10 = vrot.slane %v16967_v57, %v14993_v63  ;;  %v4108_v20 = vmul.f32 1.442695, %v3997_v36 }
 0x5da   :  { %4288 = vperm.xlu0 %14006, %v16933_v44   ;;  %21262 = vst [vmem:[#allocation53_spill] sm:$0xff] %v16953_v39  ;;  %v16959_v5 = vpop.eup %14378  ;;  %14400 = vpow2.f32 %v4112_v23  ;;  %v3980_v7 = vsub.f32 %v21270_v46, %v3753_v31 }
 0x5db   :  { %v16965_v27 = vpop.eup %14380  ;;  %14402 = vpow2.f32 %v4102_v60  ;;  %v4002_v56 = vsub.f32 %v16670_v21, %v3841_v10  ;;  %v3853_v21 = vrot.slane %v16967_v57, %v16744_v8 }
 0x5dc   :  { %21265 = vst [vmem:[#allocation54_spill] sm:$0xff] %v16965_v27  ;;  %v16973_v54 = vpop.eup %14382  ;;  %v16987_v6 = vpop.xlane.xlu1 %3609  ;;  %14404 = vpow2.f32 %v4114_v12  ;;  %v4074_v31 = vmul.f32 1.442695, %v3980_v7  ;;  %v3996_v7 = vsub.f32 %v21275_v53, %v3817_v24  ;;  %v21277_v53 = vld [vmem:[#allocation62_spill] sm:$0xff] }
 0x5dd   :  { %4282 = vperm.xlu1 %14007, %v16939_v62   ;;  %v16979_v13 = vpop.eup %14384  ;;  %v3857_v30 = vrot.slane %v16987_v6, %v14993_v63  ;;  %14406 = vpow2.f32 %v4108_v20  ;;  %v4118_v36 = vmul.f32 1.442695, %v4002_v56  ;;  %v4005_v51 = vsub.f32 %v21274_v55, %v3853_v21 }
 0x5de   :  { %4327 = vperm.xlu0 %14006, %v16945_v15   ;;  %v16985_v18 = vpop.eup %14386  ;;  %v4106_v24 = vmul.f32 1.442695, %v3996_v7 }
 0x5df   :  { %21267 = vst [vmem:[#allocation61_spill] sm:$0xff] %v16985_v18  ;;  %v16993_v11 = vpop.eup %14388  ;;  %v4006_v10 = vsub.f32 %v16691_v19, %v3857_v30  ;;  %v3869_v19 = vrot.slane %v16987_v6, %v16744_v8  ;;  %v4124_v21 = vmul.f32 1.442695, %v4005_v51 }
 0x5e0   :  { %21269 = vst [vmem:[#allocation55_spill] sm:$0xff] %v16993_v11  ;;  %v16999_v23 = vpop.eup %14390 }
 0x5e1   :  { %4285 = vperm.xlu1 %14007, %v16953_v39   ;;  %v4072_v39 = vmul.f32 1.442695, %v3979_v45  ;;  %v17005_v60 = vpop.eup %14392  ;;  %v21272_v45 = vld [vmem:[#allocation59_spill] sm:$0xff]  ;;  %v4126_v56 = vmul.f32 1.442695, %v4006_v10 }
 0x5e2   :  { %4324 = vperm.xlu0 %14006, %v16959_v5   ;;  %v3995_v46 = vsub.f32 %v21272_v45, %v3813_v38  ;;  %v3845_v45 = vrot.slane %v16967_v57, %v16738_v43 }
 0x5e3   :  { %14408 = vpow2.f32 %v4072_v39 }
 0x5e4   :  { %v17011_v12 = vpop.eup %14394  ;;  %14410 = vpow2.f32 %v4118_v36  ;;  %v17025_v30 = vpop.xlane.xlu1 %3612  ;;  %v4104_v38 = vmul.f32 1.442695, %v3995_v46  ;;  %v4009_v36 = vsub.f32 %v16707_v2, %v3869_v19  ;;  %v3849_v46 = vrot.slane %v16967_v57, %v16741_v58 }
 0x5e5   :  { %4315 = vperm.xlu1 %14007, %v16965_v27   ;;  %21271 = vst [vmem:[#allocation56_spill] sm:$0xff] %v17011_v12  ;;  %v17017_v20 = vpop.eup %14396  ;;  %14412 = vpow2.f32 %v4074_v31  ;;  %v3873_v10 = vrot.slane %v17025_v30, %v14993_v63  ;;  %v3861_v57 = vrot.slane %v16987_v6, %v16738_v43 }
 0x5e6   :  { %4336 = vperm.xlu0 %14006, %v16973_v54   ;;  %21273 = vst [vmem:[#allocation57_spill] sm:$0xff] %v17017_v20  ;;  %v17023_v39 = vpop.eup %14398  ;;  %14414 = vpow2.f32 %v4126_v56  ;;  %v4132_v2 = vmul.f32 1.442695, %v4009_v36 }
 0x5e7   :  { %v17031_v55 = vpop.eup %14400  ;;  %14416 = vpow2.f32 %v4104_v38  ;;  %v4010_v19 = vsub.f32 %v16716_v14, %v3873_v10  ;;  %v21279_v38 = vld [vmem:[#allocation63_spill] sm:$0xff]  ;;  %v3865_v10 = vrot.slane %v16987_v6, %v16741_v58 }
 0x5e8   :  { %v17037_v31 = vpop.eup %14402  ;;  %14418 = vpow2.f32 %v4124_v21  ;;  %v4004_v7 = vsub.f32 %v21279_v38, %v3849_v46 }
 0x5e9   :  { %4318 = vperm.xlu1 %14007, %v16979_v13   ;;  %21276 = vst [vmem:[#allocation58_spill] sm:$0xff] %v17037_v31  ;;  %v17043_v51 = vpop.eup %14404  ;;  %14420 = vpow2.f32 %v4106_v24  ;;  %v4134_v21 = vmul.f32 1.442695, %v4010_v19  ;;  %v21281_v24 = vld [vmem:[#allocation64_spill] sm:$0xff] }
 0x5ea   :  { %4351 = vperm.xlu0 %14006, %v16985_v18   ;;  %21278 = vst [vmem:[#allocation59_spill] sm:$0xff] %v17043_v51  ;;  %v17047_v56 = vpop.eup %14406  ;;  %14422 = vpow2.f32 %v4132_v2  ;;  %v4122_v36 = vmul.f32 1.442695, %v4004_v7  ;;  %v21284_v2 = vld [vmem:[#allocation65_spill] sm:$0xff] }
 0x5eb   :  { %v4008_v19 = vsub.f32 %v21284_v2, %v3865_v10 }
 0x5ed   :  { %4321 = vperm.xlu1 %14007, %v16993_v11  }
 0x5ee   :  { %4360 = vperm.xlu0 %14006, %v16999_v23  }
 0x5f1   :  { %4330 = vperm.xlu1 %14007, %v17005_v60  }
 0x5f2   :  { %4291 = vperm.xlu0 %14006, %v17011_v12   ;;  %v4003_v12 = vsub.f32 %v21277_v53, %v3845_v45  ;;  %v17053_v45 = vpop.eup %14408 }
 0x5f3   :  { %v17056_v14 = vpop.eup %14410 }
 0x5f4   :  { %v4120_v61 = vmul.f32 1.442695, %v4003_v12  ;;  %21280 = vst [vmem:[#allocation66_spill] sm:$0xff] %v17056_v14  ;;  %v4007_v12 = vsub.f32 %v21281_v24, %v3861_v57  ;;  %v17062_v46 = vpop.eup %14412  ;;  %v4130_v57 = vmul.f32 1.442695, %v4008_v19  ;;  %v3885_v19 = vrot.slane %v17025_v30, %v16744_v8 }
 0x5f5   :  { %4333 = vperm.xlu1 %14007, %v17017_v20   ;;  %21282 = vst [vmem:[#allocation60_spill] sm:$0xff] %v17062_v46  ;;  %v17065_v53 = vpop.eup %14414 }
 0x5f6   :  { %4300 = vperm.xlu0 %14006, %v17023_v39   ;;  %14424 = vpow2.f32 %v4120_v61  ;;  %21283 = vst [vmem:[#allocation62_spill] sm:$0xff] %v17065_v53  ;;  %v4128_v38 = vmul.f32 1.442695, %v4007_v12  ;;  %v3877_v61 = vrot.slane %v17025_v30, %v16738_v43  ;;  %v17071_v6 = vpop.eup %14416  ;;  %v21287_v12 = vld [vmem:[#allocation23_spill] sm:$0xff]  ;;  %v4013_v18 = vsub.f32 %v21294_v47, %v3885_v19 }
 0x5f7   :  { %14426 = vpow2.f32 %v4134_v21  ;;  %v17074_v7 = vpop.eup %14418  ;;  %v3881_v21 = vrot.slane %v17025_v30, %v16741_v58  ;;  %v1861_v2 = vcombine.high %v21287_v12, %v21287_v12 }
 0x5f8   :  { %14428 = vpow2.f32 %v4122_v36  ;;  %v21285_v36 = vld [vmem:[#allocation67_spill] sm:$0xff]  ;;  %v17080_v10 = vpop.eup %14420 }
 0x5f9   :  { %4354 = vperm.xlu1 %14007, %v17031_v55   ;;  %14430 = vpow2.f32 %v4128_v38  ;;  %v4011_v24 = vsub.f32 %v21285_v36, %v3877_v61  ;;  %21286 = vst [vmem:[#allocation63_spill] sm:$0xff] %v17080_v10  ;;  %v21289_v38 = vld [vmem:[#allocation68_spill] sm:$0xff]  ;;  %v21291_v36 = vld [vmem:[#allocation21_spill] sm:$0xff] }
 0x5fa   :  { %4339 = vperm.xlu0 %14006, %v17037_v31   ;;  %14432 = vpow2.f32 %v4130_v57 }
 0x5fd   :  { %4357 = vperm.xlu1 %14007, %v17043_v51   ;;  %v17094_v51 = vrot.slane %v1861_v2, %v21291_v36 }
 0x5fe   :  { %4348 = vperm.xlu0 %14006, %v17047_v56  }
 0x5ff   :  { %21292 = vst [vmem:[#allocation67_spill] sm:$0xff] %v17094_v51  ;;  %v17123_v19 = vcombine.high %v17094_v51, %v17094_v51 }
 0x601   :  { %4294 = vperm.xlu1 %14007, %v17053_v45   ;;  %21301 = vst [vmem:[#allocation87_spill] sm:$0xff] %v17123_v19 }
 0x602   :  { %4363 = vperm.xlu0 %14006, %v17056_v14   ;;  %v4136_v14 = vmul.f32 1.442695, %v4011_v24  ;;  %v21297_v24 = vld [vmem:[#allocation24_spill] sm:$0xff] }
 0x603   :  { %v17110_v2 = vcombine.high %v21297_v24, %v21297_v24 }
 0x604   :  { %14434 = vpow2.f32 %v4136_v14 }
 0x605   :  { %4297 = vperm.xlu1 %14007, %v17062_v46   ;;  %v17085_v46 = vpop.eup %14422  ;;  %21298 = vst [vmem:[#allocation24_spill] sm:$0xff] %v17110_v2 }
 0x606   :  { %4375 = vperm.xlu0 %14006, %v17065_v53   ;;  %21288 = vst [vmem:[#allocation64_spill] sm:$0xff] %v17085_v46  ;;  %v4012_v53 = vsub.f32 %v21289_v38, %v3881_v21  ;;  %v17091_v61 = vpop.eup %14424  ;;  %v17106_v21 = vrot.slane %v17094_v51, %v14993_v63 }
 0x607   :  { %21290 = vst [vmem:[#allocation65_spill] sm:$0xff] %v17091_v61  ;;  %v17097_v12 = vpop.eup %14426 }
 0x608   :  { %21293 = vst [vmem:[#allocation23_spill] sm:$0xff] %v17097_v12  ;;  %v4138_v57 = vmul.f32 1.442695, %v4012_v53  ;;  %v17101_v30 = vpop.eup %14428  ;;  %21296 = vst [vmem:[#allocation69_spill] sm:$0xff] %v17106_v21  ;;  %v4208_v14 = vpop.permute.xlu0 %4207  ;;  %v17119_v53 = vrot.slane %v17110_v2, %v14993_v63 }
 0x609   :  { %4342 = vperm.xlu1 %14007, %v17071_v6   ;;  %21295 = vst [vmem:[#allocation68_spill] sm:$0xff] %v17101_v30  ;;  %v4211_v38 = vpop.permute.xlu1 %4210  ;;  %v17114_v47 = vpop.eup %14430 }
 0x60a   :  { %4372 = vperm.xlu0 %14006, %v17074_v7   ;;  %14436 = vpow2.f32 %v4138_v57  ;;  %21299 = vst [vmem:[#allocation85_spill] sm:$0xff] %v17114_v47  ;;  %21300 = vst [vmem:[#allocation86_spill] sm:$0xff] %v17119_v53  ;;  %v17134_v57 = vrot.slane %v17123_v19, %v14993_v63 }
 0x60c   :  { %21303 = vst [vmem:[#allocation89_spill] sm:$0xff] %v17134_v57  ;;  %v4214_v2 = vpop.permute.xlu0 %4213 }
 0x60d   :  { %4345 = vperm.xlu1 %14007, %v17080_v10   ;;  %v4140_v10 = vmul.f32 1.442695, %v4013_v18  ;;  %v17129_v18 = vpop.eup %14432 }
 0x60e   :  { %4384 = vperm.xlu0 %14006, %v17085_v46   ;;  %21302 = vst [vmem:[#allocation88_spill] sm:$0xff] %v17129_v18 }
 0x60f   :  { %14438 = vpow2.f32 %v4140_v10  ;;  %v21305_v10 = vld [vmem:[#allocation25_spill] sm:$0xff] }
 0x611   :  { %4366 = vperm.xlu1 %14007, %v17091_v61   ;;  %v17138_v51 = vpop.eup %14434 }
 0x612   :  { %4387 = vperm.xlu0 %14006, %v17097_v12   ;;  %21304 = vst [vmem:[#allocation90_spill] sm:$0xff] %v17138_v51 }
 0x615   :  { %4369 = vperm.xlu1 %14007, %v17101_v30  }
 0x616   :  { %2049 = vrot.lane.b32.xlu0 %v17106_v21, %s14860_s11 }
 0x617   :  { %v17145_v12 = vpop.eup %14436 }
 0x618   :  { %v17125_v24 = vpop.permute.xlu1 %4219  ;;  %21306 = vst [vmem:[#allocation25_spill] sm:$0xff] %v17145_v12 }
 0x619   :  { %4378 = vperm.xlu1 %14007, %v17114_v47  }
 0x61a   :  { %2051 = vrot.lane.b32.xlu0 %v17119_v53, %s14860_s11  ;;  %v1910_v53 = vcombine.high %v21305_v10, %v21305_v10  ;;  %v21310_v10 = vld [vmem:[#allocation26_spill] sm:$0xff] }
 0x61b   :  { %v17162_v20 = vcombine.high %v21310_v10, %v21310_v10 }
 0x61c   :  { %v17140_v21 = vpop.permute.xlu1 %4222  ;;  %v17149_v30 = vrot.slane %v1910_v53, %v21291_v36  ;;  %v17151_v59 = vpop.eup %14438 }
 0x61d   :  { %4381 = vperm.xlu1 %14007, %v17129_v18   ;;  %v4217_v18 = vpop.permute.xlu0 %4216  ;;  %21308 = vst [vmem:[#allocation92_spill] sm:$0xff] %v17151_v59  ;;  %21311 = vst [vmem:[#allocation26_spill] sm:$0xff] %v17162_v20  ;;  %v17170_v36 = vrot.slane %v17162_v20, %v14993_v63 }
 0x61e   :  { %2053 = vrot.lane.b32.xlu0 %v17134_v57, %s14860_s11  ;;  %21307 = vst [vmem:[#allocation91_spill] sm:$0xff] %v17149_v30  ;;  %v17158_v31 = vrot.slane %v17149_v30, %v14993_v63  ;;  %v17174_v16 = vcombine.high %v17149_v30, %v17149_v30 }
 0x61f   :  { %21312 = vst [vmem:[#allocation94_spill] sm:$0xff] %v17170_v36 }
 0x620   :  { %v4226_v19 = vpop.permute.xlu1 %4225  ;;  %21309 = vst [vmem:[#allocation93_spill] sm:$0xff] %v17158_v31  ;;  %21313 = vst [vmem:[#allocation95_spill] sm:$0xff] %v17174_v16  ;;  %v17182_v15 = vrot.slane %v17174_v16, %v14993_v63 }
 0x621   :  { %4390 = vperm.xlu1 %14007, %v17138_v51  }
 0x622   :  { %21314 = vst [vmem:[#allocation96_spill] sm:$0xff] %v17182_v15 }
 0x625   :  { %4393 = vperm.xlu1 %14007, %v17145_v12  }
 0x628   :  { %v17153_v57 = vpop.permute.xlu0 %4231 }
 0x629   :  { %4396 = vperm.xlu1 %14007, %v17151_v59   ;;  %v4235_v52 = vpop.permute.xlu1 %4234 }
 0x62c   :  { %v17164_v12 = vpop.permute.xlu0 %4237 }
 0x62d   :  { %2065 = vrot.lane.b32.xlu1 %v17158_v31, %s14860_s11  ;;  %v4229_v53 = vpop.permute.xlu1 %4228  ;;  %v21315_v31 = vld [vmem:[#allocation20_spill] sm:$0xff] }
 0x62e   :  { %v4405_v26 = vrot.slane %v4211_v38, %v21315_v31  ;;  %v4401_v41 = vrot.slane %v4208_v14, %v21315_v31  ;;  %v4409_v20 = vrot.slane %v4214_v2, %v21315_v31  ;;  %v4413_v30 = vrot.slane %v4217_v18, %v21315_v31 }
 0x630   :  { %v17176_v37 = vpop.permute.xlu0 %4240  ;;  %v4654_v27 = vsel %vm3498_vm5, %v4405_v26, %v4401_v41 }
 0x631   :  { %2067 = vrot.lane.b32.xlu1 %v17170_v36, %s14860_s11  ;;  %v4259_v10 = vpop.permute.xlu1 %4258  ;;  %v4655_v50 = vsel %vm3500_vm7, %v4409_v20, %v4654_v27 }
 0x632   :  { %v4656_v16 = vsel %vm3502_vm6, %v4413_v30, %v4655_v50 }
 0x633   :  { %v4718_v38 = vsel %vm3565_vm8, %v4656_v16, 0.0 }
 0x634   :  { %v4256_v11 = vpop.permute.xlu0 %4255 }
 0x635   :  { %2069 = vrot.lane.b32.xlu1 %v17182_v15, %s14860_s11  ;;  %v4262_v36 = vpop.permute.xlu1 %4261 }
 0x638   :  { %v4265_v51 = vpop.permute.xlu0 %4264 }
 0x63c   :  { %v4304_v59 = vpop.permute.xlu1 %4303 }
 0x63d   :  { %4719 = vadd.xlane.f32.xlu0 %v4718_v38  ;;  %v4310_v14 = vpop.permute.xlu0 %4309  ;;  %v4529_v18 = vrot.slane %v4304_v59, %v21315_v31  ;;  %v4421_v59 = vrot.slane %v17140_v21, %v21315_v31 }
 0x63e   :  { %v4537_v41 = vrot.slane %v4310_v14, %v21315_v31  ;;  %v4417_v14 = vrot.slane %v17125_v24, %v21315_v31  ;;  %v4465_v24 = vrot.slane %v4256_v11, %v21315_v31 }
 0x640   :  { %v4307_v2 = vpop.permute.xlu1 %4306 }
 0x641   :  { %v4247_v32 = vpop.permute.xlu0 %4246  ;;  %v4533_v63 = vrot.slane %v4307_v2, %v21315_v31 }
 0x643   :  { %v4678_v26 = vsel %vm3498_vm5, %v4533_v63, %v4529_v18  ;;  %v4425_v63 = vrot.slane %v4226_v19, %v21315_v31 }
 0x644   :  { %v4244_v15 = vpop.permute.xlu1 %4243  ;;  %v4679_v16 = vsel %vm3500_vm7, %v4537_v41, %v4678_v26  ;;  %v4657_v26 = vsel %vm3498_vm5, %v4421_v59, %v4417_v14  ;;  %v4437_v41 = vrot.slane %v4235_v52, %v21315_v31  ;;  %v4469_v52 = vrot.slane %v4259_v10, %v21315_v31 }
 0x645   :  { %v4253_v29 = vpop.permute.xlu0 %4252  ;;  %v4658_v19 = vsel %vm3500_vm7, %v4425_v63, %v4657_v26  ;;  %v4449_v11 = vrot.slane %v4244_v15, %v21315_v31  ;;  %v4453_v10 = vrot.slane %v4247_v32, %v21315_v31 }
 0x646   :  { %v4666_v63 = vsel %vm3498_vm5, %v4469_v52, %v4465_v24 }
 0x648   :  { %v4313_v27 = vpop.permute.xlu1 %4312 }
 0x649   :  { %v4541_v50 = vrot.slane %v4313_v27, %v21315_v31  ;;  %v4268_v20 = vpop.permute.xlu0 %4267  ;;  %v4429_v27 = vrot.slane %v4229_v53, %v21315_v31 }
 0x64a   :  { %v4481_v32 = vrot.slane %v4268_v20, %v21315_v31 }
 0x64b   :  { %v4680_v30 = vsel %vm3502_vm6, %v4541_v50, %v4679_v16  ;;  %v4441_v50 = vrot.slane %v17164_v12, %v21315_v31  ;;  %v4445_v16 = vrot.slane %v17176_v37, %v21315_v31  ;;  %v4659_v53 = vsel %vm3502_vm6, %v4429_v27, %v4658_v19 }
 0x64c   :  { %v4250_v38 = vpop.permute.xlu1 %4249  ;;  %v4742_v47 = vsel %vm3565_vm8, %v4680_v30, 0.0  ;;  %v4721_v12 = vsel %vm3565_vm8, %v4659_v53, 0.0  ;;  %v4477_v37 = vrot.slane %v4265_v51, %v21315_v31 }
 0x64d   :  { %4743 = vadd.xlane.f32.xlu0 %v4742_v47  ;;  %v4280_v2 = vpop.permute.xlu0 %4279  ;;  %v4433_v47 = vrot.slane %v17153_v57, %v21315_v31  ;;  %v4473_v57 = vrot.slane %v4262_v36, %v21315_v31  ;;  %v4457_v26 = vrot.slane %v4250_v38, %v21315_v31 }
 0x64f   :  { %v4660_v59 = vsel %vm3498_vm5, %v4437_v41, %v4433_v47  ;;  %v4667_v19 = vsel %vm3500_vm7, %v4473_v57, %v4666_v63 }
 0x650   :  { %v4271_v18 = vpop.permute.xlu1 %4270  ;;  %v4661_v61 = vsel %vm3500_vm7, %v4441_v50, %v4660_v59  ;;  %v4663_v50 = vsel %vm3498_vm5, %v4453_v10, %v4449_v11  ;;  %v4668_v15 = vsel %vm3502_vm6, %v4477_v37, %v4667_v19  ;;  %v4497_v37 = vrot.slane %v4280_v2, %v21315_v31 }
 0x651   :  { %v4277_v46 = vpop.permute.xlu0 %4276  ;;  %v4662_v27 = vsel %vm3502_vm6, %v4445_v16, %v4661_v61  ;;  %v4485_v24 = vrot.slane %v4271_v18, %v21315_v31  ;;  %v4664_v38 = vsel %vm3500_vm7, %v4457_v26, %v4663_v50  ;;  %v4461_v16 = vrot.slane %v4253_v29, %v21315_v31 }
 0x652   :  { %v4724_v47 = vsel %vm3565_vm8, %v4662_v27, 0.0  ;;  %v4730_v59 = vsel %vm3565_vm8, %v4668_v15, 0.0  ;;  %v4493_v29 = vrot.slane %v4277_v46, %v21315_v31 }
 0x653   :  { %v4669_v52 = vsel %vm3498_vm5, %v4485_v24, %v4481_v32  ;;  %v4665_v18 = vsel %vm3502_vm6, %v4461_v16, %v4664_v38 }
 0x654   :  { %v4274_v21 = vpop.permute.xlu1 %4273  ;;  %v4727_v11 = vsel %vm3565_vm8, %v4665_v18, 0.0 }
 0x655   :  { %v4289_v30 = vpop.permute.xlu0 %4288  ;;  %v4489_v51 = vrot.slane %v4274_v21, %v21315_v31 }
 0x657   :  { %v4670_v63 = vsel %vm3500_vm7, %v4489_v51, %v4669_v52 }
 0x658   :  { %v4283_v14 = vpop.permute.xlu1 %4282 }
 0x659   :  { %4722 = vadd.xlane.f32.xlu1 %v4721_v12  ;;  %v4328_v41 = vpop.permute.xlu0 %4327  ;;  %v4501_v57 = vrot.slane %v4283_v14, %v21315_v31  ;;  %v4671_v14 = vsel %vm3502_vm6, %v4493_v29, %v4670_v63 }
 0x65a   :  { %v4733_v46 = vsel %vm3565_vm8, %v4671_v14, 0.0  ;;  %v4561_v18 = vrot.slane %v4328_v41, %v21315_v31 }
 0x65b   :  { %v4672_v27 = vsel %vm3498_vm5, %v4501_v57, %v4497_v37 }
 0x65c   :  { %v4286_v36 = vpop.permute.xlu1 %4285 }
 0x65d   :  { %4725 = vadd.xlane.f32.xlu1 %v4724_v47  ;;  %v4325_v61 = vpop.permute.xlu0 %4324  ;;  %v4505_v12 = vrot.slane %v4286_v36, %v21315_v31  ;;  %v4509_v47 = vrot.slane %v4289_v30, %v21315_v31 }
 0x65e   :  { %v4557_v15 = vrot.slane %v4325_v61, %v21315_v31 }
 0x65f   :  { %v4673_v36 = vsel %vm3500_vm7, %v4505_v12, %v4672_v27 }
 0x660   :  { %v4316_v53 = vpop.permute.xlu1 %4315  ;;  %v4674_v24 = vsel %vm3502_vm6, %v4509_v47, %v4673_v36 }
 0x661   :  { %4731 = vadd.xlane.f32.xlu1 %v4730_v59  ;;  %v4337_v21 = vpop.permute.xlu0 %4336  ;;  %v4545_v19 = vrot.slane %v4316_v53, %v21315_v31  ;;  %v4736_v30 = vsel %vm3565_vm8, %v4674_v24, 0.0 }
 0x662   :  { %v4573_v63 = vrot.slane %v4337_v21, %v21315_v31 }
 0x664   :  { %v4319_v20 = vpop.permute.xlu1 %4318 }
 0x665   :  { %4728 = vadd.xlane.f32.xlu1 %v4727_v11  ;;  %v4549_v26 = vrot.slane %v4319_v20, %v21315_v31  ;;  %v4352_v10 = vpop.permute.xlu0 %4351 }
 0x666   :  { %v4593_v41 = vrot.slane %v4352_v10, %v21315_v31 }
 0x667   :  { %v4681_v51 = vsel %vm3498_vm5, %v4549_v26, %v4545_v19 }
 0x668   :  { %v4322_v2 = vpop.permute.xlu1 %4321 }
 0x669   :  { %v4553_v50 = vrot.slane %v4322_v2, %v21315_v31  ;;  %4734 = vadd.xlane.f32.xlu1 %v4733_v46  ;;  %v4361_v38 = vpop.permute.xlu0 %4360 }
 0x66a   :  { %v4605_v21 = vrot.slane %v4361_v38, %v21315_v31 }
 0x66b   :  { %v4682_v16 = vsel %vm3500_vm7, %v4553_v50, %v4681_v51 }
 0x66c   :  { %v4331_v32 = vpop.permute.xlu1 %4330  ;;  %v4683_v53 = vsel %vm3502_vm6, %v4557_v15, %v4682_v16 }
 0x66d   :  { %4737 = vadd.xlane.f32.xlu1 %v4736_v30  ;;  %v4745_v59 = vsel %vm3565_vm8, %v4683_v53, 0.0  ;;  %v4565_v52 = vrot.slane %v4331_v32, %v21315_v31  ;;  %v4292_v57 = vpop.permute.xlu0 %4291 }
 0x66e   :  { %4746 = vadd.xlane.f32.xlu0 %v4745_v59  ;;  %v4513_v10 = vrot.slane %v4292_v57, %v21315_v31 }
 0x66f   :  { %v4684_v37 = vsel %vm3498_vm5, %v4565_v52, %v4561_v18 }
 0x670   :  { %v4334_v61 = vpop.permute.xlu1 %4333 }
 0x671   :  { %v4569_v12 = vrot.slane %v4334_v61, %v21315_v31  ;;  %v4301_v29 = vpop.permute.xlu0 %4300 }
 0x672   :  { %v4525_v38 = vrot.slane %v4301_v29, %v21315_v31 }
 0x673   :  { %v4685_v20 = vsel %vm3500_vm7, %v4569_v12, %v4684_v37 }
 0x674   :  { %v4355_v11 = vpop.permute.xlu1 %4354  ;;  %v4686_v27 = vsel %vm3502_vm6, %v4573_v63, %v4685_v20 }
 0x675   :  { %v4748_v14 = vsel %vm3565_vm8, %v4686_v27, 0.0  ;;  %v4597_v26 = vrot.slane %v4355_v11, %v21315_v31  ;;  %v4340_v36 = vpop.permute.xlu0 %4339 }
 0x676   :  { %4749 = vadd.xlane.f32.xlu0 %v4748_v14  ;;  %v4577_v57 = vrot.slane %v4340_v36, %v21315_v31 }
 0x677   :  { %v4690_v2 = vsel %vm3498_vm5, %v4597_v26, %v4593_v41 }
 0x678   :  { %v4358_v47 = vpop.permute.xlu1 %4357 }
 0x679   :  { %v4601_v19 = vrot.slane %v4358_v47, %v21315_v31  ;;  %v4349_v15 = vpop.permute.xlu0 %4348 }
 0x67a   :  { %v4589_v29 = vrot.slane %v4349_v15, %v21315_v31 }
 0x67b   :  { %v4691_v46 = vsel %vm3500_vm7, %v4601_v19, %v4690_v2 }
 0x67c   :  { %v4295_v50 = vpop.permute.xlu1 %4294  ;;  %v4692_v24 = vsel %vm3502_vm6, %v4605_v21, %v4691_v46 }
 0x67d   :  { %v4754_v51 = vsel %vm3565_vm8, %v4692_v24, 0.0  ;;  %v4517_v16 = vrot.slane %v4295_v50, %v21315_v31  ;;  %v4364_v59 = vpop.permute.xlu0 %4363 }
 0x67e   :  { %4755 = vadd.xlane.f32.xlu0 %v4754_v51  ;;  %v4609_v36 = vrot.slane %v4364_v59, %v21315_v31 }
 0x67f   :  { %v4675_v53 = vsel %vm3498_vm5, %v4517_v16, %v4513_v10 }
 0x680   :  { %v4298_v32 = vpop.permute.xlu1 %4297 }
 0x681   :  { %v4521_v30 = vrot.slane %v4298_v32, %v21315_v31  ;;  %v4376_v20 = vpop.permute.xlu0 %4375 }
 0x683   :  { %v4676_v52 = vsel %vm3500_vm7, %v4521_v30, %v4675_v53 }
 0x684   :  { %v4343_v18 = vpop.permute.xlu1 %4342  ;;  %v4677_v61 = vsel %vm3502_vm6, %v4525_v38, %v4676_v52  ;;  %v4625_v38 = vrot.slane %v4376_v20, %v21315_v31 }
 0x685   :  { %v4739_v12 = vsel %vm3565_vm8, %v4677_v61, 0.0  ;;  %v4581_v63 = vrot.slane %v4343_v18, %v21315_v31  ;;  %v4373_v21 = vpop.permute.xlu0 %4372 }
 0x686   :  { %4740 = vadd.xlane.f32.xlu1 %v4739_v12  ;;  %v4621_v50 = vrot.slane %v4373_v21, %v21315_v31 }
 0x687   :  { %v4687_v27 = vsel %vm3498_vm5, %v4581_v63, %v4577_v57 }
 0x688   :  { %v4346_v37 = vpop.permute.xlu1 %4345 }
 0x689   :  { %v4585_v11 = vrot.slane %v4346_v37, %v21315_v31  ;;  %v4385_v30 = vpop.permute.xlu0 %4384 }
 0x68a   :  { %v4637_v52 = vrot.slane %v4385_v30, %v21315_v31 }
 0x68b   :  { %v4688_v14 = vsel %vm3500_vm7, %v4585_v11, %v4687_v27 }
 0x68c   :  { %v4367_v26 = vpop.permute.xlu1 %4366  ;;  %v4689_v41 = vsel %vm3502_vm6, %v4589_v29, %v4688_v14 }
 0x68d   :  { %v4751_v47 = vsel %vm3565_vm8, %v4689_v41, 0.0  ;;  %v4613_v19 = vrot.slane %v4367_v26, %v21315_v31  ;;  %v4388_v37 = vpop.permute.xlu0 %4387 }
 0x68e   :  { %4752 = vadd.xlane.f32.xlu0 %v4751_v47  ;;  %v4641_v27 = vrot.slane %v4388_v37, %v21315_v31 }
 0x68f   :  { %v4693_v24 = vsel %vm3498_vm5, %v4613_v19, %v4609_v36 }
 0x690   :  { %v4370_v2 = vpop.permute.xlu1 %4369 }
 0x691   :  { %v4617_v46 = vrot.slane %v4370_v2, %v21315_v31  ;;  %v17319_v36 = vpop.permute.xlu0 %2049 }
 0x693   :  { %v4694_v15 = vsel %vm3500_vm7, %v4617_v46, %v4693_v24 }
 0x694   :  { %v4379_v51 = vpop.permute.xlu1 %4378  ;;  %v4695_v16 = vsel %vm3502_vm6, %v4621_v50, %v4694_v15 }
 0x695   :  { %v4757_v10 = vsel %vm3565_vm8, %v4695_v16, 0.0  ;;  %v4629_v32 = vrot.slane %v4379_v51, %v21315_v31  ;;  %v17321_v2 = vpop.permute.xlu0 %2051 }
 0x696   :  { %4758 = vadd.xlane.f32.xlu0 %v4757_v10 }
 0x697   :  { %v4696_v18 = vsel %vm3498_vm5, %v4629_v32, %v4625_v38 }
 0x698   :  { %v4382_v53 = vpop.permute.xlu1 %4381 }
 0x699   :  { %v4633_v59 = vrot.slane %v4382_v53, %v21315_v31  ;;  %v17323_v46 = vpop.permute.xlu0 %2053 }
 0x69b   :  { %v4697_v61 = vsel %vm3500_vm7, %v4633_v59, %v4696_v18 }
 0x69c   :  { %v4391_v12 = vpop.permute.xlu1 %4390  ;;  %v4698_v63 = vsel %vm3502_vm6, %v4637_v52, %v4697_v61 }
 0x69d   :  { %v4760_v57 = vsel %vm3565_vm8, %v4698_v63, 0.0  ;;  %v4645_v29 = vrot.slane %v4391_v12, %v21315_v31 }
 0x69e   :  { %4761 = vadd.xlane.f32.xlu0 %v4760_v57 }
 0x69f   :  { %v4699_v26 = vsel %vm3498_vm5, %v4645_v29, %v4641_v27 }
 0x6a0   :  { %v4394_v11 = vpop.permute.xlu1 %4393 }
 0x6a1   :  { %v4649_v20 = vrot.slane %v4394_v11, %v21315_v31 }
 0x6a3   :  { %v4700_v47 = vsel %vm3500_vm7, %v4649_v20, %v4699_v26 }
 0x6a4   :  { %v4397_v14 = vpop.permute.xlu1 %4396 }
 0x6a5   :  { %v4653_v41 = vrot.slane %v4397_v14, %v21315_v31 }
 0x6a7   :  { %v4701_v19 = vsel %vm3502_vm6, %v4653_v41, %v4700_v47 }
 0x6a8   :  { %v4763_v21 = vsel %vm3565_vm8, %v4701_v19, 0.0  ;;  %v17325_v24 = vpop.permute.xlu1 %2065 }
 0x6a9   :  { %4764 = vadd.xlane.f32.xlu0 %v4763_v21 }
 0x6ac   :  { %v17333_v10 = vpop.permute.xlu1 %2067 }
 0x6b0   :  { %v17340_v59 = vpop.permute.xlu1 %2069 }
 0x6c6   :  { %v4720_v50 = vpop.xlane.xlu0 %4719 }
 0x6c7   :  { %14440 = vrcp.f32 %v4720_v50 }
 0x6d4   :  { %v17327_v15 = vpop.eup %14440 }
 0x6d5   :  { %v4813_v51 = vrot.slane %v17327_v15, %v16744_v8  ;;  %v4805_v16 = vrot.slane %v17327_v15, %v16738_v43  ;;  %v4809_v38 = vrot.slane %v17327_v15, %v16741_v58 }
 0x6d6   :  { %v4744_v12 = vpop.xlane.xlu0 %4743 }
 0x6d7   :  { %v5121_v32 = vmul.f32 %v16769_v3, %v4813_v51  ;;  %v5119_v30 = vmul.f32 %v16761_v22, %v4805_v16  ;;  %v5120_v53 = vmul.f32 %v16766_v25, %v4809_v38 }
 0x6d9   :  { %5199 = vperm.xlu1 %14007, %v5121_v32   ;;  %5189 = vperm.xlu0 %14006, %v5119_v30  }
 0x6dd   :  { %5194 = vperm.xlu0 %14006, %v5120_v53  }
 0x6e2   :  { %v4723_v52 = vpop.xlane.xlu1 %4722 }
 0x6e3   :  { %14442 = vrcp.f32 %v4723_v52 }
 0x6e6   :  { %v4726_v18 = vpop.xlane.xlu1 %4725 }
 0x6e7   :  { %14444 = vrcp.f32 %v4726_v18 }
 0x6ea   :  { %v4732_v61 = vpop.xlane.xlu1 %4731 }
 0x6eb   :  { %14446 = vrcp.f32 %v4732_v61 }
 0x6ec   :  { %14448 = vrcp.f32 %v4744_v12 }
 0x6ee   :  { %v4729_v3 = vpop.xlane.xlu1 %4728 }
 0x6ef   :  { %14450 = vrcp.f32 %v4729_v3 }
 0x6f0   :  { %v17342_v22 = vpop.eup %14442 }
 0x6f1   :  { %v4821_v63 = vrot.slane %v17342_v22, %v16738_v43  ;;  %v4829_v25 = vrot.slane %v17342_v22, %v16744_v8 }
 0x6f2   :  { %v4735_v57 = vpop.xlane.xlu1 %4734 }
 0x6f3   :  { %14452 = vrcp.f32 %v4735_v57  ;;  %v5123_v37 = vmul.f32 %v16785_v9, %v4821_v63  ;;  %v5125_v11 = vmul.f32 %v16814_v42, %v4829_v25  ;;  %v4825_v42 = vrot.slane %v17342_v22, %v16741_v58 }
 0x6f4   :  { %v17350_v29 = vpop.eup %14444 }
 0x6f5   :  { %5209 = vperm.xlu1 %14007, %v5123_v37   ;;  %5219 = vperm.xlu0 %14006, %v5125_v11   ;;  %v4845_v20 = vrot.slane %v17350_v29, %v16744_v8  ;;  %v4837_v26 = vrot.slane %v17350_v29, %v16738_v43  ;;  %v5124_v32 = vmul.f32 %v16791_v48, %v4825_v42 }
 0x6f6   :  { %v4738_v27 = vpop.xlane.xlu1 %4737 }
 0x6f7   :  { %14454 = vrcp.f32 %v4738_v27  ;;  %v5129_v14 = vmul.f32 %v16823_v4, %v4845_v20  ;;  %v4747_v47 = vpop.xlane.xlu0 %4746  ;;  %v5127_v4 = vmul.f32 %v16804_v17, %v4837_v26 }
 0x6f8   :  { %v17357_v41 = vpop.eup %14446  ;;  %14456 = vrcp.f32 %v4747_v47 }
 0x6f9   :  { %5239 = vperm.xlu0 %14006, %v5129_v14   ;;  %v4877_v9 = vrot.slane %v17357_v41, %v16744_v8  ;;  %v17363_v19 = vpop.eup %14448  ;;  %v4869_v50 = vrot.slane %v17357_v41, %v16738_v43 }
 0x6fb   :  { %v5137_v21 = vmul.f32 %v16842_v0, %v4877_v9  ;;  %v5135_v30 = vmul.f32 %v16826_v34, %v4869_v50  ;;  %v4941_v0 = vrot.slane %v17363_v19, %v16744_v8  ;;  %v4933_v34 = vrot.slane %v17363_v19, %v16738_v43 }
 0x6fc   :  { %v17369_v51 = vpop.eup %14450 }
 0x6fd   :  { %5279 = vperm.xlu1 %14007, %v5137_v21   ;;  %5229 = vperm.xlu0 %14006, %v5127_v4   ;;  %v4853_v38 = vrot.slane %v17369_v51, %v16738_v43  ;;  %v5153_v52 = vmul.f32 %v16887_v35, %v4941_v0  ;;  %v5151_v3 = vmul.f32 %v16862_v1, %v4933_v34 }
 0x6fe   :  { %v4861_v35 = vrot.slane %v17369_v51, %v16744_v8 }
 0x6ff   :  { %v4750_v16 = vpop.xlane.xlu0 %4749  ;;  %v5131_v17 = vmul.f32 %v16864_v33, %v4853_v38 }
 0x700   :  { %v17377_v53 = vpop.eup %14452  ;;  %14458 = vrcp.f32 %v4750_v16  ;;  %v5133_v57 = vmul.f32 %v16881_v28, %v4861_v35 }
 0x701   :  { %5214 = vperm.xlu1 %14007, %v5124_v32   ;;  %5269 = vperm.xlu0 %14006, %v5135_v30   ;;  %v4885_v48 = vrot.slane %v17377_v53, %v16738_v43 }
 0x703   :  { %v5139_v12 = vmul.f32 %v16913_v49, %v4885_v48  ;;  %v4893_v49 = vrot.slane %v17377_v53, %v16744_v8 }
 0x704   :  { %v17385_v18 = vpop.eup %14454 }
 0x705   :  { %5249 = vperm.xlu0 %14006, %v5131_v17   ;;  %5359 = vperm.xlu1 %14007, %v5153_v52   ;;  %v4901_v33 = vrot.slane %v17385_v18, %v16738_v43  ;;  %v17393_v63 = vpop.eup %14456  ;;  %v5141_v20 = vmul.f32 %v16919_v40, %v4893_v49  ;;  %v21318_v49 = vld [vmem:[#allocation85_spill] sm:$0xff] }
 0x706   :  { %v4949_v1 = vrot.slane %v17393_v63, %v16738_v43  ;;  %v4957_v47 = vrot.slane %v17393_v63, %v16744_v8 }
 0x707   :  { %v4756_v61 = vpop.xlane.xlu0 %4755  ;;  %v5143_v25 = vmul.f32 %v16939_v62, %v4901_v33  ;;  %v4909_v62 = vrot.slane %v17385_v18, %v16744_v8 }
 0x708   :  { %14460 = vrcp.f32 %v4756_v61  ;;  %v5155_v27 = vmul.f32 %v16979_v13, %v4949_v1  ;;  %v5157_v42 = vmul.f32 %v16959_v5, %v4957_v47  ;;  %v4841_v47 = vrot.slane %v17350_v29, %v16741_v58 }
 0x709   :  { %5289 = vperm.xlu0 %14006, %v5139_v12   ;;  %5349 = vperm.xlu1 %14007, %v5151_v3   ;;  %v5145_v14 = vmul.f32 %v16933_v44, %v4909_v62  ;;  %v21316_v12 = vld [vmem:[#allocation65_spill] sm:$0xff] }
 0x70d   :  { %v17401_v37 = vpop.eup %14458  ;;  %5309 = vperm.xlu0 %14006, %v5143_v25   ;;  %5259 = vperm.xlu1 %14007, %v5133_v57   ;;  %v21317_v25 = vld [vmem:[#allocation64_spill] sm:$0xff] }
 0x70e   :  { %v4965_v28 = vrot.slane %v17401_v37, %v16738_v43  ;;  %v4973_v21 = vrot.slane %v17401_v37, %v16744_v8 }
 0x70f   :  { %v4741_v11 = vpop.xlane.xlu1 %4740 }
 0x710   :  { %14462 = vrcp.f32 %v4741_v11  ;;  %v5159_v26 = vmul.f32 %v17005_v60, %v4965_v28  ;;  %v5161_v60 = vmul.f32 %v16973_v54, %v4973_v21  ;;  %v21319_v11 = vld [vmem:[#allocation80_spill] sm:$0xff] }
 0x711   :  { %5299 = vperm.xlu1 %14007, %v5141_v20   ;;  %5369 = vperm.xlu0 %14006, %v5155_v27   ;;  %v21320_v27 = vld [vmem:[#allocation22_spill] sm:$0xff] }
 0x712   :  { %v4801_v62 = vrot.slane %v17327_v15, %v21320_v27  ;;  %v4945_v15 = vrot.slane %v17393_v63, %v21320_v27 }
 0x715   :  { %v17413_v9 = vpop.eup %14460  ;;  %5319 = vperm.xlu1 %14007, %v5145_v14   ;;  %5389 = vperm.xlu0 %14006, %v5159_v26   ;;  %v21321_v14 = vld [vmem:[#allocation73_spill] sm:$0xff] }
 0x716   :  { %v4997_v40 = vrot.slane %v17413_v9, %v16738_v43  ;;  %v5005_v4 = vrot.slane %v17413_v9, %v16744_v8  ;;  %v5118_v26 = vmul.f32 %v21321_v14, %v4801_v62  ;;  %v21335_v14 = vld [vmem:[#allocation77_spill] sm:$0xff] }
 0x717   :  { %v4753_v13 = vpop.xlane.xlu0 %4752 }
 0x718   :  { %14464 = vrcp.f32 %v4753_v13  ;;  %v5167_v44 = vmul.f32 %v17031_v55, %v4997_v40  ;;  %v5169_v32 = vmul.f32 %v16999_v23, %v5005_v4  ;;  %v21322_v13 = vld [vmem:[#allocation92_spill] sm:$0xff]  ;;  %v21324_v4 = vld [vmem:[#allocation90_spill] sm:$0xff] }
 0x719   :  { %5379 = vperm.xlu1 %14007, %v5157_v42  }
 0x71a   :  { %5429 = vperm.xlu0 %14006, %v5167_v44   ;;  %v21323_v44 = vld [vmem:[#allocation76_spill] sm:$0xff] }
 0x71d   :  { %v17424_v50 = vpop.eup %14462  ;;  %5399 = vperm.xlu1 %14007, %v5161_v60   ;;  %v5128_v60 = vmul.f32 %v21323_v44, %v4841_v47  ;;  %v4993_v47 = vrot.slane %v17413_v9, %v21320_v27  ;;  %v4881_v44 = vrot.slane %v17377_v53, %v21320_v27 }
 0x71e   :  { %v4917_v16 = vrot.slane %v17424_v50, %v16738_v43  ;;  %v4925_v30 = vrot.slane %v17424_v50, %v16744_v8 }
 0x71f   :  { %v4759_v5 = vpop.xlane.xlu0 %4758 }
 0x720   :  { %14466 = vrcp.f32 %v4759_v5  ;;  %v5147_v55 = vmul.f32 %v17053_v45, %v4917_v16  ;;  %v5149_v54 = vmul.f32 %v17023_v39, %v4925_v30  ;;  %v4953_v5 = vrot.slane %v17393_v63, %v16741_v58  ;;  %v21328_v63 = vld [vmem:[#allocation74_spill] sm:$0xff] }
 0x721   :  { %5439 = vperm.xlu1 %14007, %v5169_v32   ;;  %v21325_v32 = vld [vmem:[#allocation54_spill] sm:$0xff] }
 0x722   :  { %5329 = vperm.xlu0 %14006, %v5147_v55   ;;  %v5154_v30 = vmul.f32 %v21325_v32, %v4945_v15  ;;  %v4833_v55 = vrot.slane %v17350_v29, %v21320_v27  ;;  %v21329_v29 = vld [vmem:[#allocation52_spill] sm:$0xff]  ;;  %v5001_v15 = vrot.slane %v17413_v9, %v16741_v58  ;;  %v21342_v9 = vld [vmem:[#allocation51_spill] sm:$0xff] }
 0x725   :  { %v17433_v38 = vpop.eup %14464  ;;  %5339 = vperm.xlu1 %14007, %v5149_v54   ;;  %v21326_v54 = vld [vmem:[#allocation55_spill] sm:$0xff] }
 0x726   :  { %v4989_v0 = vrot.slane %v17433_v38, %v16744_v8  ;;  %v4981_v17 = vrot.slane %v17433_v38, %v16738_v43  ;;  %v4985_v62 = vrot.slane %v17433_v38, %v16741_v58 }
 0x727   :  { %v4762_v23 = vpop.xlane.xlu0 %4761 }
 0x728   :  { %14468 = vrcp.f32 %v4762_v23  ;;  %v5165_v52 = vmul.f32 %v17047_v56, %v4989_v0  ;;  %v5163_v48 = vmul.f32 %v17071_v6, %v4981_v17  ;;  %v5156_v0 = vmul.f32 %v21326_v54, %v4953_v5  ;;  %v21327_v23 = vld [vmem:[#allocation75_spill] sm:$0xff]  ;;  %v21341_v54 = vld [vmem:[#allocation66_spill] sm:$0xff] }
 0x729   :  { %v4817_v17 = vrot.slane %v17342_v22, %v21320_v27  ;;  %v21330_v22 = vld [vmem:[#allocation79_spill] sm:$0xff] }
 0x72a   :  { %5419 = vperm.xlu1 %14007, %v5165_v52   ;;  %5409 = vperm.xlu0 %14006, %v5163_v48   ;;  %v5126_v52 = vmul.f32 %v21327_v23, %v4833_v55  ;;  %v4961_v48 = vrot.slane %v17401_v37, %v21320_v27  ;;  %v4889_v55 = vrot.slane %v17377_v53, %v16741_v58  ;;  %v21344_v53 = vld [vmem:[#allocation68_spill] sm:$0xff] }
 0x72c   :  { %v5140_v23 = vmul.f32 %v21342_v9, %v4889_v55 }
 0x72d   :  { %v17441_v45 = vpop.eup %14466 }
 0x72e   :  { %v5021_v39 = vrot.slane %v17441_v45, %v16744_v8  ;;  %v5013_v34 = vrot.slane %v17441_v45, %v16738_v43  ;;  %v5009_v5 = vrot.slane %v17441_v45, %v21320_v27 }
 0x730   :  { %v5173_v61 = vmul.f32 %v17074_v7, %v5021_v39  ;;  %v5171_v3 = vmul.f32 %v21316_v12, %v5013_v34  ;;  %v4937_v7 = vrot.slane %v17363_v19, %v16741_v58  ;;  %v5122_v39 = vmul.f32 %v21328_v63, %v4817_v17  ;;  %v21343_v63 = vld [vmem:[#allocation84_spill] sm:$0xff] }
 0x731   :  { %v4929_v34 = vrot.slane %v17363_v19, %v21320_v27  ;;  %v4849_v12 = vrot.slane %v17369_v51, %v21320_v27  ;;  %v21332_v19 = vld [vmem:[#allocation57_spill] sm:$0xff]  ;;  %v4897_v17 = vrot.slane %v17385_v18, %v21320_v27 }
 0x732   :  { %5459 = vperm.xlu1 %14007, %v5173_v61   ;;  %5449 = vperm.xlu0 %14006, %v5171_v3   ;;  %v4765_v33 = vpop.xlane.xlu0 %4764  ;;  %v5152_v20 = vmul.f32 %v21319_v11, %v4937_v7  ;;  %v5158_v61 = vmul.f32 %v21329_v29, %v4961_v48  ;;  %v4865_v11 = vrot.slane %v17357_v41, %v21320_v27 }
 0x733   :  { %14470 = vrcp.f32 %v4765_v33  ;;  %v5150_v3 = vmul.f32 %v21330_v22, %v4929_v34  ;;  %v4969_v33 = vrot.slane %v17401_v37, %v16741_v58  ;;  %v21334_v37 = vld [vmem:[#allocation83_spill] sm:$0xff] }
 0x735   :  { %v17449_v56 = vpop.eup %14468 }
 0x736   :  { %v5037_v6 = vrot.slane %v17449_v56, %v16744_v8  ;;  %v5029_v35 = vrot.slane %v17449_v56, %v16738_v43  ;;  %v5025_v34 = vrot.slane %v17449_v56, %v21320_v27 }
 0x738   :  { %v5177_v57 = vmul.f32 %v21317_v25, %v5037_v6  ;;  %v5175_v1 = vmul.f32 %v21318_v49, %v5029_v35  ;;  %v21331_v6 = vld [vmem:[#allocation81_spill] sm:$0xff]  ;;  %v4977_v25 = vrot.slane %v17433_v38, %v21320_v27  ;;  %v4857_v49 = vrot.slane %v17369_v51, %v16741_v58  ;;  %v21336_v51 = vld [vmem:[#allocation63_spill] sm:$0xff]  ;;  %v21338_v38 = vld [vmem:[#allocation78_spill] sm:$0xff] }
 0x739   :  { %v5130_v35 = vmul.f32 %v21331_v6, %v4849_v12  ;;  %v21346_v6 = vld [vmem:[#allocation53_spill] sm:$0xff] }
 0x73a   :  { %5479 = vperm.xlu1 %14007, %v5177_v57   ;;  %5469 = vperm.xlu0 %14006, %v5175_v1   ;;  %v5160_v57 = vmul.f32 %v21332_v19, %v4969_v33  ;;  %v21333_v1 = vld [vmem:[#allocation58_spill] sm:$0xff] }
 0x73b   :  { %v5162_v7 = vmul.f32 %v21333_v1, %v4977_v25  ;;  %v5033_v25 = vrot.slane %v17449_v56, %v16741_v58 }
 0x73e   :  { %5354 = vperm.xlu0 %14006, %v5152_v20   ;;  %v5132_v20 = vmul.f32 %v21334_v37, %v4857_v49  ;;  %v21347_v49 = vld [vmem:[#allocation56_spill] sm:$0xff] }
 0x740   :  { %v17462_v28 = vpop.eup %14470 }
 0x741   :  { %v5053_v40 = vrot.slane %v17462_v28, %v16744_v8  ;;  %v5045_v21 = vrot.slane %v17462_v28, %v16738_v43 }
 0x742   :  { %5184 = vperm.xlu0 %14006, %v5118_v26   ;;  %v5134_v26 = vmul.f32 %v21335_v14, %v4865_v11  ;;  %v4921_v11 = vrot.slane %v17424_v50, %v16741_v58 }
 0x743   :  { %v5181_v42 = vmul.f32 %v21322_v13, %v5053_v40  ;;  %v5179_v16 = vmul.f32 %v21324_v4, %v5045_v21  ;;  %v5164_v40 = vmul.f32 %v21336_v51, %v4985_v62  ;;  %v4873_v13 = vrot.slane %v17357_v41, %v16741_v58  ;;  %v21339_v4 = vld [vmem:[#allocation82_spill] sm:$0xff]  ;;  %v21340_v41 = vld [vmem:[#allocation59_spill] sm:$0xff]  ;;  %v21349_v62 = vld [vmem:[#allocation60_spill] sm:$0xff] }
 0x744   :  { %v5148_v14 = vmul.f32 %v21349_v62, %v4921_v11  ;;  %v21351_v51 = vld [vmem:[#allocation45_spill] sm:$0xff] }
 0x745   :  { %5499 = vperm.xlu1 %14007, %v5181_v42   ;;  %v21337_v42 = vld [vmem:[#allocation61_spill] sm:$0xff] }
 0x746   :  { %5234 = vperm.xlu0 %14006, %v5128_v60   ;;  %v5166_v21 = vmul.f32 %v21337_v42, %v4993_v47  ;;  %v5136_v60 = vmul.f32 %v21338_v38, %v4873_v13  ;;  %v21353_v42 = vld [vmem:[#allocation41_spill] sm:$0xff] }
 0x747   :  { %v21356_v38 = vld [vmem:[#allocation29_spill] sm:$0xff] }
 0x748   :  { %v21368_v62 = vld [vmem:[#allocation49_spill] sm:$0xff] }
 0x749   :  { %5489 = vperm.xlu1 %14007, %v5179_v16   ;;  %v5138_v16 = vmul.f32 %v21339_v4, %v4881_v44  ;;  %v21355_v44 = vld [vmem:[#allocation47_spill] sm:$0xff] }
 0x74a   :  { %5364 = vperm.xlu0 %14006, %v5154_v30   ;;  %v5168_v30 = vmul.f32 %v21340_v41, %v5001_v15  ;;  %v21357_v15 = vld [vmem:[#allocation25_spill] sm:$0xff] }
 0x74d   :  { %5374 = vperm.xlu1 %14007, %v5156_v0   ;;  %v5170_v0 = vmul.f32 %v21341_v54, %v5009_v5 }
 0x74e   :  { %5224 = vperm.xlu0 %14006, %v5126_v52   ;;  %v5017_v52 = vrot.slane %v17441_v45, %v16741_v58  ;;  %v4913_v45 = vrot.slane %v17424_v50, %v21320_v27 }
 0x750   :  { %v5172_v29 = vmul.f32 %v21344_v53, %v5017_v52  ;;  %v5146_v1 = vmul.f32 %v21347_v49, %v4913_v45  ;;  %v21360_v52 = vld [vmem:[#allocation23_spill] sm:$0xff]  ;;  %v21361_v53 = vld [vmem:[#allocation48_spill] sm:$0xff] }
 0x751   :  { %5204 = vperm.xlu1 %14007, %v5122_v39   ;;  %v5142_v39 = vmul.f32 %v21343_v63, %v4897_v17 }
 0x752   :  { %5384 = vperm.xlu0 %14006, %v5158_v61   ;;  %v4905_v61 = vrot.slane %v17385_v18, %v16741_v58  ;;  %v21348_v18 = vld [vmem:[#allocation88_spill] sm:$0xff] }
 0x754   :  { %v5190_v32 = vpop.permute.xlu0 %5189  ;;  %v5200_v12 = vpop.permute.xlu1 %5199 }
 0x755   :  { %5344 = vperm.xlu1 %14007, %v5150_v3   ;;  %v21345_v3 = vld [vmem:[#allocation62_spill] sm:$0xff] }
 0x756   :  { %5244 = vperm.xlu0 %14006, %v5130_v35   ;;  %v5174_v33 = vmul.f32 %v21345_v3, %v5025_v34  ;;  %v5144_v35 = vmul.f32 %v21346_v6, %v4905_v61  ;;  %v21363_v3 = vld [vmem:[#allocation69_spill] sm:$0xff] }
 0x758   :  { %v17532_v48 = vpop.permute.xlu0 %5194 }
 0x759   :  { %5394 = vperm.xlu1 %14007, %v5160_v57  }
 0x75a   :  { %5404 = vperm.xlu0 %14006, %v5162_v7   ;;  %v5176_v7 = vmul.f32 %v21348_v18, %v5033_v25 }
 0x75d   :  { %5254 = vperm.xlu1 %14007, %v5132_v20  }
 0x75e   :  { %5264 = vperm.xlu0 %14006, %v5134_v26   ;;  %v5049_v26 = vrot.slane %v17462_v28, %v16741_v58 }
 0x760   :  { %v5180_v4 = vmul.f32 %v21357_v15, %v5049_v26 }
 0x761   :  { %5414 = vperm.xlu1 %14007, %v5164_v40   ;;  %v21352_v40 = vld [vmem:[#allocation27_spill] sm:$0xff] }
 0x762   :  { %5424 = vperm.xlu0 %14006, %v5166_v21   ;;  %v2103_v13 = vsel %vm1353_vm2, %v21352_v40, %v21351_v51  ;;  %v21354_v21 = vld [vmem:[#allocation30_spill] sm:$0xff]  ;;  %v21371_v40 = vld [vmem:[#allocation32_spill] sm:$0xff] }
 0x763   :  { %v2104_v50 = vsel %vm1353_vm2, %v21354_v21, %v21353_v42  ;;  %v17571_v5 = vsel %vm1370_vm3, %v2103_v13, %v21351_v51  ;;  %v21370_v51 = vld [vmem:[#allocation50_spill] sm:$0xff] }
 0x764   :  { %v17579_v55 = vsel %vm1370_vm3, %v2104_v50, %v21353_v42  ;;  %v5505_v54 = vmul.f32 %v5200_v12, %v17571_v5  ;;  %v2106_v13 = vsel %vm1353_vm2, %v21371_v40, %v21370_v51  ;;  %v21372_v50 = vld [vmem:[#allocation42_spill] sm:$0xff] }
 0x765   :  { %5274 = vperm.xlu1 %14007, %v5136_v60   ;;  %v2105_v60 = vsel %vm1353_vm2, %v21356_v38, %v21355_v44  ;;  %21358 = vst [vmem:[#allocation64_spill] sm:$0xff] %v17579_v55 }
 0x766   :  { %5284 = vperm.xlu0 %14006, %v5138_v16   ;;  %v5041_v16 = vrot.slane %v17462_v28, %v21320_v27  ;;  %v17585_v28 = vsel %vm1370_vm3, %v2105_v60, %v21355_v44  ;;  %v5587_v61 = vsel %vm2919_vm4, %v5505_v54, 0.0  ;;  %v21373_v44 = vld [vmem:[#allocation34_spill] sm:$0xff]  ;;  %v21375_v54 = vld [vmem:[#allocation24_spill] sm:$0xff] }
 0x767   :  { %21359 = vst [vmem:[#allocation85_spill] sm:$0xff] %v17585_v28  ;;  %v2112_v38 = vsel %vm1353_vm2, %v21373_v44, %v21372_v50  ;;  %v17653_v44 = vsel %vm1370_vm3, %v2106_v13, %v21370_v51  ;;  %v21386_v51 = vld [vmem:[#allocation46_spill] sm:$0xff]  ;;  %v21387_v13 = vld [vmem:[#allocation36_spill] sm:$0xff] }
 0x768   :  { %v5178_v63 = vmul.f32 %v21360_v52, %v5041_v16  ;;  %v21374_v16 = vld [vmem:[#allocation86_spill] sm:$0xff] }
 0x769   :  { %5434 = vperm.xlu1 %14007, %v5168_v30   ;;  %v21378_v52 = vld [vmem:[#allocation94_spill] sm:$0xff] }
 0x76a   :  { %5444 = vperm.xlu0 %14006, %v5170_v0   ;;  %v5503_v0 = vmul.f32 %v5190_v32, %v17571_v5 }
 0x76c   :  { %v5573_v12 = vsel %vm2919_vm4, %v5503_v0, 0.0  ;;  %v2093_v0 = vsel %vm1336_vm0, %v21375_v54, %v21374_v16  ;;  %v17657_v16 = vsel %vm1370_vm3, %v2112_v38, %v21372_v50  ;;  %v2114_v50 = vsel %vm1353_vm2, %v21387_v13, %v21386_v51 }
 0x76d   :  { %5294 = vperm.xlu1 %14007, %v5140_v23   ;;  %v5574_v18 = vrot.slane %v5573_v12, 4 }
 0x76e   :  { %5304 = vperm.xlu0 %14006, %v5142_v39  }
 0x770   :  { %v5220_v22 = vpop.permute.xlu0 %5219  ;;  %v5210_v19 = vpop.permute.xlu1 %5209 }
 0x771   :  { %5454 = vperm.xlu1 %14007, %v5172_v29   ;;  %v5509_v17 = vmul.f32 %v5220_v22, %v17579_v55  ;;  %v5507_v9 = vmul.f32 %v5210_v19, %v17579_v55  ;;  %v21362_v29 = vld [vmem:[#allocation28_spill] sm:$0xff]  ;;  %v21366_v19 = vld [vmem:[#allocation93_spill] sm:$0xff] }
 0x772   :  { %5464 = vperm.xlu0 %14006, %v5174_v33   ;;  %v2107_v32 = vsel %vm1353_vm2, %v21362_v29, %v21361_v53  ;;  %v21364_v33 = vld [vmem:[#allocation67_spill] sm:$0xff] }
 0x773   :  { %v5615_v22 = vsel %vm2919_vm4, %v5509_v17, 0.0  ;;  %v2092_v45 = vsel %vm1336_vm0, %v21364_v33, %v21363_v3  ;;  %v5601_v6 = vsel %vm2919_vm4, %v5507_v9, 0.0  ;;  %v17608_v25 = vsel %vm1370_vm3, %v2107_v32, %v21361_v53  ;;  %v21376_v17 = vld [vmem:[#allocation89_spill] sm:$0xff]  ;;  %v21377_v9 = vld [vmem:[#allocation87_spill] sm:$0xff]  ;;  %v21380_v53 = vld [vmem:[#allocation96_spill] sm:$0xff] }
 0x774   :  { %v5240_v57 = vpop.permute.xlu0 %5239  ;;  %21365 = vst [vmem:[#allocation80_spill] sm:$0xff] %v17608_v25  ;;  %v5616_v42 = vrot.slane %v5615_v22, 4  ;;  %v5602_v60 = vrot.slane %v5601_v6, 4  ;;  %v21381_v29 = vld [vmem:[#allocation95_spill] sm:$0xff] }
 0x775   :  { %5314 = vperm.xlu1 %14007, %v5144_v35   ;;  %v5513_v23 = vmul.f32 %v5240_v57, %v17585_v28  ;;  %v21367_v57 = vld [vmem:[#allocation91_spill] sm:$0xff]  ;;  %v17640_v32 = vsel %vm1336_vm0, %v21381_v29, %v21380_v53 }
 0x776   :  { %5324 = vperm.xlu0 %14006, %v5146_v1   ;;  %v2100_v49 = vsel %vm1336_vm0, %v21367_v57, %v21366_v19  ;;  %v5588_v1 = vrot.slane %v5587_v61, 4  ;;  %v21382_v3 = vld [vmem:[#allocation43_spill] sm:$0xff]  ;;  %v5617_v54 = vadd.f32 %v5616_v42, %v5615_v22  ;;  %v2108_v22 = vsel %vm1353_vm2, %v2092_v45, %v17319_v36 }
 0x777   :  { %v5643_v35 = vsel %vm2919_vm4, %v5513_v23, 0.0  ;;  %v2094_v23 = vsel %vm1336_vm0, %v21377_v9, %v21376_v17  ;;  %v21383_v33 = vld [vmem:[#allocation35_spill] sm:$0xff]  ;;  %v21385_v17 = vld [vmem:[#allocation33_spill] sm:$0xff]  ;;  %v2109_v42 = vsel %vm1353_vm2, %v2093_v0, %v17321_v2  ;;  %v2116_v45 = vsel %vm1353_vm2, %v2100_v49, %v17325_v24 }
 0x778   :  { %v5280_v37 = vpop.permute.xlu1 %5279  ;;  %v5230_v20 = vpop.permute.xlu0 %5229  ;;  %v5644_v15 = vrot.slane %v5643_v35, 4  ;;  %v2113_v19 = vsel %vm1353_vm2, %v21383_v33, %v21382_v3  ;;  %v5589_v57 = vadd.f32 %v5588_v1, %v5587_v61  ;;  %v2110_v38 = vsel %vm1353_vm2, %v2094_v23, %v17323_v46 }
 0x779   :  { %5474 = vperm.xlu1 %14007, %v5176_v7   ;;  %v5521_v21 = vmul.f32 %v5280_v37, %v17608_v25  ;;  %v5618_v29 = vrot.slane %v5617_v54, 2  ;;  %v17697_v49 = vsel %vm1370_vm3, %v2109_v42, %v17321_v2  ;;  %v17707_v13 = vsel %vm1370_vm3, %v2116_v45, %v17325_v24 }
 0x77a   :  { %v5645_v61 = vadd.f32 %v5644_v15, %v5643_v35  ;;  %v14078_v35 = vld [vmem:[#allocation8 + $0x70] sm:$0xff]   ;;  %21388 = vst [vmem:[#allocation73_spill] sm:$0xff] %v17697_v49 }
 0x77c   :  { %v17553_v56 = vpop.permute.xlu1 %5214  ;;  %v17555_v47 = vpop.permute.xlu0 %5269 }
 0x77d   :  { %21350 = vst [vmem:[#allocation65_spill] sm:$0xff] %v17553_v56  ;;  %5334 = vperm.xlu1 %14007, %v5148_v14   ;;  %v21369_v14 = vld [vmem:[#allocation31_spill] sm:$0xff] }
 0x77e   :  { %v2111_v26 = vsel %vm1353_vm2, %v21369_v14, %v21368_v62  ;;  %v5575_v14 = vadd.f32 %v5574_v18, %v5573_v12  ;;  %v17666_v18 = vsel %vm1370_vm3, %v2113_v19, %v21382_v3  ;;  %v17687_v3 = vsel %vm1370_vm3, %v2114_v50, %v21386_v51 }
 0x77f   :  { %v5646_v19 = vrot.slane %v5645_v61, 2 }
 0x780   :  { %v17573_v41 = vpop.permute.xlu1 %5359  ;;  %v17575_v30 = vpop.permute.xlu0 %5249  ;;  %v5576_v15 = vrot.slane %v5575_v14, 2 }
 0x781   :  { %5494 = vperm.xlu1 %14007, %v5180_v4   ;;  %v5511_v4 = vmul.f32 %v5230_v20, %v17585_v28  ;;  %v17644_v20 = vsel %vm1370_vm3, %v2111_v26, %v21368_v62  ;;  %v5699_v62 = vsel %vm2919_vm4, %v5521_v21, 0.0  ;;  %v21384_v26 = vld [vmem:[#allocation44_spill] sm:$0xff]  ;;  %v14076_v21 = vld [vmem:[#allocation8 + $0x78] sm:$0xff]   ;;  %v5515_v24 = vmul.f32 %v17575_v30, %v17653_v44 }
 0x782   :  { %v2115_v9 = vsel %vm1353_vm2, %v21385_v17, %v21384_v26  ;;  %13900 = vmatprep.subr.bf16.mxu0 %v14076_v21  ;;  %v14079_v17 = vld [vmem:[#allocation8 + $0x30] sm:$0xff]   ;;  %v5537_v51 = vmul.f32 %v17573_v41, %v17644_v20  ;;  %v5519_v41 = vmul.f32 %v17555_v47, %v17608_v25  ;;  %v14082_v47 = vld [vmem:[#allocation8 + $0x60] sm:$0xff]  }
 0x783   :  { %v5629_v12 = vsel %vm2919_vm4, %v5511_v4, 0.0  ;;  %v5700_v4 = vrot.slane %v5699_v62, 4  ;;  %v17681_v53 = vsel %vm1370_vm3, %v2115_v9, %v21384_v26  ;;  %v17693_v26 = vsel %vm1370_vm3, %v2108_v22, %v17319_v36 }
 0x784   :  { %v17591_v39 = vpop.permute.xlu1 %5349  ;;  %v17593_v34 = vpop.permute.xlu0 %5289  ;;  %v5630_v0 = vrot.slane %v5629_v12, 4  ;;  %v17701_v9 = vsel %vm1370_vm3, %v2110_v38, %v17323_v46  ;;  %v5577_v36 = vadd.f32 %v5576_v15, %v5575_v14  ;;  %v5619_v46 = vadd.f32 %v5618_v29, %v5617_v54  ;;  %v14081_v14 = vld [vmem:[#allocation8 + $0x28] sm:$0xff]  }
 0x785   :  { %5484 = vperm.xlu1 %14007, %v5178_v63   ;;  %v21379_v63 = vld [vmem:[#allocation26_spill] sm:$0xff]  ;;  %v5701_v22 = vadd.f32 %v5700_v4, %v5699_v62  ;;  %v5647_v38 = vadd.f32 %v5646_v19, %v5645_v61  ;;  %v5811_v62 = vsel %vm2919_vm4, %v5537_v51, 0.0  ;;  %v5685_v45 = vsel %vm2919_vm4, %v5519_v41, 0.0  ;;  %v14083_v19 = vld [vmem:[#allocation8 + $0x20] sm:$0xff]  }
 0x786   :  { %v2101_v37 = vsel %vm1336_vm0, %v21379_v63, %v21378_v52  ;;  %v5603_v52 = vadd.f32 %v5602_v60, %v5601_v6  ;;  %v14077_v6 = vld [vmem:[#allocation8 + $0x38] sm:$0xff]   ;;  %v5590_v60 = vrot.slane %v5589_v57, 2  ;;  %v5631_v42 = vadd.f32 %v5630_v0, %v5629_v12 }
 0x787   :  { %v2117_v23 = vsel %vm1353_vm2, %v2101_v37, %v17333_v10  ;;  %13901 = vmatpush3.bf16.msra.mxu0 %v14077_v6  ;;  %v14080_v37 = vld [vmem:[#allocation8 + $0x68] sm:$0xff]   ;;  %v5578_v61 = vrot.slane %v5577_v36, 1  ;;  %v5620_v15 = vrot.slane %v5619_v46, 1  ;;  %v5648_v0 = vrot.slane %v5647_v38, 1 }
 0x788   :  { %v17613_v7 = vpop.permute.xlu1 %5259  ;;  %v17615_v11 = vpop.permute.xlu0 %5309  ;;  %v5604_v33 = vrot.slane %v5603_v52, 2  ;;  %13902 = vmatprep.subr.bf16.mxu0 %v14078_v35  ;;  %v5591_v50 = vadd.f32 %v5590_v60, %v5589_v57  ;;  %v17711_v2 = vsel %vm1370_vm3, %v2117_v23, %v17333_v10  ;;  %v5535_v10 = vmul.f32 %v17591_v39, %v17644_v20 }
 0x789   :  { %v5632_v4 = vrot.slane %v5631_v42, 2  ;;  %v5812_v23 = vrot.slane %v5811_v62, 4  ;;  %v5621_v43 = vadd.f32 %v5620_v15, %v5619_v46  ;;  %v5517_v56 = vmul.f32 %v17613_v7, %v17653_v44 }
 0x78a   :  { %v5605_v35 = vadd.f32 %v5604_v33, %v5603_v52  ;;  %v2118_v52 = vsel %vm1353_vm2, %v17640_v32, %v17340_v59  ;;  %v5592_v30 = vrot.slane %v5591_v50, 1  ;;  %v5797_v32 = vsel %vm2919_vm4, %v5535_v10, 0.0 }
 0x78b   :  { %13903 = vmatpush3.bf16.msra.mxu0 %v14079_v17  ;;  %v5657_v17 = vsel %vm2919_vm4, %v5515_v24, 0.0  ;;  %v5798_v27 = vrot.slane %v5797_v32, 4 }
 0x78c   :  { %v17649_v40 = vpop.permute.xlu1 %5299  ;;  %v5370_v1 = vpop.permute.xlu0 %5369  ;;  %13904 = vmatprep.subr.bf16.mxu0 %v14080_v37  ;;  %v5606_v29 = vrot.slane %v5605_v35, 1  ;;  %v5658_v10 = vrot.slane %v5657_v17, 4 }
 0x78d   :  { %v5539_v57 = vmul.f32 %v5370_v1, %v17657_v16  ;;  %v5702_v1 = vrot.slane %v5701_v22, 2 }
 0x78f   :  { %v5825_v33 = vsel %vm2919_vm4, %v5539_v57, 0.0  ;;  %13905 = vmatpush3.bf16.msra.mxu0 %v14081_v14  ;;  %v5703_v41 = vadd.f32 %v5702_v1, %v5701_v22  ;;  %v5633_v57 = vadd.f32 %v5632_v4, %v5631_v42  ;;  %v5649_v22 = vadd.f32 %v5648_v0, %v5647_v38  ;;  %v14086_v1 = vld [vmem:[#allocation8 + $0x50] sm:$0xff]  }
 0x790   :  { %v17677_v63 = vpop.permute.xlu1 %5319  ;;  %v5390_v21 = vpop.permute.xlu0 %5389  ;;  %13906 = vmatprep.subr.bf16.mxu0 %v14082_v47  ;;  %v5826_v14 = vrot.slane %v5825_v33, 4  ;;  %v14085_v47 = vld [vmem:[#allocation8 + $0x18] sm:$0xff]   ;;  %v5523_v42 = vmul.f32 %v17593_v34, %v17693_v26  ;;  %v5659_v38 = vadd.f32 %v5658_v10, %v5657_v17 }
 0x791   :  { %v5543_v54 = vmul.f32 %v5390_v21, %v17666_v18  ;;  %v14084_v21 = vld [vmem:[#allocation8 + $0x58] sm:$0xff]   ;;  %v5704_v28 = vrot.slane %v5703_v41, 1 }
 0x793   :  { %v5853_v51 = vsel %vm2919_vm4, %v5543_v54, 0.0  ;;  %13907 = vmatpush3.bf16.msra.mxu0 %v14083_v19  ;;  %v5827_v19 = vadd.f32 %v5826_v14, %v5825_v33 }
 0x794   :  { %v5380_v6 = vpop.permute.xlu1 %5379  ;;  %v5854_v54 = vrot.slane %v5853_v51, 4  ;;  %13908 = vmatprep.subr.bf16.mxu0 %v14084_v21  ;;  %v5527_v21 = vmul.f32 %v17615_v11, %v17697_v49 }
 0x795   :  { %v5541_v12 = vmul.f32 %v5380_v6, %v17657_v16  ;;  %v5593_v6 = vadd.f32 %v5592_v30, %v5591_v50  ;;  %v17735_v31 = vpop.permute.xlu0 %5429  ;;  %v5607_v50 = vadd.f32 %v5606_v29, %v5605_v35  ;;  %v5813_v30 = vadd.f32 %v5812_v23, %v5811_v62 }
 0x796   :  { %v5799_v62 = vadd.f32 %v5798_v27, %v5797_v32  ;;  %v5713_v27 = vsel %vm2919_vm4, %v5523_v42, 0.0  ;;  %v5671_v23 = vsel %vm2919_vm4, %v5517_v56, 0.0  ;;  %v5660_v32 = vrot.slane %v5659_v38, 2 }
 0x797   :  { %v5839_v39 = vsel %vm2919_vm4, %v5541_v12, 0.0  ;;  %v5686_v12 = vrot.slane %v5685_v45, 4  ;;  %v6134_v35 = vsel %vm3498_vm5, %v5621_v43, %v5593_v6  ;;  %13909 = vmatpush3.bf16.msra.mxu0 %v14085_v47  ;;  %v5672_v56 = vrot.slane %v5671_v23, 4 }
 0x798   :  { %v5400_v60 = vpop.permute.xlu1 %5399  ;;  %v5840_v8 = vrot.slane %v5839_v39, 4  ;;  %v17755_v7 = vsel %vm3500_vm7, %v5649_v22, %v6134_v35  ;;  %13910 = vmatprep.subr.bf16.mxu0 %v14086_v1  ;;  %v5741_v22 = vsel %vm2919_vm4, %v5527_v21, 0.0 }
 0x799   :  { %v5545_v37 = vmul.f32 %v5400_v60, %v17666_v18  ;;  %v5579_v60 = vadd.f32 %v5578_v61, %v5577_v36  ;;  %v5687_v46 = vadd.f32 %v5686_v12, %v5685_v45  ;;  %v5855_v61 = vadd.f32 %v5854_v54, %v5853_v51  ;;  %v14087_v45 = vld [vmem:[#allocation8 + $0x10] sm:$0xff]  }
 0x79a   :  { %v5841_v15 = vadd.f32 %v5840_v8, %v5839_v39  ;;  %v17749_v8 = vsel %vm1370_vm3, %v2118_v52, %v17340_v59  ;;  %v17757_v39 = vadd.f32 %v5704_v28, %v5703_v41  ;;  %v5828_v59 = vrot.slane %v5827_v19, 2 }
 0x79b   :  { %v5867_v24 = vsel %vm2919_vm4, %v5545_v37, 0.0  ;;  %v5634_v37 = vrot.slane %v5633_v57, 1  ;;  %v17752_v34 = vsel %vm3498_vm5, %v5607_v50, %v5579_v60  ;;  %v5688_v43 = vrot.slane %v5687_v46, 2  ;;  %13911 = vmatpush3.bf16.msra.mxu0 %v14087_v45 }
 0x79c   :  { %v17733_v58 = vpop.permute.xlu1 %5439  ;;  %v5868_v25 = vrot.slane %v5867_v24, 4  ;;  %v5842_v29 = vrot.slane %v5841_v15, 2  ;;  %v5800_v51 = vrot.slane %v5799_v62, 2  ;;  %v5856_v6 = vrot.slane %v5855_v61, 2 }
 0x79d   :  { %v17744_v36 = vpop.permute.xlu0 %5329  ;;  %v17760_v0 = vadd.f32 %v5634_v37, %v5633_v57  ;;  %v5714_v41 = vrot.slane %v5713_v27, 4  ;;  %v17767_v14 = vadd.f32 %v5688_v43, %v5687_v46  ;;  %v5829_v54 = vadd.f32 %v5828_v59, %v5827_v19 }
 0x79e   :  { %v5869_v55 = vadd.f32 %v5868_v25, %v5867_v24  ;;  %v5814_v25 = vrot.slane %v5813_v30, 2  ;;  %v5525_v24 = vmul.f32 %v17649_v40, %v17693_v26  ;;  %v5843_v10 = vadd.f32 %v5842_v29, %v5841_v15 }
 0x79f   :  { %v5801_v50 = vadd.f32 %v5800_v51, %v5799_v62  ;;  %v17774_v37 = vadd.f32 %v5660_v32, %v5659_v38  ;;  %v17776_v46 = vadd.f32 %v5714_v41, %v5713_v27  ;;  %v5742_v45 = vrot.slane %v5741_v22, 4 }
 0x7a0   :  { %v17740_v4 = vpop.permute.xlu1 %5339  ;;  %v5870_v52 = vrot.slane %v5869_v55, 2  ;;  %v5815_v28 = vadd.f32 %v5814_v25, %v5813_v30  ;;  %v5857_v30 = vadd.f32 %v5856_v6, %v5855_v61  ;;  %v5727_v40 = vsel %vm2919_vm4, %v5525_v24, 0.0 }
 0x7a1   :  { %v5844_v15 = vrot.slane %v5843_v10, 1  ;;  %v5830_v25 = vrot.slane %v5829_v54, 1  ;;  %v5802_v29 = vrot.slane %v5801_v50, 1  ;;  %v5673_v61 = vadd.f32 %v5672_v56, %v5671_v23 }
 0x7a2   :  { %v5871_v47 = vadd.f32 %v5870_v52, %v5869_v55  ;;  %v5816_v42 = vrot.slane %v5815_v28, 1  ;;  %v5529_v55 = vmul.f32 %v17677_v63, %v17697_v49  ;;  %v5858_v59 = vrot.slane %v5857_v30, 1 }
 0x7a3   :  { %v5551_v27 = vmul.f32 %v17735_v31, %v17681_v53  ;;  %v5716_v32 = vrot.slane %v17776_v46, 2  ;;  %v5845_v51 = vadd.f32 %v5844_v15, %v5843_v10  ;;  %v5743_v6 = vadd.f32 %v5742_v45, %v5741_v22 }
 0x7a4   :  { %v5872_v62 = vrot.slane %v5871_v47, 1  ;;  %v5817_v38 = vadd.f32 %v5816_v42, %v5815_v28  ;;  %v5755_v63 = vsel %vm2919_vm4, %v5529_v55, 0.0  ;;  %v5831_v41 = vadd.f32 %v5830_v25, %v5829_v54 }
 0x7a5   :  { %v5420_v33 = vpop.permute.xlu1 %5419  ;;  %v5410_v17 = vpop.permute.xlu0 %5409  ;;  %v5803_v56 = vadd.f32 %v5802_v29, %v5801_v50  ;;  %v5859_v28 = vadd.f32 %v5858_v59, %v5857_v30  ;;  %v5756_v42 = vrot.slane %v5755_v63, 4  ;;  %v5909_v31 = vsel %vm2919_vm4, %v5551_v27, 0.0 }
 0x7a6   :  { %v5549_v12 = vmul.f32 %v5420_v33, %v17687_v3  ;;  %v5547_v57 = vmul.f32 %v5410_v17, %v17687_v3  ;;  %v5728_v33 = vrot.slane %v5727_v40, 4  ;;  %v6141_v49 = vsel %vm3498_vm5, %v5845_v51, %v5817_v38 }
 0x7a7   :  { %v5553_v10 = vmul.f32 %v17733_v58, %v17681_v53  ;;  %v5533_v54 = vmul.f32 %v17740_v4, %v17701_v9  ;;  %v6073_v22 = vsel %vm3498_vm5, %v5831_v41, %v5803_v56  ;;  %v5910_v45 = vrot.slane %v5909_v31, 4 }
 0x7a8   :  { %v5895_v60 = vsel %vm2919_vm4, %v5549_v12, 0.0  ;;  %v5881_v11 = vsel %vm2919_vm4, %v5547_v57, 0.0  ;;  %v5873_v12 = vadd.f32 %v5872_v62, %v5871_v47  ;;  %v5744_v4 = vrot.slane %v5743_v6, 2 }
 0x7a9   :  { %v5896_v1 = vrot.slane %v5895_v60, 4  ;;  %v5882_v35 = vrot.slane %v5881_v11, 4  ;;  %v5662_v29 = vrot.slane %v17774_v37, 1  ;;  %v5923_v27 = vsel %vm2919_vm4, %v5553_v10, 0.0 }
 0x7aa   :  { %v6142_v50 = vsel %vm3500_vm7, %v5873_v12, %v6141_v49  ;;  %v5911_v41 = vadd.f32 %v5910_v45, %v5909_v31 }
 0x7ab   :  { %v5897_v19 = vadd.f32 %v5896_v1, %v5895_v60  ;;  %v5883_v43 = vadd.f32 %v5882_v35, %v5881_v11  ;;  %v5674_v60 = vrot.slane %v5673_v61, 2  ;;  %v5729_v1 = vadd.f32 %v5728_v33, %v5727_v40 }
 0x7ac   :  { %v5757_v33 = vadd.f32 %v5756_v42, %v5755_v63  ;;  %v5663_v56 = vadd.f32 %v5662_v29, %v17774_v37  ;;  %v5912_v31 = vrot.slane %v5911_v41, 2 }
 0x7ad   :  { %v5898_v52 = vrot.slane %v5897_v19, 2  ;;  %v5884_v17 = vrot.slane %v5883_v43, 2  ;;  %v5460_v24 = vpop.permute.xlu1 %5459  ;;  %v5450_v23 = vpop.permute.xlu0 %5449  ;;  %v5675_v62 = vadd.f32 %v5674_v60, %v5673_v61  ;;  %v5730_v59 = vrot.slane %v5729_v1, 2 }
 0x7ae   :  { %v5557_v40 = vmul.f32 %v5460_v24, %v17707_v13  ;;  %v5555_v38 = vmul.f32 %v5450_v23, %v17707_v13  ;;  %v5745_v24 = vadd.f32 %v5744_v4, %v5743_v6  ;;  %v5924_v60 = vrot.slane %v5923_v27, 4 }
 0x7af   :  { %v5899_v21 = vadd.f32 %v5898_v52, %v5897_v19  ;;  %v5885_v57 = vadd.f32 %v5884_v17, %v5883_v43  ;;  %v6074_v19 = vsel %vm3500_vm7, %v5859_v28, %v6073_v22  ;;  %v5531_v43 = vmul.f32 %v17744_v36, %v17701_v9 }
 0x7b0   :  { %v5783_v52 = vsel %vm2919_vm4, %v5533_v54, 0.0  ;;  %v5951_v17 = vsel %vm2919_vm4, %v5557_v40, 0.0  ;;  %v5690_v36 = vrot.slane %v17767_v14, 1  ;;  %v5731_v42 = vadd.f32 %v5730_v59, %v5729_v1 }
 0x7b1   :  { %v5900_v11 = vrot.slane %v5899_v21, 1  ;;  %v5886_v35 = vrot.slane %v5885_v57, 1  ;;  %v5769_v23 = vsel %vm2919_vm4, %v5531_v43, 0.0  ;;  %v5784_v63 = vrot.slane %v5783_v52, 4 }
 0x7b2   :  { %v5952_v28 = vrot.slane %v5951_v17, 4  ;;  %v5746_v22 = vrot.slane %v5745_v24, 1  ;;  %v5691_v1 = vadd.f32 %v5690_v36, %v17767_v14  ;;  %v5925_v40 = vadd.f32 %v5924_v60, %v5923_v27 }
 0x7b3   :  { %v5901_v47 = vadd.f32 %v5900_v11, %v5899_v21  ;;  %v5887_v30 = vadd.f32 %v5886_v35, %v5885_v57  ;;  %v5717_v21 = vadd.f32 %v5716_v32, %v17776_v46  ;;  %v5676_v57 = vrot.slane %v5675_v62, 1 }
 0x7b4   :  { %v5937_v11 = vsel %vm2919_vm4, %v5555_v38, 0.0  ;;  %v5758_v35 = vrot.slane %v5757_v33, 2  ;;  %v6067_v32 = vsel %vm3500_vm7, %v17760_v0, %v17752_v34  ;;  %v5913_v29 = vadd.f32 %v5912_v31, %v5911_v41 }
 0x7b5   :  { %v5480_v55 = vpop.permute.xlu1 %5479  ;;  %v5470_v15 = vpop.permute.xlu0 %5469  ;;  %v17796_v25 = vsel %vm3502_vm6, %v5901_v47, %v6142_v50  ;;  %v17802_v49 = vsel %vm3502_vm6, %v5887_v30, %v6074_v19  ;;  %v5718_v6 = vrot.slane %v5717_v21, 1  ;;  %v5770_v47 = vrot.slane %v5769_v23, 4 }
 0x7b6   :  { %v5561_v58 = vmul.f32 %v5480_v55, %v17711_v2  ;;  %v5559_v61 = vmul.f32 %v5470_v15, %v17711_v2  ;;  %v5677_v37 = vadd.f32 %v5676_v57, %v5675_v62  ;;  %v5785_v50 = vadd.f32 %v5784_v63, %v5783_v52 }
 0x7b7   :  { %v5938_v30 = vrot.slane %v5937_v11, 4  ;;  %v5953_v55 = vadd.f32 %v5952_v28, %v5951_v17  ;;  %v6068_v45 = vsel %vm3502_vm6, %v5663_v56, %v6067_v32  ;;  %v5759_v4 = vadd.f32 %v5758_v35, %v5757_v33 }
 0x7b8   :  { %v5979_v12 = vsel %vm2919_vm4, %v5561_v58, 0.0  ;;  %v5965_v54 = vsel %vm2919_vm4, %v5559_v61, 0.0  ;;  %v5732_v58 = vrot.slane %v5731_v42, 1  ;;  %v5719_v0 = vadd.f32 %v5718_v6, %v5717_v21 }
 0x7b9   :  { %v17810_v51 = vpop.permute.xlu0 %5354  ;;  %v5980_v10 = vrot.slane %v5979_v12, 4  ;;  %v5966_v15 = vrot.slane %v5965_v54, 4  ;;  %v5771_v62 = vadd.f32 %v5770_v47, %v5769_v23  ;;  %v6136_v14 = vsel %vm3502_vm6, %v5677_v37, %v17755_v7 }
 0x7ba   :  { %v17831_v52 = vadd.f32 %v5746_v22, %v5745_v24  ;;  %v5786_v38 = vrot.slane %v5785_v50, 2  ;;  %v5939_v27 = vadd.f32 %v5938_v30, %v5937_v11  ;;  %v5926_v17 = vrot.slane %v5925_v40, 2 }
 0x7bb   :  { %v5981_v43 = vadd.f32 %v5980_v10, %v5979_v12  ;;  %v5954_v61 = vrot.slane %v5953_v55, 2  ;;  %v5967_v36 = vadd.f32 %v5966_v15, %v5965_v54  ;;  %v5733_v57 = vadd.f32 %v5732_v58, %v5731_v42 }
 0x7bc   :  { %v5760_v63 = vrot.slane %v5759_v4, 1  ;;  %v5914_v56 = vrot.slane %v5913_v29, 1  ;;  %v5772_v60 = vrot.slane %v5771_v62, 2  ;;  %v5787_v28 = vadd.f32 %v5786_v38, %v5785_v50 }
 0x7bd   :  { %v17819_v46 = vpop.permute.xlu0 %5184  ;;  %v5982_v21 = vrot.slane %v5981_v43, 2  ;;  %v5940_v11 = vrot.slane %v5939_v27, 2  ;;  %v6137_v10 = vsel %vm6033_vm9, %v17757_v39, %v6136_v14  ;;  %v5927_v54 = vadd.f32 %v5926_v17, %v5925_v40 }
 0x7be   :  { %v5955_v32 = vadd.f32 %v5954_v61, %v5953_v55  ;;  %v5968_v42 = vrot.slane %v5967_v36, 2  ;;  %v5761_v47 = vadd.f32 %v5760_v63, %v5759_v4  ;;  %v5773_v50 = vadd.f32 %v5772_v60, %v5771_v62 }
 0x7bf   :  { %v5983_v37 = vadd.f32 %v5982_v21, %v5981_v43  ;;  %v6138_v39 = vsel %vm6035_vm10, %v5733_v57, %v6137_v10  ;;  %v5788_v40 = vrot.slane %v5787_v28, 1  ;;  %v5941_v55 = vadd.f32 %v5940_v11, %v5939_v27 }
 0x7c0   :  { %v5500_v19 = vpop.permute.xlu1 %5499  ;;  %v5928_v38 = vrot.slane %v5927_v54, 1  ;;  %v5956_v17 = vrot.slane %v5955_v32, 1  ;;  %v5969_v4 = vadd.f32 %v5968_v42, %v5967_v36  ;;  %v6069_v61 = vsel %vm6033_vm9, %v5691_v1, %v6068_v45 }
 0x7c1   :  { %v17826_v34 = vpop.permute.xlu0 %5234  ;;  %v5565_v59 = vmul.f32 %v5500_v19, %v17749_v8  ;;  %v17841_v19 = vadd.f32 %v5914_v56, %v5913_v29  ;;  %v14089_v29 = vld [vmem:[#allocation8 + $0x8] sm:$0xff]   ;;  %v6070_v56 = vsel %vm6035_vm10, %v5719_v0, %v6069_v61  ;;  %v5774_v36 = vrot.slane %v5773_v50, 1 }
 0x7c2   :  { %v5789_v60 = vadd.f32 %v5788_v40, %v5787_v28  ;;  %v5957_v45 = vadd.f32 %v5956_v17, %v5955_v32  ;;  %v5536_v11 = vmul.f32 %v17810_v51, %v17644_v20  ;;  %v5929_v10 = vadd.f32 %v5928_v38, %v5927_v54  ;;  %v14091_v54 = vld [vmem:[#allocation8] sm:$0xff]  }
 0x7c3   :  { %v6007_v33 = vsel %vm2919_vm4, %v5565_v59, 0.0  ;;  %v5775_v32 = vadd.f32 %v5774_v36, %v5773_v50 }
 0x7c4   :  { %v5490_v12 = vpop.permute.xlu1 %5489  ;;  %v6008_v41 = vrot.slane %v6007_v33, 4  ;;  %v6144_v51 = vsel %vm6033_vm9, %v5929_v10, %v17796_v25 }
 0x7c5   :  { %v5365_v23 = vpop.permute.xlu0 %5364  ;;  %v5563_v7 = vmul.f32 %v5490_v12, %v17749_v8  ;;  %v5984_v12 = vrot.slane %v5983_v37, 1 }
 0x7c6   :  { %v5538_v24 = vmul.f32 %v5365_v23, %v17657_v16  ;;  %v6009_v35 = vadd.f32 %v6008_v41, %v6007_v33  ;;  %v14088_v33 = vld [vmem:[#allocation8 + $0x48] sm:$0xff]   ;;  %v6139_v23 = vsel %vm6037_vm11, %v5761_v47, %v6138_v39 }
 0x7c7   :  { %v5993_v6 = vsel %vm2919_vm4, %v5563_v7, 0.0  ;;  %13912 = vmatprep.subr.bf16.mxu0 %v14088_v33  ;;  %v5942_v7 = vrot.slane %v5941_v55, 1  ;;  %v5985_v42 = vadd.f32 %v5984_v12, %v5983_v37  ;;  %v6140_v40 = vsel %vm6039_vm12, %v5789_v60, %v6139_v23 }
 0x7c8   :  { %v5375_v31 = vpop.permute.xlu1 %5374  ;;  %v6010_v22 = vrot.slane %v6009_v35, 2  ;;  %v5994_v30 = vrot.slane %v5993_v6, 4  ;;  %v5818_v58 = vsel %vm2919_vm4, %v5538_v24, 0.0  ;;  %13913 = vmatpush3.bf16.msra.mxu0 %v14089_v29  ;;  %v5970_v24 = vrot.slane %v5969_v4, 1 }
 0x7c9   :  { %v17839_v15 = vpop.permute.xlu0 %5224  ;;  %v5819_v63 = vrot.slane %v5818_v58, 4  ;;  %v5540_v21 = vmul.f32 %v5375_v31, %v17657_v16  ;;  %v5943_v39 = vadd.f32 %v5942_v7, %v5941_v55 }
 0x7ca   :  { %v6011_v59 = vadd.f32 %v6010_v22, %v6009_v35  ;;  %v5995_v14 = vadd.f32 %v5994_v30, %v5993_v6  ;;  %v5971_v37 = vadd.f32 %v5970_v24, %v5969_v4  ;;  %v6076_v4 = vsel %vm6033_vm9, %v17841_v19, %v17802_v49 }
 0x7cb   :  { %v5820_v6 = vadd.f32 %v5819_v63, %v5818_v58  ;;  %v5832_v31 = vsel %vm2919_vm4, %v5540_v21, 0.0  ;;  %v5804_v58 = vsel %vm2919_vm4, %v5536_v11, 0.0 }
 0x7cc   :  { %v17845_v43 = vpop.permute.xlu1 %5204  ;;  %v5996_v62 = vrot.slane %v5995_v14, 2  ;;  %v6012_v57 = vrot.slane %v6011_v59, 1  ;;  %v5833_v61 = vrot.slane %v5832_v31, 4 }
 0x7cd   :  { %v5385_v41 = vpop.permute.xlu0 %5384  ;;  %v5821_v12 = vrot.slane %v5820_v6, 2 }
 0x7ce   :  { %v5542_v27 = vmul.f32 %v5385_v41, %v17666_v18  ;;  %v5997_v1 = vadd.f32 %v5996_v62, %v5995_v14  ;;  %v6013_v47 = vadd.f32 %v6012_v57, %v6011_v59  ;;  %v14090_v14 = vld [vmem:[#allocation8 + $0x40] sm:$0xff]   ;;  %v6145_v59 = vsel %vm6035_vm10, %v5957_v45, %v6144_v51 }
 0x7cf   :  { %v6146_v50 = vsel %vm6037_vm11, %v5985_v42, %v6145_v59  ;;  %13914 = vmatprep.subr.bf16.mxu0 %v14090_v14  ;;  %v5805_v62 = vrot.slane %v5804_v58, 4  ;;  %v6077_v41 = vsel %vm6035_vm10, %v5943_v39, %v6076_v4  ;;  %v5834_v60 = vadd.f32 %v5833_v61, %v5832_v31 }
 0x7d0   :  { %v5846_v16 = vsel %vm2919_vm4, %v5542_v27, 0.0  ;;  %v5345_v35 = vpop.permute.xlu1 %5344  ;;  %v5998_v28 = vrot.slane %v5997_v1, 1  ;;  %v6147_v25 = vsel %vm6039_vm12, %v6013_v47, %v6146_v50  ;;  %13915 = vmatpush3.bf16.msra.mxu0 %v14091_v54  ;;  %v6071_v27 = vsel %vm6037_vm11, %v17831_v52, %v6070_v56 }
 0x7d1   :  { %v17856_v0 = vpop.permute.xlu0 %5244  ;;  %v5847_v22 = vrot.slane %v5846_v16, 4  ;;  %v5534_v30 = vmul.f32 %v5345_v35, %v17644_v20  ;;  %v14008_v21 = vpack.i.bf16 %v6147_v25, %v6140_v40  ;;  %v6078_v23 = vsel %vm6037_vm11, %v5971_v37, %v6077_v41 }
 0x7d2   :  { %v5999_v29 = vadd.f32 %v5998_v28, %v5997_v1  ;;  %v5822_v45 = vadd.f32 %v5821_v12, %v5820_v6  ;;  %v5806_v56 = vadd.f32 %v5805_v62, %v5804_v58  ;;  %v5835_v47 = vrot.slane %v5834_v60, 2 }
 0x7d3   :  { %v5790_v38 = vsel %vm2919_vm4, %v5534_v30, 0.0  ;;  %v5848_v33 = vadd.f32 %v5847_v22, %v5846_v16  ;;  %14009 = vrot.lane.b32.xlu0 %v14008_v21, %s14860_s11 }
 0x7d4   :  { %v5395_v17 = vpop.permute.xlu1 %5394  ;;  %v5791_v20 = vrot.slane %v5790_v38, 4  ;;  %v6079_v52 = vsel %vm6039_vm12, %v5999_v29, %v6078_v23  ;;  %v5823_v6 = vrot.slane %v5822_v45, 1 }
 0x7d5   :  { %v5405_v55 = vpop.permute.xlu0 %5404  ;;  %v5544_v57 = vmul.f32 %v5395_v17, %v17666_v18  ;;  %v5849_v7 = vrot.slane %v5848_v33, 2  ;;  %v6072_v18 = vsel %vm6039_vm12, %v5775_v32, %v6071_v27  ;;  %v5807_v32 = vrot.slane %v5806_v56, 2 }
 0x7d6   :  { %v5792_v63 = vadd.f32 %v5791_v20, %v5790_v38  ;;  %v5546_v49 = vmul.f32 %v5405_v55, %v17687_v3  ;;  %v14013_v42 = vpack.i.bf16 %v6079_v52, %v6072_v18  ;;  %v5836_v38 = vadd.f32 %v5835_v47, %v5834_v60 }
 0x7d7   :  { %v5860_v24 = vsel %vm2919_vm4, %v5544_v57, 0.0  ;;  %v5850_v28 = vadd.f32 %v5849_v7, %v5848_v33  ;;  %v5824_v33 = vadd.f32 %v5823_v6, %v5822_v45  ;;  %v5808_v55 = vadd.f32 %v5807_v32, %v5806_v56 }
 0x7d8   :  { %v17875_v36 = vpop.permute.xlu1 %5254  ;;  %v5793_v1 = vrot.slane %v5792_v63, 2  ;;  %v5861_v16 = vrot.slane %v5860_v24, 4  ;;  %v5874_v35 = vsel %vm2919_vm4, %v5546_v49, 0.0  ;;  %14014 = vrot.lane.b32.xlu1 %v14013_v42, %s14860_s11 }
 0x7d9   :  { %v17879_v19 = vpop.permute.xlu0 %5264  ;;  %v5875_v10 = vrot.slane %v5874_v35, 4  ;;  %v5851_v59 = vrot.slane %v5850_v28, 1  ;;  %v5809_v27 = vrot.slane %v5808_v55, 1 }
 0x7da   :  { %v5794_v11 = vadd.f32 %v5793_v1, %v5792_v63  ;;  %v5862_v30 = vadd.f32 %v5861_v16, %v5860_v24 }
 0x7db   :  { %v5876_v40 = vadd.f32 %v5875_v10, %v5874_v35  ;;  %v5852_v62 = vadd.f32 %v5851_v59, %v5850_v28  ;;  %v5810_v18 = vadd.f32 %v5809_v27, %v5808_v55 }
 0x7dc   :  { %v5415_v31 = vpop.permute.xlu1 %5414  ;;  %v5795_v22 = vrot.slane %v5794_v11, 1  ;;  %v5863_v51 = vrot.slane %v5862_v30, 2 }
 0x7dd   :  { %v5425_v39 = vpop.permute.xlu0 %5424  ;;  %v5548_v14 = vmul.f32 %v5415_v31, %v17687_v3  ;;  %v5877_v37 = vrot.slane %v5876_v40, 2  ;;  %v5837_v3 = vrot.slane %v5836_v38, 1 }
 0x7de   :  { %v5796_v54 = vadd.f32 %v5795_v22, %v5794_v11  ;;  %v5864_v20 = vadd.f32 %v5863_v51, %v5862_v30  ;;  %v5550_v47 = vmul.f32 %v5425_v39, %v17681_v53 }
 0x7df   :  { %v5888_v17 = vsel %vm2919_vm4, %v5548_v14, 0.0  ;;  %v5878_v50 = vadd.f32 %v5877_v37, %v5876_v40  ;;  %v5838_v49 = vadd.f32 %v5837_v3, %v5836_v38 }
 0x7e0   :  { %v17887_v58 = vpop.permute.xlu1 %5274  ;;  %v5889_v29 = vrot.slane %v5888_v17, 4  ;;  %v6041_v12 = vsel %vm3498_vm5, %v5824_v33, %v5796_v54  ;;  %v5865_v41 = vrot.slane %v5864_v20, 1  ;;  %v5902_v40 = vsel %vm2919_vm4, %v5550_v47, 0.0 }
 0x7e1   :  { %v17890_v61 = vpop.permute.xlu0 %5284  ;;  %v5879_v25 = vrot.slane %v5878_v50, 1  ;;  %v6042_v23 = vsel %vm3500_vm7, %v5852_v62, %v6041_v12  ;;  %v6109_v35 = vsel %vm3498_vm5, %v5838_v49, %v5810_v18 }
 0x7e2   :  { %v5890_v63 = vadd.f32 %v5889_v29, %v5888_v17  ;;  %v5866_v24 = vadd.f32 %v5865_v41, %v5864_v20 }
 0x7e3   :  { %v5880_v57 = vadd.f32 %v5879_v25, %v5878_v50 }
 0x7e4   :  { %v5435_v4 = vpop.permute.xlu1 %5434  ;;  %v5891_v60 = vrot.slane %v5890_v63, 2  ;;  %v6110_v42 = vsel %vm3500_vm7, %v5866_v24, %v6109_v35 }
 0x7e5   :  { %v5445_v21 = vpop.permute.xlu0 %5444  ;;  %v17895_v7 = vsel %vm3502_vm6, %v5880_v57, %v6042_v23  ;;  %v5552_v11 = vmul.f32 %v5435_v4, %v17681_v53  ;;  %v5903_v53 = vrot.slane %v5902_v40, 4 }
 0x7e6   :  { %v5892_v45 = vadd.f32 %v5891_v60, %v5890_v63  ;;  %v5554_v22 = vmul.f32 %v5445_v21, %v17707_v13 }
 0x7e7   :  { %v5916_v28 = vsel %vm2919_vm4, %v5552_v11, 0.0  ;;  %v5904_v29 = vadd.f32 %v5903_v53, %v5902_v40 }
 0x7e8   :  { %v17897_v1 = vpop.permute.xlu1 %5294  ;;  %v5893_v52 = vrot.slane %v5892_v45, 1  ;;  %v5917_v32 = vrot.slane %v5916_v28, 4  ;;  %v5930_v14 = vsel %vm2919_vm4, %v5554_v22, 0.0 }
 0x7e9   :  { %v17899_v56 = vpop.permute.xlu0 %5304  ;;  %v5931_v17 = vrot.slane %v5930_v14, 4  ;;  %v5905_v21 = vrot.slane %v5904_v29, 2 }
 0x7ea   :  { %v5894_v10 = vadd.f32 %v5893_v52, %v5892_v45  ;;  %v5918_v59 = vadd.f32 %v5917_v32, %v5916_v28 }
 0x7eb   :  { %v5906_v52 = vadd.f32 %v5905_v21, %v5904_v29 }
 0x7ec   :  { %v5455_v16 = vpop.permute.xlu1 %5454  ;;  %v17905_v31 = vsel %vm3502_vm6, %v5894_v10, %v6110_v42  ;;  %v5919_v12 = vrot.slane %v5918_v59, 2 }
 0x7ed   :  { %v5465_v6 = vpop.permute.xlu0 %5464  ;;  %v5556_v51 = vmul.f32 %v5455_v16, %v17707_v13  ;;  %v5932_v13 = vadd.f32 %v5931_v17, %v5930_v14  ;;  %v5907_v32 = vrot.slane %v5906_v52, 1 }
 0x7ee   :  { %v5558_v54 = vmul.f32 %v5465_v6, %v17711_v2  ;;  %v5920_v57 = vadd.f32 %v5919_v12, %v5918_v59 }
 0x7ef   :  { %v5944_v38 = vsel %vm2919_vm4, %v5556_v51, 0.0  ;;  %v5933_v27 = vrot.slane %v5932_v13, 2 }
 0x7f0   :  { %v17910_v30 = vpop.permute.xlu1 %5314  ;;  %v5945_v39 = vrot.slane %v5944_v38, 4  ;;  %v5958_v33 = vsel %vm2919_vm4, %v5558_v54, 0.0 }
 0x7f1   :  { %v5959_v55 = vrot.slane %v5958_v33, 4  ;;  %v5934_v35 = vadd.f32 %v5933_v27, %v5932_v13 }
 0x7f2   :  { %v5946_v20 = vadd.f32 %v5945_v39, %v5944_v38 }
 0x7f3   :  { %v5960_v4 = vadd.f32 %v5959_v55, %v5958_v33  ;;  %v5935_v54 = vrot.slane %v5934_v35, 1  ;;  %v5908_v33 = vadd.f32 %v5907_v32, %v5906_v52 }
 0x7f4   :  { %v5475_v37 = vpop.permute.xlu1 %5474  ;;  %v5947_v25 = vrot.slane %v5946_v20, 2 }
 0x7f5   :  { %v5560_v3 = vmul.f32 %v5475_v37, %v17711_v2  ;;  %v5961_v49 = vrot.slane %v5960_v4, 2  ;;  %v5921_v2 = vrot.slane %v5920_v57, 1  ;;  %v5936_v29 = vadd.f32 %v5935_v54, %v5934_v35  ;;  %v21392_v35 = vld [vmem:[#allocation80_spill] sm:$0xff] }
 0x7f6   :  { %v5948_v60 = vadd.f32 %v5947_v25, %v5946_v20 }
 0x7f7   :  { %v5972_v41 = vsel %vm2919_vm4, %v5560_v3, 0.0  ;;  %v5962_v47 = vadd.f32 %v5961_v49, %v5960_v4  ;;  %v5922_v14 = vadd.f32 %v5921_v2, %v5920_v57  ;;  %v21390_v49 = vld [vmem:[#allocation65_spill] sm:$0xff]  ;;  %v5502_v2 = vmul.f32 %v17819_v46, %v17571_v5 }
 0x7f8   :  { %v17918_v50 = vpop.permute.xlu1 %5334  ;;  %v5973_v23 = vrot.slane %v5972_v41, 4  ;;  %v5949_v42 = vrot.slane %v5948_v60, 1 }
 0x7f9   :  { %v5963_v39 = vrot.slane %v5962_v47, 1  ;;  %v6112_v55 = vsel %vm6033_vm9, %v5922_v14, %v17905_v31  ;;  %v5566_v46 = vsel %vm2919_vm4, %v5502_v2, 0.0  ;;  %v5325_v14 = vpop.permute.xlu0 %5324 }
 0x7fa   :  { %v5974_v18 = vadd.f32 %v5973_v23, %v5972_v41  ;;  %v5950_v53 = vadd.f32 %v5949_v42, %v5948_v60  ;;  %v5504_v23 = vmul.f32 %v17532_v48, %v17571_v5  ;;  %v21389_v60 = vld [vmem:[#allocation64_spill] sm:$0xff]  ;;  %v5524_v42 = vmul.f32 %v17897_v1, %v17693_v26 }
 0x7fb   :  { %v5964_v13 = vadd.f32 %v5963_v39, %v5962_v47  ;;  %v5506_v48 = vmul.f32 %v17845_v43, %v21389_v60  ;;  %v5532_v5 = vmul.f32 %v17918_v50, %v17701_v9  ;;  %v5567_v39 = vrot.slane %v5566_v46, 4 }
 0x7fc   :  { %v5495_v62 = vpop.permute.xlu1 %5494  ;;  %v5975_v10 = vrot.slane %v5974_v18, 2  ;;  %v6113_v4 = vsel %vm6035_vm10, %v5950_v53, %v6112_v55 }
 0x7fd   :  { %v5564_v63 = vmul.f32 %v5495_v62, %v17749_v8  ;;  %v5594_v43 = vsel %vm2919_vm4, %v5506_v48, 0.0 }
 0x7fe   :  { %v5976_v6 = vadd.f32 %v5975_v10, %v5974_v18  ;;  %v5520_v10 = vmul.f32 %v17887_v58, %v21392_v35  ;;  %v5514_v58 = vmul.f32 %v17856_v0, %v17653_v44 }
 0x7ff   :  { %v6000_v45 = vsel %vm2919_vm4, %v5564_v63, 0.0  ;;  %v6044_v63 = vsel %vm6033_vm9, %v5908_v33, %v17895_v7  ;;  %v21391_v7 = vld [vmem:[#allocation85_spill] sm:$0xff] }
 0x800   :  { %v5485_v24 = vpop.permute.xlu1 %5484  ;;  %v6001_v11 = vrot.slane %v6000_v45, 4  ;;  %v5977_v37 = vrot.slane %v5976_v6, 1  ;;  %v6045_v41 = vsel %vm6035_vm10, %v5936_v29, %v6044_v63  ;;  %v5512_v18 = vmul.f32 %v17826_v34, %v21391_v7 }
 0x801   :  { %v5562_v16 = vmul.f32 %v5485_v24, %v17749_v8  ;;  %v6046_v31 = vsel %vm6037_vm11, %v5964_v13, %v6045_v41  ;;  %v5580_v24 = vsel %vm2919_vm4, %v5504_v23, 0.0  ;;  %v5692_v1 = vsel %vm2919_vm4, %v5520_v10, 0.0 }
 0x802   :  { %v6002_v28 = vadd.f32 %v6001_v11, %v6000_v45  ;;  %v5978_v8 = vadd.f32 %v5977_v37, %v5976_v6  ;;  %v5508_v45 = vmul.f32 %v21390_v49, %v21389_v60  ;;  %v5581_v52 = vrot.slane %v5580_v24, 4 }
 0x803   :  { %v5986_v22 = vsel %vm2919_vm4, %v5562_v16, 0.0  ;;  %v5516_v16 = vmul.f32 %v17875_v36, %v17653_v44  ;;  %v5636_v34 = vsel %vm2919_vm4, %v5512_v18, 0.0  ;;  %v5510_v32 = vmul.f32 %v17839_v15, %v21391_v7 }
 0x804   :  { %v5987_v40 = vrot.slane %v5986_v22, 4  ;;  %v6003_v51 = vrot.slane %v6002_v28, 2  ;;  %v6114_v62 = vsel %vm6037_vm11, %v5978_v8, %v6113_v4  ;;  %v5608_v11 = vsel %vm2919_vm4, %v5508_v45, 0.0 }
 0x805   :  { %v5609_v47 = vrot.slane %v5608_v11, 4  ;;  %v5582_v6 = vadd.f32 %v5581_v52, %v5580_v24  ;;  %v5664_v36 = vsel %vm2919_vm4, %v5516_v16, 0.0  ;;  %v5522_v37 = vmul.f32 %v17890_v61, %v17693_v26 }
 0x806   :  { %v5988_v38 = vadd.f32 %v5987_v40, %v5986_v22  ;;  %v6004_v59 = vadd.f32 %v6003_v51, %v6002_v28  ;;  %v21393_v28 = vld [vmem:[#allocation73_spill] sm:$0xff]  ;;  %v5637_v40 = vrot.slane %v5636_v34, 4  ;;  %v5720_v51 = vsel %vm2919_vm4, %v5524_v42, 0.0 }
 0x807   :  { %v5528_v22 = vmul.f32 %v17910_v30, %v21393_v28  ;;  %v5518_v30 = vmul.f32 %v17879_v19, %v21392_v35  ;;  %v5610_v50 = vadd.f32 %v5609_v47, %v5608_v11  ;;  %v5665_v54 = vrot.slane %v5664_v36, 4 }
 0x808   :  { %v5989_v17 = vrot.slane %v5988_v38, 2  ;;  %v6005_v20 = vrot.slane %v6004_v59, 1  ;;  %v5595_v44 = vrot.slane %v5594_v43, 4  ;;  %v5693_v0 = vrot.slane %v5692_v1, 4 }
 0x809   :  { %v5526_v53 = vmul.f32 %v17899_v56, %v21393_v28  ;;  %v5776_v15 = vsel %vm2919_vm4, %v5532_v5, 0.0  ;;  %v5650_v19 = vsel %vm2919_vm4, %v5514_v58, 0.0  ;;  %v5530_v8 = vmul.f32 %v5325_v14, %v17701_v9 }
 0x80a   :  { %v5990_v12 = vadd.f32 %v5989_v17, %v5988_v38  ;;  %v6006_v25 = vadd.f32 %v6005_v20, %v6004_v59  ;;  %v5748_v38 = vsel %vm2919_vm4, %v5528_v22, 0.0  ;;  %v5721_v59 = vrot.slane %v5720_v51, 4 }
 0x80b   :  { %v5638_v17 = vadd.f32 %v5637_v40, %v5636_v34  ;;  %v5622_v33 = vsel %vm2919_vm4, %v5510_v32, 0.0  ;;  %v5678_v26 = vsel %vm2919_vm4, %v5518_v30, 0.0  ;;  %v5749_v61 = vrot.slane %v5748_v38, 4 }
 0x80c   :  { %v5991_v3 = vrot.slane %v5990_v12, 1  ;;  %v17933_v21 = vsel %vm6039_vm12, %v6006_v25, %v6114_v62  ;;  %v5611_v20 = vrot.slane %v5610_v50, 2  ;;  %v5666_v55 = vadd.f32 %v5665_v54, %v5664_v36 }
 0x80d   :  { %v5706_v29 = vsel %vm2919_vm4, %v5522_v37, 0.0  ;;  %v5596_v56 = vadd.f32 %v5595_v44, %v5594_v43  ;;  %v5651_v13 = vrot.slane %v5650_v19, 4  ;;  %v5694_v25 = vadd.f32 %v5693_v0, %v5692_v1 }
 0x80e   :  { %v5992_v57 = vadd.f32 %v5991_v3, %v5990_v12  ;;  %v5777_v12 = vrot.slane %v5776_v15, 4  ;;  %v5734_v4 = vsel %vm2919_vm4, %v5526_v53, 0.0  ;;  %v5623_v3 = vrot.slane %v5622_v33, 4 }
 0x80f   :  { %v5679_v62 = vrot.slane %v5678_v26, 4  ;;  %v5722_v63 = vadd.f32 %v5721_v59, %v5720_v51  ;;  %v5762_v9 = vsel %vm2919_vm4, %v5530_v8, 0.0  ;;  %v5568_v41 = vadd.f32 %v5567_v39, %v5566_v46 }
 0x810   :  { %v17938_v27 = vsel %vm6039_vm12, %v5992_v57, %v6046_v31  ;;  %v5639_v57 = vrot.slane %v5638_v17, 2  ;;  %v5707_v31 = vrot.slane %v5706_v29, 4  ;;  %v5750_v23 = vadd.f32 %v5749_v61, %v5748_v38 }
 0x811   :  { %v5583_v60 = vrot.slane %v5582_v6, 2  ;;  %v5667_v49 = vrot.slane %v5666_v55, 2  ;;  %v5735_v45 = vrot.slane %v5734_v4, 4  ;;  %v5778_v24 = vadd.f32 %v5777_v12, %v5776_v15 }
 0x812   :  { %v5597_v7 = vrot.slane %v5596_v56, 2  ;;  %v5652_v18 = vadd.f32 %v5651_v13, %v5650_v19  ;;  %v5695_v52 = vrot.slane %v5694_v25, 2  ;;  %v5763_v11 = vrot.slane %v5762_v9, 4 }
 0x813   :  { %v5612_v16 = vadd.f32 %v5611_v20, %v5610_v50  ;;  %v5624_v2 = vadd.f32 %v5623_v3, %v5622_v33  ;;  %v5680_v48 = vadd.f32 %v5679_v62, %v5678_v26  ;;  %v5723_v35 = vrot.slane %v5722_v63, 2 }
 0x814   :  { %v5569_v10 = vrot.slane %v5568_v41, 2  ;;  %v5640_v42 = vadd.f32 %v5639_v57, %v5638_v17  ;;  %v5708_v47 = vadd.f32 %v5707_v31, %v5706_v29  ;;  %v5751_v34 = vrot.slane %v5750_v23, 2 }
 0x815   :  { %v5584_v28 = vadd.f32 %v5583_v60, %v5582_v6  ;;  %v5668_v22 = vadd.f32 %v5667_v49, %v5666_v55  ;;  %v5736_v36 = vadd.f32 %v5735_v45, %v5734_v4  ;;  %v5779_v5 = vrot.slane %v5778_v24, 2 }
 0x816   :  { %v5598_v46 = vadd.f32 %v5597_v7, %v5596_v56  ;;  %v5653_v43 = vrot.slane %v5652_v18, 2  ;;  %v5696_v58 = vadd.f32 %v5695_v52, %v5694_v25  ;;  %v5764_v1 = vadd.f32 %v5763_v11, %v5762_v9 }
 0x817   :  { %v5613_v40 = vrot.slane %v5612_v16, 1  ;;  %v5625_v32 = vrot.slane %v5624_v2, 2  ;;  %v5681_v30 = vrot.slane %v5680_v48, 2  ;;  %v5724_v51 = vadd.f32 %v5723_v35, %v5722_v63 }
 0x818   :  { %v5570_v14 = vadd.f32 %v5569_v10, %v5568_v41  ;;  %v5641_v50 = vrot.slane %v5640_v42, 1  ;;  %v5709_v54 = vrot.slane %v5708_v47, 2  ;;  %v5752_v37 = vadd.f32 %v5751_v34, %v5750_v23 }
 0x819   :  { %v5585_v38 = vrot.slane %v5584_v28, 1  ;;  %v5669_v44 = vrot.slane %v5668_v22, 1  ;;  %v5737_v0 = vrot.slane %v5736_v36, 2  ;;  %v5780_v53 = vadd.f32 %v5779_v5, %v5778_v24 }
 0x81a   :  { %v5599_v6 = vrot.slane %v5598_v46, 1  ;;  %v5654_v15 = vadd.f32 %v5653_v43, %v5652_v18  ;;  %v5697_v39 = vrot.slane %v5696_v58, 1  ;;  %v5765_v19 = vrot.slane %v5764_v1, 2 }
 0x81b   :  { %v5614_v59 = vadd.f32 %v5613_v40, %v5612_v16  ;;  %v5626_v8 = vadd.f32 %v5625_v32, %v5624_v2  ;;  %v5682_v17 = vadd.f32 %v5681_v30, %v5680_v48  ;;  %v5725_v33 = vrot.slane %v5724_v51, 1 }
 0x81c   :  { %v5571_v26 = vrot.slane %v5570_v14, 1  ;;  %v5642_v61 = vadd.f32 %v5641_v50, %v5640_v42  ;;  %v5710_v20 = vadd.f32 %v5709_v54, %v5708_v47  ;;  %v5753_v55 = vrot.slane %v5752_v37, 1 }
 0x81d   :  { %v5586_v29 = vadd.f32 %v5585_v38, %v5584_v28  ;;  %v5670_v12 = vadd.f32 %v5669_v44, %v5668_v22  ;;  %v5738_v56 = vadd.f32 %v5737_v0, %v5736_v36  ;;  %v5781_v13 = vrot.slane %v5780_v53, 1 }
 0x81e   :  { %v5600_v25 = vadd.f32 %v5599_v6, %v5598_v46  ;;  %v5655_v4 = vrot.slane %v5654_v15, 1  ;;  %v5698_v3 = vadd.f32 %v5697_v39, %v5696_v58  ;;  %v5766_v62 = vadd.f32 %v5765_v19, %v5764_v1  ;;  %v14094_v6 = vld [vmem:[#allocation10 + $0xe4] ss:$16 sps:$4 sm:$0xff]   ;;  %v14097_v39 = vld [vmem:[#allocation10 + $0xec] ss:$16 sps:$4 sm:$0xff]  }
 0x81f   :  { %v6102_v63 = vsel %vm3498_vm5, %v5614_v59, %v5586_v29  ;;  %v5627_v9 = vrot.slane %v5626_v8, 1  ;;  %v5683_v41 = vrot.slane %v5682_v17, 1  ;;  %v5726_v57 = vadd.f32 %v5725_v33, %v5724_v51  ;;  %v14100_v19 = vld [vmem:[#allocation10 + $0xc4] ss:$16 sps:$4 sm:$0xff]   ;;  %6539 = vmatprep.subr.bf16.mxu1 %v14094_v6  ;;  %v14103_v59 = vld [vmem:[#allocation10 + $0xcc] ss:$16 sps:$4 sm:$0xff]   ;;  %6582 = vmatprep.subr.bf16.mxu0 %v14097_v39 }
 0x820   :  { %v5572_v31 = vadd.f32 %v5571_v26, %v5570_v14  ;;  %v6103_v23 = vsel %vm3500_vm7, %v5642_v61, %v6102_v63  ;;  %v5711_v60 = vrot.slane %v5710_v20, 1  ;;  %v5754_v49 = vadd.f32 %v5753_v55, %v5752_v37  ;;  %v14107_v63 = vld [vmem:[#allocation10 + $0xa8] ss:$16 sps:$4 sm:$0xff]   ;;  %v14151_v39 = vld [vmem:[#allocation11 + $0x10] sm:$0xff]  }
 0x821   :  { %v6104_v45 = vsel %vm3502_vm6, %v5670_v12, %v6103_v23  ;;  %v5739_v24 = vrot.slane %v5738_v56, 1  ;;  %v5782_v7 = vadd.f32 %v5781_v13, %v5780_v53  ;;  %v5656_v52 = vadd.f32 %v5655_v4, %v5654_v15  ;;  %v14092_v53 = vld [vmem:[#allocation10 + $0xe0] ss:$16 sps:$4 sm:$0xff]   ;;  %v14095_v15 = vld [vmem:[#allocation10 + $0xe8] ss:$16 sps:$4 sm:$0xff]  }
 0x822   :  { %v6030_v18 = vsel %vm3498_vm5, %v5600_v25, %v5572_v31  ;;  %v6105_v11 = vsel %vm6033_vm9, %v5698_v3, %v6104_v45  ;;  %v5767_v16 = vrot.slane %v5766_v62, 1  ;;  %v5628_v2 = vadd.f32 %v5627_v9, %v5626_v8  ;;  %6540 = vmatpush1.bf16.msra.mxu1 %v14092_v53  ;;  %v14098_v8 = vld [vmem:[#allocation10 + $0xc0] ss:$16 sps:$4 sm:$0xff]   ;;  %v14683_v13 = vld [vmem:[#allocation2 + $0x8] sm:$0xff]  ;;  %v14148_v53 = vld [vmem:[#allocation11 + $0x58] sm:$0xff]  }
 0x823   :  { %v5684_v48 = vadd.f32 %v5683_v41, %v5682_v17  ;;  %v6106_v10 = vsel %vm6035_vm10, %v5726_v57, %v6105_v11  ;;  %v5712_v42 = vadd.f32 %v5711_v60, %v5710_v20  ;;  %v5740_v36 = vadd.f32 %v5739_v24, %v5738_v56  ;;  %6541 = vmatprep.subr.bf16.mxu1 %v14100_v19  ;;  %v14101_v17 = vld [vmem:[#allocation10 + $0xc8] ss:$16 sps:$4 sm:$0xff]   ;;  %v14682_v20 = vld [vmem:[#allocation2] sm:$0xff]  ;;  %v14109_v9 = vld [vmem:[#allocation10 + $0xac] ss:$16 sps:$4 sm:$0xff]  }
 0x824   :  { %v6107_v28 = vsel %vm6037_vm11, %v5754_v49, %v6106_v10  ;;  %v6031_v22 = vsel %vm3500_vm7, %v5628_v2, %v6030_v18  ;;  %v5768_v43 = vadd.f32 %v5767_v16, %v5766_v62  ;;  %v14104_v3 = vld [vmem:[#allocation10 + $0xa0] ss:$16 sps:$4 sm:$0xff]   ;;  %v14106_v62 = vld [vmem:[#allocation10 + $0xa4] ss:$16 sps:$4 sm:$0xff]   ;;  %v14113_v31 = vld [vmem:[#allocation10 + $0x88] ss:$16 sps:$4 sm:$0xff]  }
 0x825   :  { %v6108_v5 = vsel %vm6039_vm12, %v5782_v7, %v6107_v28  ;;  %v6032_v46 = vsel %vm3502_vm6, %v5656_v52, %v6031_v22  ;;  %v14110_v41 = vld [vmem:[#allocation10 + $0x80] ss:$16 sps:$4 sm:$0xff]   ;;  %v14112_v57 = vld [vmem:[#allocation10 + $0x84] ss:$16 sps:$4 sm:$0xff]   ;;  %v14115_v23 = vld [vmem:[#allocation10 + $0x8c] ss:$16 sps:$4 sm:$0xff]  }
 0x826   :  { %v6034_v40 = vsel %vm6033_vm9, %v5684_v48, %v6032_v46  ;;  %6542 = vmatpush1.bf16.msra.mxu1 %v14098_v8  ;;  %v14118_v60 = vld [vmem:[#allocation10 + $0x64] ss:$16 sps:$4 sm:$0xff]   ;;  %v14121_v49 = vld [vmem:[#allocation10 + $0x6c] ss:$16 sps:$4 sm:$0xff]   ;;  %v14116_v45 = vld [vmem:[#allocation10 + $0x60] ss:$16 sps:$4 sm:$0xff]  }
 0x827   :  { %v6036_v30 = vsel %vm6035_vm10, %v5712_v42, %v6034_v40  ;;  %6543 = vmatprep.subr.bf16.mxu1 %v14106_v62  ;;  %v14119_v24 = vld [vmem:[#allocation10 + $0x68] ss:$16 sps:$4 sm:$0xff]   ;;  %v14124_v7 = vld [vmem:[#allocation10 + $0x44] ss:$16 sps:$4 sm:$0xff]   ;;  %v14127_v18 = vld [vmem:[#allocation10 + $0x4c] ss:$16 sps:$4 sm:$0xff]  }
 0x828   :  { %v6038_v54 = vsel %vm6037_vm11, %v5740_v36, %v6036_v30  ;;  %v14122_v52 = vld [vmem:[#allocation10 + $0x40] ss:$16 sps:$4 sm:$0xff]   ;;  %v14125_v11 = vld [vmem:[#allocation10 + $0x48] ss:$16 sps:$4 sm:$0xff]   ;;  %v14130_v16 = vld [vmem:[#allocation10 + $0x24] ss:$16 sps:$4 sm:$0xff]  }
 0x829   :  { %v6040_v37 = vsel %vm6039_vm12, %v5768_v43, %v6038_v54  ;;  %v14133_v2 = vld [vmem:[#allocation10 + $0x2c] ss:$16 sps:$4 sm:$0xff]   ;;  %v14128_v48 = vld [vmem:[#allocation10 + $0x20] ss:$16 sps:$4 sm:$0xff]   ;;  %v14136_v10 = vld [vmem:[#allocation10 + $0x4] ss:$16 sps:$4 sm:$0xff]  }
 0x82a   :  { %6544 = vmatpush1.bf16.msra.mxu1 %v14104_v3  ;;  %v14139_v42 = vld [vmem:[#allocation10 + $0xc] ss:$16 sps:$4 sm:$0xff]   ;;  %v14143_v54 = vld [vmem:[#allocation11 + $0x30] sm:$0xff]   ;;  %v14154_v8 = vld [vmem:[#allocation11 + $0x40] sm:$0xff]  }
 0x82b   :  { %6545 = vmatprep.subr.bf16.mxu1 %v14112_v57  ;;  %v14149_v6 = vld [vmem:[#allocation11 + $0x18] sm:$0xff]   ;;  %v14152_v19 = vld [vmem:[#allocation11 + $0x48] sm:$0xff]  }
 0x82e   :  { %6546 = vmatpush1.bf16.msra.mxu1 %v14110_v41 }
 0x82f   :  { %6547 = vmatprep.subr.bf16.mxu1 %v14118_v60 }
 0x832   :  { %6548 = vmatpush1.bf16.msra.mxu1 %v14116_v45 }
 0x833   :  { %6549 = vmatprep.subr.bf16.mxu1 %v14124_v7 }
 0x836   :  { %6550 = vmatpush1.bf16.msra.mxu1 %v14122_v52 }
 0x837   :  { %6551 = vmatprep.subr.bf16.mxu1 %v14130_v16 }
 0x83a   :  { %6552 = vmatpush1.bf16.msra.mxu1 %v14128_v48 }
 0x83b   :  { %6553 = vmatprep.subr.bf16.mxu1 %v14136_v10 }
 0x845   :  { %v14010_v35 = vpop.permute.xlu0 %14009 }
 0x846   :  { %v14012_v47 = vunpack.i.h.bf16 %v14010_v35  ;;  %v14011_v34 = vunpack.i.l.bf16 %v14010_v35  ;;  %v14131_v35 = vld [vmem:[#allocation10 + $0x28] ss:$16 sps:$4 sm:$0xff]  }
 0x848   :  { %v6157_v58 = vsel %vm6154_vm13, %v6108_v5, %v14011_v34  ;;  %v6158_v1 = vsel %vm6154_vm13, %v17933_v21, %v14012_v47  ;;  %v21394_v21 = vmov 0   ;;  %v14134_v47 = vld [vmem:[#allocation10] ss:$16 sps:$4 sm:$0xff]   ;;  %v14137_v34 = vld [vmem:[#allocation10 + $0x8] ss:$16 sps:$4 sm:$0xff]  }
 0x849   :  { %v6160_v32 = vpack.c.bf16 %v6158_v1, %v6157_v58  ;;  %6554 = vmatpush1.bf16.msra.mxu1 %v14134_v47 }
 0x84a   :  { %v14015_v51 = vpop.permute.xlu1 %14014 }
 0x84b   :  { %v14017_v14 = vunpack.i.h.bf16 %v14015_v51  ;;  %v14016_v50 = vunpack.i.l.bf16 %v14015_v51  ;;  %6321 = vmatprep.mubr.bf16.mxu0 %v6160_v32  ;;  %v14140_v51 = vld [vmem:[#allocation11 + $0x78] sm:$0xff]  }
 0x84c   :  { %13922 = vmatprep.subr.bf16.mxu1 %v14140_v51 }
 0x84d   :  { %v6155_v38 = vsel %vm6154_vm13, %v6040_v37, %v14016_v50  ;;  %v6156_v44 = vsel %vm6154_vm13, %v17938_v27, %v14017_v14  ;;  %v14141_v14 = vld [vmem:[#allocation11 + $0x38] sm:$0xff]   ;;  %v14142_v50 = vld [vmem:[#allocation11 + $0x70] sm:$0xff]   ;;  %v14144_v37 = vld [vmem:[#allocation11 + $0x68] sm:$0xff]  }
 0x84e   :  { %v6159_v0 = vpack.c.bf16 %v6156_v44, %v6155_v38  ;;  %v14145_v38 = vld [vmem:[#allocation11 + $0x28] sm:$0xff]   ;;  %v14146_v44 = vld [vmem:[#allocation11 + $0x60] sm:$0xff]  }
 0x850   :  { %6322 = vmatmul.mubr.bf16.vlgmr.msra.gmra.mxu0 %v6159_v0  ;;  %v14147_v0 = vld [vmem:[#allocation11 + $0x20] sm:$0xff]  }
 0x851   :  { %6614 = vmatprep.mubr.bf16.mxu0 %v21394_v21  ;;  %6583 = vmatpush1.bf16.msra.mxu0 %v14095_v15  ;;  %v14150_v15 = vld [vmem:[#allocation11 + $0x50] sm:$0xff]  }
 0x852   :  { %6584 = vmatprep.subr.bf16.mxu0 %v14103_v59  ;;  %v14153_v59 = vld [vmem:[#allocation11 + $0x8] sm:$0xff]  }
 0x855   :  { %6585 = vmatpush1.bf16.msra.mxu0 %v14101_v17  ;;  %v14155_v17 = vld [vmem:[#allocation11] sm:$0xff]  }
 0x856   :  { %6586 = vmatprep.subr.bf16.mxu0 %v14109_v9 }
 0x859   :  { %6587 = vmatpush1.bf16.msra.mxu0 %v14107_v63 }
 0x85a   :  { %6588 = vmatprep.subr.bf16.mxu0 %v14115_v23 }
 0x85d   :  { %6589 = vmatpush1.bf16.msra.mxu0 %v14113_v31 }
 0x85e   :  { %6590 = vmatprep.subr.bf16.mxu0 %v14121_v49 }
 0x861   :  { %6591 = vmatpush1.bf16.msra.mxu0 %v14119_v24 }
 0x862   :  { %6592 = vmatprep.subr.bf16.mxu0 %v14127_v18 }
 0x865   :  { %6593 = vmatpush1.bf16.msra.mxu0 %v14125_v11 }
 0x866   :  { %6594 = vmatprep.subr.bf16.mxu0 %v14133_v2 }
 0x869   :  { %6595 = vmatpush1.bf16.msra.mxu0 %v14131_v35 }
 0x86a   :  { %6596 = vmatprep.subr.bf16.mxu0 %v14139_v42 }
 0x86d   :  { %6597 = vmatpush1.bf16.msra.mxu0 %v14137_v34 }
 0x910   :  { %v13916_v27 = vpop.f32.mrf.mxu0 }
 0x912   :  { %v13917_v33 = vpop.f32.mrf.mxu0 }
 0x913   :  { %v13918_v26 = vadd.f32 %v13917_v33, %v13916_v27 }
 0x914   :  { %v13919_v61 = vpop.f32.mrf.mxu0 }
 0x915   :  { %v18008_v55 = vadd.f32 %v14682_v20, %v13918_v26 }
 0x916   :  { %v13920_v29 = vpop.f32.mrf.mxu0 }
 0x917   :  { %v13921_v12 = vadd.f32 %v13920_v29, %v13919_v61  ;;  %v6332_v56 = vmul.f32 %v18008_v55, %v18008_v55 }
 0x919   :  { %v18012_v25 = vadd.f32 %v14683_v13, %v13921_v12  ;;  %6334 = vadd.xlane.f32.xlu0 %v6332_v56 }
 0x91b   :  { %v6333_v4 = vmul.f32 %v18012_v25, %v18012_v25 }
 0x91d   :  { %6336 = vadd.xlane.f32.xlu1 %v6333_v4 }
 0x9a2   :  { %v6335_v28 = vpop.xlane.xlu0 %6334 }
 0x9a3   :  { %v6338_v22 = vmul.f32 0.0078125, %v6335_v28  ;;  %v14156_v28 = vld [vmem:[#allocation7 + $0x1e0] ss:$16 sps:$4 sm:$0xff]  }
 0x9a5   :  { %v6340_v36 = vadd.f32 1e-06, %v6338_v22  ;;  %v14158_v22 = vld [vmem:[#allocation7 + $0x1e4] ss:$16 sps:$4 sm:$0xff]  }
 0x9a6   :  { %v6337_v5 = vpop.xlane.xlu1 %6336  ;;  %7038 = vmatprep.subr.bf16.mxu0 %v14158_v22 }
 0x9a7   :  { %v6339_v46 = vmul.f32 0.0078125, %v6337_v5  ;;  %14472 = vrsqrt.f32 %v6340_v36  ;;  %v14159_v36 = vld [vmem:[#allocation7 + $0x1e8] ss:$16 sps:$4 sm:$0xff]   ;;  %v14161_v5 = vld [vmem:[#allocation7 + $0x1ec] ss:$16 sps:$4 sm:$0xff]  }
 0x9a9   :  { %v6341_v43 = vadd.f32 1e-06, %v6339_v46  ;;  %v14164_v46 = vld [vmem:[#allocation7 + $0x1c4] ss:$16 sps:$4 sm:$0xff]  }
 0x9ab   :  { %14474 = vrsqrt.f32 %v6341_v43  ;;  %v14167_v43 = vld [vmem:[#allocation7 + $0x1cc] ss:$16 sps:$4 sm:$0xff]  }
 0x9b4   :  { %v14473_v58 = vpop.eup %14472 }
 0x9b5   :  { %v6344_v40 = vmul.f32 %v14473_v58, %v18008_v55  ;;  %v14162_v58 = vld [vmem:[#allocation7 + $0x1c0] ss:$16 sps:$4 sm:$0xff]  }
 0x9b8   :  { %v14475_v1 = vpop.eup %14474 }
 0x9b9   :  { %v6345_v32 = vmul.f32 %v14475_v1, %v18012_v25  ;;  %v14165_v1 = vld [vmem:[#allocation7 + $0x1c8] ss:$16 sps:$4 sm:$0xff]  }
 0x9bb   :  { %v6346_v30 = vpack.c.bf16 %v6345_v32, %v6344_v40 }
 0x9bd   :  { %6572 = vmatmul.mubr.bf16.vlgmr.msra.gmra.mxu1 %v6346_v30  ;;  %6615 = vmatmul.mubr.bf16.vlgmr.msra.gmra.mxu0 %v6346_v30 }
 0x9be   :  { %7070 = vmatprep.mubr.bf16.mxu0 %v21394_v21  ;;  %13923 = vmatpush3.bf16.msra.mxu1 %v14141_v14 }
 0x9bf   :  { %13924 = vmatprep.subr.bf16.mxu1 %v14142_v50  ;;  %7039 = vmatpush1.bf16.msra.mxu0 %v14156_v28 }
 0x9c0   :  { %7040 = vmatprep.subr.bf16.mxu0 %v14164_v46 }
 0x9c2   :  { %13925 = vmatpush3.bf16.msra.mxu1 %v14143_v54 }
 0x9c3   :  { %13926 = vmatprep.subr.bf16.mxu1 %v14144_v37  ;;  %7041 = vmatpush1.bf16.msra.mxu0 %v14162_v58  ;;  %v21400_v58 = vld [vmem:[#allocation22_spill] sm:$0xff] }
 0x9c6   :  { %13927 = vmatpush3.bf16.msra.mxu1 %v14145_v38 }
 0x9c7   :  { %13928 = vmatprep.subr.bf16.mxu1 %v14146_v44 }
 0x9ca   :  { %13929 = vmatpush3.bf16.msra.mxu1 %v14147_v0  ;;  %v14168_v0 = vld [vmem:[#allocation7 + $0x1a0] ss:$16 sps:$4 sm:$0xff]  }
 0x9cb   :  { %13930 = vmatprep.subr.bf16.mxu1 %v14148_v53  ;;  %v14170_v53 = vld [vmem:[#allocation7 + $0x1a4] ss:$16 sps:$4 sm:$0xff]  }
 0x9cc   :  { %7042 = vmatprep.subr.bf16.mxu0 %v14170_v53 }
 0x9cd   :  { %7043 = vmatpush1.bf16.msra.mxu0 %v14168_v0 }
 0x9ce   :  { %13931 = vmatpush3.bf16.msra.mxu1 %v14149_v6  ;;  %v14171_v6 = vld [vmem:[#allocation7 + $0x1a8] ss:$16 sps:$4 sm:$0xff]  }
 0x9cf   :  { %13932 = vmatprep.subr.bf16.mxu1 %v14150_v15  ;;  %v14173_v15 = vld [vmem:[#allocation7 + $0x1ac] ss:$16 sps:$4 sm:$0xff]  }
 0x9d2   :  { %13933 = vmatpush3.bf16.msra.mxu1 %v14151_v39  ;;  %v14176_v39 = vld [vmem:[#allocation7 + $0x184] ss:$16 sps:$4 sm:$0xff]  }
 0x9d3   :  { %13934 = vmatprep.subr.bf16.mxu1 %v14152_v19  ;;  %v14177_v19 = vld [vmem:[#allocation7 + $0x188] ss:$16 sps:$4 sm:$0xff]   ;;  %7044 = vmatprep.subr.bf16.mxu0 %v14176_v39 }
 0x9d6   :  { %13935 = vmatpush3.bf16.msra.mxu1 %v14153_v59  ;;  %v14179_v59 = vld [vmem:[#allocation7 + $0x18c] ss:$16 sps:$4 sm:$0xff]  }
 0x9d7   :  { %13936 = vmatprep.subr.bf16.mxu1 %v14154_v8  ;;  %v14182_v8 = vld [vmem:[#allocation7 + $0x164] ss:$16 sps:$4 sm:$0xff]  }
 0x9da   :  { %13937 = vmatpush3.bf16.msra.mxu1 %v14155_v17  ;;  %v14180_v17 = vld [vmem:[#allocation7 + $0x160] ss:$16 sps:$4 sm:$0xff]  }
 0x9db   :  { %7081 = vmatprep.subr.bf16.mxu1 %v14161_v5 }
 0xa7d   :  { %v6573_v27 = vpop.f32.mrf.mxu1  ;;  %v6616_v31 = vpop.f32.mrf.mxu0 }
 0xa7e   :  { %v13764_v33 = vmul.f32 -1.442695, %v6573_v27 }
 0xa7f   :  { %v6575_v26 = vpop.f32.mrf.mxu1  ;;  %v6618_v23 = vpop.f32.mrf.mxu0 }
 0xa80   :  { %14476 = vpow2.f32 %v13764_v33  ;;  %v13765_v61 = vmul.f32 -1.442695, %v6575_v26  ;;  %v14188_v33 = vld [vmem:[#allocation7 + $0x144] ss:$16 sps:$4 sm:$0xff]  }
 0xa81   :  { %v6577_v20 = vpop.f32.mrf.mxu1  ;;  %v6620_v24 = vpop.f32.mrf.mxu0 }
 0xa82   :  { %14478 = vpow2.f32 %v13765_v61  ;;  %v13766_v29 = vmul.f32 -1.442695, %v6577_v20  ;;  %v14186_v61 = vld [vmem:[#allocation7 + $0x140] ss:$16 sps:$4 sm:$0xff]  }
 0xa83   :  { %v6579_v12 = vpop.f32.mrf.mxu1  ;;  %v6622_v48 = vpop.f32.mrf.mxu0 }
 0xa84   :  { %14480 = vpow2.f32 %v13766_v29  ;;  %v13767_v56 = vmul.f32 -1.442695, %v6579_v12  ;;  %v14194_v29 = vld [vmem:[#allocation7 + $0x124] ss:$16 sps:$4 sm:$0xff]  }
 0xa86   :  { %14482 = vpow2.f32 %v13767_v56  ;;  %v14192_v56 = vld [vmem:[#allocation7 + $0x120] ss:$16 sps:$4 sm:$0xff]  }
 0xa8d   :  { %v14477_v13 = vpop.eup %14476 }
 0xa8e   :  { %v6637_v3 = vadd.f32 1.0, %v14477_v13  ;;  %v14195_v13 = vld [vmem:[#allocation7 + $0x128] ss:$16 sps:$4 sm:$0xff]  }
 0xa8f   :  { %v14479_v4 = vpop.eup %14478 }
 0xa90   :  { %v6638_v62 = vadd.f32 1.0, %v14479_v4  ;;  %v14200_v4 = vld [vmem:[#allocation7 + $0x104] ss:$16 sps:$4 sm:$0xff]  }
 0xa91   :  { %v14481_v63 = vpop.eup %14480 }
 0xa92   :  { %14484 = vrcp.f32 %v6638_v62  ;;  %v6639_v9 = vadd.f32 1.0, %v14481_v63  ;;  %v14198_v62 = vld [vmem:[#allocation7 + $0x100] ss:$16 sps:$4 sm:$0xff]   ;;  %v14201_v63 = vld [vmem:[#allocation7 + $0x108] ss:$16 sps:$4 sm:$0xff]  }
 0xa93   :  { %v14483_v41 = vpop.eup %14482  ;;  %14486 = vrcp.f32 %v6637_v3  ;;  %v14203_v3 = vld [vmem:[#allocation7 + $0x10c] ss:$16 sps:$4 sm:$0xff]  }
 0xa94   :  { %14488 = vrcp.f32 %v6639_v9  ;;  %v6640_v57 = vadd.f32 1.0, %v14483_v41 }
 0xa96   :  { %14490 = vrcp.f32 %v6640_v57 }
 0xa9f   :  { %v14485_v60 = vpop.eup %14484 }
 0xaa0   :  { %v14487_v49 = vpop.eup %14486  ;;  %v6650_v7 = vmul.f32 %v14485_v60, %v6575_v26  ;;  %v14191_v26 = vld [vmem:[#allocation7 + $0x14c] ss:$16 sps:$4 sm:$0xff]  }
 0xaa1   :  { %v14489_v45 = vpop.eup %14488  ;;  %v6649_v11 = vmul.f32 %v14487_v49, %v6573_v27  ;;  %v14183_v27 = vld [vmem:[#allocation7 + $0x168] ss:$16 sps:$4 sm:$0xff]  }
 0xaa2   :  { %v6651_v18 = vmul.f32 %v14489_v45, %v6577_v20  ;;  %v6654_v35 = vmul.f32 %v6650_v7, %v6618_v23  ;;  %v14189_v20 = vld [vmem:[#allocation7 + $0x148] ss:$16 sps:$4 sm:$0xff]  }
 0xaa3   :  { %v14491_v52 = vpop.eup %14490  ;;  %v6653_v42 = vmul.f32 %v6649_v11, %v6616_v31 }
 0xaa4   :  { %v6652_v16 = vmul.f32 %v14491_v52, %v6579_v12  ;;  %v6655_v2 = vmul.f32 %v6651_v18, %v6620_v24  ;;  %v14197_v12 = vld [vmem:[#allocation7 + $0x12c] ss:$16 sps:$4 sm:$0xff]  }
 0xaa6   :  { %v6656_v10 = vmul.f32 %v6652_v16, %v6622_v48  ;;  %v6657_v34 = vpack.c.bf16 %v6655_v2, %v6653_v42  ;;  %v21397_v48 = vld [vmem:[#allocation21_spill] sm:$0xff] }
 0xaa8   :  { %v6658_v47 = vpack.c.bf16 %v6656_v10, %v6654_v35 }
 0xaaa   :  { %6819 = vmatprep.mubr.bf16.mxu1 %v6658_v47 }
 0xaab   :  { %6820 = vmatmul.mubr.bf16.vlgmr.msra.gmra.mxu1 %v6657_v34 }
 0xaac   :  { %7113 = vmatprep.mubr.bf16.mxu1 %v21394_v21  ;;  %7082 = vmatpush1.bf16.msra.mxu1 %v14159_v36 }
 0xaad   :  { %7083 = vmatprep.subr.bf16.mxu1 %v14167_v43 }
 0xab0   :  { %7084 = vmatpush1.bf16.msra.mxu1 %v14165_v1 }
 0xab1   :  { %7085 = vmatprep.subr.bf16.mxu1 %v14173_v15 }
 0xab4   :  { %7086 = vmatpush1.bf16.msra.mxu1 %v14171_v6 }
 0xab5   :  { %7087 = vmatprep.subr.bf16.mxu1 %v14179_v59 }
 0xab8   :  { %7088 = vmatpush1.bf16.msra.mxu1 %v14177_v19 }
 0xb6b   :  { %v13938_v40 = vpop.f32.mrf.mxu1 }
 0xb6d   :  { %v13939_v32 = vpop.f32.mrf.mxu1 }
 0xb6e   :  { %v13940_v30 = vadd.f32 %v13939_v32, %v13938_v40 }
 0xb6f   :  { %v13941_v51 = vpop.f32.mrf.mxu1 }
 0xb70   :  { %v18021_v14 = vadd.f32 %v13940_v30, %v18008_v55  ;;  %v14174_v55 = vld [vmem:[#allocation7 + $0x180] ss:$16 sps:$4 sm:$0xff]  }
 0xb71   :  { %v13942_v50 = vpop.f32.mrf.mxu1  ;;  %7045 = vmatpush1.bf16.msra.mxu0 %v14174_v55 }
 0xb72   :  { %21395 = vst [vmem:[#allocation92_spill] sm:$0xff] %v18021_v14  ;;  %v13943_v54 = vadd.f32 %v13942_v50, %v13941_v51  ;;  %v6830_v37 = vmul.f32 %v18021_v14, %v18021_v14  ;;  %7046 = vmatprep.subr.bf16.mxu0 %v14182_v8 }
 0xb74   :  { %v18026_v38 = vadd.f32 %v13943_v54, %v18012_v25  ;;  %6832 = vadd.xlane.f32.xlu0 %v6830_v37  ;;  %v14185_v25 = vld [vmem:[#allocation7 + $0x16c] ss:$16 sps:$4 sm:$0xff]  }
 0xb75   :  { %7089 = vmatprep.subr.bf16.mxu1 %v14185_v25  ;;  %7047 = vmatpush1.bf16.msra.mxu0 %v14180_v17 }
 0xb76   :  { %21396 = vst [vmem:[#allocation76_spill] sm:$0xff] %v18026_v38  ;;  %v6831_v44 = vmul.f32 %v18026_v38, %v18026_v38  ;;  %7090 = vmatpush1.bf16.msra.mxu1 %v14183_v27  ;;  %7048 = vmatprep.subr.bf16.mxu0 %v14188_v33 }
 0xb77   :  { %7091 = vmatprep.subr.bf16.mxu1 %v14191_v26 }
 0xb78   :  { %6834 = vadd.xlane.f32.xlu0 %v6831_v44 }
 0xb79   :  { %7049 = vmatpush1.bf16.msra.mxu0 %v14186_v61 }
 0xb7a   :  { %7092 = vmatpush1.bf16.msra.mxu1 %v14189_v20  ;;  %7050 = vmatprep.subr.bf16.mxu0 %v14194_v29 }
 0xb7b   :  { %7093 = vmatprep.subr.bf16.mxu1 %v14197_v12 }
 0xb7d   :  { %7051 = vmatpush1.bf16.msra.mxu0 %v14192_v56 }
 0xb7e   :  { %7094 = vmatpush1.bf16.msra.mxu1 %v14195_v13  ;;  %7052 = vmatprep.subr.bf16.mxu0 %v14200_v4 }
 0xb7f   :  { %7095 = vmatprep.subr.bf16.mxu1 %v14203_v3 }
 0xb81   :  { %7053 = vmatpush1.bf16.msra.mxu0 %v14198_v62 }
 0xb82   :  { %7096 = vmatpush1.bf16.msra.mxu1 %v14201_v63 }
 0xbfd   :  { %v6833_v9 = vpop.xlane.xlu0 %6832 }
 0xbfe   :  { %v6836_v41 = vmul.f32 0.0078125, %v6833_v9 }
 0xc00   :  { %v6838_v57 = vadd.f32 1e-06, %v6836_v41 }
 0xc01   :  { %v6835_v31 = vpop.xlane.xlu0 %6834 }
 0xc02   :  { %v6837_v23 = vmul.f32 0.0078125, %v6835_v31  ;;  %14492 = vrsqrt.f32 %v6838_v57 }
 0xc04   :  { %v6839_v60 = vadd.f32 1e-06, %v6837_v23 }
 0xc06   :  { %14494 = vrsqrt.f32 %v6839_v60 }
 0xc0f   :  { %v14493_v49 = vpop.eup %14492 }
 0xc10   :  { %v6842_v24 = vmul.f32 %v14493_v49, %v18021_v14 }
 0xc13   :  { %v14495_v45 = vpop.eup %14494 }
 0xc14   :  { %v6843_v7 = vmul.f32 %v14495_v45, %v18026_v38 }
 0xc16   :  { %v6844_v18 = vpack.c.bf16 %v6843_v7, %v6842_v24 }
 0xc18   :  { %7071 = vmatmul.mubr.bf16.vlgmr.msra.gmra.mxu0 %v6844_v18  ;;  %7114 = vmatmul.mubr.bf16.vlgmr.msra.gmra.mxu1 %v6844_v18 }
 0xc19   :  { %13246 = vmatprep.mubr.bf16.mxu1 %v21394_v21 }
 0xcd8   :  { %v18033_v52 = vpop.f32.mrf.mxu0  ;;  %v18035_v11 = vpop.f32.mrf.mxu1 }
 0xcd9   :  { %7154 = vrot.lane.b32.xlu0 %v18035_v11, %s14860_s11  ;;  %7214 = vrot.lane.b32.xlu1 %v18033_v52, %s14860_s11 }
 0xcda   :  { %v7117_v16 = vpop.f32.mrf.mxu1  ;;  %v18042_v10 = vpop.f32.mrf.mxu0 }
 0xcdb   :  { %v8530_v2 = vcombine.high %v7117_v16, %v7117_v16  ;;  %v8537_v35 = vrot.slane %v7117_v16, %v21397_v48 }
 0xcdc   :  { %v18044_v42 = vpop.f32.mrf.mxu1  ;;  %v18080_v6 = vpop.f32.mrf.mxu0 }
 0xcdd   :  { %v18047_v47 = vrot.slane %v8530_v2, %v21397_v48  ;;  %v8545_v34 = vcombine.high %v8537_v35, %v8537_v35  ;;  %v8553_v28 = vrot.slane %v8537_v35, %v21397_v48  ;;  %7186 = vrot.lane.b32.xlu0 %v18033_v52, %s14860_s11  ;;  %7274 = vrot.lane.b32.xlu1 %v18042_v10, %s14860_s11 }
 0xcde   :  { %v7121_v22 = vpop.f32.mrf.mxu1  ;;  %v18127_v3 = vpop.f32.mrf.mxu0 }
 0xcdf   :  { %21398 = vst [vmem:[#allocation90_spill] sm:$0xff] %v18047_v47  ;;  %v18056_v36 = vrot.slane %v18047_v47, %v21397_v48  ;;  %v8567_v5 = vrot.slane %v8545_v34, %v21397_v48  ;;  %v8579_v46 = vcombine.high %v7121_v22, %v7121_v22  ;;  %v8586_v43 = vrot.slane %v7121_v22, %v21397_v48 }
 0xce0   :  { %v8647_v1 = vrot.slane %v8553_v28, %v21400_v58  ;;  %v8575_v40 = vcombine.high %v8553_v28, %v8553_v28 }
 0xce1   :  { %21399 = vst [vmem:[#allocation54_spill] sm:$0xff] %v18056_v36  ;;  %v18062_v32 = vrot.slane %v8579_v46, %v21397_v48  ;;  %7126 = vrot.lane.b32.xlu0 %v18035_v11, %s14860_s11  ;;  %7156 = vrot.lane.b32.xlu1 %v18044_v42, %s14860_s11  ;;  %v8594_v30 = vcombine.high %v8586_v43, %v8586_v43 }
 0xce2   :  { %v8602_v51 = vrot.slane %v8586_v43, %v21397_v48  ;;  %v8655_v50 = vrot.slane %v8575_v40, %v21400_v58  ;;  %v8663_v54 = vrot.slane %v18056_v36, %v21400_v58  ;;  %v8651_v44 = vrot.slane %v8567_v5, %v21400_v58 }
 0xce3   :  { %21401 = vst [vmem:[#allocation55_spill] sm:$0xff] %v18062_v32  ;;  %v18074_v37 = vrot.slane %v18062_v32, %v21397_v48  ;;  %v8577_v0 = vcombine.high %v8567_v5, %v8567_v5  ;;  %v18078_v53 = vsel %vm1336_vm0, %v8553_v28, %v8647_v1  ;;  %v8616_v15 = vrot.slane %v8594_v30, %v21397_v48 }
 0xce4   :  { %21403 = vst [vmem:[#allocation74_spill] sm:$0xff] %v18078_v53  ;;  %v8679_v55 = vrot.slane %v8602_v51, %v21400_v58  ;;  %v8624_v39 = vcombine.high %v8602_v51, %v8602_v51  ;;  %v18085_v19 = vsel %vm1336_vm0, %v8575_v40, %v8655_v50  ;;  %v18098_v33 = vsel %vm1336_vm0, %v18056_v36, %v8663_v54 }
 0xce5   :  { %21402 = vst [vmem:[#allocation75_spill] sm:$0xff] %v18074_v37  ;;  %21404 = vst [vmem:[#allocation52_spill] sm:$0xff] %v18085_v19  ;;  %7246 = vrot.lane.b32.xlu0 %v18042_v10, %s14860_s11  ;;  %7189 = vrot.lane.b32.xlu1 %v18080_v6, %s14860_s11  ;;  %v8659_v59 = vrot.slane %v8577_v0, %v21400_v58  ;;  %v8695_v8 = vrot.slane %v18074_v37, %v21400_v58 }
 0xce6   :  { %v8683_v25 = vrot.slane %v8616_v15, %v21400_v58  ;;  %v8687_v17 = vrot.slane %v8624_v39, %v21400_v58  ;;  %v8626_v27 = vcombine.high %v8616_v15, %v8616_v15  ;;  %21405 = vst [vmem:[#allocation79_spill] sm:$0xff] %v18098_v33  ;;  %v18101_v26 = vsel %vm1336_vm0, %v8567_v5, %v8651_v44 }
 0xce7   :  { %21406 = vst [vmem:[#allocation81_spill] sm:$0xff] %v18101_v26  ;;  %v18104_v61 = vsel %vm1336_vm0, %v8602_v51, %v8679_v55  ;;  %v18107_v20 = vsel %vm1336_vm0, %v8577_v0, %v8659_v59  ;;  %v18111_v29 = vsel %vm1336_vm0, %v18074_v37, %v8695_v8 }
 0xce8   :  { %21407 = vst [vmem:[#allocation57_spill] sm:$0xff] %v18104_v61  ;;  %21408 = vst [vmem:[#allocation58_spill] sm:$0xff] %v18107_v20  ;;  %v8691_v12 = vrot.slane %v8626_v27, %v21400_v58  ;;  %v18115_v56 = vsel %vm1336_vm0, %v8616_v15, %v8683_v25  ;;  %v18118_v13 = vsel %vm1336_vm0, %v8624_v39, %v8687_v17 }
 0xce9   :  { %21409 = vst [vmem:[#allocation83_spill] sm:$0xff] %v18111_v29  ;;  %21410 = vst [vmem:[#allocation77_spill] sm:$0xff] %v18115_v56  ;;  %7129 = vrot.lane.b32.xlu1 %v18044_v42, %s14860_s11  ;;  %7216 = vrot.lane.b32.xlu0 %v18080_v6, %s14860_s11 }
 0xcea   :  { %21411 = vst [vmem:[#allocation63_spill] sm:$0xff] %v18118_v13  ;;  %v18125_v4 = vsel %vm1336_vm0, %v8626_v27, %v8691_v12 }
 0xceb   :  { %21412 = vst [vmem:[#allocation61_spill] sm:$0xff] %v18125_v4 }
 0xced   :  { %8724 = vrot.lane.b32.xlu0 %v8647_v1, %s14860_s11  ;;  %7276 = vrot.lane.b32.xlu1 %v18127_v3, %s14860_s11 }
 0xcf1   :  { %8728 = vrot.lane.b32.xlu0 %v8655_v50, %s14860_s11  ;;  %7249 = vrot.lane.b32.xlu1 %v18127_v3, %s14860_s11 }
 0xcf5   :  { %8732 = vrot.lane.b32.xlu0 %v8663_v54, %s14860_s11  ;;  %8726 = vrot.lane.b32.xlu1 %v8651_v44, %s14860_s11 }
 0xcf9   :  { %8740 = vrot.lane.b32.xlu0 %v8679_v55, %s14860_s11  ;;  %8742 = vrot.lane.b32.xlu1 %v8683_v25, %s14860_s11 }
 0xcfd   :  { %8730 = vrot.lane.b32.xlu0 %v8659_v59, %s14860_s11  ;;  %8744 = vrot.lane.b32.xlu1 %v8687_v17, %s14860_s11 }
 0xd01   :  { %8748 = vrot.lane.b32.xlu1 %v8695_v8, %s14860_s11 }
 0xd05   :  { %8746 = vrot.lane.b32.xlu1 %v8691_v12, %s14860_s11 }
 0xd4b   :  { %v18143_v62 = vpop.permute.xlu0 %7154  ;;  %v18145_v63 = vpop.permute.xlu1 %7214 }
 0xd4c   :  { %7220 = vrot.lane.b32.xlu0 %v18145_v63, %s14860_s11 }
 0xd4f   :  { %v7187_v9 = vpop.permute.xlu0 %7186  ;;  %v18149_v41 = vpop.permute.xlu1 %7274 }
 0xd50   :  { %7160 = vrot.lane.b32.xlu0 %v18143_v62, %s14860_s11  ;;  %v7188_v31 = vsel %vm423_vm1, %v7187_v9, %v18033_v52  ;;  %v21423_v9 = vld [vmem:[#allocation37_spill] sm:$0xff] }
 0xd53   :  { %v7127_v57 = vpop.permute.xlu0 %7126  ;;  %v18155_v23 = vpop.permute.xlu1 %7156 }
 0xd54   :  { %7192 = vrot.lane.b32.xlu0 %v7188_v31, %s14860_s11  ;;  %v7128_v49 = vsel %vm423_vm1, %v7127_v57, %v18035_v11 }
 0xd57   :  { %v7247_v60 = vpop.permute.xlu0 %7246  ;;  %v7190_v45 = vpop.permute.xlu1 %7189 }
 0xd58   :  { %7132 = vrot.lane.b32.xlu0 %v7128_v49, %s14860_s11  ;;  %v7248_v7 = vsel %vm423_vm1, %v7247_v60, %v18042_v10  ;;  %v7191_v16 = vsel %vm423_vm1, %v7190_v45, %v18080_v6 }
 0xd5b   :  { %v18161_v24 = vpop.permute.xlu0 %7216  ;;  %v7130_v18 = vpop.permute.xlu1 %7129 }
 0xd5c   :  { %7280 = vrot.lane.b32.xlu0 %v18149_v41, %s14860_s11  ;;  %7223 = vrot.lane.b32.xlu1 %v18161_v24, %s14860_s11  ;;  %v7131_v35 = vsel %vm423_vm1, %v7130_v18, %v18044_v42 }
 0xd5f   :  { %v18175_v2 = vpop.permute.xlu1 %7276  ;;  %v18185_v22 = vpop.permute.xlu0 %8724 }
 0xd60   :  { %7252 = vrot.lane.b32.xlu0 %v7248_v7, %s14860_s11  ;;  %7163 = vrot.lane.b32.xlu1 %v18155_v23, %s14860_s11  ;;  %21413 = vst [vmem:[#allocation78_spill] sm:$0xff] %v18185_v22 }
 0xd63   :  { %v7250_v34 = vpop.permute.xlu1 %7249  ;;  %v18187_v5 = vpop.permute.xlu0 %8728 }
 0xd64   :  { %7194 = vrot.lane.b32.xlu1 %v7191_v16, %s14860_s11  ;;  %v7251_v28 = vsel %vm423_vm1, %v7250_v34, %v18127_v3  ;;  %21414 = vst [vmem:[#allocation82_spill] sm:$0xff] %v18187_v5 }
 0xd67   :  { %v18189_v46 = vpop.permute.xlu0 %8732  ;;  %v18191_v43 = vpop.permute.xlu1 %8726 }
 0xd68   :  { %7134 = vrot.lane.b32.xlu1 %v7131_v35, %s14860_s11  ;;  %21415 = vst [vmem:[#allocation59_spill] sm:$0xff] %v18189_v46  ;;  %21416 = vst [vmem:[#allocation66_spill] sm:$0xff] %v18191_v43 }
 0xd6b   :  { %v18193_v1 = vpop.permute.xlu0 %8740  ;;  %v18195_v40 = vpop.permute.xlu1 %8742 }
 0xd6c   :  { %7283 = vrot.lane.b32.xlu1 %v18175_v2, %s14860_s11  ;;  %21417 = vst [vmem:[#allocation51_spill] sm:$0xff] %v18193_v1  ;;  %21418 = vst [vmem:[#allocation84_spill] sm:$0xff] %v18195_v40 }
 0xd6f   :  { %v18197_v30 = vpop.permute.xlu0 %8730  ;;  %v18199_v51 = vpop.permute.xlu1 %8744 }
 0xd70   :  { %7254 = vrot.lane.b32.xlu1 %v7251_v28, %s14860_s11  ;;  %21419 = vst [vmem:[#allocation68_spill] sm:$0xff] %v18197_v30  ;;  %21420 = vst [vmem:[#allocation62_spill] sm:$0xff] %v18199_v51 }
 0xd73   :  { %v18206_v15 = vpop.permute.xlu1 %8748 }
 0xd74   :  { %21421 = vst [vmem:[#allocation53_spill] sm:$0xff] %v18206_v15 }
 0xd77   :  { %v18209_v39 = vpop.permute.xlu1 %8746 }
 0xd78   :  { %21422 = vst [vmem:[#allocation56_spill] sm:$0xff] %v18209_v39 }
 0xdbe   :  { %v7221_v50 = vpop.permute.xlu0 %7220 }
 0xdbf   :  { %v7222_v54 = vsel %vm423_vm1, %v7221_v50, %v18145_v63 }
 0xdc0   :  { %7226 = vrot.lane.b32.xlu0 %v7222_v54, %s14860_s11 }
 0xdc2   :  { %v7161_v44 = vpop.permute.xlu0 %7160 }
 0xdc3   :  { %v7162_v0 = vsel %vm423_vm1, %v7161_v44, %v18143_v62  ;;  %v21424_v44 = vld [vmem:[#allocation39_spill] sm:$0xff] }
 0xdc4   :  { %7166 = vrot.lane.b32.xlu0 %v7162_v0, %s14860_s11 }
 0xdc6   :  { %v7193_v55 = vpop.permute.xlu0 %7192 }
 0xdc7   :  { %v7196_v17 = vsel %vm423_vm1, %v7193_v55, %v18033_v52 }
 0xdc8   :  { %v7198_v57 = vmul.f32 %v7196_v17, %v21423_v9 }
 0xdca   :  { %v7133_v59 = vpop.permute.xlu0 %7132 }
 0xdcb   :  { %v7136_v60 = vsel %vm423_vm1, %v7133_v59, %v18035_v11 }
 0xdcc   :  { %v7138_v7 = vmul.f32 %v7136_v60, %v21423_v9 }
 0xdce   :  { %v7281_v8 = vpop.permute.xlu0 %7280  ;;  %v7224_v25 = vpop.permute.xlu1 %7223 }
 0xdcf   :  { %v7282_v27 = vsel %vm423_vm1, %v7281_v8, %v18149_v41  ;;  %v7225_v12 = vsel %vm423_vm1, %v7224_v25, %v18161_v24 }
 0xdd0   :  { %7286 = vrot.lane.b32.xlu0 %v7282_v27, %s14860_s11  ;;  %7228 = vrot.lane.b32.xlu1 %v7225_v12, %s14860_s11 }
 0xdd2   :  { %v7164_v31 = vpop.permute.xlu1 %7163  ;;  %v7253_v45 = vpop.permute.xlu0 %7252 }
 0xdd3   :  { %v7165_v49 = vsel %vm423_vm1, %v7164_v31, %v18155_v23  ;;  %v7256_v16 = vsel %vm423_vm1, %v7253_v45, %v18042_v10 }
 0xdd4   :  { %7202 = vrot.lane.b32.xlu0 %v7198_v57, %s14870_s4  ;;  %7168 = vrot.lane.b32.xlu1 %v7165_v49, %s14860_s11  ;;  %v7258_v35 = vmul.f32 %v7256_v16, %v21423_v9 }
 0xdd6   :  { %v7195_v18 = vpop.permute.xlu1 %7194 }
 0xdd7   :  { %v7197_v50 = vsel %vm423_vm1, %v7195_v18, %v18080_v6 }
 0xdd8   :  { %7142 = vrot.lane.b32.xlu0 %v7138_v7, %s14870_s4  ;;  %v7199_v0 = vmul.f32 %v7197_v50, %v21424_v44 }
 0xdda   :  { %v7135_v34 = vpop.permute.xlu1 %7134 }
 0xddb   :  { %v7137_v55 = vsel %vm423_vm1, %v7135_v34, %v18044_v42 }
 0xddc   :  { %7262 = vrot.lane.b32.xlu0 %v7258_v35, %s14870_s4  ;;  %v7139_v8 = vmul.f32 %v7137_v55, %v21424_v44  ;;  %v21425_v55 = vld [vmem:[#allocation38_spill] sm:$0xff] }
 0xdde   :  { %v7284_v28 = vpop.permute.xlu1 %7283 }
 0xddf   :  { %v7285_v54 = vsel %vm423_vm1, %v7284_v28, %v18175_v2 }
 0xde0   :  { %7288 = vrot.lane.b32.xlu1 %v7285_v54, %s14860_s11 }
 0xde2   :  { %v7255_v59 = vpop.permute.xlu1 %7254 }
 0xde3   :  { %v7257_v25 = vsel %vm423_vm1, %v7255_v59, %v18127_v3 }
 0xde4   :  { %7204 = vrot.lane.b32.xlu1 %v7199_v0, %s14870_s4  ;;  %v7259_v17 = vmul.f32 %v7257_v25, %v21424_v44 }
 0xde8   :  { %7144 = vrot.lane.b32.xlu1 %v7139_v8, %s14870_s4 }
 0xdec   :  { %7264 = vrot.lane.b32.xlu1 %v7259_v17, %s14870_s4 }
 0xe32   :  { %v7227_v27 = vpop.permute.xlu0 %7226 }
 0xe33   :  { %v7230_v12 = vsel %vm423_vm1, %v7227_v27, %v18145_v63 }
 0xe34   :  { %v7232_v57 = vmul.f32 %v7230_v12, %v21423_v9 }
 0xe36   :  { %7236 = vrot.lane.b32.xlu0 %v7232_v57, %s14872_s6  ;;  %v7167_v31 = vpop.permute.xlu0 %7166 }
 0xe37   :  { %v7170_v60 = vsel %vm423_vm1, %v7167_v31, %v18143_v62 }
 0xe38   :  { %v7172_v49 = vmul.f32 %v7170_v60, %v21423_v9 }
 0xe3a   :  { %7176 = vrot.lane.b32.xlu0 %v7172_v49, %s14872_s6 }
 0xe42   :  { %v7287_v45 = vpop.permute.xlu0 %7286  ;;  %v7229_v7 = vpop.permute.xlu1 %7228 }
 0xe43   :  { %v7290_v18 = vsel %vm423_vm1, %v7287_v45, %v18149_v41  ;;  %v7231_v63 = vsel %vm423_vm1, %v7229_v7, %v18161_v24 }
 0xe44   :  { %v7292_v16 = vmul.f32 %v7290_v18, %v21423_v9  ;;  %v7233_v35 = vmul.f32 %v7231_v63, %v21424_v44 }
 0xe46   :  { %7296 = vrot.lane.b32.xlu0 %v7292_v16, %s14872_s6  ;;  %7238 = vrot.lane.b32.xlu1 %v7233_v35, %s14872_s6  ;;  %v7169_v62 = vpop.permute.xlu1 %7168  ;;  %v18271_v50 = vpop.permute.xlu0 %7202 }
 0xe47   :  { %v7171_v34 = vsel %vm423_vm1, %v7169_v62, %v18155_v23  ;;  %v7210_v23 = vmul.f32 %v18033_v52, %v21425_v55 }
 0xe48   :  { %v7173_v28 = vmul.f32 %v7171_v34, %v21424_v44 }
 0xe4a   :  { %7178 = vrot.lane.b32.xlu1 %v7173_v28, %s14872_s6  ;;  %v18273_v54 = vpop.permute.xlu0 %7142 }
 0xe4e   :  { %v18275_v0 = vpop.permute.xlu0 %7262 }
 0xe52   :  { %v7289_v41 = vpop.permute.xlu1 %7288 }
 0xe53   :  { %v7291_v24 = vsel %vm423_vm1, %v7289_v41, %v18175_v2  ;;  %v7150_v2 = vmul.f32 %v18035_v11, %v21425_v55 }
 0xe54   :  { %v7293_v9 = vmul.f32 %v7291_v24, %v21424_v44  ;;  %v7270_v24 = vmul.f32 %v18042_v10, %v21425_v55 }
 0xe56   :  { %7298 = vrot.lane.b32.xlu1 %v7293_v9, %s14872_s6  ;;  %v18279_v59 = vpop.permute.xlu1 %7204  ;;  %v21426_v9 = vld [vmem:[#allocation40_spill] sm:$0xff] }
 0xe57   :  { %v7271_v14 = vmul.f32 %v18127_v3, %v21426_v9 }
 0xe5a   :  { %v18285_v31 = vpop.permute.xlu1 %7144 }
 0xe5e   :  { %v18300_v34 = vpop.permute.xlu1 %7264 }
 0xea8   :  { %v7237_v8 = vpop.permute.xlu0 %7236 }
 0xea9   :  { %v7242_v25 = vadd.f32 %v7237_v8, %v7210_v23  ;;  %v7211_v23 = vmul.f32 %v18080_v6, %v21426_v9 }
 0xeab   :  { %v7429_v17 = vrot.slane %v7242_v25, %v21397_v48  ;;  %v7422_v41 = vcombine.high %v7242_v25, %v7242_v25 }
 0xeac   :  { %v7177_v44 = vpop.permute.xlu0 %7176 }
 0xead   :  { %v7437_v27 = vcombine.high %v7429_v17, %v7429_v17  ;;  %v7445_v12 = vrot.slane %v7429_v17, %v21397_v48  ;;  %v7182_v57 = vadd.f32 %v7177_v44, %v7150_v2 }
 0xeaf   :  { %v8197_v60 = vrot.slane %v7182_v57, %v21397_v48  ;;  %v7723_v49 = vrot.slane %v7445_v12, %v21400_v58  ;;  %v18290_v45 = vrot.slane %v7437_v27, %v21397_v48  ;;  %v7467_v62 = vcombine.high %v7445_v12, %v7445_v12 }
 0xeb0   :  { %v18316_v12 = vrot.slane %v7422_v41, %v21397_v48 }
 0xeb1   :  { %v8205_v7 = vcombine.high %v8197_v60, %v8197_v60  ;;  %v8213_v18 = vrot.slane %v8197_v60, %v21397_v48  ;;  %7784 = vrot.lane.b32.xlu0 %v7723_v49, %s14860_s11  ;;  %v7727_v63 = vrot.slane %v18290_v45, %v21400_v58  ;;  %v7731_v8 = vrot.slane %v7467_v62, %v21400_v58 }
 0xeb2   :  { %v8190_v62 = vcombine.high %v7182_v57, %v7182_v57  ;;  %v18330_v41 = vrot.slane %v18316_v12, %v21397_v48 }
 0xeb3   :  { %v8371_v16 = vrot.slane %v8213_v18, %v21400_v58  ;;  %v18298_v35 = vrot.slane %v8205_v7, %v21397_v48  ;;  %7786 = vrot.lane.b32.xlu1 %v7727_v63, %s14860_s11  ;;  %v7151_v63 = vmul.f32 %v18044_v42, %v21426_v9  ;;  %v8235_v38 = vcombine.high %v8213_v18, %v8213_v18 }
 0xeb4   :  { %v7438_v9 = vcombine.high %v18316_v12, %v18316_v12 }
 0xeb5   :  { %8432 = vrot.lane.b32.xlu0 %v8371_v16, %s14860_s11  ;;  %v8375_v28 = vrot.slane %v18298_v35, %v21400_v58 }
 0xeb7   :  { %8434 = vrot.lane.b32.xlu1 %v8375_v28, %s14860_s11 }
 0xeb8   :  { %v7297_v17 = vpop.permute.xlu0 %7296  ;;  %v7239_v2 = vpop.permute.xlu1 %7238 }
 0xeb9   :  { %v18312_v44 = vadd.f32 %v7297_v17, %v7270_v24  ;;  %v7243_v27 = vadd.f32 %v7239_v2, %v7211_v23  ;;  %7788 = vrot.lane.b32.xlu0 %v7731_v8, %s14860_s11 }
 0xebb   :  { %v7629_v55 = vrot.slane %v18312_v44, %v21397_v48  ;;  %v7478_v25 = vrot.slane %v7243_v27, %v21397_v48  ;;  %v7471_v23 = vcombine.high %v7243_v27, %v7243_v27 }
 0xebc   :  { %v7179_v16 = vpop.permute.xlu1 %7178 }
 0xebd   :  { %v7637_v60 = vcombine.high %v7629_v55, %v7629_v55  ;;  %v7645_v49 = vrot.slane %v7629_v55, %v21397_v48  ;;  %v7486_v7 = vcombine.high %v7478_v25, %v7478_v25  ;;  %v7494_v8 = vrot.slane %v7478_v25, %v21397_v48 }
 0xebe   :  { %v7183_v17 = vadd.f32 %v7179_v16, %v7151_v63  ;;  %v18338_v55 = vrot.slane %v8190_v62, %v21397_v48  ;;  %v18344_v27 = vrot.slane %v7471_v23, %v21397_v48 }
 0xebf   :  { %v7915_v28 = vrot.slane %v7645_v49, %v21400_v58  ;;  %v18326_v24 = vrot.slane %v7637_v60, %v21397_v48  ;;  %v7508_v57 = vrot.slane %v7486_v7, %v21397_v48  ;;  %v7739_v60 = vrot.slane %v18330_v41, %v21400_v58 }
 0xec0   :  { %v8246_v25 = vrot.slane %v7183_v17, %v21397_v48  ;;  %v7516_v16 = vcombine.high %v7494_v8, %v7494_v8  ;;  %v8379_v7 = vrot.slane %v8235_v38, %v21400_v58  ;;  %v18353_v62 = vrot.slane %v18338_v55, %v21397_v48 }
 0xec1   :  { %7976 = vrot.lane.b32.xlu0 %v7915_v28, %s14860_s11  ;;  %v7919_v2 = vrot.slane %v18326_v24, %v21400_v58  ;;  %v7759_v63 = vrot.slane %v7508_v57, %v21400_v58  ;;  %v18359_v23 = vrot.slane %v18344_v27, %v21397_v48 }
 0xec2   :  { %v8254_v28 = vcombine.high %v8246_v25, %v8246_v25  ;;  %v7763_v18 = vrot.slane %v7516_v16, %v21400_v58  ;;  %v8262_v38 = vrot.slane %v8246_v25, %v21397_v48 }
 0xec3   :  { %7978 = vrot.lane.b32.xlu1 %v7919_v2, %s14860_s11  ;;  %v8387_v2 = vrot.slane %v18353_v62, %v21400_v58 }
 0xec4   :  { %v8284_v21 = vcombine.high %v8262_v38, %v8262_v38 }
 0xec5   :  { %7792 = vrot.lane.b32.xlu0 %v7739_v60, %s14860_s11  ;;  %v8239_v60 = vcombine.high %v7183_v17, %v7183_v17  ;;  %v7469_v17 = vcombine.high %v18290_v45, %v18290_v45 }
 0xec7   :  { %7802 = vrot.lane.b32.xlu1 %v7759_v63, %s14860_s11  ;;  %v7771_v63 = vrot.slane %v18359_v23, %v21400_v58  ;;  %v18378_v25 = vrot.slane %v8239_v60, %v21397_v48 }
 0xec8   :  { %v7299_v16 = vpop.permute.xlu1 %7298 }
 0xec9   :  { %8436 = vrot.lane.b32.xlu0 %v8379_v7, %s14860_s11  ;;  %v18369_v7 = vrot.slane %v8254_v28, %v21397_v48  ;;  %v18392_v60 = vrot.slane %v18378_v25, %v21397_v48 }
 0xecb   :  { %7804 = vrot.lane.b32.xlu1 %v7763_v18, %s14860_s11  ;;  %v7755_v18 = vrot.slane %v7494_v8, %v21400_v58  ;;  %v8407_v28 = vrot.slane %v18369_v7, %v21400_v58  ;;  %v7735_v8 = vrot.slane %v7469_v17, %v21400_v58  ;;  %v7518_v17 = vcombine.high %v7508_v57, %v7508_v57 }
 0xecd   :  { %8440 = vrot.lane.b32.xlu0 %v8387_v2, %s14860_s11  ;;  %v7303_v2 = vadd.f32 %v7299_v16, %v7271_v14  ;;  %v8411_v14 = vrot.slane %v8284_v21, %v21400_v58  ;;  %v7622_v16 = vcombine.high %v18312_v44, %v18312_v44  ;;  %v8419_v21 = vrot.slane %v18392_v60, %v21400_v58 }
 0xecf   :  { %7808 = vrot.lane.b32.xlu1 %v7771_v63, %s14860_s11  ;;  %v7667_v63 = vcombine.high %v7645_v49, %v7645_v49  ;;  %v7678_v45 = vrot.slane %v7303_v2, %v21397_v48 }
 0xed1   :  { %7800 = vrot.lane.b32.xlu0 %v7755_v18, %s14860_s11  ;;  %v7923_v12 = vrot.slane %v7667_v63, %v21400_v58  ;;  %v18399_v18 = vrot.slane %v7438_v9, %v21397_v48  ;;  %v7686_v49 = vcombine.high %v7678_v45, %v7678_v45  ;;  %v7694_v9 = vrot.slane %v7678_v45, %v21397_v48 }
 0xed2   :  { %v7767_v63 = vrot.slane %v7518_v17, %v21400_v58 }
 0xed3   :  { %8450 = vrot.lane.b32.xlu1 %v8407_v28, %s14860_s11  ;;  %v18405_v28 = vrot.slane %v7622_v16, %v21397_v48  ;;  %v7743_v44 = vrot.slane %v18399_v18, %v21400_v58  ;;  %v7716_v45 = vcombine.high %v7694_v9, %v7694_v9 }
 0xed5   :  { %7790 = vrot.lane.b32.xlu0 %v7735_v8, %s14860_s11  ;;  %v7468_v8 = vcombine.high %v18330_v41, %v18330_v41  ;;  %v18420_v16 = vrot.slane %v18405_v28, %v21397_v48  ;;  %v7955_v17 = vrot.slane %v7716_v45, %v21400_v58 }
 0xed7   :  { %8452 = vrot.lane.b32.xlu1 %v8411_v14, %s14860_s11  ;;  %v7708_v14 = vrot.slane %v7686_v49, %v21397_v48  ;;  %v7747_v57 = vrot.slane %v7468_v8, %v21400_v58  ;;  %v7931_v49 = vrot.slane %v18420_v16, %v21400_v58  ;;  %v8403_v8 = vrot.slane %v8262_v38, %v21400_v58 }
 0xed9   :  { %7980 = vrot.lane.b32.xlu0 %v7923_v12, %s14860_s11  ;;  %v7487_v12 = vcombine.high %v18344_v27, %v18344_v27  ;;  %v7951_v41 = vrot.slane %v7708_v14, %v21400_v58  ;;  %v8206_v27 = vcombine.high %v18338_v55, %v18338_v55 }
 0xedb   :  { %8456 = vrot.lane.b32.xlu1 %v8419_v21, %s14860_s11  ;;  %v7671_v21 = vcombine.high %v7303_v2, %v7303_v2 }
 0xedd   :  { %7794 = vrot.lane.b32.xlu0 %v7743_v44, %s14860_s11  ;;  %v7515_v44 = vrot.slane %v7487_v12, %v21397_v48  ;;  %v8234_v12 = vrot.slane %v8206_v27, %v21397_v48 }
 0xedf   :  { %7806 = vrot.lane.b32.xlu1 %v7767_v63, %s14860_s11  ;;  %v8237_v63 = vcombine.high %v18298_v35, %v18298_v35  ;;  %v7775_v2 = vrot.slane %v7515_v44, %v21400_v58  ;;  %v8391_v45 = vrot.slane %v8234_v12, %v21400_v58 }
 0xee1   :  { %7796 = vrot.lane.b32.xlu0 %v7747_v57, %s14860_s11  ;;  %v7685_v57 = vrot.slane %v7671_v21, %v21397_v48  ;;  %v8383_v55 = vrot.slane %v8237_v63, %v21400_v58  ;;  %v7669_v63 = vcombine.high %v18326_v24, %v18326_v24 }
 0xee3   :  { %7994 = vrot.lane.b32.xlu1 %v7951_v41, %s14860_s11  ;;  %v7517_v41 = vcombine.high %v18359_v23, %v18359_v23  ;;  %v7701_v35 = vrot.slane %v7685_v57, %v21397_v48  ;;  %v8255_v23 = vcombine.high %v18378_v25, %v18378_v25  ;;  %v7947_v25 = vrot.slane %v7694_v9, %v21400_v58 }
 0xee4   :  { %v7470_v9 = vcombine.high %v18399_v18, %v18399_v18 }
 0xee5   :  { %7984 = vrot.lane.b32.xlu0 %v7931_v49, %s14860_s11  ;;  %v7779_v38 = vrot.slane %v7517_v41, %v21400_v58  ;;  %v8236_v49 = vcombine.high %v18353_v62, %v18353_v62  ;;  %v7963_v21 = vrot.slane %v7701_v35, %v21400_v58  ;;  %v8283_v62 = vrot.slane %v8255_v23, %v21397_v48 }
 0xee6   :  { %v7638_v41 = vcombine.high %v18405_v28, %v18405_v28  ;;  %v7519_v23 = vcombine.high %v7515_v44, %v7515_v44 }
 0xee7   :  { %7996 = vrot.lane.b32.xlu1 %v7955_v17, %s14860_s11  ;;  %v8286_v17 = vcombine.high %v18369_v7, %v18369_v7  ;;  %v8395_v27 = vrot.slane %v8236_v49, %v21400_v58  ;;  %v8423_v7 = vrot.slane %v8283_v62, %v21400_v58  ;;  %v7687_v49 = vcombine.high %v7685_v57, %v7685_v57 }
 0xee9   :  { %8448 = vrot.lane.b32.xlu0 %v8403_v8, %s14860_s11  ;;  %v8415_v8 = vrot.slane %v8286_v17, %v21400_v58  ;;  %v7715_v17 = vrot.slane %v7687_v49, %v21397_v48 }
 0xeeb   :  { %7810 = vrot.lane.b32.xlu1 %v7775_v2, %s14860_s11  ;;  %v8285_v2 = vcombine.high %v18392_v60, %v18392_v60  ;;  %v7666_v60 = vrot.slane %v7638_v41, %v21397_v48  ;;  %v7967_v44 = vrot.slane %v7715_v17, %v21400_v58  ;;  %v7719_v41 = vcombine.high %v7715_v17, %v7715_v17 }
 0xeed   :  { %8438 = vrot.lane.b32.xlu0 %v8383_v55, %s14860_s11  ;;  %v7927_v55 = vrot.slane %v7669_v63, %v21400_v58  ;;  %v8427_v24 = vrot.slane %v8285_v2, %v21400_v58  ;;  %v7935_v18 = vrot.slane %v7666_v60, %v21400_v58 }
 0xeef   :  { %7812 = vrot.lane.b32.xlu1 %v7779_v38, %s14860_s11  ;;  %v7718_v38 = vcombine.high %v7708_v14, %v7708_v14  ;;  %v7783_v14 = vrot.slane %v7519_v23, %v21400_v58 }
 0xef1   :  { %8442 = vrot.lane.b32.xlu0 %v8391_v45, %s14860_s11  ;;  %v7751_v45 = vrot.slane %v7470_v9, %v21400_v58  ;;  %v7959_v28 = vrot.slane %v7718_v38, %v21400_v58 }
 0xef3   :  { %8000 = vrot.lane.b32.xlu1 %v7963_v21, %s14860_s11  ;;  %v7668_v21 = vcombine.high %v18420_v16, %v18420_v16 }
 0xef5   :  { %8444 = vrot.lane.b32.xlu0 %v8395_v27, %s14860_s11  ;;  %v7939_v57 = vrot.slane %v7668_v21, %v21400_v58  ;;  %v8238_v27 = vcombine.high %v8234_v12, %v8234_v12 }
 0xef7   :  { %8454 = vrot.lane.b32.xlu1 %v8415_v8, %s14860_s11  ;;  %v7717_v8 = vcombine.high %v7701_v35, %v7701_v35  ;;  %v8399_v16 = vrot.slane %v8238_v27, %v21400_v58  ;;  %v7975_v35 = vrot.slane %v7719_v41, %v21400_v58 }
 0xef9   :  { %7992 = vrot.lane.b32.xlu0 %v7947_v25, %s14860_s11  ;;  %v7670_v25 = vcombine.high %v7666_v60, %v7666_v60  ;;  %v7971_v63 = vrot.slane %v7717_v8, %v21400_v58 }
 0xefb   :  { %8458 = vrot.lane.b32.xlu1 %v8423_v7, %s14860_s11  ;;  %v8287_v7 = vcombine.high %v8283_v62, %v8283_v62  ;;  %v7943_v2 = vrot.slane %v7670_v25, %v21400_v58 }
 0xefd   :  { %7982 = vrot.lane.b32.xlu0 %v7927_v55, %s14860_s11  ;;  %v8431_v12 = vrot.slane %v8287_v7, %v21400_v58  ;;  %v14684_v55 = vld [vmem:[#allocation5] sm:$0xff] }
 0xefe   :  { %v7244_v9 = vmul.f32 %v14684_v55, %v18042_v10  ;;  %v7184_v62 = vmul.f32 %v14684_v55, %v18033_v52 }
 0xeff   :  { %8460 = vrot.lane.b32.xlu1 %v8427_v24, %s14860_s11  ;;  %v7124_v24 = vmul.f32 %v14684_v55, %v18035_v11 }
 0xf00   :  { %v18511_v38 = vadd.f32 %v18275_v0, %v7244_v9  ;;  %v18514_v60 = vadd.f32 %v18271_v50, %v7184_v62 }
 0xf01   :  { %7798 = vrot.lane.b32.xlu0 %v7751_v45, %s14860_s11  ;;  %v18517_v49 = vadd.f32 %v18273_v54, %v7124_v24 }
 0xf02   :  { %v7313_v10 = vrot.slane %v18514_v60, %v21397_v48 }
 0xf03   :  { %7998 = vrot.lane.b32.xlu1 %v7959_v28, %s14860_s11  ;;  %v7529_v28 = vrot.slane %v18511_v38, %v21397_v48  ;;  %v8081_v52 = vrot.slane %v18517_v49, %v21397_v48 }
 0xf04   :  { %v18529_v54 = vrot.slane %v7313_v10, %v21397_v48 }
 0xf05   :  { %7986 = vrot.lane.b32.xlu0 %v7935_v18, %s14860_s11  ;;  %v7537_v23 = vcombine.high %v7529_v28, %v7529_v28  ;;  %v7321_v18 = vcombine.high %v7313_v10, %v7313_v10  ;;  %v8089_v21 = vcombine.high %v8081_v52, %v8081_v52  ;;  %v18526_v50 = vrot.slane %v7529_v28, %v21397_v48 }
 0xf07   :  { %7814 = vrot.lane.b32.xlu1 %v7783_v14, %s14860_s11  ;;  %v18532_v14 = vrot.slane %v8081_v52, %v21397_v48  ;;  %v18535_v17 = vrot.slane %v7537_v23, %v21397_v48  ;;  %v18540_v27 = vrot.slane %v8089_v21, %v21397_v48  ;;  %v18545_v8 = vrot.slane %v7321_v18, %v21397_v48 }
 0xf09   :  { %7988 = vrot.lane.b32.xlu0 %v7939_v57, %s14860_s11  ;;  %v8291_v7 = vrot.slane %v18532_v14, %v21400_v58  ;;  %v7839_v41 = vrot.slane %v18535_v17, %v21400_v58 }
 0xf0b   :  { %8002 = vrot.lane.b32.xlu1 %v7967_v44, %s14860_s11  ;;  %v8480_v28 = vsel %vm1336_vm0, %v18532_v14, %v8291_v7 }
 0xf0d   :  { %8446 = vrot.lane.b32.xlu0 %v8399_v16, %s14860_s11  ;;  %v7835_v16 = vrot.slane %v18526_v50, %v21400_v58 }
 0xf0f   :  { %8004 = vrot.lane.b32.xlu1 %v7971_v63, %s14860_s11 }
 0xf11   :  { %7990 = vrot.lane.b32.xlu0 %v7943_v2, %s14860_s11 }
 0xf13   :  { %8462 = vrot.lane.b32.xlu1 %v8431_v12, %s14860_s11 }
 0xf17   :  { %8006 = vrot.lane.b32.xlu1 %v7975_v35, %s14860_s11  ;;  %v8295_v35 = vrot.slane %v18540_v27, %v21400_v58 }
 0xf19   :  { %v8481_v21 = vsel %vm1336_vm0, %v18540_v27, %v8295_v35 }
 0xf23   :  { %v7785_v45 = vpop.permute.xlu0 %7784 }
 0xf24   :  { %v8024_v44 = vsel %vm1336_vm0, %v18529_v54, %v7785_v45 }
 0xf25   :  { %v7787_v0 = vpop.permute.xlu1 %7786  ;;  %v8040_v2 = vsel %vm1353_vm2, %v8024_v44, %v7835_v16 }
 0xf26   :  { %v8025_v63 = vsel %vm1336_vm0, %v18545_v8, %v7787_v0 }
 0xf27   :  { %v8433_v11 = vpop.permute.xlu0 %8432  ;;  %v8041_v62 = vsel %vm1353_vm2, %v8025_v63, %v7839_v41 }
 0xf28   :  { %v8496_v18 = vsel %vm1353_vm2, %v8480_v28, %v8433_v11 }
 0xf29   :  { %v8435_v25 = vpop.permute.xlu1 %8434 }
 0xf2b   :  { %v18537_v57 = vpop.permute.xlu0 %7788 }
 0xf33   :  { %v7977_v12 = vpop.permute.xlu0 %7976 }
 0xf34   :  { %v8056_v55 = vsel %vm1370_vm3, %v8040_v2, %v7977_v12  ;;  %v8497_v12 = vsel %vm1353_vm2, %v8481_v21, %v8435_v25 }
 0xf35   :  { %v8842_v9 = vrot.slane %v8056_v55, %v21397_v48  ;;  %v7979_v24 = vpop.permute.xlu1 %7978  ;;  %v18580_v55 = vsel %vm1370_vm3, %v8496_v18, %v8433_v11 }
 0xf36   :  { %v8057_v45 = vsel %vm1370_vm3, %v8041_v62, %v7979_v24 }
 0xf37   :  { %v8843_v10 = vcombine.high %v8842_v9, %v8842_v9  ;;  %v8850_v52 = vrot.slane %v8842_v9, %v21397_v48  ;;  %v8866_v23 = vrot.slane %v8057_v45, %v21397_v48  ;;  %v18566_v0 = vpop.permute.xlu0 %7792 }
 0xf39   :  { %v18572_v44 = vrot.slane %v8843_v10, %v21397_v48  ;;  %v8858_v16 = vcombine.high %v8850_v52, %v8850_v52  ;;  %v8867_v63 = vcombine.high %v8866_v23, %v8866_v23  ;;  %v8874_v2 = vrot.slane %v8866_v23, %v21397_v48  ;;  %v18575_v7 = vpop.permute.xlu1 %7802 }
 0xf3a   :  { %v9223_v41 = vrot.slane %v8850_v52, %v21400_v58  ;;  %v8513_v10 = vsel %vm1370_vm3, %v8497_v12, %v8435_v25 }
 0xf3b   :  { %v8881_v9 = vrot.slane %v8867_v63, %v21397_v48  ;;  %v18583_v62 = vpop.permute.xlu0 %8436  ;;  %v9227_v35 = vrot.slane %v18572_v44, %v21400_v58  ;;  %v9239_v24 = vrot.slane %v8874_v2, %v21400_v58  ;;  %v9231_v28 = vrot.slane %v8858_v16, %v21400_v58 }
 0xf3c   :  { %v9540_v45 = vmul.f32 %v9223_v41, %v18580_v55  ;;  %v8882_v52 = vcombine.high %v8874_v2, %v8874_v2 }
 0xf3d   :  { %v18591_v23 = vpop.permute.xlu1 %7804  ;;  %v9541_v11 = vmul.f32 %v9227_v35, %v18580_v55  ;;  %v9544_v21 = vmul.f32 %v9239_v24, %v8513_v10  ;;  %v9243_v63 = vrot.slane %v8881_v9, %v21400_v58  ;;  %v9542_v41 = vmul.f32 %v9231_v28, %v18580_v55 }
 0xf3e   :  { %v9604_v18 = vsel %vm2919_vm4, %v9540_v45, 0.0  ;;  %v8883_v25 = vcombine.high %v8881_v9, %v8881_v9  ;;  %v9247_v2 = vrot.slane %v8882_v52, %v21400_v58  ;;  %v7567_v28 = vcombine.high %v18526_v50, %v18526_v50 }
 0xf3f   :  { %9605 = vadd.xlane.f32.xlu0 %v9604_v18  ;;  %v18596_v4 = vpop.permute.xlu0 %8440  ;;  %v9607_v39 = vsel %vm2919_vm4, %v9541_v11, 0.0  ;;  %v9616_v12 = vsel %vm2919_vm4, %v9544_v21, 0.0  ;;  %v9545_v35 = vmul.f32 %v9243_v63, %v8513_v10  ;;  %v9610_v45 = vsel %vm2919_vm4, %v9542_v41, 0.0 }
 0xf40   :  { %9608 = vadd.xlane.f32.xlu1 %v9607_v39  ;;  %v9251_v18 = vrot.slane %v8883_v25, %v21400_v58  ;;  %v7351_v9 = vcombine.high %v18529_v54, %v18529_v54  ;;  %v8119_v11 = vcombine.high %v18532_v14, %v18532_v14  ;;  %v9546_v63 = vmul.f32 %v9247_v2, %v8513_v10 }
 0xf41   :  { %v18600_v16 = vpop.permute.xlu1 %7808  ;;  %v9619_v21 = vsel %vm2919_vm4, %v9545_v35, 0.0  ;;  %v7522_v50 = vcombine.high %v18511_v38, %v18511_v38  ;;  %v7306_v54 = vcombine.high %v18514_v60, %v18514_v60  ;;  %v8074_v14 = vcombine.high %v18517_v49, %v18517_v49 }
 0xf42   :  { %v18610_v39 = vmul.f32 %v9251_v18, %v8513_v10  ;;  %v8026_v25 = vsel %vm1336_vm0, %v7351_v9, %v18537_v57  ;;  %v8299_v35 = vrot.slane %v8119_v11, %v21400_v58  ;;  %v9622_v10 = vsel %vm2919_vm4, %v9546_v63, 0.0 }
 0xf43   :  { %9617 = vadd.xlane.f32.xlu0 %v9616_v12  ;;  %v18604_v24 = vpop.permute.xlu0 %7800  ;;  %v7843_v12 = vrot.slane %v7567_v28, %v21400_v58  ;;  %v18637_v18 = vrot.slane %v7522_v50, %v21397_v48  ;;  %v18641_v28 = vrot.slane %v7306_v54, %v21397_v48  ;;  %v8088_v49 = vrot.slane %v8074_v14, %v21397_v48 }
 0xf44   :  { %9611 = vadd.xlane.f32.xlu1 %v9610_v45  ;;  %v8482_v9 = vsel %vm1336_vm0, %v8119_v11, %v8299_v35 }
 0xf45   :  { %v18616_v52 = vpop.permute.xlu1 %8450  ;;  %v8042_v2 = vsel %vm1353_vm2, %v8026_v25, %v7843_v12  ;;  %v18654_v50 = vrot.slane %v18637_v18, %v21397_v48  ;;  %v8104_v11 = vrot.slane %v8088_v49, %v21397_v48  ;;  %v18662_v35 = vrot.slane %v18641_v28, %v21397_v48 }
 0xf47   :  { %9620 = vadd.xlane.f32.xlu0 %v9619_v21  ;;  %v18619_v41 = vpop.permute.xlu0 %7790  ;;  %v8498_v21 = vsel %vm1353_vm2, %v8482_v9, %v18583_v62  ;;  %v8028_v9 = vsel %vm1336_vm0, %v18662_v35, %v18566_v0  ;;  %v7851_v15 = vrot.slane %v18654_v50, %v21400_v58  ;;  %v18769_v1 = vcombine.high %v8104_v11, %v8104_v11 }
 0xf49   :  { %v18633_v57 = vpop.permute.xlu1 %8452 }
 0xf4b   :  { %9623 = vadd.xlane.f32.xlu0 %v9622_v10  ;;  %v7981_v45 = vpop.permute.xlu0 %7980  ;;  %v18666_v10 = vsel %vm1370_vm3, %v8498_v21, %v18583_v62  ;;  %v8307_v21 = vrot.slane %v8104_v11, %v21400_v58 }
 0xf4c   :  { %v8058_v38 = vsel %vm1370_vm3, %v8042_v2, %v7981_v45 }
 0xf4d   :  { %v8890_v60 = vrot.slane %v8058_v38, %v21397_v48  ;;  %v18668_v2 = vpop.permute.xlu1 %8456 }
 0xf4f   :  { %v8891_v63 = vcombine.high %v8890_v60, %v8890_v60  ;;  %v18648_v25 = vrot.slane %v8890_v60, %v21397_v48  ;;  %v18650_v12 = vpop.permute.xlu0 %7794 }
 0xf51   :  { %v8905_v54 = vrot.slane %v8891_v63, %v21397_v48  ;;  %v9255_v14 = vrot.slane %v18648_v25, %v21400_v58  ;;  %v18685_v30 = vpop.permute.xlu1 %7806 }
 0xf53   :  { %v18670_v45 = vpop.permute.xlu0 %7796  ;;  %v9548_v38 = vmul.f32 %v9255_v14, %v18666_v10  ;;  %v9259_v60 = vrot.slane %v8905_v54, %v21400_v58  ;;  %v8907_v63 = vcombine.high %v8905_v54, %v8905_v54  ;;  %v8044_v14 = vsel %vm1353_vm2, %v8028_v9, %v7851_v15 }
 0xf55   :  { %v9628_v29 = vsel %vm2919_vm4, %v9548_v38, 0.0  ;;  %v9549_v62 = vmul.f32 %v9259_v60, %v18666_v10  ;;  %v9267_v13 = vrot.slane %v8907_v63, %v21400_v58  ;;  %v14685_v60 = vld [vmem:[#allocation5 + $0x8] sm:$0xff] }
 0xf56   :  { %9629 = vadd.xlane.f32.xlu1 %v9628_v29  ;;  %v8484_v29 = vsel %vm1336_vm0, %v8104_v11, %v8307_v21  ;;  %v7245_v63 = vmul.f32 %v14685_v60, %v18127_v3 }
 0xf57   :  { %v7985_v51 = vpop.permute.xlu0 %7984  ;;  %v9631_v20 = vsel %vm2919_vm4, %v9549_v62, 0.0  ;;  %v18689_v54 = vmul.f32 %v9267_v13, %v18666_v10  ;;  %v8500_v15 = vsel %vm1353_vm2, %v8484_v29, %v18596_v4  ;;  %v7125_v13 = vmul.f32 %v14685_v60, %v18044_v42  ;;  %v18719_v29 = vpop.permute.xlu1 %7994 }
 0xf58   :  { %v8060_v0 = vsel %vm1370_vm3, %v8044_v14, %v7985_v51  ;;  %9632 = vadd.xlane.f32.xlu0 %v9631_v20  ;;  %v7185_v20 = vmul.f32 %v14685_v60, %v18080_v6  ;;  %v18707_v62 = vadd.f32 %v18300_v34, %v7245_v63  ;;  %v8090_v6 = vcombine.high %v8088_v49, %v8088_v49 }
 0xf59   :  { %v18692_v38 = vrot.slane %v8060_v0, %v21397_v48  ;;  %v18713_v14 = vadd.f32 %v18285_v31, %v7125_v13  ;;  %v18717_v0 = vsel %vm1370_vm3, %v8500_v15, %v18596_v4  ;;  %v7322_v15 = vcombine.high %v18641_v28, %v18641_v28 }
 0xf5a   :  { %v7209_v3 = vadd.f32 %v18279_v59, %v7185_v20  ;;  %v7578_v34 = vrot.slane %v18707_v62, %v21397_v48  ;;  %v7538_v59 = vcombine.high %v18637_v18, %v18637_v18  ;;  %v18733_v49 = vrot.slane %v8090_v6, %v21397_v48 }
 0xf5b   :  { %v18700_v9 = vrot.slane %v18692_v38, %v21397_v48  ;;  %v18702_v51 = vpop.permute.xlu0 %8448  ;;  %v8130_v4 = vrot.slane %v18713_v14, %v21397_v48  ;;  %v18739_v20 = vpop.permute.xlu1 %7996  ;;  %v7569_v13 = vcombine.high %v18535_v17, %v18535_v17  ;;  %v8121_v28 = vcombine.high %v18540_v27, %v18540_v27 }
 0xf5c   :  { %v7362_v31 = vrot.slane %v7209_v3, %v21397_v48  ;;  %v18744_v18 = vrot.slane %v7578_v34, %v21397_v48  ;;  %v8311_v40 = vrot.slane %v18733_v49, %v21400_v58  ;;  %v18767_v61 = vrot.slane %v7322_v15, %v21397_v48 }
 0xf5d   :  { %v9287_v21 = vrot.slane %v18700_v9, %v21400_v58  ;;  %v7568_v27 = vcombine.high %v18654_v50, %v18654_v50  ;;  %v7847_v19 = vrot.slane %v7569_v13, %v21400_v58  ;;  %v8303_v5 = vrot.slane %v8121_v28, %v21400_v58 }
 0xf5e   :  { %v18750_v6 = vrot.slane %v7362_v31, %v21397_v48  ;;  %v7867_v33 = vrot.slane %v18744_v18, %v21400_v58  ;;  %v18790_v26 = vsel %vm1336_vm0, %v18733_v49, %v8311_v40  ;;  %v8138_v37 = vcombine.high %v8130_v4, %v8130_v4 }
 0xf5f   :  { %v18721_v56 = vpop.permute.xlu0 %8438  ;;  %v9556_v42 = vmul.f32 %v9287_v21, %v18717_v0  ;;  %v18747_v21 = vrot.slane %v7538_v59, %v21397_v48  ;;  %v18783_v11 = vpop.permute.xlu1 %7810  ;;  %v8939_v40 = vcombine.high %v18692_v38, %v18692_v38 }
 0xf60   :  { %v8032_v59 = vsel %vm1336_vm0, %v18750_v6, %v18604_v24 }
 0xf61   :  { %v9652_v60 = vsel %vm2919_vm4, %v9556_v42, 0.0  ;;  %v7355_v42 = vcombine.high %v7209_v3, %v7209_v3  ;;  %v7353_v3 = vcombine.high %v18545_v8, %v18545_v8  ;;  %v7370_v8 = vcombine.high %v7362_v31, %v7362_v31 }
 0xf62   :  { %9653 = vadd.xlane.f32.xlu1 %v9652_v60  ;;  %v18753_v60 = vrot.slane %v8130_v4, %v21397_v48  ;;  %v7855_v50 = vrot.slane %v18747_v21, %v21400_v58  ;;  %v8048_v13 = vsel %vm1353_vm2, %v8032_v59, %v7867_v33  ;;  %v8859_v31 = vcombine.high %v18572_v44, %v18572_v44 }
 0xf63   :  { %v18735_v63 = vpop.permute.xlu0 %8442  ;;  %v18779_v24 = vrot.slane %v7355_v42, %v21397_v48  ;;  %v7586_v42 = vcombine.high %v7578_v34, %v7578_v34  ;;  %v8027_v43 = vsel %vm1336_vm0, %v7353_v3, %v18619_v41  ;;  %v18804_v33 = vrot.slane %v7568_v27, %v21400_v58 }
 0xf64   :  { %v8323_v15 = vrot.slane %v18753_v60, %v21400_v58  ;;  %v18807_v44 = vrot.slane %v7370_v8, %v21397_v48  ;;  %v7400_v41 = vcombine.high %v18750_v6, %v18750_v6  ;;  %v8043_v4 = vsel %vm1353_vm2, %v8027_v43, %v7847_v19 }
 0xf65   :  { %v18813_v34 = vrot.slane %v18779_v24, %v21397_v48  ;;  %v9235_v3 = vrot.slane %v8859_v31, %v21400_v58  ;;  %v18825_v6 = vrot.slane %v7586_v42, %v21397_v48  ;;  %v8906_v27 = vcombine.high %v18648_v25, %v18648_v25 }
 0xf66   :  { %v8483_v8 = vsel %vm1336_vm0, %v8121_v28, %v8303_v5  ;;  %v18837_v19 = vrot.slane %v8939_v40, %v21397_v48  ;;  %v7571_v25 = vcombine.high %v18707_v62, %v18707_v62  ;;  %v7616_v5 = vcombine.high %v18744_v18, %v18744_v18 }
 0xf67   :  { %v18759_v17 = vpop.permute.xlu0 %8444  ;;  %v8499_v42 = vsel %vm1353_vm2, %v8483_v8, %v18721_v56  ;;  %v9543_v18 = vmul.f32 %v9235_v3, %v18580_v55 }
 0xf68   :  { %v9291_v55 = vrot.slane %v18837_v19, %v21400_v58  ;;  %v7875_v53 = vrot.slane %v7616_v5, %v21400_v58 }
 0xf6b   :  { %v7993_v46 = vpop.permute.xlu0 %7992 }
 0xf6c   :  { %v8064_v22 = vsel %vm1370_vm3, %v8048_v13, %v7993_v46  ;;  %v8488_v46 = vsel %vm1336_vm0, %v18753_v60, %v8323_v15  ;;  %v18830_v15 = vpop.permute.xlu1 %7812 }
 0xf6d   :  { %v9034_v36 = vrot.slane %v8064_v22, %v21397_v48  ;;  %v8504_v38 = vsel %vm1353_vm2, %v8488_v46, %v18702_v51  ;;  %v18834_v46 = vrot.slane %v8138_v37, %v21397_v48  ;;  %v8033_v37 = vsel %vm1336_vm0, %v18807_v44, %v18575_v7 }
 0xf6e   :  { %v18853_v28 = vsel %vm1370_vm3, %v8504_v38, %v18702_v51  ;;  %v8029_v7 = vsel %vm1336_vm0, %v18767_v61, %v18650_v12  ;;  %v7871_v51 = vrot.slane %v18825_v6, %v21400_v58  ;;  %v8954_v38 = vcombine.high %v18700_v9, %v18700_v9 }
 0xf6f   :  { %v18820_v22 = vrot.slane %v9034_v36, %v21397_v48  ;;  %v7983_v59 = vpop.permute.xlu0 %7982  ;;  %v9035_v8 = vcombine.high %v9034_v36, %v9034_v36  ;;  %v8034_v12 = vsel %vm1336_vm0, %v7400_v41, %v18591_v23  ;;  %v18884_v9 = vsel %vm1370_vm3, %v8499_v42, %v18721_v56 }
 0xf70   :  { %v8059_v13 = vsel %vm1370_vm3, %v8043_v4, %v7983_v59  ;;  %v9263_v59 = vrot.slane %v8906_v27, %v21400_v58  ;;  %v8049_v3 = vsel %vm1353_vm2, %v8033_v37, %v7871_v51  ;;  %v18886_v36 = vpop.permute.xlu1 %8000  ;;  %v9613_v23 = vsel %vm2919_vm4, %v9543_v18, 0.0 }
 0xf71   :  { %v18840_v43 = vrot.slane %v8059_v13, %v21397_v48  ;;  %v9351_v31 = vrot.slane %v18820_v22, %v21400_v58  ;;  %v8065_v27 = vsel %vm1370_vm3, %v8049_v3, %v18719_v29  ;;  %v21427_v41 = vcombine.high %v18662_v35, %v18662_v35 }
 0xf72   :  { %v9550_v37 = vmul.f32 %v9263_v59, %v18666_v10  ;;  %v9295_v42 = vrot.slane %v8954_v38, %v21400_v58  ;;  %v18902_v29 = vrot.slane %v9035_v8, %v21397_v48  ;;  %v9557_v18 = vmul.f32 %v9291_v55, %v18717_v0 }
 0xf73   :  { %v18859_v40 = vrot.slane %v18840_v43, %v21397_v48  ;;  %v18861_v4 = vpop.permute.xlu0 %7798  ;;  %v9572_v62 = vmul.f32 %v9351_v31, %v18853_v28  ;;  %v8030_v56 = vsel %vm1336_vm0, %v21427_v41, %v18670_v45  ;;  %v18908_v51 = vrot.slane %v7571_v25, %v21397_v48 }
 0xf74   :  { %v8327_v35 = vrot.slane %v18834_v46, %v21400_v58  ;;  %v8050_v10 = vsel %vm1353_vm2, %v8034_v12, %v7875_v53  ;;  %v8501_v45 = vsel %vm1353_vm2, %v18790_v26, %v18735_v63  ;;  %v8046_v25 = vsel %vm1353_vm2, %v8030_v56, %v18804_v33  ;;  %v18926_v8 = vpop.permute.xlu1 %8454 }
 0xf75   :  { %v9700_v13 = vsel %vm2919_vm4, %v9572_v62, 0.0  ;;  %v9271_v31 = vrot.slane %v18859_v40, %v21400_v58  ;;  %v8045_v62 = vsel %vm1353_vm2, %v8029_v7, %v7855_v50  ;;  %v8066_v59 = vsel %vm1370_vm3, %v8050_v10, %v18739_v20 }
 0xf76   :  { %9701 = vadd.xlane.f32.xlu1 %v9700_v13  ;;  %v9634_v53 = vsel %vm2919_vm4, %v9550_v37, 0.0  ;;  %v9655_v55 = vsel %vm2919_vm4, %v9557_v18, 0.0  ;;  %v9355_v12 = vrot.slane %v18902_v29, %v21400_v58  ;;  %v18945_v3 = vsel %vm1370_vm3, %v8501_v45, %v18735_v63 }
 0xf77   :  { %v7987_v32 = vpop.permute.xlu0 %7986  ;;  %v9552_v47 = vmul.f32 %v9271_v31, %v18884_v9  ;;  %v9558_v31 = vmul.f32 %v9295_v42, %v18717_v0  ;;  %v8168_v41 = vcombine.high %v18753_v60, %v18753_v60  ;;  %v18968_v37 = vrot.slane %v8066_v59, %v21397_v48 }
 0xf78   :  { %v8061_v5 = vsel %vm1370_vm3, %v8045_v62, %v7987_v32  ;;  %v18913_v32 = vrot.slane %v8065_v27, %v21397_v48  ;;  %v21428_v27 = vrot.slane %v18769_v1, %v21400_v58  ;;  %v8930_v60 = vcombine.high %v18859_v40, %v18859_v40  ;;  %v18978_v45 = vpop.permute.xlu1 %8458 }
 0xf79   :  { %v8962_v50 = vrot.slane %v8061_v5, %v21397_v48  ;;  %v9640_v7 = vsel %vm2919_vm4, %v9552_v47, 0.0  ;;  %v18963_v5 = vrot.slane %v18908_v51, %v21397_v48  ;;  %v9658_v18 = vsel %vm2919_vm4, %v9558_v31, 0.0 }
 0xf7a   :  { %9641 = vadd.xlane.f32.xlu0 %v9640_v7  ;;  %9614 = vadd.xlane.f32.xlu1 %v9613_v23  ;;  %v18941_v20 = vrot.slane %v18913_v32, %v21397_v48  ;;  %v8486_v62 = vsel %vm1336_vm0, %v18769_v1, %v21428_v27  ;;  %v8489_v23 = vsel %vm1336_vm0, %v18834_v46, %v8327_v35 }
 0xf7b   :  { %v18920_v47 = vrot.slane %v8962_v50, %v21397_v48  ;;  %v7989_v38 = vpop.permute.xlu0 %7988  ;;  %v8505_v1 = vsel %vm1353_vm2, %v8489_v23, %v18616_v52  ;;  %v8502_v42 = vsel %vm1353_vm2, %v8486_v62, %v18759_v17  ;;  %v8963_v7 = vcombine.high %v8962_v50, %v8962_v50 }
 0xf7c   :  { %v8062_v13 = vsel %vm1370_vm3, %v8046_v25, %v7989_v38  ;;  %v9573_v35 = vmul.f32 %v9355_v12, %v18853_v28  ;;  %v9050_v10 = vcombine.high %v18820_v22, %v18820_v22  ;;  %v9367_v59 = vrot.slane %v18941_v20, %v21400_v58 }
 0xf7d   :  { %v18932_v26 = vrot.slane %v8062_v13, %v21397_v48  ;;  %v9303_v33 = vrot.slane %v18920_v47, %v21400_v58  ;;  %v8123_v40 = vcombine.high %v18713_v14, %v18713_v14  ;;  %v8331_v50 = vrot.slane %v8168_v41, %v21400_v58 }
 0xf7e   :  { %9656 = vadd.xlane.f32.xlu0 %v9655_v55  ;;  %9635 = vadd.xlane.f32.xlu1 %v9634_v53  ;;  %v18990_v13 = vsel %vm1370_vm3, %v8502_v42, %v18759_v17  ;;  %v8036_v22 = vsel %vm1336_vm0, %v18813_v34, %v18600_v16  ;;  %v18997_v53 = vsel %vm1370_vm3, %v8505_v1, %v18616_v52 }
 0xf7f   :  { %v18958_v56 = vrot.slane %v18932_v26, %v21397_v48  ;;  %v9560_v63 = vmul.f32 %v9303_v33, %v18945_v3  ;;  %v7883_v31 = vrot.slane %v18963_v5, %v21400_v58  ;;  %v19004_v55 = vrot.slane %v18968_v37, %v21397_v48 }
 0xf80   :  { %v19007_v17 = vrot.slane %v8963_v7, %v21397_v48  ;;  %v9703_v33 = vsel %vm2919_vm4, %v9573_v35, 0.0  ;;  %v9279_v16 = vrot.slane %v8930_v60, %v21400_v58  ;;  %v8915_v52 = vcombine.high %v18840_v43, %v18840_v43  ;;  %v19023_v60 = vpop.permute.xlu1 %8460 }
 0xf81   :  { %v9664_v25 = vsel %vm2919_vm4, %v9560_v63, 0.0  ;;  %v9319_v38 = vrot.slane %v18958_v56, %v21400_v58  ;;  %v9576_v27 = vmul.f32 %v9367_v59, %v18997_v53  ;;  %v9359_v62 = vrot.slane %v9050_v10, %v21400_v58 }
 0xf82   :  { %9659 = vadd.xlane.f32.xlu0 %v9658_v18  ;;  %9665 = vadd.xlane.f32.xlu1 %v9664_v25  ;;  %v19017_v23 = vrot.slane %v8123_v40, %v21397_v48  ;;  %v8490_v63 = vsel %vm1336_vm0, %v8168_v41, %v8331_v50  ;;  %v8052_v42 = vsel %vm1353_vm2, %v8036_v22, %v7883_v31  ;;  %v9625_v43 = vsel %vm2919_vm4, %v18610_v39, 0.0  ;;  %v19037_v25 = vpop.permute.xlu0 %8446 }
 0xf83   :  { %v9564_v14 = vmul.f32 %v9319_v38, %v18990_v13  ;;  %v8506_v1 = vsel %vm1353_vm2, %v8490_v63, %v18633_v57  ;;  %v8978_v7 = vcombine.high %v18920_v47, %v18920_v47  ;;  %v8987_v18 = vcombine.high %v18932_v26, %v18932_v26 }
 0xf84   :  { %v9554_v35 = vmul.f32 %v9279_v16, %v18884_v9  ;;  %v9307_v41 = vrot.slane %v19007_v17, %v21400_v58  ;;  %v19035_v10 = vrot.slane %v8915_v52, %v21397_v48  ;;  %v9712_v38 = vsel %vm2919_vm4, %v9576_v27, 0.0 }
 0xf85   :  { %v9676_v12 = vsel %vm2919_vm4, %v9564_v14, 0.0  ;;  %v9574_v39 = vmul.f32 %v9359_v62, %v18853_v28  ;;  %v9383_v47 = vrot.slane %v19004_v55, %v21400_v58  ;;  %v7371_v26 = vcombine.high %v18779_v24, %v18779_v24 }
 0xf86   :  { %9704 = vadd.xlane.f32.xlu0 %v9703_v33  ;;  %9677 = vadd.xlane.f32.xlu1 %v9676_v12  ;;  %v19047_v59 = vrot.slane %v19017_v23, %v21397_v48  ;;  %v8068_v40 = vsel %vm1370_vm3, %v8052_v42, %v18886_v36  ;;  %v7354_v50 = vcombine.high %v18767_v61, %v18767_v61  ;;  %v9646_v36 = vsel %vm2919_vm4, %v9554_v35, 0.0 }
 0xf87   :  { %v7618_v22 = vcombine.high %v18825_v6, %v18825_v6  ;;  %v19057_v31 = vsel %vm1370_vm3, %v8506_v1, %v18633_v57  ;;  %v7402_v24 = vcombine.high %v18807_v44, %v18807_v44  ;;  %v7570_v14 = vcombine.high %v18747_v21, %v18747_v21  ;;  %v7999_v57 = vpop.permute.xlu1 %7998 }
 0xf88   :  { %v19064_v33 = vrot.slane %v8987_v18, %v21397_v48  ;;  %v9561_v61 = vmul.f32 %v9307_v41, %v18945_v3  ;;  %v9311_v16 = vrot.slane %v8978_v7, %v21400_v58  ;;  %v19070_v6 = vrot.slane %v8068_v40, %v21397_v48  ;;  %v7991_v7 = vpop.permute.xlu0 %7990 }
 0xf89   :  { %v9706_v52 = vsel %vm2919_vm4, %v9574_v39, 0.0  ;;  %v9580_v44 = vmul.f32 %v9383_v47, %v19057_v31  ;;  %v9275_v21 = vrot.slane %v19035_v10, %v21400_v58  ;;  %v8339_v12 = vrot.slane %v19047_v59, %v21400_v58 }
 0xf8a   :  { %9626 = vadd.xlane.f32.xlu0 %v9625_v43  ;;  %9713 = vadd.xlane.f32.xlu1 %v9712_v38  ;;  %v19079_v27 = vrot.slane %v7371_v26, %v21397_v48  ;;  %v8031_v62 = vsel %vm1336_vm0, %v7354_v50, %v18861_v4  ;;  %v8035_v63 = vsel %vm1336_vm0, %v7402_v24, %v18685_v30  ;;  %v9667_v35 = vsel %vm2919_vm4, %v9561_v61, 0.0 }
 0xf8b   :  { %v9059_v1 = vcombine.high %v18913_v32, %v18913_v32  ;;  %v7879_v42 = vrot.slane %v7618_v22, %v21400_v58  ;;  %v7863_v43 = vrot.slane %v7570_v14, %v21400_v58  ;;  %v9002_v18 = vcombine.high %v18958_v56, %v18958_v56  ;;  %v19117_v14 = vpop.permute.xlu1 %7814 }
 0xf8c   :  { %v9562_v41 = vmul.f32 %v9311_v16, %v18945_v3  ;;  %v9323_v4 = vrot.slane %v19064_v33, %v21400_v58  ;;  %v19097_v30 = vrot.slane %v19070_v6, %v21397_v48  ;;  %v9724_v38 = vsel %vm2919_vm4, %v9580_v44, 0.0 }
 0xf8d   :  { %v8047_v32 = vsel %vm1353_vm2, %v8031_v62, %v7863_v43  ;;  %v9553_v39 = vmul.f32 %v9275_v21, %v18884_v9  ;;  %v7587_v56 = vcombine.high %v18908_v51, %v18908_v51  ;;  %v8492_v47 = vsel %vm1336_vm0, %v19047_v59, %v8339_v12 }
 0xf8e   :  { %9647 = vadd.xlane.f32.xlu0 %v9646_v36  ;;  %9707 = vadd.xlane.f32.xlu1 %v9706_v52  ;;  %v8122_v26 = vcombine.high %v18733_v49, %v18733_v49  ;;  %v8063_v40 = vsel %vm1370_vm3, %v8047_v32, %v7991_v7  ;;  %v8508_v50 = vsel %vm1353_vm2, %v8492_v47, %v18668_v2  ;;  %v9670_v36 = vsel %vm2919_vm4, %v9562_v41, 0.0 }
 0xf8f   :  { %v19112_v22 = vrot.slane %v9059_v1, %v21397_v48  ;;  %v7401_v24 = vcombine.high %v18813_v34, %v18813_v34  ;;  %v8051_v51 = vsel %vm1353_vm2, %v8035_v63, %v7879_v42  ;;  %v9565_v49 = vmul.f32 %v9323_v4, %v18990_v13 }
 0xf90   :  { %v9327_v61 = vrot.slane %v9002_v18, %v21400_v58  ;;  %v8955_v16 = vcombine.high %v18837_v19, %v18837_v19  ;;  %v8067_v52 = vsel %vm1370_vm3, %v8051_v51, %v7999_v57  ;;  %v19126_v44 = vrot.slane %v8063_v40, %v21397_v48  ;;  %v8003_v18 = vpop.permute.xlu1 %8002 }
 0xf91   :  { %v9643_v34 = vsel %vm2919_vm4, %v9553_v39, 0.0  ;;  %v9415_v21 = vrot.slane %v19097_v30, %v21400_v58  ;;  %v19132_v12 = vrot.slane %v7587_v56, %v21397_v48  ;;  %v7617_v62 = vcombine.high %v18963_v5, %v18963_v5 }
 0xf92   :  { %9668 = vadd.xlane.f32.xlu0 %v9667_v35  ;;  %9725 = vadd.xlane.f32.xlu1 %v9724_v38  ;;  %v8170_v19 = vcombine.high %v18834_v46, %v18834_v46  ;;  %v8319_v57 = vrot.slane %v8122_v26, %v21400_v58  ;;  %v19141_v63 = vsel %vm1370_vm3, %v8508_v50, %v18668_v2  ;;  %v9679_v46 = vsel %vm2919_vm4, %v9565_v49, 0.0 }
 0xf93   :  { %v9074_v1 = vcombine.high %v18941_v20, %v18941_v20  ;;  %v9083_v42 = vcombine.high %v18968_v37, %v18968_v37  ;;  %v9371_v43 = vrot.slane %v19112_v22, %v21400_v58  ;;  %v19150_v5 = vrot.slane %v8067_v52, %v21397_v48 }
 0xf94   :  { %v9637_v7 = vsel %vm2919_vm4, %v18689_v54, 0.0  ;;  %v9566_v2 = vmul.f32 %v9327_v61, %v18990_v13  ;;  %v8037_v20 = vsel %vm1336_vm0, %v19079_v27, %v18783_v11  ;;  %v19161_v37 = vrot.slane %v19126_v44, %v21397_v48  ;;  %v8005_v52 = vpop.permute.xlu1 %8004 }
 0xf95   :  { %v9588_v35 = vmul.f32 %v9415_v21, %v19141_v63  ;;  %v9299_v41 = vrot.slane %v8955_v16, %v21400_v58  ;;  %v8139_v4 = vcombine.high %v19017_v23, %v19017_v23  ;;  %v8335_v54 = vrot.slane %v8170_v19, %v21400_v58 }
 0xf96   :  { %9671 = vadd.xlane.f32.xlu0 %v9670_v36  ;;  %9644 = vadd.xlane.f32.xlu1 %v9643_v34  ;;  %v7887_v32 = vrot.slane %v19132_v12, %v21400_v58  ;;  %v7891_v11 = vrot.slane %v7617_v62, %v21400_v58  ;;  %v19172_v38 = vrot.slane %v9083_v42, %v21397_v48  ;;  %v9682_v51 = vsel %vm2919_vm4, %v9566_v2, 0.0 }
 0xf97   :  { %v8487_v39 = vsel %vm1336_vm0, %v8122_v26, %v8319_v57  ;;  %v9577_v56 = vmul.f32 %v9371_v43, %v18997_v53  ;;  %v9375_v47 = vrot.slane %v9074_v1, %v21400_v58  ;;  %v8038_v23 = vsel %vm1336_vm0, %v7401_v24, %v18830_v15 }
 0xf98   :  { %v19181_v40 = vrot.slane %v19150_v5, %v21397_v48  ;;  %v8053_v50 = vsel %vm1353_vm2, %v8037_v20, %v7887_v32  ;;  %v8503_v36 = vsel %vm1353_vm2, %v8487_v39, %v19037_v25  ;;  %v9748_v26 = vsel %vm2919_vm4, %v9588_v35, 0.0 }
 0xf99   :  { %v9559_v49 = vmul.f32 %v9299_v41, %v18717_v0  ;;  %v9335_v61 = vrot.slane %v19161_v37, %v21400_v58  ;;  %v19192_v15 = vrot.slane %v8139_v4, %v21397_v48  ;;  %v8491_v24 = vsel %vm1336_vm0, %v8170_v19, %v8335_v54 }
 0xf9a   :  { %9680 = vadd.xlane.f32.xlu0 %v9679_v46  ;;  %9638 = vadd.xlane.f32.xlu1 %v9637_v7  ;;  %v8069_v16 = vsel %vm1370_vm3, %v8053_v50, %v8003_v18  ;;  %v8054_v34 = vsel %vm1353_vm2, %v8038_v23, %v7891_v11  ;;  %v9715_v21 = vsel %vm2919_vm4, %v9577_v56, 0.0  ;;  %v9578_v62 = vmul.f32 %v9375_v47, %v18997_v53 }
 0xf9b   :  { %v9387_v0 = vrot.slane %v19172_v38, %v21400_v58  ;;  %v8507_v57 = vsel %vm1353_vm2, %v8491_v24, %v18926_v8  ;;  %v19205_v1 = vsel %vm1370_vm3, %v8503_v36, %v19037_v25  ;;  %v9399_v19 = vrot.slane %v19181_v40, %v21400_v58 }
 0xf9c   :  { %v9051_v42 = vcombine.high %v18902_v29, %v18902_v29  ;;  %v19212_v43 = vrot.slane %v8069_v16, %v21397_v48  ;;  %v9661_v46 = vsel %vm2919_vm4, %v9559_v49, 0.0  ;;  %v9568_v7 = vmul.f32 %v9335_v61, %v19205_v1 }
 0xf9d   :  { %v8931_v2 = vcombine.high %v19035_v10, %v19035_v10  ;;  %v8343_v25 = vrot.slane %v19192_v15, %v21400_v58  ;;  %v8070_v20 = vsel %vm1370_vm3, %v8054_v34, %v8005_v52  ;;  %v9098_v29 = vcombine.high %v19004_v55, %v19004_v55 }
 0xf9e   :  { %9683 = vadd.xlane.f32.xlu0 %v9682_v51  ;;  %9749 = vadd.xlane.f32.xlu1 %v9748_v26  ;;  %v9131_v18 = vcombine.high %v19070_v6, %v19070_v6  ;;  %v19227_v35 = vsel %vm1370_vm3, %v8507_v57, %v18926_v8  ;;  %v8169_v41 = vcombine.high %v19047_v59, %v19047_v59  ;;  %v9718_v10 = vsel %vm2919_vm4, %v9578_v62, 0.0 }
 0xf9f   :  { %v9581_v4 = vmul.f32 %v9387_v0, %v19057_v31  ;;  %v9584_v54 = vmul.f32 %v9399_v19, %v19227_v35  ;;  %v9363_v32 = vrot.slane %v9051_v42, %v21400_v58  ;;  %v19237_v55 = vrot.slane %v19212_v43, %v21397_v48 }
 0xfa0   :  { %v19240_v6 = vrot.slane %v8070_v20, %v21397_v48  ;;  %v9688_v8 = vsel %vm2919_vm4, %v9568_v7, 0.0  ;;  %v9283_v59 = vrot.slane %v8931_v2, %v21400_v58  ;;  %v19245_v11 = vrot.slane %v9131_v18, %v21397_v48  ;;  %v19294_v2 = vpop.permute.xlu1 %8462 }
 0xfa1   :  { %v8493_v39 = vsel %vm1336_vm0, %v19192_v15, %v8343_v25  ;;  %v8347_v56 = vrot.slane %v8169_v41, %v21400_v58  ;;  %v9391_v47 = vrot.slane %v9098_v29, %v21400_v58  ;;  %v9727_v50 = vsel %vm2919_vm4, %v9581_v4, 0.0 }
 0xfa2   :  { %9716 = vadd.xlane.f32.xlu0 %v9715_v21  ;;  %9662 = vadd.xlane.f32.xlu1 %v9661_v46  ;;  %v8509_v23 = vsel %vm1353_vm2, %v8493_v39, %v18978_v45  ;;  %v9575_v51 = vmul.f32 %v9363_v32, %v18853_v28  ;;  %v19257_v36 = vrot.slane %v19240_v6, %v21397_v48  ;;  %v9736_v26 = vsel %vm2919_vm4, %v9584_v54, 0.0 }
 0xfa3   :  { %v9555_v49 = vmul.f32 %v9283_v59, %v18884_v9  ;;  %v9431_v61 = vrot.slane %v19237_v55, %v21400_v58  ;;  %v9146_v24 = vcombine.high %v19097_v30, %v19097_v30  ;;  %v8494_v16 = vsel %vm1336_vm0, %v8169_v41, %v8347_v56 }
 0xfa4   :  { %v9582_v28 = vmul.f32 %v9391_v47, %v19057_v31  ;;  %v9419_v52 = vrot.slane %v19245_v11, %v21400_v58  ;;  %v19271_v34 = vsel %vm1370_vm3, %v8509_v23, %v18978_v45  ;;  %v8510_v9 = vsel %vm1353_vm2, %v8494_v16, %v19023_v60 }
 0xfa5   :  { %v9011_v21 = vcombine.high %v19126_v44, %v19126_v44  ;;  %v9709_v62 = vsel %vm2919_vm4, %v9575_v51, 0.0  ;;  %v9649_v30 = vsel %vm2919_vm4, %v9555_v49, 0.0  ;;  %v9592_v0 = vmul.f32 %v9431_v61, %v19271_v34 }
 0xfa6   :  { %9719 = vadd.xlane.f32.xlu0 %v9718_v10  ;;  %9689 = vadd.xlane.f32.xlu1 %v9688_v8  ;;  %v9447_v57 = vrot.slane %v19257_v36, %v21400_v58  ;;  %v8979_v45 = vcombine.high %v19007_v17, %v19007_v17  ;;  %v9423_v19 = vrot.slane %v9146_v24, %v21400_v58  ;;  %v9730_v46 = vsel %vm2919_vm4, %v9582_v28, 0.0 }
 0xfa7   :  { %v19287_v42 = vsel %vm1370_vm3, %v8510_v9, %v19023_v60  ;;  %v19290_v44 = vrot.slane %v9011_v21, %v21397_v48  ;;  %v9589_v7 = vmul.f32 %v9419_v52, %v19141_v63  ;;  %v9760_v25 = vsel %vm2919_vm4, %v9592_v0, 0.0 }
 0xfa8   :  { %v9596_v17 = vmul.f32 %v9447_v57, %v19287_v42  ;;  %v9315_v20 = vrot.slane %v8979_v45, %v21400_v58  ;;  %v9003_v60 = vcombine.high %v19064_v33, %v19064_v33  ;;  %v7403_v29 = vcombine.high %v19079_v27, %v19079_v27 }
 0xfa9   :  { %v7619_v18 = vcombine.high %v19132_v12, %v19132_v12  ;;  %v9590_v41 = vmul.f32 %v9423_v19, %v19141_v63  ;;  %v9107_v10 = vcombine.high %v19150_v5, %v19150_v5  ;;  %v9026_v4 = vcombine.high %v19161_v37, %v19161_v37  ;;  %v8007_v37 = vpop.permute.xlu1 %8006 }
 0xfaa   :  { %9728 = vadd.xlane.f32.xlu0 %v9727_v50  ;;  %9737 = vadd.xlane.f32.xlu1 %v9736_v26  ;;  %v9751_v54 = vsel %vm2919_vm4, %v9589_v7, 0.0  ;;  %v9339_v33 = vrot.slane %v19290_v44, %v21400_v58  ;;  %v9772_v32 = vsel %vm2919_vm4, %v9596_v17, 0.0  ;;  %v9563_v27 = vmul.f32 %v9315_v20, %v18945_v3 }
 0xfab   :  { %v9331_v12 = vrot.slane %v9003_v60, %v21400_v58  ;;  %v9075_v8 = vcombine.high %v19112_v22, %v19112_v22  ;;  %v8039_v5 = vsel %vm1336_vm0, %v7403_v29, %v19117_v14  ;;  %v7895_v59 = vrot.slane %v7619_v18, %v21400_v58 }
 0xfac   :  { %v9099_v39 = vcombine.high %v19172_v38, %v19172_v38  ;;  %v19324_v56 = vrot.slane %v9107_v10, %v21397_v48  ;;  %v9754_v3 = vsel %vm2919_vm4, %v9590_v41, 0.0  ;;  %v9569_v47 = vmul.f32 %v9339_v33, %v19205_v1 }
 0xfad   :  { %v9343_v23 = vrot.slane %v9026_v4, %v21400_v58  ;;  %v8055_v22 = vsel %vm1353_vm2, %v8039_v5, %v7895_v59  ;;  %v9673_v14 = vsel %vm2919_vm4, %v9563_v27, 0.0  ;;  %v9567_v50 = vmul.f32 %v9331_v12, %v18990_v13 }
 0xfae   :  { %9710 = vadd.xlane.f32.xlu0 %v9709_v62  ;;  %9650 = vadd.xlane.f32.xlu1 %v9649_v30  ;;  %v9379_v51 = vrot.slane %v9075_v8, %v21400_v58  ;;  %v8071_v38 = vsel %vm1370_vm3, %v8055_v22, %v8007_v37  ;;  %v9122_v26 = vcombine.high %v19181_v40, %v19181_v40  ;;  %v9691_v16 = vsel %vm2919_vm4, %v9569_v47, 0.0 }
 0xfaf   :  { %v8171_v49 = vcombine.high %v19192_v15, %v19192_v15  ;;  %v9395_v61 = vrot.slane %v9099_v39, %v21400_v58  ;;  %v9155_v24 = vcombine.high %v19212_v43, %v19212_v43  ;;  %v9570_v13 = vmul.f32 %v9343_v23, %v19205_v1 }
 0xfb0   :  { %v9403_v28 = vrot.slane %v19324_v56, %v21400_v58  ;;  %v9202_v52 = vrot.slane %v8071_v38, %v21397_v48  ;;  %v9685_v40 = vsel %vm2919_vm4, %v9567_v50, 0.0  ;;  %v9579_v9 = vmul.f32 %v9379_v51, %v18997_v53 }
 0xfb1   :  { %v9147_v15 = vcombine.high %v19245_v11, %v19245_v11  ;;  %v8351_v43 = vrot.slane %v8171_v49, %v21400_v58  ;;  %v9583_v21 = vmul.f32 %v9395_v61, %v19057_v31  ;;  %v9169_v62 = vrot.slane %v9155_v24, %v21397_v48 }
 0xfb2   :  { %9731 = vadd.xlane.f32.xlu0 %v9730_v46  ;;  %9761 = vadd.xlane.f32.xlu1 %v9760_v25  ;;  %v9694_v30 = vsel %vm2919_vm4, %v9570_v13, 0.0  ;;  %v9585_v0 = vmul.f32 %v9403_v28, %v19227_v35  ;;  %v9407_v57 = vrot.slane %v9122_v26, %v21400_v58  ;;  %v9210_v45 = vrot.slane %v9202_v52, %v21397_v48 }
 0xfb3   :  { %v9721_v53 = vsel %vm2919_vm4, %v9579_v9, 0.0  ;;  %v9427_v11 = vrot.slane %v9147_v15, %v21400_v58  ;;  %v9179_v19 = vcombine.high %v19240_v6, %v19240_v6  ;;  %v8495_v31 = vsel %vm1336_vm0, %v8171_v49, %v8351_v43 }
 0xfb4   :  { %v9733_v46 = vsel %vm2919_vm4, %v9583_v21, 0.0  ;;  %v9170_v7 = vcombine.high %v19237_v55, %v19237_v55  ;;  %v9739_v25 = vsel %vm2919_vm4, %v9585_v0, 0.0  ;;  %v9586_v17 = vmul.f32 %v9407_v57, %v19227_v35 }
 0xfb5   :  { %v9435_v20 = vrot.slane %v9169_v62, %v21400_v58  ;;  %v8511_v60 = vsel %vm1353_vm2, %v8495_v31, %v19294_v2  ;;  %v9591_v29 = vmul.f32 %v9427_v11, %v19141_v63  ;;  %v9463_v6 = vrot.slane %v9210_v45, %v21400_v58 }
 0xfb6   :  { %9752 = vadd.xlane.f32.xlu0 %v9751_v54  ;;  %9773 = vadd.xlane.f32.xlu1 %v9772_v32  ;;  %v9027_v18 = vcombine.high %v19290_v44, %v19290_v44  ;;  %v9193_v55 = vrot.slane %v9179_v19, %v21397_v48  ;;  %v8527_v41 = vsel %vm1370_vm3, %v8511_v60, %v19294_v2  ;;  %v9742_v10 = vsel %vm2919_vm4, %v9586_v17, 0.0 }
 0xfb7   :  { %v9593_v4 = vmul.f32 %v9435_v20, %v19271_v34  ;;  %v9439_v54 = vrot.slane %v9170_v7, %v21400_v58  ;;  %v9757_v63 = vsel %vm2919_vm4, %v9591_v29, 0.0  ;;  %v9600_v33 = vmul.f32 %v9463_v6, %v8527_v41  ;;  %v21429_v29 = vld [vmem:[#allocation20_spill] sm:$0xff] }
 0xfb8   :  { %v9347_v32 = vrot.slane %v9027_v18, %v21400_v58  ;;  %v9123_v44 = vcombine.high %v19324_v56, %v19324_v56  ;;  %v9194_v27 = vcombine.high %v19257_v36, %v19257_v36  ;;  %v9203_v2 = vcombine.high %v9202_v52, %v9202_v52 }
 0xfb9   :  { %v9763_v12 = vsel %vm2919_vm4, %v9593_v4, 0.0  ;;  %v9594_v8 = vmul.f32 %v9439_v54, %v19271_v34  ;;  %v9451_v5 = vrot.slane %v9193_v55, %v21400_v58  ;;  %v9784_v37 = vsel %vm2919_vm4, %v9600_v33, 0.0 }
 0xfba   :  { %9755 = vadd.xlane.f32.xlu0 %v9754_v3  ;;  %9674 = vadd.xlane.f32.xlu1 %v9673_v14  ;;  %v9571_v59 = vmul.f32 %v9347_v32, %v19205_v1  ;;  %v9411_v39 = vrot.slane %v9123_v44, %v21400_v58  ;;  %v9171_v3 = vcombine.high %v9169_v62, %v9169_v62 }
 0xfbb   :  { %v9217_v56 = vrot.slane %v9203_v2, %v21397_v48  ;;  %v9766_v36 = vsel %vm2919_vm4, %v9594_v8, 0.0  ;;  %v9597_v47 = vmul.f32 %v9451_v5, %v19287_v42  ;;  %v9455_v23 = vrot.slane %v9194_v27, %v21400_v58 }
 0xfbc   :  { %v9697_v22 = vsel %vm2919_vm4, %v9571_v59, 0.0  ;;  %v9587_v14 = vmul.f32 %v9411_v39, %v19227_v35  ;;  %v9443_v50 = vrot.slane %v9171_v3, %v21400_v58  ;;  %v9195_v1 = vcombine.high %v9193_v55, %v9193_v55 }
 0xfbd   :  { %v9218_v51 = vcombine.high %v9210_v45, %v9210_v45  ;;  %v9775_v38 = vsel %vm2919_vm4, %v9597_v47, 0.0  ;;  %v9598_v26 = vmul.f32 %v9455_v23, %v19287_v42  ;;  %v9467_v49 = vrot.slane %v9217_v56, %v21400_v58 }
 0xfbe   :  { %9692 = vadd.xlane.f32.xlu0 %v9691_v16  ;;  %9686 = vadd.xlane.f32.xlu1 %v9685_v40  ;;  %v9745_v61 = vsel %vm2919_vm4, %v9587_v14, 0.0  ;;  %v9595_v24 = vmul.f32 %v9443_v50, %v19271_v34  ;;  %v9459_v16 = vrot.slane %v9195_v1, %v21400_v58  ;;  %v9219_v52 = vcombine.high %v9217_v56, %v9217_v56 }
 0xfbf   :  { %v9778_v35 = vsel %vm2919_vm4, %v9598_v26, 0.0  ;;  %v9601_v13 = vmul.f32 %v9467_v49, %v8527_v41  ;;  %v9471_v28 = vrot.slane %v9218_v51, %v21400_v58 }
 0xfc0   :  { %v9769_v40 = vsel %vm2919_vm4, %v9595_v24, 0.0  ;;  %v9599_v9 = vmul.f32 %v9459_v16, %v19287_v42  ;;  %v9475_v34 = vrot.slane %v9219_v52, %v21400_v58 }
 0xfc1   :  { %v9787_v15 = vsel %vm2919_vm4, %v9601_v13, 0.0  ;;  %v9602_v43 = vmul.f32 %v9471_v28, %v8527_v41 }
 0xfc2   :  { %9695 = vadd.xlane.f32.xlu0 %v9694_v30  ;;  %9722 = vadd.xlane.f32.xlu1 %v9721_v53  ;;  %v9781_v21 = vsel %vm2919_vm4, %v9599_v9, 0.0  ;;  %v9603_v30 = vmul.f32 %v9475_v34, %v8527_v41 }
 0xfc3   :  { %v9790_v62 = vsel %vm2919_vm4, %v9602_v43, 0.0 }
 0xfc4   :  { %v9793_v0 = vsel %vm2919_vm4, %v9603_v30, 0.0 }
 0xfc6   :  { %9740 = vadd.xlane.f32.xlu0 %v9739_v25  ;;  %9734 = vadd.xlane.f32.xlu1 %v9733_v46 }
 0xfc8   :  { %v9606_v57 = vpop.xlane.xlu0 %9605 }
 0xfc9   :  { %v9609_v45 = vpop.xlane.xlu1 %9608  ;;  %v19420_v60 = vmul.f32 0.125, %v9606_v57 }
 0xfca   :  { %9743 = vadd.xlane.f32.xlu0 %v9742_v10  ;;  %9758 = vadd.xlane.f32.xlu1 %v9757_v63  ;;  %v19414_v7 = vmul.f32 0.125, %v9609_v45 }
 0xfcb   :  { %v9927_v10 = vrot.slane %v19420_v60, %v21429_v29 }
 0xfcc   :  { %v9618_v42 = vpop.xlane.xlu0 %9617  ;;  %v9931_v6 = vrot.slane %v19414_v7, %v21429_v29 }
 0xfcd   :  { %v9612_v53 = vpop.xlane.xlu1 %9611  ;;  %v19444_v39 = vmul.f32 0.125, %v9618_v42 }
 0xfce   :  { %9764 = vadd.xlane.f32.xlu0 %v9763_v12  ;;  %9785 = vadd.xlane.f32.xlu1 %v9784_v37  ;;  %v19416_v25 = vmul.f32 0.125, %v9612_v53  ;;  %v10180_v63 = vsel %vm3498_vm5, %v9931_v6, %v9927_v10 }
 0xfcf   :  { %v9943_v23 = vrot.slane %v19444_v39, %v21429_v29 }
 0xfd0   :  { %v9621_v11 = vpop.xlane.xlu0 %9620  ;;  %v9935_v18 = vrot.slane %v19416_v25, %v21429_v29 }
 0xfd1   :  { %v19440_v5 = vmul.f32 0.125, %v9621_v11 }
 0xfd2   :  { %9767 = vadd.xlane.f32.xlu0 %v9766_v36  ;;  %9698 = vadd.xlane.f32.xlu1 %v9697_v22  ;;  %v10181_v44 = vsel %vm3500_vm7, %v9935_v18, %v10180_v63 }
 0xfd3   :  { %v9947_v56 = vrot.slane %v19440_v5, %v21429_v29 }
 0xfd4   :  { %v9624_v31 = vpop.xlane.xlu0 %9623 }
 0xfd5   :  { %v19442_v37 = vmul.f32 0.125, %v9624_v31  ;;  %v10183_v1 = vsel %vm3498_vm5, %v9947_v56, %v9943_v23 }
 0xfd6   :  { %9776 = vadd.xlane.f32.xlu0 %v9775_v38  ;;  %9746 = vadd.xlane.f32.xlu1 %v9745_v61 }
 0xfd7   :  { %v9951_v36 = vrot.slane %v19442_v37, %v21429_v29 }
 0xfd9   :  { %v10184_v38 = vsel %vm3500_vm7, %v9951_v36, %v10183_v1 }
 0xfda   :  { %9779 = vadd.xlane.f32.xlu0 %v9778_v35  ;;  %9770 = vadd.xlane.f32.xlu1 %v9769_v40 }
 0xfde   :  { %9788 = vadd.xlane.f32.xlu0 %v9787_v15  ;;  %9782 = vadd.xlane.f32.xlu1 %v9781_v21 }
 0xfdf   :  { %v9630_v19 = vpop.xlane.xlu1 %9629 }
 0xfe0   :  { %v19474_v40 = vmul.f32 0.125, %v9630_v19 }
 0xfe1   :  { %v9633_v17 = vpop.xlane.xlu0 %9632 }
 0xfe2   :  { %9791 = vadd.xlane.f32.xlu0 %v9790_v62  ;;  %v19468_v35 = vmul.f32 0.125, %v9633_v17  ;;  %v9959_v21 = vrot.slane %v19474_v40, %v21429_v29 }
 0xfe4   :  { %v9963_v9 = vrot.slane %v19468_v35, %v21429_v29 }
 0xfe6   :  { %9794 = vadd.xlane.f32.xlu0 %v9793_v0  ;;  %v10186_v45 = vsel %vm3498_vm5, %v9963_v9, %v9959_v21 }
 0xfeb   :  { %v9654_v46 = vpop.xlane.xlu1 %9653 }
 0xfec   :  { %v19498_v19 = vmul.f32 0.125, %v9654_v46 }
 0xfff   :  { %v19418_v20 = vpop.xlane.xlu1 %9701 }
0x1003   :  { %v19426_v55 = vpop.xlane.xlu0 %9641  ;;  %v9615_v41 = vpop.xlane.xlu1 %9614 }
0x1004   :  { %v19430_v4 = vmul.f32 0.125, %v9615_v41  ;;  %v19528_v1 = vmul.f32 0.125, %v19426_v55 }
0x1006   :  { %v9939_v54 = vrot.slane %v19430_v4, %v21429_v29  ;;  %v9975_v55 = vrot.slane %v19528_v1, %v21429_v29 }
0x1007   :  { %v9657_v33 = vpop.xlane.xlu0 %9656  ;;  %v9636_v32 = vpop.xlane.xlu1 %9635 }
0x1008   :  { %v10182_v27 = vsel %vm3502_vm6, %v9939_v54, %v10181_v44  ;;  %v19472_v28 = vmul.f32 0.125, %v9636_v32  ;;  %v19486_v30 = vmul.f32 0.125, %v9657_v33  ;;  %v9991_v54 = vrot.slane %v19498_v19, %v21429_v29 }
0x1009   :  { %v10244_v2 = vsel %vm3565_vm8, %v10182_v27, -inf }
0x100a   :  { %10245 = vmax.xlane.f32.xlu1 %v10244_v2  ;;  %v9967_v43 = vrot.slane %v19472_v28, %v21429_v29  ;;  %v9995_v6 = vrot.slane %v19486_v30, %v21429_v29 }
0x100b   :  { %v9660_v12 = vpop.xlane.xlu0 %9659  ;;  %v19438_v8 = vpop.xlane.xlu1 %9665 }
0x100c   :  { %v19493_v42 = vmul.f32 0.125, %v9660_v12  ;;  %v10187_v11 = vsel %vm3500_vm7, %v9967_v43, %v10186_v45  ;;  %v10192_v32 = vsel %vm3498_vm5, %v9995_v6, %v9991_v54 }
0x100e   :  { %v9999_v41 = vrot.slane %v19493_v42, %v21429_v29 }
0x100f   :  { %v9705_v59 = vpop.xlane.xlu0 %9704  ;;  %v19446_v3 = vpop.xlane.xlu1 %9677 }
0x1010   :  { %v10193_v27 = vsel %vm3500_vm7, %v9999_v41, %v10192_v32  ;;  %v19517_v12 = vmul.f32 0.125, %v9705_v59 }
0x1012   :  { %v10059_v59 = vrot.slane %v19517_v12, %v21429_v29 }
0x1013   :  { %v9627_v47 = vpop.xlane.xlu0 %9626  ;;  %v19456_v14 = vpop.xlane.xlu1 %9713 }
0x1014   :  { %v19454_v22 = vmul.f32 0.125, %v9627_v47 }
0x1016   :  { %v9955_v50 = vrot.slane %v19454_v22, %v21429_v29 }
0x1017   :  { %v9648_v51 = vpop.xlane.xlu0 %9647  ;;  %v9708_v26 = vpop.xlane.xlu1 %9707 }
0x1018   :  { %v10185_v49 = vsel %vm3502_vm6, %v9955_v50, %v10184_v38  ;;  %v19522_v47 = vmul.f32 0.125, %v9708_v26  ;;  %v19525_v50 = vmul.f32 0.125, %v19418_v20 }
0x1019   :  { %v10247_v61 = vsel %vm3565_vm8, %v10185_v49, -inf }
0x101a   :  { %10248 = vmax.xlane.f32.xlu0 %v10247_v61  ;;  %v19536_v61 = vmul.f32 0.125, %v9648_v51  ;;  %v10063_v26 = vrot.slane %v19522_v47, %v21429_v29  ;;  %v10055_v20 = vrot.slane %v19525_v50, %v21429_v29 }
0x101b   :  { %v19464_v24 = vpop.xlane.xlu0 %9668  ;;  %v19466_v16 = vpop.xlane.xlu1 %9725 }
0x101c   :  { %v10204_v51 = vsel %vm3498_vm5, %v10059_v59, %v10055_v20  ;;  %v9983_v45 = vrot.slane %v19536_v61, %v21429_v29  ;;  %v19564_v32 = vmul.f32 0.125, %v19464_v24  ;;  %v19572_v59 = vmul.f32 0.125, %v19438_v8 }
0x101e   :  { %v10007_v8 = vrot.slane %v19572_v59, %v21429_v29 }
0x101f   :  { %v19470_v13 = vpop.xlane.xlu0 %9671  ;;  %v9645_v52 = vpop.xlane.xlu1 %9644 }
0x1020   :  { %v19519_v56 = vmul.f32 0.125, %v9645_v52 }
0x1022   :  { %v9979_v49 = vrot.slane %v19519_v56, %v21429_v29 }
0x1023   :  { %v19478_v15 = vpop.xlane.xlu0 %9680  ;;  %v9639_v34 = vpop.xlane.xlu1 %9638 }
0x1024   :  { %v19484_v62 = vmul.f32 0.125, %v9639_v34 }
0x1026   :  { %v9971_v0 = vrot.slane %v19484_v62, %v21429_v29 }
0x1027   :  { %v19490_v57 = vpop.xlane.xlu0 %9683  ;;  %v19495_v53 = vpop.xlane.xlu1 %9749 }
0x1028   :  { %v10188_v31 = vsel %vm3502_vm6, %v9971_v0, %v10187_v11  ;;  %v10189_v0 = vsel %vm3498_vm5, %v9979_v49, %v9975_v55 }
0x1029   :  { %v10250_v17 = vsel %vm3565_vm8, %v10188_v31, -inf  ;;  %v10190_v54 = vsel %vm3500_vm7, %v9983_v45, %v10189_v0 }
0x102a   :  { %10251 = vmax.xlane.f32.xlu1 %v10250_v17  ;;  %v10205_v17 = vsel %vm3500_vm7, %v10063_v26, %v10204_v51  ;;  %v10011_v26 = vrot.slane %v19564_v32, %v21429_v29 }
0x102b   :  { %v9717_v18 = vpop.xlane.xlu0 %9716  ;;  %v9663_v10 = vpop.xlane.xlu1 %9662 }
0x102c   :  { %v19508_v63 = vmul.f32 0.125, %v9663_v10  ;;  %v19594_v51 = vmul.f32 0.125, %v9717_v18  ;;  %v19607_v18 = vmul.f32 0.125, %v19456_v14 }
0x102e   :  { %v10003_v46 = vrot.slane %v19508_v63, %v21429_v29 }
0x102f   :  { %v9720_v33 = vpop.xlane.xlu0 %9719  ;;  %v19513_v44 = vpop.xlane.xlu1 %9689 }
0x1030   :  { %v10194_v2 = vsel %vm3502_vm6, %v10003_v46, %v10193_v27 }
0x1031   :  { %v10256_v36 = vsel %vm3565_vm8, %v10194_v2, -inf  ;;  %v19567_v2 = vmul.f32 0.125, %v19470_v13  ;;  %v19583_v13 = vmul.f32 0.125, %v19490_v57  ;;  %v10195_v57 = vsel %vm3498_vm5, %v10011_v26, %v10007_v8 }
0x1032   :  { %10257 = vmax.xlane.f32.xlu1 %v10256_v36  ;;  %v10075_v26 = vrot.slane %v19594_v51, %v21429_v29 }
0x1033   :  { %v9729_v23 = vpop.xlane.xlu0 %9728  ;;  %v19530_v38 = vpop.xlane.xlu1 %9737  ;;  %v10015_v20 = vrot.slane %v19567_v2, %v21429_v29 }
0x1037   :  { %v9711_v52 = vpop.xlane.xlu0 %9710  ;;  %v9651_v43 = vpop.xlane.xlu1 %9650 }
0x1038   :  { %v19544_v9 = vmul.f32 0.125, %v9711_v52  ;;  %v19546_v34 = vmul.f32 0.125, %v9651_v43  ;;  %v19578_v52 = vmul.f32 0.125, %v19478_v15  ;;  %v19588_v43 = vmul.f32 0.125, %v19446_v3 }
0x103a   :  { %v10067_v21 = vrot.slane %v19544_v9, %v21429_v29  ;;  %v9987_v11 = vrot.slane %v19546_v34, %v21429_v29  ;;  %v10027_v15 = vrot.slane %v19578_v52, %v21429_v29 }
0x103b   :  { %v9732_v31 = vpop.xlane.xlu0 %9731  ;;  %v19557_v6 = vpop.xlane.xlu1 %9761 }
0x103c   :  { %v10206_v41 = vsel %vm3502_vm6, %v10067_v21, %v10205_v17  ;;  %v10191_v46 = vsel %vm3502_vm6, %v9987_v11, %v10190_v54  ;;  %v10031_v11 = vrot.slane %v19583_v13, %v21429_v29  ;;  %v19601_v17 = vmul.f32 0.125, %v9720_v33 }
0x103d   :  { %v10268_v10 = vsel %vm3565_vm8, %v10206_v41, -inf  ;;  %v10253_v49 = vsel %vm3565_vm8, %v10191_v46, -inf  ;;  %v10196_v41 = vsel %vm3500_vm7, %v10015_v20, %v10195_v57  ;;  %v19615_v33 = vmul.f32 0.125, %v9729_v23 }
0x103e   :  { %10269 = vmax.xlane.f32.xlu1 %v10268_v10  ;;  %v10023_v10 = vrot.slane %v19588_v43, %v21429_v29  ;;  %v10079_v14 = vrot.slane %v19601_v17, %v21429_v29  ;;  %v19622_v57 = vmul.f32 0.125, %v9732_v31  ;;  %v19628_v23 = vmul.f32 0.125, %v19466_v16 }
0x103f   :  { %v9753_v27 = vpop.xlane.xlu0 %9752  ;;  %v19569_v36 = vpop.xlane.xlu1 %9773  ;;  %21430 = vst [vmem:[#allocation88_spill] sm:$0xff] %v19615_v33 }
0x1040   :  { %v10198_v8 = vsel %vm3498_vm5, %v10027_v15, %v10023_v10  ;;  %21431 = vst [vmem:[#allocation60_spill] sm:$0xff] %v19622_v57  ;;  %v10091_v10 = vrot.slane %v19615_v33, %v21429_v29  ;;  %v19636_v31 = vmul.f32 0.125, %v9753_v27  ;;  %v10095_v16 = vrot.slane %v19622_v57, %v21429_v29 }
0x1041   :  { %v19649_v27 = vmul.f32 0.125, %v19495_v53 }
0x1042   :  { %10254 = vmax.xlane.f32.xlu1 %v10253_v49  ;;  %21432 = vst [vmem:[#allocation45_spill] sm:$0xff] %v19636_v31 }
0x1043   :  { %v9756_v24 = vpop.xlane.xlu0 %9755  ;;  %v9675_v55 = vpop.xlane.xlu1 %9674 }
0x1044   :  { %v19590_v21 = vmul.f32 0.125, %v9675_v55 }
0x1046   :  { %v10019_v0 = vrot.slane %v19590_v21, %v21429_v29 }
0x1047   :  { %v9693_v45 = vpop.xlane.xlu0 %9692  ;;  %v9687_v3 = vpop.xlane.xlu1 %9686 }
0x1048   :  { %v19609_v54 = vmul.f32 0.125, %v9687_v3  ;;  %v10197_v46 = vsel %vm3502_vm6, %v10019_v0, %v10196_v41  ;;  %v10199_v3 = vsel %vm3500_vm7, %v10031_v11, %v10198_v8  ;;  %v10071_v41 = vrot.slane %v19607_v18, %v21429_v29 }
0x1049   :  { %v10259_v49 = vsel %vm3565_vm8, %v10197_v46, -inf }
0x104a   :  { %v10035_v20 = vrot.slane %v19609_v54, %v21429_v29  ;;  %10260 = vmax.xlane.f32.xlu1 %v10259_v49  ;;  %v10207_v48 = vsel %vm3498_vm5, %v10075_v26, %v10071_v41  ;;  %v10123_v41 = vrot.slane %v19636_v31, %v21429_v29 }
0x104b   :  { %v9696_v55 = vpop.xlane.xlu0 %9695  ;;  %v9723_v0 = vpop.xlane.xlu1 %9722 }
0x104c   :  { %v19630_v46 = vmul.f32 0.125, %v9723_v0  ;;  %v10200_v49 = vsel %vm3502_vm6, %v10035_v20, %v10199_v3  ;;  %v19643_v0 = vmul.f32 0.125, %v9756_v24  ;;  %v10208_v3 = vsel %vm3500_vm7, %v10079_v14, %v10207_v48 }
0x104d   :  { %v10262_v15 = vsel %vm3565_vm8, %v10200_v49, -inf  ;;  %v10087_v49 = vrot.slane %v19628_v23, %v21429_v29 }
0x104e   :  { %v10083_v11 = vrot.slane %v19630_v46, %v21429_v29  ;;  %10263 = vmax.xlane.f32.xlu1 %v10262_v15  ;;  %21433 = vst [vmem:[#allocation27_spill] sm:$0xff] %v19643_v0  ;;  %v10127_v53 = vrot.slane %v19643_v0, %v21429_v29  ;;  %v19674_v0 = vmul.f32 0.125, %v9696_v55 }
0x104f   :  { %v9741_v8 = vpop.xlane.xlu0 %9740  ;;  %v9735_v20 = vpop.xlane.xlu1 %9734  ;;  %v10210_v14 = vsel %vm3498_vm5, %v10091_v10, %v10087_v49 }
0x1050   :  { %v19651_v33 = vmul.f32 0.125, %v9735_v20  ;;  %v10209_v15 = vsel %vm3502_vm6, %v10083_v11, %v10208_v3  ;;  %v10211_v20 = vsel %vm3500_vm7, %v10095_v16, %v10210_v14  ;;  %v10119_v11 = vrot.slane %v19649_v27, %v21429_v29  ;;  %21436 = vst [vmem:[#allocation47_spill] sm:$0xff] %v19674_v0 }
0x1051   :  { %v10271_v26 = vsel %vm3565_vm8, %v10209_v15, -inf  ;;  %v10047_v55 = vrot.slane %v19674_v0, %v21429_v29 }
0x1052   :  { %21434 = vst [vmem:[#allocation41_spill] sm:$0xff] %v19651_v33  ;;  %v10099_v24 = vrot.slane %v19651_v33, %v21429_v29  ;;  %10272 = vmax.xlane.f32.xlu0 %v10271_v26  ;;  %v19669_v33 = vmul.f32 0.125, %v9693_v45  ;;  %v10216_v26 = vsel %vm3498_vm5, %v10123_v41, %v10119_v11  ;;  %v19693_v11 = vmul.f32 0.125, %v19530_v38 }
0x1053   :  { %v9744_v48 = vpop.xlane.xlu0 %9743  ;;  %v9759_v57 = vpop.xlane.xlu1 %9758  ;;  %v10217_v14 = vsel %vm3500_vm7, %v10127_v53, %v10216_v26 }
0x1054   :  { %v19665_v3 = vmul.f32 0.125, %v9759_v57  ;;  %v10212_v15 = vsel %vm3502_vm6, %v10099_v24, %v10211_v20  ;;  %21435 = vst [vmem:[#allocation30_spill] sm:$0xff] %v19669_v33  ;;  %v19678_v57 = vmul.f32 0.125, %v19513_v44  ;;  %v10043_v20 = vrot.slane %v19669_v33, %v21429_v29 }
0x1055   :  { %v10274_v31 = vsel %vm3565_vm8, %v10212_v15, -inf  ;;  %v19684_v15 = vmul.f32 0.125, %v9741_v8  ;;  %v19688_v41 = vmul.f32 0.125, %v9744_v48  ;;  %v10103_v33 = vrot.slane %v19693_v11, %v21429_v29 }
0x1056   :  { %v10131_v10 = vrot.slane %v19665_v3, %v21429_v29  ;;  %10275 = vmax.xlane.f32.xlu0 %v10274_v31  ;;  %v10039_v44 = vrot.slane %v19678_v57, %v21429_v29 }
0x1057   :  { %v9765_v49 = vpop.xlane.xlu0 %9764  ;;  %v9786_v16 = vpop.xlane.xlu1 %9785  ;;  %21437 = vst [vmem:[#allocation29_spill] sm:$0xff] %v19684_v15  ;;  %21438 = vst [vmem:[#allocation25_spill] sm:$0xff] %v19688_v41  ;;  %v10107_v8 = vrot.slane %v19684_v15, %v21429_v29 }
0x1058   :  { %v10218_v24 = vsel %vm3502_vm6, %v10131_v10, %v10217_v14  ;;  %v19699_v26 = vmul.f32 0.125, %v9765_v49  ;;  %v10201_v48 = vsel %vm3498_vm5, %v10043_v20, %v10039_v44  ;;  %v19712_v49 = vmul.f32 0.125, %v19557_v6 }
0x1059   :  { %v10280_v45 = vsel %vm3565_vm8, %v10218_v24, -inf }
0x105a   :  { %10281 = vmax.xlane.f32.xlu0 %v10280_v45  ;;  %21440 = vst [vmem:[#allocation48_spill] sm:$0xff] %v19699_v26  ;;  %v10111_v45 = vrot.slane %v19688_v41, %v21429_v29  ;;  %v10139_v44 = vrot.slane %v19699_v26, %v21429_v29  ;;  %v10213_v41 = vsel %vm3498_vm5, %v10107_v8, %v10103_v33 }
0x105b   :  { %v9768_v31 = vpop.xlane.xlu0 %9767  ;;  %v9699_v53 = vpop.xlane.xlu1 %9698 }
0x105c   :  { %v19695_v10 = vmul.f32 0.125, %v9699_v53  ;;  %v19706_v0 = vmul.f32 0.125, %v9768_v31  ;;  %v10202_v53 = vsel %vm3500_vm7, %v10047_v55, %v10201_v48 }
0x105e   :  { %21439 = vst [vmem:[#allocation23_spill] sm:$0xff] %v19695_v10  ;;  %v10051_v14 = vrot.slane %v19695_v10, %v21429_v29  ;;  %21441 = vst [vmem:[#allocation28_spill] sm:$0xff] %v19706_v0  ;;  %v10143_v6 = vrot.slane %v19706_v0, %v21429_v29 }
0x105f   :  { %v9777_v24 = vpop.xlane.xlu0 %9776  ;;  %v9747_v38 = vpop.xlane.xlu1 %9746 }
0x1060   :  { %v19714_v15 = vmul.f32 0.125, %v9747_v38  ;;  %v10203_v10 = vsel %vm3502_vm6, %v10051_v14, %v10202_v53  ;;  %v19720_v31 = vmul.f32 0.125, %v9777_v24  ;;  %v10135_v53 = vrot.slane %v19712_v49, %v21429_v29 }
0x1061   :  { %v10265_v20 = vsel %vm3565_vm8, %v10203_v10, -inf  ;;  %v10214_v10 = vsel %vm3500_vm7, %v10111_v45, %v10213_v41  ;;  %v19733_v24 = vmul.f32 0.125, %v19569_v36 }
0x1062   :  { %21442 = vst [vmem:[#allocation69_spill] sm:$0xff] %v19720_v31  ;;  %v10115_v55 = vrot.slane %v19714_v15, %v21429_v29  ;;  %10266 = vmax.xlane.f32.xlu1 %v10265_v20  ;;  %v10155_v8 = vrot.slane %v19720_v31, %v21429_v29  ;;  %v10219_v45 = vsel %vm3498_vm5, %v10139_v44, %v10135_v53 }
0x1063   :  { %v9780_v48 = vpop.xlane.xlu0 %9779  ;;  %v9771_v14 = vpop.xlane.xlu1 %9770 }
0x1064   :  { %v19727_v38 = vmul.f32 0.125, %v9780_v48  ;;  %v19735_v26 = vmul.f32 0.125, %v9771_v14  ;;  %v10215_v20 = vsel %vm3502_vm6, %v10115_v55, %v10214_v10  ;;  %v10220_v14 = vsel %vm3500_vm7, %v10143_v6, %v10219_v45 }
0x1065   :  { %v10277_v33 = vsel %vm3565_vm8, %v10215_v20, -inf  ;;  %v10151_v55 = vrot.slane %v19733_v24, %v21429_v29 }
0x1066   :  { %21443 = vst [vmem:[#allocation67_spill] sm:$0xff] %v19727_v38  ;;  %21444 = vst [vmem:[#allocation93_spill] sm:$0xff] %v19735_v26  ;;  %v10147_v48 = vrot.slane %v19735_v26, %v21429_v29  ;;  %10278 = vmax.xlane.f32.xlu0 %v10277_v33  ;;  %v10159_v36 = vrot.slane %v19727_v38, %v21429_v29  ;;  %v19758_v26 = vmul.f32 0.125, %v9786_v16 }
0x1067   :  { %v9789_v41 = vpop.xlane.xlu0 %9788  ;;  %v9783_v0 = vpop.xlane.xlu1 %9782  ;;  %v10222_v38 = vsel %vm3498_vm5, %v10155_v8, %v10151_v55 }
0x1068   :  { %v19749_v10 = vmul.f32 0.125, %v9783_v0  ;;  %v10221_v20 = vsel %vm3502_vm6, %v10147_v48, %v10220_v14  ;;  %v19752_v31 = vmul.f32 0.125, %v9789_v41  ;;  %21446 = vst [vmem:[#allocation49_spill] sm:$0xff] %v19758_v26  ;;  %v10223_v0 = vsel %vm3500_vm7, %v10159_v36, %v10222_v38 }
0x1069   :  { %v10283_v33 = vsel %vm3565_vm8, %v10221_v20, -inf  ;;  %v10167_v16 = vrot.slane %v19758_v26, %v21429_v29 }
0x106a   :  { %21445 = vst [vmem:[#allocation91_spill] sm:$0xff] %v19752_v31  ;;  %v10163_v44 = vrot.slane %v19749_v10, %v21429_v29  ;;  %10284 = vmax.xlane.f32.xlu0 %v10283_v33  ;;  %v10171_v48 = vrot.slane %v19752_v31, %v21429_v29 }
0x106b   :  { %v9792_v53 = vpop.xlane.xlu0 %9791 }
0x106c   :  { %v19760_v6 = vmul.f32 0.125, %v9792_v53  ;;  %v10224_v45 = vsel %vm3502_vm6, %v10163_v44, %v10223_v0  ;;  %v10225_v36 = vsel %vm3498_vm5, %v10171_v48, %v10167_v16 }
0x106d   :  { %v10286_v41 = vsel %vm3565_vm8, %v10224_v45, -inf  ;;  %v21449_v45 = vld [vmem:[#allocation70_spill] sm:$0xff] }
0x106e   :  { %21447 = vst [vmem:[#allocation31_spill] sm:$0xff] %v19760_v6  ;;  %v10175_v14 = vrot.slane %v19760_v6, %v21429_v29  ;;  %10287 = vmax.xlane.f32.xlu0 %v10286_v41  ;;  %v21450_v6 = vld [vmem:[#allocation71_spill] sm:$0xff] }
0x106f   :  { %v9795_v20 = vpop.xlane.xlu0 %9794 }
0x1070   :  { %v19771_v8 = vmul.f32 0.125, %v9795_v20  ;;  %v10226_v55 = vsel %vm3500_vm7, %v10175_v14, %v10225_v36 }
0x1072   :  { %21448 = vst [vmem:[#allocation50_spill] sm:$0xff] %v19771_v8  ;;  %v10179_v38 = vrot.slane %v19771_v8, %v21429_v29  ;;  %v21451_v8 = vld [vmem:[#allocation72_spill] sm:$0xff] }
0x1074   :  { %v10227_v33 = vsel %vm3502_vm6, %v10179_v38, %v10226_v55 }
0x1075   :  { %v10289_v44 = vsel %vm3565_vm8, %v10227_v33, -inf }
0x1076   :  { %10290 = vmax.xlane.f32.xlu0 %v10289_v44 }
0x1093   :  { %v10246_v53 = vpop.xlane.xlu1 %10245 }
0x1094   :  { %v10311_v0 = vrot.slane %v10246_v53, %v21400_v58  ;;  %v10315_v41 = vrot.slane %v10246_v53, %v21449_v45  ;;  %v10319_v20 = vrot.slane %v10246_v53, %v21450_v6  ;;  %v10323_v48 = vrot.slane %v10246_v53, %v21451_v8 }
0x1096   :  { %v10628_v31 = vsub.f32 %v19420_v60, %v10311_v0  ;;  %v10629_v29 = vsub.f32 %v19414_v7, %v10315_v41  ;;  %v10630_v14 = vsub.f32 %v19416_v25, %v10319_v20  ;;  %v10631_v36 = vsub.f32 %v19430_v4, %v10323_v48 }
0x1098   :  { %v10692_v16 = vmul.f32 1.442695, %v10628_v31  ;;  %v10694_v38 = vmul.f32 1.442695, %v10629_v29  ;;  %v10696_v55 = vmul.f32 1.442695, %v10630_v14 }
0x1099   :  { %v10698_v33 = vmul.f32 1.442695, %v10631_v36 }
0x109a   :  { %14496 = vpow2.f32 %v10692_v16 }
0x109b   :  { %14498 = vpow2.f32 %v10694_v38 }
0x109c   :  { %14500 = vpow2.f32 %v10696_v55 }
0x109d   :  { %14502 = vpow2.f32 %v10698_v33 }
0x10a3   :  { %v10249_v44 = vpop.xlane.xlu0 %10248 }
0x10a4   :  { %v10327_v26 = vrot.slane %v10249_v44, %v21400_v58  ;;  %v10331_v60 = vrot.slane %v10249_v44, %v21449_v45  ;;  %v10335_v7 = vrot.slane %v10249_v44, %v21450_v6 }
0x10a6   :  { %v10632_v53 = vsub.f32 %v19444_v39, %v10327_v26  ;;  %v10633_v25 = vsub.f32 %v19440_v5, %v10331_v60  ;;  %v10634_v0 = vsub.f32 %v19442_v37, %v10335_v7  ;;  %v10339_v26 = vrot.slane %v10249_v44, %v21451_v8 }
0x10a7   :  { %v19792_v29 = vpop.eup %14496 }
0x10a8   :  { %21452 = vst [vmem:[#allocation32_spill] sm:$0xff] %v19792_v29  ;;  %v19794_v31 = vpop.eup %14498  ;;  %v10700_v4 = vmul.f32 1.442695, %v10632_v53  ;;  %10885 = vperm.xlu1 %14007, %v19792_v29   ;;  %v10702_v41 = vmul.f32 1.442695, %v10633_v25  ;;  %v10635_v7 = vsub.f32 %v19454_v22, %v10339_v26 }
0x10a9   :  { %10888 = vperm.xlu0 %14006, %v19794_v31   ;;  %v19799_v20 = vpop.eup %14500  ;;  %v10704_v39 = vmul.f32 1.442695, %v10634_v0 }
0x10aa   :  { %14504 = vpow2.f32 %v10700_v4  ;;  %v19802_v5 = vpop.eup %14502 }
0x10ab   :  { %14506 = vpow2.f32 %v10702_v41  ;;  %v10706_v41 = vmul.f32 1.442695, %v10635_v7 }
0x10ac   :  { %14508 = vpow2.f32 %v10704_v39 }
0x10ad   :  { %10891 = vperm.xlu0 %14006, %v19799_v20  }
0x10b1   :  { %10894 = vperm.xlu0 %14006, %v19802_v5  }
0x10b3   :  { %v10252_v48 = vpop.xlane.xlu1 %10251 }
0x10b4   :  { %v10343_v14 = vrot.slane %v10252_v48, %v21400_v58  ;;  %v10347_v37 = vrot.slane %v10252_v48, %v21449_v45  ;;  %v10351_v16 = vrot.slane %v10252_v48, %v21450_v6  ;;  %v10355_v38 = vrot.slane %v10252_v48, %v21451_v8 }
0x10b6   :  { %v10636_v55 = vsub.f32 %v19474_v40, %v10343_v14  ;;  %v10637_v33 = vsub.f32 %v19468_v35, %v10347_v37  ;;  %v10638_v60 = vsub.f32 %v19472_v28, %v10351_v16  ;;  %v10639_v25 = vsub.f32 %v19484_v62, %v10355_v38 }
0x10b7   :  { %v19810_v36 = vpop.eup %14504 }
0x10b8   :  { %21453 = vst [vmem:[#allocation42_spill] sm:$0xff] %v19810_v36  ;;  %10897 = vperm.xlu1 %14007, %v19810_v36   ;;  %v10708_v44 = vmul.f32 1.442695, %v10636_v55  ;;  %v10710_v53 = vmul.f32 1.442695, %v10637_v33  ;;  %v19818_v4 = vpop.eup %14506 }
0x10b9   :  { %v10712_v0 = vmul.f32 1.442695, %v10638_v60  ;;  %v10714_v40 = vmul.f32 1.442695, %v10639_v25  ;;  %v19824_v26 = vpop.eup %14508 }
0x10ba   :  { %14510 = vpow2.f32 %v10708_v44 }
0x10bb   :  { %14512 = vpow2.f32 %v10710_v53  ;;  %v10258_v39 = vpop.xlane.xlu1 %10257 }
0x10bc   :  { %10900 = vperm.xlu1 %14007, %v19818_v4   ;;  %v10375_v35 = vrot.slane %v10258_v39, %v21400_v58  ;;  %v10379_v28 = vrot.slane %v10258_v39, %v21449_v45  ;;  %v10383_v22 = vrot.slane %v10258_v39, %v21450_v6  ;;  %14514 = vpow2.f32 %v10712_v0 }
0x10bd   :  { %v10387_v62 = vrot.slane %v10258_v39, %v21451_v8  ;;  %14516 = vpow2.f32 %v10706_v41 }
0x10be   :  { %v10644_v48 = vsub.f32 %v19498_v19, %v10375_v35  ;;  %v10645_v14 = vsub.f32 %v19486_v30, %v10379_v28  ;;  %v10646_v37 = vsub.f32 %v19493_v42, %v10383_v22  ;;  %14518 = vpow2.f32 %v10714_v40 }
0x10bf   :  { %v10647_v38 = vsub.f32 %v19508_v63, %v10387_v62 }
0x10c0   :  { %10903 = vperm.xlu1 %14007, %v19824_v26   ;;  %v10726_v16 = vmul.f32 1.442695, %v10645_v14  ;;  %v10724_v55 = vmul.f32 1.442695, %v10644_v48  ;;  %v10728_v33 = vmul.f32 1.442695, %v10646_v37 }
0x10c1   :  { %v10730_v60 = vmul.f32 1.442695, %v10647_v38 }
0x10c2   :  { %14520 = vpow2.f32 %v10726_v16 }
0x10c3   :  { %14522 = vpow2.f32 %v10724_v55 }
0x10c4   :  { %14524 = vpow2.f32 %v10728_v33 }
0x10c5   :  { %14526 = vpow2.f32 %v10730_v60 }
0x10c7   :  { %v10270_v7 = vpop.xlane.xlu1 %10269  ;;  %v19832_v44 = vpop.eup %14510 }
0x10c8   :  { %21454 = vst [vmem:[#allocation34_spill] sm:$0xff] %v19832_v44  ;;  %v10439_v30 = vrot.slane %v10270_v7, %v21400_v58  ;;  %v10443_v19 = vrot.slane %v10270_v7, %v21449_v45  ;;  %v10447_v42 = vrot.slane %v10270_v7, %v21450_v6  ;;  %v19837_v53 = vpop.eup %14512  ;;  %10909 = vperm.xlu0 %14006, %v19832_v44  }
0x10c9   :  { %v10451_v63 = vrot.slane %v10270_v7, %v21451_v8  ;;  %10912 = vperm.xlu1 %14007, %v19837_v53   ;;  %v19845_v35 = vpop.eup %14514 }
0x10ca   :  { %v10660_v25 = vsub.f32 %v19525_v50, %v10439_v30  ;;  %v10661_v0 = vsub.f32 %v19517_v12, %v10443_v19  ;;  %v10662_v41 = vsub.f32 %v19522_v47, %v10447_v42  ;;  %21455 = vst [vmem:[#allocation86_spill] sm:$0xff] %v19845_v35  ;;  %v19848_v62 = vpop.eup %14516 }
0x10cb   :  { %v10255_v39 = vpop.xlane.xlu1 %10254  ;;  %v10663_v12 = vsub.f32 %v19544_v9, %v10451_v63  ;;  %v19858_v38 = vpop.eup %14518 }
0x10cc   :  { %v10756_v28 = vmul.f32 1.442695, %v10660_v25  ;;  %v10758_v22 = vmul.f32 1.442695, %v10661_v0  ;;  %v10359_v40 = vrot.slane %v10255_v39, %v21400_v58  ;;  %v10363_v48 = vrot.slane %v10255_v39, %v21449_v45  ;;  %10915 = vperm.xlu0 %14006, %v19845_v35  }
0x10cd   :  { %v10367_v50 = vrot.slane %v10255_v39, %v21450_v6  ;;  %10906 = vperm.xlu1 %14007, %v19848_v62   ;;  %v10760_v14 = vmul.f32 1.442695, %v10662_v41  ;;  %v10371_v37 = vrot.slane %v10255_v39, %v21451_v8  ;;  %v10762_v9 = vmul.f32 1.442695, %v10663_v12 }
0x10ce   :  { %14528 = vpow2.f32 %v10756_v28  ;;  %v10640_v47 = vsub.f32 %v19528_v1, %v10359_v40  ;;  %v10641_v16 = vsub.f32 %v19519_v56, %v10363_v48 }
0x10cf   :  { %14530 = vpow2.f32 %v10758_v22  ;;  %v19860_v33 = vpop.eup %14520  ;;  %v10642_v60 = vsub.f32 %v19536_v61, %v10367_v50  ;;  %v10643_v1 = vsub.f32 %v19546_v34, %v10371_v37 }
0x10d0   :  { %v10716_v55 = vmul.f32 1.442695, %v10640_v47  ;;  %10918 = vperm.xlu0 %14006, %v19858_v38   ;;  %v10718_v7 = vmul.f32 1.442695, %v10641_v16  ;;  %v19866_v30 = vpop.eup %14522 }
0x10d1   :  { %10936 = vperm.xlu1 %14007, %v19860_v33   ;;  %21456 = vst [vmem:[#allocation24_spill] sm:$0xff] %v19866_v30  ;;  %v19868_v19 = vpop.eup %14524  ;;  %v10720_v61 = vmul.f32 1.442695, %v10642_v60  ;;  %v10722_v34 = vmul.f32 1.442695, %v10643_v1 }
0x10d2   :  { %14532 = vpow2.f32 %v10716_v55  ;;  %21457 = vst [vmem:[#allocation89_spill] sm:$0xff] %v19868_v19  ;;  %v19877_v39 = vpop.eup %14526 }
0x10d3   :  { %14534 = vpow2.f32 %v10760_v14  ;;  %v10261_v56 = vpop.xlane.xlu1 %10260 }
0x10d4   :  { %v10391_v42 = vrot.slane %v10261_v56, %v21400_v58  ;;  %v10395_v63 = vrot.slane %v10261_v56, %v21449_v45  ;;  %10933 = vperm.xlu0 %14006, %v19866_v30   ;;  %14536 = vpow2.f32 %v10762_v9  ;;  %v10399_v25 = vrot.slane %v10261_v56, %v21450_v6 }
0x10d5   :  { %10939 = vperm.xlu1 %14007, %v19868_v19   ;;  %14538 = vpow2.f32 %v10718_v7  ;;  %v10403_v40 = vrot.slane %v10261_v56, %v21451_v8 }
0x10d6   :  { %v10648_v0 = vsub.f32 %v19572_v59, %v10391_v42  ;;  %v10649_v41 = vsub.f32 %v19564_v32, %v10395_v63  ;;  %14540 = vpow2.f32 %v10720_v61  ;;  %v10650_v48 = vsub.f32 %v19567_v2, %v10399_v25 }
0x10d7   :  { %v10264_v28 = vpop.xlane.xlu1 %10263  ;;  %14542 = vpow2.f32 %v10722_v34  ;;  %v10651_v37 = vsub.f32 %v19590_v21, %v10403_v40 }
0x10d8   :  { %v10407_v22 = vrot.slane %v10264_v28, %v21400_v58  ;;  %10942 = vperm.xlu0 %14006, %v19877_v39   ;;  %v10732_v12 = vmul.f32 1.442695, %v10648_v0  ;;  %v10734_v47 = vmul.f32 1.442695, %v10649_v41  ;;  %v10411_v59 = vrot.slane %v10264_v28, %v21449_v45 }
0x10d9   :  { %v10736_v16 = vmul.f32 1.442695, %v10650_v48  ;;  %v10415_v2 = vrot.slane %v10264_v28, %v21450_v6  ;;  %v10419_v60 = vrot.slane %v10264_v28, %v21451_v8  ;;  %v10738_v21 = vmul.f32 1.442695, %v10651_v37 }
0x10da   :  { %v10652_v32 = vsub.f32 %v19588_v43, %v10407_v22  ;;  %14544 = vpow2.f32 %v10732_v12  ;;  %v10653_v43 = vsub.f32 %v19578_v52, %v10411_v59 }
0x10db   :  { %v19883_v50 = vpop.eup %14528  ;;  %v10273_v55 = vpop.xlane.xlu0 %10272  ;;  %14546 = vpow2.f32 %v10734_v47  ;;  %v10654_v56 = vsub.f32 %v19583_v13, %v10415_v2  ;;  %v10655_v61 = vsub.f32 %v19609_v54, %v10419_v60 }
0x10dc   :  { %21458 = vst [vmem:[#allocation87_spill] sm:$0xff] %v19883_v50  ;;  %v19887_v14 = vpop.eup %14530  ;;  %10981 = vperm.xlu0 %14006, %v19883_v50   ;;  %v10740_v1 = vmul.f32 1.442695, %v10652_v32  ;;  %14548 = vpow2.f32 %v10736_v16  ;;  %v10455_v42 = vrot.slane %v10273_v55, %v21400_v58  ;;  %v10742_v25 = vmul.f32 1.442695, %v10653_v43 }
0x10dd   :  { %10984 = vperm.xlu1 %14007, %v19887_v14   ;;  %v10459_v52 = vrot.slane %v10273_v55, %v21449_v45  ;;  %v10744_v41 = vmul.f32 1.442695, %v10654_v56  ;;  %v10463_v13 = vrot.slane %v10273_v55, %v21450_v6  ;;  %v10746_v54 = vmul.f32 1.442695, %v10655_v61 }
0x10de   :  { %14550 = vpow2.f32 %v10740_v1  ;;  %v10664_v28 = vsub.f32 %v19607_v18, %v10455_v42  ;;  %v10467_v47 = vrot.slane %v10273_v55, %v21451_v8 }
0x10df   :  { %v19893_v9 = vpop.eup %14532  ;;  %v10276_v0 = vpop.xlane.xlu0 %10275  ;;  %14552 = vpow2.f32 %v10738_v21  ;;  %v10665_v40 = vsub.f32 %v19594_v51, %v10459_v52  ;;  %v10666_v59 = vsub.f32 %v19601_v17, %v10463_v13  ;;  %v21464_v21 = vld [vmem:[#allocation88_spill] sm:$0xff] }
0x10e0   :  { %21459 = vst [vmem:[#allocation94_spill] sm:$0xff] %v19893_v9  ;;  %v19897_v7 = vpop.eup %14534  ;;  %14554 = vpow2.f32 %v10742_v25  ;;  %v10471_v48 = vrot.slane %v10276_v0, %v21400_v58  ;;  %v10764_v18 = vmul.f32 1.442695, %v10664_v28  ;;  %v10475_v51 = vrot.slane %v10276_v0, %v21449_v45  ;;  %v21466_v25 = vld [vmem:[#allocation60_spill] sm:$0xff]  ;;  %v21467_v28 = vld [vmem:[#allocation41_spill] sm:$0xff] }
0x10e1   :  { %21460 = vst [vmem:[#allocation26_spill] sm:$0xff] %v19897_v7  ;;  %10987 = vperm.xlu0 %14006, %v19897_v7   ;;  %10921 = vperm.xlu1 %14007, %v19893_v9   ;;  %v19903_v63 = vpop.eup %14536  ;;  %14556 = vpow2.f32 %v10744_v41  ;;  %v10766_v37 = vmul.f32 1.442695, %v10665_v40  ;;  %v10667_v60 = vsub.f32 %v19630_v46, %v10467_v47  ;;  %v10768_v55 = vmul.f32 1.442695, %v10666_v59 }
0x10e2   :  { %v19907_v34 = vpop.eup %14538  ;;  %14558 = vpow2.f32 %v10746_v54  ;;  %v10668_v16 = vsub.f32 %v19628_v23, %v10471_v48  ;;  %v10479_v17 = vrot.slane %v10276_v0, %v21450_v6  ;;  %v10483_v1 = vrot.slane %v10276_v0, %v21451_v8 }
0x10e3   :  { %v19913_v22 = vpop.eup %14540  ;;  %14560 = vpow2.f32 %v10764_v18  ;;  %v10669_v56 = vsub.f32 %v21464_v21, %v10475_v51  ;;  %v10282_v42 = vpop.xlane.xlu0 %10281  ;;  %v10770_v46 = vmul.f32 1.442695, %v10667_v60  ;;  %v21469_v60 = vld [vmem:[#allocation45_spill] sm:$0xff]  ;;  %v21471_v21 = vld [vmem:[#allocation27_spill] sm:$0xff] }
0x10e4   :  { %21461 = vst [vmem:[#allocation96_spill] sm:$0xff] %v19913_v22  ;;  %v19917_v12 = vpop.eup %14542  ;;  %14562 = vpow2.f32 %v10766_v37  ;;  %v10772_v23 = vmul.f32 1.442695, %v10668_v16  ;;  %v10670_v52 = vsub.f32 %v21466_v25, %v10479_v17  ;;  %v10503_v41 = vrot.slane %v10282_v42, %v21400_v58 }
0x10e5   :  { %10924 = vperm.xlu0 %14006, %v19907_v34   ;;  %10990 = vperm.xlu1 %14007, %v19903_v63   ;;  %14564 = vpow2.f32 %v10768_v55  ;;  %v10671_v0 = vsub.f32 %v21467_v28, %v10483_v1  ;;  %v10774_v54 = vmul.f32 1.442695, %v10669_v56  ;;  %v10507_v40 = vrot.slane %v10282_v42, %v21449_v45 }
0x10e6   :  { %14566 = vpow2.f32 %v10772_v23  ;;  %v10776_v47 = vmul.f32 1.442695, %v10670_v52  ;;  %v10511_v59 = vrot.slane %v10282_v42, %v21450_v6  ;;  %v10676_v18 = vsub.f32 %v19649_v27, %v10503_v41 }
0x10e7   :  { %v19923_v32 = vpop.eup %14544  ;;  %14568 = vpow2.f32 %v10770_v46  ;;  %v10778_v51 = vmul.f32 1.442695, %v10671_v0  ;;  %v10515_v16 = vrot.slane %v10282_v42, %v21451_v8  ;;  %v10677_v55 = vsub.f32 %v21469_v60, %v10507_v40  ;;  %v21476_v60 = vld [vmem:[#allocation47_spill] sm:$0xff] }
0x10e8   :  { %21462 = vst [vmem:[#allocation95_spill] sm:$0xff] %v19923_v32  ;;  %v19927_v2 = vpop.eup %14546  ;;  %14570 = vpow2.f32 %v10774_v54  ;;  %v10678_v56 = vsub.f32 %v21471_v21, %v10511_v59  ;;  %v10788_v23 = vmul.f32 1.442695, %v10676_v18  ;;  %v21474_v59 = vld [vmem:[#allocation30_spill] sm:$0xff] }
0x10e9   :  { %10930 = vperm.xlu0 %14006, %v19917_v12   ;;  %10927 = vperm.xlu1 %14007, %v19913_v22   ;;  %v19933_v43 = vpop.eup %14548  ;;  %14572 = vpow2.f32 %v10776_v47  ;;  %v10679_v42 = vsub.f32 %v19665_v3, %v10515_v16  ;;  %v10790_v25 = vmul.f32 1.442695, %v10677_v55 }
0x10ea   :  { %21463 = vst [vmem:[#allocation43_spill] sm:$0xff] %v19933_v43  ;;  %14574 = vpow2.f32 %v10778_v51  ;;  %v10792_v28 = vmul.f32 1.442695, %v10678_v56 }
0x10eb   :  { %v19937_v61 = vpop.eup %14550  ;;  %v10267_v17 = vpop.xlane.xlu1 %10266  ;;  %14576 = vpow2.f32 %v10788_v23  ;;  %v10794_v47 = vmul.f32 1.442695, %v10679_v42  ;;  %v21478_v23 = vld [vmem:[#allocation23_spill] sm:$0xff] }
0x10ec   :  { %21465 = vst [vmem:[#allocation35_spill] sm:$0xff] %v19937_v61  ;;  %v19943_v13 = vpop.eup %14552  ;;  %v10423_v27 = vrot.slane %v10267_v17, %v21400_v58  ;;  %v10427_v52 = vrot.slane %v10267_v17, %v21449_v45  ;;  %v10431_v0 = vrot.slane %v10267_v17, %v21450_v6  ;;  %14578 = vpow2.f32 %v10790_v25 }
0x10ed   :  { %10945 = vperm.xlu0 %14006, %v19923_v32   ;;  %10948 = vperm.xlu1 %14007, %v19927_v2   ;;  %v19947_v48 = vpop.eup %14554  ;;  %v10435_v3 = vrot.slane %v10267_v17, %v21451_v8  ;;  %14580 = vpow2.f32 %v10792_v28 }
0x10ee   :  { %v19953_v37 = vpop.eup %14556  ;;  %v10656_v54 = vsub.f32 %v19678_v57, %v10423_v27  ;;  %v10657_v18 = vsub.f32 %v21474_v59, %v10427_v52  ;;  %v10658_v55 = vsub.f32 %v21476_v60, %v10431_v0  ;;  %14582 = vpow2.f32 %v10794_v47 }
0x10ef   :  { %21468 = vst [vmem:[#allocation44_spill] sm:$0xff] %v19953_v37  ;;  %v19957_v1 = vpop.eup %14558  ;;  %v10279_v51 = vpop.xlane.xlu0 %10278  ;;  %v10659_v17 = vsub.f32 %v21478_v23, %v10435_v3 }
0x10f0   :  { %21470 = vst [vmem:[#allocation33_spill] sm:$0xff] %v19957_v1  ;;  %v19963_v46 = vpop.eup %14560  ;;  %v10748_v21 = vmul.f32 1.442695, %v10656_v54  ;;  %v10487_v57 = vrot.slane %v10279_v51, %v21400_v58  ;;  %v10750_v27 = vmul.f32 1.442695, %v10657_v18  ;;  %v10491_v42 = vrot.slane %v10279_v51, %v21449_v45  ;;  %v21481_v18 = vld [vmem:[#allocation29_spill] sm:$0xff] }
0x10f1   :  { %10957 = vperm.xlu0 %14006, %v19937_v61   ;;  %10951 = vperm.xlu1 %14007, %v19933_v43   ;;  %21472 = vst [vmem:[#allocation46_spill] sm:$0xff] %v19963_v46  ;;  %v19967_v41 = vpop.eup %14562  ;;  %v10752_v52 = vmul.f32 1.442695, %v10658_v55  ;;  %v10495_v28 = vrot.slane %v10279_v51, %v21450_v6  ;;  %v10754_v47 = vmul.f32 1.442695, %v10659_v17  ;;  %v10499_v3 = vrot.slane %v10279_v51, %v21451_v8  ;;  %v21483_v55 = vld [vmem:[#allocation25_spill] sm:$0xff] }
0x10f2   :  { %v19973_v40 = vpop.eup %14564  ;;  %14584 = vpow2.f32 %v10748_v21  ;;  %v10672_v0 = vsub.f32 %v19693_v11, %v10487_v57  ;;  %v10673_v60 = vsub.f32 %v21481_v18, %v10491_v42 }
0x10f3   :  { %21473 = vst [vmem:[#allocation36_spill] sm:$0xff] %v19973_v40  ;;  %v19977_v16 = vpop.eup %14566  ;;  %v10285_v54 = vpop.xlane.xlu0 %10284  ;;  %14586 = vpow2.f32 %v10750_v27  ;;  %v10674_v21 = vsub.f32 %v21483_v55, %v10495_v28  ;;  %v10675_v17 = vsub.f32 %v19714_v15, %v10499_v3 }
0x10f4   :  { %21475 = vst [vmem:[#allocation64_spill] sm:$0xff] %v19977_v16  ;;  %v19983_v56 = vpop.eup %14568  ;;  %14588 = vpow2.f32 %v10752_v52  ;;  %v10519_v11 = vrot.slane %v10285_v54, %v21400_v58  ;;  %v10782_v51 = vmul.f32 1.442695, %v10673_v60  ;;  %v10523_v27 = vrot.slane %v10285_v54, %v21449_v45 }
0x10f5   :  { %10954 = vperm.xlu0 %14006, %v19943_v13   ;;  %10960 = vperm.xlu1 %14007, %v19947_v48   ;;  %21477 = vst [vmem:[#allocation65_spill] sm:$0xff] %v19983_v56  ;;  %v19987_v25 = vpop.eup %14570  ;;  %14590 = vpow2.f32 %v10754_v47  ;;  %v10784_v52 = vmul.f32 1.442695, %v10674_v21  ;;  %v10527_v28 = vrot.slane %v10285_v54, %v21450_v6  ;;  %v10786_v15 = vmul.f32 1.442695, %v10675_v17  ;;  %v21487_v47 = vld [vmem:[#allocation48_spill] sm:$0xff] }
0x10f6   :  { %21479 = vst [vmem:[#allocation85_spill] sm:$0xff] %v19987_v25  ;;  %v19993_v59 = vpop.eup %14572  ;;  %v10681_v3 = vsub.f32 %v21487_v47, %v10523_v27  ;;  %v21489_v21 = vld [vmem:[#allocation28_spill] sm:$0xff] }
0x10f7   :  { %21480 = vst [vmem:[#allocation80_spill] sm:$0xff] %v19993_v59  ;;  %v19997_v23 = vpop.eup %14574  ;;  %v10288_v18 = vpop.xlane.xlu0 %10287  ;;  %v10682_v43 = vsub.f32 %v21489_v21, %v10527_v28 }
0x10f8   :  { %21482 = vst [vmem:[#allocation73_spill] sm:$0xff] %v19997_v23  ;;  %v20003_v57 = vpop.eup %14576  ;;  %v10535_v60 = vrot.slane %v10288_v18, %v21400_v58  ;;  %v10798_v17 = vmul.f32 1.442695, %v10681_v3  ;;  %v10543_v28 = vrot.slane %v10288_v18, %v21450_v6  ;;  %v21494_v3 = vld [vmem:[#allocation69_spill] sm:$0xff] }
0x10f9   :  { %10966 = vperm.xlu0 %14006, %v19957_v1   ;;  %10963 = vperm.xlu1 %14007, %v19953_v37   ;;  %v10780_v37 = vmul.f32 1.442695, %v10672_v0  ;;  %21484 = vst [vmem:[#allocation37_spill] sm:$0xff] %v20003_v57  ;;  %v20007_v42 = vpop.eup %14578  ;;  %v10680_v0 = vsub.f32 %v19712_v49, %v10519_v11 }
0x10fa   :  { %21485 = vst [vmem:[#allocation39_spill] sm:$0xff] %v20007_v42  ;;  %v20013_v55 = vpop.eup %14580  ;;  %v10684_v27 = vsub.f32 %v19733_v24, %v10535_v60 }
0x10fb   :  { %14592 = vpow2.f32 %v10780_v37  ;;  %21486 = vst [vmem:[#allocation38_spill] sm:$0xff] %v20013_v55  ;;  %v20017_v61 = vpop.eup %14582  ;;  %v10531_v37 = vrot.slane %v10285_v54, %v21451_v8  ;;  %v10796_v49 = vmul.f32 1.442695, %v10680_v0  ;;  %v10800_v54 = vmul.f32 1.442695, %v10682_v43  ;;  %v21496_v43 = vld [vmem:[#allocation67_spill] sm:$0xff] }
0x10fc   :  { %14594 = vpow2.f32 %v10782_v51  ;;  %21488 = vst [vmem:[#allocation40_spill] sm:$0xff] %v20017_v61  ;;  %v10539_v51 = vrot.slane %v10288_v18, %v21449_v45  ;;  %v10804_v24 = vmul.f32 1.442695, %v10684_v27 }
0x10fd   :  { %10996 = vperm.xlu1 %14007, %v19967_v41   ;;  %10993 = vperm.xlu0 %14006, %v19963_v46   ;;  %14596 = vpow2.f32 %v10784_v52  ;;  %v21492_v52 = vld [vmem:[#allocation93_spill] sm:$0xff] }
0x10fe   :  { %14598 = vpow2.f32 %v10786_v15  ;;  %v10547_v15 = vrot.slane %v10288_v18, %v21451_v8  ;;  %v10685_v21 = vsub.f32 %v21494_v3, %v10539_v51 }
0x10ff   :  { %v20023_v11 = vpop.eup %14584  ;;  %14600 = vpow2.f32 %v10796_v49  ;;  %v10291_v60 = vpop.xlane.xlu0 %10290  ;;  %v10686_v49 = vsub.f32 %v21496_v43, %v10543_v28 }
0x1100   :  { %21490 = vst [vmem:[#allocation70_spill] sm:$0xff] %v20023_v11  ;;  %v20027_v47 = vpop.eup %14586  ;;  %14602 = vpow2.f32 %v10798_v17  ;;  %v10687_v18 = vsub.f32 %v19749_v10, %v10547_v15  ;;  %v10806_v17 = vmul.f32 1.442695, %v10685_v21  ;;  %v10555_v51 = vrot.slane %v10291_v60, %v21449_v45  ;;  %v21501_v15 = vld [vmem:[#allocation91_spill] sm:$0xff] }
0x1101   :  { %10999 = vperm.xlu1 %14007, %v19973_v40   ;;  %11005 = vperm.xlu0 %14006, %v19977_v16   ;;  %21491 = vst [vmem:[#allocation71_spill] sm:$0xff] %v20027_v47  ;;  %v20033_v0 = vpop.eup %14588  ;;  %14604 = vpow2.f32 %v10800_v54  ;;  %v21499_v54 = vld [vmem:[#allocation49_spill] sm:$0xff]  ;;  %v10559_v10 = vrot.slane %v10291_v60, %v21450_v6 }
0x1102   :  { %21493 = vst [vmem:[#allocation72_spill] sm:$0xff] %v20033_v0  ;;  %v20037_v32 = vpop.eup %14590  ;;  %14606 = vpow2.f32 %v10804_v24  ;;  %v10810_v43 = vmul.f32 1.442695, %v10687_v18  ;;  %v10689_v21 = vsub.f32 %v21501_v15, %v10555_v51  ;;  %v21507_v15 = vld [vmem:[#allocation50_spill] sm:$0xff] }
0x1103   :  { %21495 = vst [vmem:[#allocation88_spill] sm:$0xff] %v20037_v32 }
0x1104   :  { %v10814_v18 = vmul.f32 1.442695, %v10689_v21  ;;  %v21512_v21 = vld [vmem:[#allocation90_spill] sm:$0xff] }
0x1105   :  { %11008 = vperm.xlu1 %14007, %v19987_v25   ;;  %11002 = vperm.xlu0 %14006, %v19983_v56  }
0x1109   :  { %11011 = vperm.xlu1 %14007, %v19993_v59   ;;  %11014 = vperm.xlu0 %14006, %v19997_v23  }
0x110d   :  { %11032 = vperm.xlu1 %14007, %v20007_v42   ;;  %11029 = vperm.xlu0 %14006, %v20003_v57  }
0x1111   :  { %11035 = vperm.xlu1 %14007, %v20013_v55   ;;  %11038 = vperm.xlu0 %14006, %v20017_v61   ;;  %v10683_v55 = vsub.f32 %v21492_v52, %v10531_v37  ;;  %v10551_v52 = vrot.slane %v10291_v60, %v21400_v58 }
0x1113   :  { %v10802_v37 = vmul.f32 1.442695, %v10683_v55  ;;  %v10808_v55 = vmul.f32 1.442695, %v10686_v49  ;;  %v10688_v28 = vsub.f32 %v21499_v54, %v10551_v52  ;;  %v10563_v49 = vrot.slane %v10291_v60, %v21451_v8  ;;  %v21504_v52 = vld [vmem:[#allocation31_spill] sm:$0xff] }
0x1115   :  { %10972 = vperm.xlu1 %14007, %v20027_v47   ;;  %10969 = vperm.xlu0 %14006, %v20023_v11   ;;  %v20043_v11 = vpop.eup %14592  ;;  %14608 = vpow2.f32 %v10802_v37 }
0x1116   :  { %21497 = vst [vmem:[#allocation60_spill] sm:$0xff] %v20043_v11  ;;  %v20047_v27 = vpop.eup %14594  ;;  %14610 = vpow2.f32 %v10806_v17  ;;  %v10690_v17 = vsub.f32 %v21504_v52, %v10559_v10 }
0x1117   :  { %21498 = vst [vmem:[#allocation41_spill] sm:$0xff] %v20047_v27  ;;  %v20052_v3 = vpop.eup %14596  ;;  %14612 = vpow2.f32 %v10808_v55  ;;  %v10691_v55 = vsub.f32 %v21507_v15, %v10563_v49  ;;  %v8546_v49 = vcombine.high %v21512_v21, %v21512_v21  ;;  %v21515_v15 = vld [vmem:[#allocation21_spill] sm:$0xff] }
0x1118   :  { %21500 = vst [vmem:[#allocation45_spill] sm:$0xff] %v20052_v3  ;;  %v20056_v24 = vpop.eup %14598  ;;  %14614 = vpow2.f32 %v10810_v43 }
0x1119   :  { %10975 = vperm.xlu1 %14007, %v20033_v0   ;;  %10978 = vperm.xlu0 %14006, %v20037_v32   ;;  %21502 = vst [vmem:[#allocation27_spill] sm:$0xff] %v20056_v24  ;;  %v10812_v0 = vmul.f32 1.442695, %v10688_v28  ;;  %v20060_v37 = vpop.eup %14600  ;;  %v10816_v28 = vmul.f32 1.442695, %v10690_v17 }
0x111a   :  { %21503 = vst [vmem:[#allocation30_spill] sm:$0xff] %v20060_v37  ;;  %v20064_v54 = vpop.eup %14602  ;;  %v10818_v43 = vmul.f32 1.442695, %v10691_v55  ;;  %v20092_v55 = vrot.slane %v8546_v49, %v21515_v15 }
0x111b   :  { %21505 = vst [vmem:[#allocation47_spill] sm:$0xff] %v20064_v54  ;;  %14616 = vpow2.f32 %v10812_v0  ;;  %v20068_v51 = vpop.eup %14604 }
0x111c   :  { %21506 = vst [vmem:[#allocation23_spill] sm:$0xff] %v20068_v51  ;;  %14618 = vpow2.f32 %v10814_v18  ;;  %v20071_v19 = vpop.eup %14606 }
0x111d   :  { %11020 = vperm.xlu1 %14007, %v20047_v27   ;;  %11017 = vperm.xlu0 %14006, %v20043_v11   ;;  %21508 = vst [vmem:[#allocation29_spill] sm:$0xff] %v20071_v19  ;;  %14620 = vpow2.f32 %v10816_v28 }
0x111e   :  { %14622 = vpow2.f32 %v10818_v43  ;;  %v21517_v43 = vld [vmem:[#allocation55_spill] sm:$0xff] }
0x111f   :  { %v8595_v21 = vcombine.high %v21517_v43, %v21517_v43 }
0x1121   :  { %11023 = vperm.xlu1 %14007, %v20052_v3   ;;  %11026 = vperm.xlu0 %14006, %v20056_v24  }
0x1122   :  { %v20075_v60 = vpop.eup %14608 }
0x1123   :  { %21509 = vst [vmem:[#allocation25_spill] sm:$0xff] %v20075_v60  ;;  %v20077_v10 = vpop.eup %14610  ;;  %v10886_v17 = vpop.permute.xlu1 %10885 }
0x1124   :  { %21510 = vst [vmem:[#allocation48_spill] sm:$0xff] %v20077_v10  ;;  %v20081_v0 = vpop.eup %14612 }
0x1125   :  { %11044 = vperm.xlu1 %14007, %v20064_v54   ;;  %11041 = vperm.xlu0 %14006, %v20060_v37   ;;  %21511 = vst [vmem:[#allocation28_spill] sm:$0xff] %v20081_v0  ;;  %v20085_v52 = vpop.eup %14614  ;;  %v21518_v37 = vld [vmem:[#allocation54_spill] sm:$0xff] }
0x1126   :  { %21513 = vst [vmem:[#allocation93_spill] sm:$0xff] %v20085_v52  ;;  %v20108_v49 = vcombine.high %v21518_v37, %v21518_v37  ;;  %v20124_v37 = vcombine.high %v20092_v55, %v20092_v55 }
0x1128   :  { %v20089_v18 = vpop.eup %14616  ;;  %v20120_v30 = vrot.slane %v20108_v49, %v21400_v58 }
0x1129   :  { %11047 = vperm.xlu1 %14007, %v20068_v51   ;;  %11053 = vperm.xlu0 %14006, %v20071_v19   ;;  %21514 = vst [vmem:[#allocation69_spill] sm:$0xff] %v20089_v18  ;;  %v20094_v28 = vpop.eup %14618  ;;  %v10889_v19 = vpop.permute.xlu0 %10888 }
0x112a   :  { %21516 = vst [vmem:[#allocation67_spill] sm:$0xff] %v20094_v28  ;;  %v20110_v57 = vpop.eup %14620 }
0x112b   :  { %21519 = vst [vmem:[#allocation49_spill] sm:$0xff] %v20110_v57  ;;  %v20126_v22 = vpop.eup %14622 }
0x112c   :  { %21520 = vst [vmem:[#allocation91_spill] sm:$0xff] %v20126_v22 }
0x112d   :  { %11056 = vperm.xlu1 %14007, %v20077_v10   ;;  %11050 = vperm.xlu0 %14006, %v20075_v60   ;;  %v10892_v3 = vpop.permute.xlu0 %10891  ;;  %v21522_v10 = vld [vmem:[#allocation20_spill] sm:$0xff] }
0x112e   :  { %v11083_v54 = vrot.slane %v10889_v19, %v21522_v10  ;;  %v11087_v60 = vrot.slane %v10892_v3, %v21522_v10 }
0x1131   :  { %11059 = vperm.xlu1 %14007, %v20081_v0   ;;  %11062 = vperm.xlu0 %14006, %v20085_v52   ;;  %v20104_v0 = vrot.slane %v20092_v55, %v21400_v58  ;;  %v10895_v59 = vpop.permute.xlu0 %10894  ;;  %v11079_v52 = vrot.slane %v10886_v17, %v21522_v10 }
0x1133   :  { %v20096_v51 = vpop.permute.xlu1 %10897  ;;  %v11332_v32 = vsel %vm3498_vm5, %v11083_v54, %v11079_v52 }
0x1134   :  { %v11333_v47 = vsel %vm3500_vm7, %v11087_v60, %v11332_v32 }
0x1135   :  { %11068 = vperm.xlu1 %14007, %v20094_v28   ;;  %11065 = vperm.xlu0 %14006, %v20089_v18   ;;  %v20116_v18 = vrot.slane %v8595_v21, %v21515_v15  ;;  %v20137_v21 = vrot.slane %v20124_v37, %v21400_v58 }
0x1137   :  { %v10901_v43 = vpop.permute.xlu1 %10900  ;;  %v20133_v15 = vrot.slane %v20116_v18, %v21400_v58  ;;  %v20153_v16 = vcombine.high %v20116_v18, %v20116_v18 }
0x1138   :  { %v11099_v60 = vrot.slane %v10901_v43, %v21522_v10 }
0x1139   :  { %11071 = vperm.xlu1 %14007, %v20110_v57   ;;  %8734 = vrot.lane.b32.xlu0 %v20104_v0, %s14860_s11  ;;  %v21521_v57 = vld [vmem:[#allocation75_spill] sm:$0xff] }
0x113a   :  { %v20141_v11 = vcombine.high %v21521_v57, %v21521_v57  ;;  %v20159_v57 = vrot.slane %v20153_v16, %v21400_v58 }
0x113b   :  { %v10904_v9 = vpop.permute.xlu1 %10903 }
0x113c   :  { %v20149_v50 = vrot.slane %v20141_v11, %v21400_v58  ;;  %v11091_v58 = vrot.slane %v10895_v59, %v21522_v10 }
0x113d   :  { %11074 = vperm.xlu1 %14007, %v20126_v22   ;;  %8736 = vrot.lane.b32.xlu0 %v20120_v30, %s14860_s11 }
0x113e   :  { %v11334_v42 = vsel %vm3502_vm6, %v11091_v58, %v11333_v47  ;;  %v11103_v47 = vrot.slane %v10904_v9, %v21522_v10 }
0x113f   :  { %v11396_v3 = vsel %vm3565_vm8, %v11334_v42, 0.0  ;;  %v11095_v42 = vrot.slane %v20096_v51, %v21522_v10 }
0x1141   :  { %8750 = vrot.lane.b32.xlu1 %v20133_v15, %s14860_s11  ;;  %8738 = vrot.lane.b32.xlu0 %v20137_v21, %s14860_s11 }
0x1143   :  { %v10910_v36 = vpop.permute.xlu0 %10909 }
0x1144   :  { %v10913_v44 = vpop.permute.xlu1 %10912 }
0x1145   :  { %8752 = vrot.lane.b32.xlu1 %v20149_v50, %s14860_s11 }
0x1147   :  { %v10916_v40 = vpop.permute.xlu0 %10915 }
0x1148   :  { %v10907_v46 = vpop.permute.xlu1 %10906  ;;  %v11119_v43 = vrot.slane %v10916_v40, %v21522_v10 }
0x1149   :  { %8754 = vrot.lane.b32.xlu1 %v20159_v57, %s14860_s11  ;;  %v11107_v52 = vrot.slane %v10907_v46, %v21522_v10 }
0x114b   :  { %v10919_v28 = vpop.permute.xlu0 %10918 }
0x114c   :  { %v10937_v35 = vpop.permute.xlu1 %10936 }
0x114f   :  { %v10934_v22 = vpop.permute.xlu0 %10933 }
0x1150   :  { %v10940_v29 = vpop.permute.xlu1 %10939 }
0x1153   :  { %v20163_v7 = vpop.permute.xlu0 %10942 }
0x1157   :  { %v10982_v24 = vpop.permute.xlu0 %10981 }
0x1158   :  { %v10985_v27 = vpop.permute.xlu1 %10984  ;;  %v11207_v17 = vrot.slane %v10982_v24, %v21522_v10 }
0x1159   :  { %v11211_v56 = vrot.slane %v10985_v27, %v21522_v10 }
0x115b   :  { %v11356_v1 = vsel %vm3498_vm5, %v11211_v56, %v11207_v17  ;;  %v11335_v56 = vsel %vm3498_vm5, %v11099_v60, %v11095_v42 }
0x115c   :  { %v10922_v61 = vpop.permute.xlu1 %10921  ;;  %v10988_v23 = vpop.permute.xlu0 %10987 }
0x115d   :  { %v11215_v19 = vrot.slane %v10988_v23, %v21522_v10 }
0x115f   :  { %v11357_v32 = vsel %vm3500_vm7, %v11215_v19, %v11356_v1  ;;  %v11115_v1 = vrot.slane %v10913_v44, %v21522_v10  ;;  %v11336_v19 = vsel %vm3500_vm7, %v11103_v47, %v11335_v56  ;;  %v11151_v44 = vrot.slane %v10940_v29, %v21522_v10 }
0x1160   :  { %v10991_v25 = vpop.permute.xlu1 %10990  ;;  %11397 = vadd.xlane.f32.xlu0 %v11396_v3  ;;  %v10925_v59 = vpop.permute.xlu0 %10924  ;;  %v11123_v3 = vrot.slane %v10919_v28, %v21522_v10  ;;  %v11337_v51 = vsel %vm3502_vm6, %v11107_v52, %v11336_v19  ;;  %v11155_v28 = vrot.slane %v20163_v7, %v21522_v10  ;;  %v11127_v29 = vrot.slane %v10922_v61, %v21522_v10 }
0x1161   :  { %v11219_v54 = vrot.slane %v10991_v25, %v21522_v10  ;;  %v11111_v25 = vrot.slane %v10910_v36, %v21522_v10  ;;  %v11399_v40 = vsel %vm3565_vm8, %v11337_v51, 0.0 }
0x1163   :  { %v11358_v58 = vsel %vm3502_vm6, %v11219_v54, %v11357_v32  ;;  %v11143_v54 = vrot.slane %v10934_v22, %v21522_v10  ;;  %v11338_v46 = vsel %vm3498_vm5, %v11115_v1, %v11111_v25  ;;  %v11147_v32 = vrot.slane %v10937_v35, %v21522_v10 }
0x1164   :  { %v10928_v27 = vpop.permute.xlu1 %10927  ;;  %v10931_v24 = vpop.permute.xlu0 %10930  ;;  %v11420_v23 = vsel %vm3565_vm8, %v11358_v58, 0.0  ;;  %v11339_v58 = vsel %vm3500_vm7, %v11119_v43, %v11338_v46  ;;  %v11131_v22 = vrot.slane %v10925_v59, %v21522_v10 }
0x1165   :  { %11421 = vadd.xlane.f32.xlu0 %v11420_v23  ;;  %v11344_v47 = vsel %vm3498_vm5, %v11147_v32, %v11143_v54  ;;  %v11340_v23 = vsel %vm3502_vm6, %v11123_v3, %v11339_v58  ;;  %v11135_v35 = vrot.slane %v10928_v27, %v21522_v10  ;;  %v11139_v43 = vrot.slane %v10931_v24, %v21522_v10 }
0x1166   :  { %v11402_v56 = vsel %vm3565_vm8, %v11340_v23, 0.0  ;;  %v11345_v1 = vsel %vm3500_vm7, %v11151_v44, %v11344_v47  ;;  %v11341_v25 = vsel %vm3498_vm5, %v11131_v22, %v11127_v29 }
0x1167   :  { %v11346_v7 = vsel %vm3502_vm6, %v11155_v28, %v11345_v1  ;;  %v11342_v59 = vsel %vm3500_vm7, %v11135_v35, %v11341_v25 }
0x1168   :  { %v10949_v17 = vpop.permute.xlu1 %10948  ;;  %v10946_v9 = vpop.permute.xlu0 %10945  ;;  %v11408_v51 = vsel %vm3565_vm8, %v11346_v7, 0.0  ;;  %v11343_v24 = vsel %vm3502_vm6, %v11139_v43, %v11342_v59 }
0x1169   :  { %v11163_v19 = vrot.slane %v10949_v17, %v21522_v10  ;;  %v11159_v27 = vrot.slane %v10946_v9, %v21522_v10 }
0x116c   :  { %v10952_v60 = vpop.permute.xlu1 %10951  ;;  %v10958_v36 = vpop.permute.xlu0 %10957 }
0x116d   :  { %11400 = vadd.xlane.f32.xlu1 %v11399_v40  ;;  %v11167_v61 = vrot.slane %v10952_v60, %v21522_v10  ;;  %v11347_v40 = vsel %vm3498_vm5, %v11163_v19, %v11159_v27  ;;  %v11175_v17 = vrot.slane %v10958_v36, %v21522_v10  ;;  %v11405_v60 = vsel %vm3565_vm8, %v11343_v24, 0.0 }
0x116f   :  { %v11348_v47 = vsel %vm3500_vm7, %v11167_v61, %v11347_v40 }
0x1170   :  { %v10961_v42 = vpop.permute.xlu1 %10960  ;;  %v10955_v52 = vpop.permute.xlu0 %10954 }
0x1171   :  { %11403 = vadd.xlane.f32.xlu1 %v11402_v56  ;;  %v11179_v46 = vrot.slane %v10961_v42, %v21522_v10  ;;  %v11171_v32 = vrot.slane %v10955_v52, %v21522_v10 }
0x1173   :  { %v11350_v28 = vsel %vm3498_vm5, %v11179_v46, %v11175_v17  ;;  %v11349_v23 = vsel %vm3502_vm6, %v11171_v32, %v11348_v47 }
0x1174   :  { %v10964_v3 = vpop.permute.xlu1 %10963  ;;  %v10967_v54 = vpop.permute.xlu0 %10966  ;;  %v11411_v52 = vsel %vm3565_vm8, %v11349_v23, 0.0 }
0x1175   :  { %11409 = vadd.xlane.f32.xlu1 %v11408_v51  ;;  %v11183_v44 = vrot.slane %v10964_v3, %v21522_v10  ;;  %v11187_v22 = vrot.slane %v10967_v54, %v21522_v10 }
0x1177   :  { %v11351_v35 = vsel %vm3500_vm7, %v11183_v44, %v11350_v28 }
0x1178   :  { %v10997_v9 = vpop.permute.xlu1 %10996  ;;  %v10994_v58 = vpop.permute.xlu0 %10993  ;;  %v11352_v1 = vsel %vm3502_vm6, %v11187_v22, %v11351_v35 }
0x1179   :  { %11406 = vadd.xlane.f32.xlu1 %v11405_v60  ;;  %v11227_v36 = vrot.slane %v10997_v9, %v21522_v10  ;;  %v11223_v56 = vrot.slane %v10994_v58, %v21522_v10  ;;  %v11414_v59 = vsel %vm3565_vm8, %v11352_v1, 0.0 }
0x117b   :  { %v11359_v19 = vsel %vm3498_vm5, %v11227_v36, %v11223_v56 }
0x117c   :  { %v11000_v29 = vpop.permute.xlu1 %10999  ;;  %v11006_v42 = vpop.permute.xlu0 %11005 }
0x117d   :  { %11412 = vadd.xlane.f32.xlu1 %v11411_v52  ;;  %v11231_v25 = vrot.slane %v11000_v29, %v21522_v10  ;;  %v11239_v51 = vrot.slane %v11006_v42, %v21522_v10 }
0x117f   :  { %v11360_v3 = vsel %vm3500_vm7, %v11231_v25, %v11359_v19 }
0x1180   :  { %v11009_v43 = vpop.permute.xlu1 %11008  ;;  %v11003_v7 = vpop.permute.xlu0 %11002 }
0x1181   :  { %v11235_v27 = vrot.slane %v11003_v7, %v21522_v10  ;;  %11415 = vadd.xlane.f32.xlu1 %v11414_v59  ;;  %v11243_v61 = vrot.slane %v11009_v43, %v21522_v10 }
0x1183   :  { %v11361_v54 = vsel %vm3502_vm6, %v11235_v27, %v11360_v3  ;;  %v11362_v17 = vsel %vm3498_vm5, %v11243_v61, %v11239_v51 }
0x1184   :  { %v11012_v46 = vpop.permute.xlu1 %11011  ;;  %v11015_v32 = vpop.permute.xlu0 %11014  ;;  %v11423_v24 = vsel %vm3565_vm8, %v11361_v54, 0.0 }
0x1185   :  { %v11247_v44 = vrot.slane %v11012_v46, %v21522_v10  ;;  %v11251_v40 = vrot.slane %v11015_v32, %v21522_v10  ;;  %11424 = vadd.xlane.f32.xlu0 %v11423_v24 }
0x1187   :  { %v11363_v9 = vsel %vm3500_vm7, %v11247_v44, %v11362_v17 }
0x1188   :  { %v11033_v58 = vpop.permute.xlu1 %11032  ;;  %v11030_v60 = vpop.permute.xlu0 %11029  ;;  %v11364_v47 = vsel %vm3502_vm6, %v11251_v40, %v11363_v9 }
0x1189   :  { %v11426_v28 = vsel %vm3565_vm8, %v11364_v47, 0.0  ;;  %v11275_v22 = vrot.slane %v11033_v58, %v21522_v10  ;;  %v11271_v23 = vrot.slane %v11030_v60, %v21522_v10 }
0x118a   :  { %11427 = vadd.xlane.f32.xlu0 %v11426_v28 }
0x118b   :  { %v11368_v36 = vsel %vm3498_vm5, %v11275_v22, %v11271_v23 }
0x118c   :  { %v11036_v35 = vpop.permute.xlu1 %11035  ;;  %v11039_v29 = vpop.permute.xlu0 %11038 }
0x118d   :  { %v11279_v42 = vrot.slane %v11036_v35, %v21522_v10  ;;  %v11283_v52 = vrot.slane %v11039_v29, %v21522_v10 }
0x118f   :  { %v11369_v56 = vsel %vm3500_vm7, %v11279_v42, %v11368_v36 }
0x1190   :  { %v10973_v1 = vpop.permute.xlu1 %10972  ;;  %v10970_v25 = vpop.permute.xlu0 %10969  ;;  %v11370_v43 = vsel %vm3502_vm6, %v11283_v52, %v11369_v56 }
0x1191   :  { %v11432_v7 = vsel %vm3565_vm8, %v11370_v43, 0.0  ;;  %v11195_v59 = vrot.slane %v10973_v1, %v21522_v10  ;;  %v11191_v19 = vrot.slane %v10970_v25, %v21522_v10 }
0x1192   :  { %11433 = vadd.xlane.f32.xlu0 %v11432_v7 }
0x1193   :  { %v11353_v51 = vsel %vm3498_vm5, %v11195_v59, %v11191_v19 }
0x1194   :  { %v10976_v27 = vpop.permute.xlu1 %10975  ;;  %v10979_v61 = vpop.permute.xlu0 %10978 }
0x1195   :  { %v11199_v3 = vrot.slane %v10976_v27, %v21522_v10  ;;  %v11203_v54 = vrot.slane %v10979_v61, %v21522_v10 }
0x1197   :  { %v11354_v46 = vsel %vm3500_vm7, %v11199_v3, %v11353_v51 }
0x1198   :  { %v11021_v32 = vpop.permute.xlu1 %11020  ;;  %v11018_v24 = vpop.permute.xlu0 %11017  ;;  %v11355_v44 = vsel %vm3502_vm6, %v11203_v54, %v11354_v46 }
0x1199   :  { %v11417_v40 = vsel %vm3565_vm8, %v11355_v44, 0.0  ;;  %v11259_v17 = vrot.slane %v11021_v32, %v21522_v10  ;;  %v11255_v9 = vrot.slane %v11018_v24, %v21522_v10 }
0x119a   :  { %11418 = vadd.xlane.f32.xlu1 %v11417_v40 }
0x119b   :  { %v11365_v22 = vsel %vm3498_vm5, %v11259_v17, %v11255_v9 }
0x119c   :  { %v11024_v58 = vpop.permute.xlu1 %11023  ;;  %v11027_v60 = vpop.permute.xlu0 %11026 }
0x119d   :  { %v11263_v47 = vrot.slane %v11024_v58, %v21522_v10  ;;  %v11267_v28 = vrot.slane %v11027_v60, %v21522_v10 }
0x119f   :  { %v11366_v23 = vsel %vm3500_vm7, %v11263_v47, %v11365_v22 }
0x11a0   :  { %v11045_v35 = vpop.permute.xlu1 %11044  ;;  %v11042_v29 = vpop.permute.xlu0 %11041  ;;  %v11367_v42 = vsel %vm3502_vm6, %v11267_v28, %v11366_v23  ;;  %v8777_v23 = vsel %vm1336_vm0, %v20092_v55, %v20104_v0 }
0x11a1   :  { %v11429_v52 = vsel %vm3565_vm8, %v11367_v42, 0.0  ;;  %v11291_v1 = vrot.slane %v11045_v35, %v21522_v10  ;;  %v11287_v25 = vrot.slane %v11042_v29, %v21522_v10 }
0x11a2   :  { %11430 = vadd.xlane.f32.xlu0 %v11429_v52 }
0x11a3   :  { %v11371_v19 = vsel %vm3498_vm5, %v11291_v1, %v11287_v25  ;;  %v8778_v25 = vsel %vm1336_vm0, %v20108_v49, %v20120_v30  ;;  %v8779_v30 = vsel %vm1336_vm0, %v20124_v37, %v20137_v21 }
0x11a4   :  { %v11048_v36 = vpop.permute.xlu1 %11047  ;;  %v11054_v56 = vpop.permute.xlu0 %11053 }
0x11a5   :  { %v11295_v43 = vrot.slane %v11048_v36, %v21522_v10  ;;  %v11303_v51 = vrot.slane %v11054_v56, %v21522_v10 }
0x11a7   :  { %v11372_v3 = vsel %vm3500_vm7, %v11295_v43, %v11371_v19 }
0x11a8   :  { %v11057_v7 = vpop.permute.xlu1 %11056  ;;  %v11051_v59 = vpop.permute.xlu0 %11050 }
0x11a9   :  { %v11299_v27 = vrot.slane %v11051_v59, %v21522_v10  ;;  %v11307_v61 = vrot.slane %v11057_v7, %v21522_v10 }
0x11ab   :  { %v11373_v54 = vsel %vm3502_vm6, %v11299_v27, %v11372_v3  ;;  %v11374_v17 = vsel %vm3498_vm5, %v11307_v61, %v11303_v51  ;;  %v8785_v61 = vsel %vm1336_vm0, %v20116_v18, %v20133_v15  ;;  %v8786_v18 = vsel %vm1336_vm0, %v20141_v11, %v20149_v50 }
0x11ac   :  { %v11060_v46 = vpop.permute.xlu1 %11059  ;;  %v11063_v32 = vpop.permute.xlu0 %11062  ;;  %v11435_v24 = vsel %vm3565_vm8, %v11373_v54, 0.0 }
0x11ad   :  { %v11311_v44 = vrot.slane %v11060_v46, %v21522_v10  ;;  %v11315_v40 = vrot.slane %v11063_v32, %v21522_v10  ;;  %11436 = vadd.xlane.f32.xlu0 %v11435_v24  ;;  %v8787_v24 = vsel %vm1336_vm0, %v20153_v16, %v20159_v57 }
0x11af   :  { %v11375_v9 = vsel %vm3500_vm7, %v11311_v44, %v11374_v17 }
0x11b0   :  { %v11069_v58 = vpop.permute.xlu1 %11068  ;;  %v11066_v60 = vpop.permute.xlu0 %11065  ;;  %v11376_v47 = vsel %vm3502_vm6, %v11315_v40, %v11375_v9 }
0x11b1   :  { %v11438_v28 = vsel %vm3565_vm8, %v11376_v47, 0.0  ;;  %v11323_v29 = vrot.slane %v11069_v58, %v21522_v10  ;;  %v11319_v42 = vrot.slane %v11066_v60, %v21522_v10 }
0x11b2   :  { %11439 = vadd.xlane.f32.xlu0 %v11438_v28 }
0x11b3   :  { %v11377_v0 = vsel %vm3498_vm5, %v11323_v29, %v11319_v42 }
0x11b4   :  { %v11072_v22 = vpop.permute.xlu1 %11071  ;;  %v8735_v35 = vpop.permute.xlu0 %8734 }
0x11b5   :  { %v8793_v52 = vsel %vm1353_vm2, %v8777_v23, %v8735_v35  ;;  %v11327_v36 = vrot.slane %v11072_v22, %v21522_v10 }
0x11b6   :  { %v20295_v56 = vsel %vm1370_vm3, %v8793_v52, %v8735_v35 }
0x11b7   :  { %21523 = vst [vmem:[#allocation31_spill] sm:$0xff] %v20295_v56  ;;  %v11378_v19 = vsel %vm3500_vm7, %v11327_v36, %v11377_v0 }
0x11b8   :  { %v11075_v1 = vpop.permute.xlu1 %11074  ;;  %v8737_v43 = vpop.permute.xlu0 %8736 }
0x11b9   :  { %v11331_v55 = vrot.slane %v11075_v1, %v21522_v10  ;;  %v8794_v7 = vsel %vm1353_vm2, %v8778_v25, %v8737_v43 }
0x11ba   :  { %v20304_v59 = vsel %vm1370_vm3, %v8794_v7, %v8737_v43 }
0x11bb   :  { %v11379_v27 = vsel %vm3502_vm6, %v11331_v55, %v11378_v19 }
0x11bc   :  { %v8751_v3 = vpop.permute.xlu1 %8750  ;;  %v8739_v49 = vpop.permute.xlu0 %8738  ;;  %v11441_v10 = vsel %vm3565_vm8, %v11379_v27, 0.0 }
0x11bd   :  { %v8801_v54 = vsel %vm1353_vm2, %v8785_v61, %v8751_v3  ;;  %v8795_v51 = vsel %vm1353_vm2, %v8779_v30, %v8739_v49  ;;  %11442 = vadd.xlane.f32.xlu0 %v11441_v10 }
0x11be   :  { %v20318_v46 = vsel %vm1370_vm3, %v8801_v54, %v8751_v3  ;;  %v20321_v32 = vsel %vm1370_vm3, %v8795_v51, %v8739_v49 }
0x11c0   :  { %v8753_v15 = vpop.permute.xlu1 %8752 }
0x11c1   :  { %v8802_v37 = vsel %vm1353_vm2, %v8786_v18, %v8753_v15 }
0x11c2   :  { %v20328_v21 = vsel %vm1370_vm3, %v8802_v37, %v8753_v15 }
0x11c4   :  { %v8755_v44 = vpop.permute.xlu1 %8754 }
0x11c5   :  { %v8803_v40 = vsel %vm1353_vm2, %v8787_v24, %v8755_v44 }
0x11c6   :  { %v20335_v17 = vsel %vm1370_vm3, %v8803_v40, %v8755_v44 }
0x11e9   :  { %v11398_v9 = vpop.xlane.xlu0 %11397 }
0x11ea   :  { %14624 = vrcp.f32 %v11398_v9 }
0x11ee   :  { %v11422_v35 = vpop.xlane.xlu0 %11421 }
0x11f6   :  { %v11401_v58 = vpop.xlane.xlu1 %11400 }
0x11f7   :  { %v20337_v50 = vpop.eup %14624  ;;  %14626 = vrcp.f32 %v11401_v58 }
0x11f8   :  { %v11491_v11 = vrot.slane %v20337_v50, %v21451_v8  ;;  %v11483_v60 = vrot.slane %v20337_v50, %v21449_v45  ;;  %v11487_v28 = vrot.slane %v20337_v50, %v21450_v6 }
0x11fa   :  { %v11404_v47 = vpop.xlane.xlu1 %11403  ;;  %v11799_v16 = vmul.f32 %v19802_v5, %v11491_v11  ;;  %v11797_v57 = vmul.f32 %v19794_v31, %v11483_v60  ;;  %v11798_v23 = vmul.f32 %v19799_v20, %v11487_v28  ;;  %v21524_v28 = vld [vmem:[#allocation33_spill] sm:$0xff] }
0x11fb   :  { %14628 = vrcp.f32 %v11404_v47 }
0x11fc   :  { %11877 = vperm.xlu1 %14007, %v11799_v16   ;;  %11867 = vperm.xlu0 %14006, %v11797_v57  }
0x11fe   :  { %v11410_v22 = vpop.xlane.xlu1 %11409 }
0x11ff   :  { %14630 = vrcp.f32 %v11410_v22 }
0x1200   :  { %11872 = vperm.xlu0 %14006, %v11798_v23   ;;  %14632 = vrcp.f32 %v11422_v35  ;;  %v21525_v23 = vld [vmem:[#allocation85_spill] sm:$0xff] }
0x1202   :  { %v11407_v29 = vpop.xlane.xlu1 %11406 }
0x1203   :  { %14634 = vrcp.f32 %v11407_v29 }
0x1204   :  { %v20348_v42 = vpop.eup %14626 }
0x1205   :  { %v11499_v31 = vrot.slane %v20348_v42, %v21449_v45  ;;  %v11507_v5 = vrot.slane %v20348_v42, %v21451_v8  ;;  %v11503_v19 = vrot.slane %v20348_v42, %v21450_v6 }
0x1206   :  { %v11413_v52 = vpop.xlane.xlu1 %11412 }
0x1207   :  { %14636 = vrcp.f32 %v11413_v52  ;;  %v11801_v36 = vmul.f32 %v19818_v4, %v11499_v31  ;;  %v11803_v20 = vmul.f32 %v19848_v62, %v11507_v5  ;;  %v11802_v10 = vmul.f32 %v19824_v26, %v11503_v19  ;;  %v21526_v5 = vld [vmem:[#allocation65_spill] sm:$0xff]  ;;  %v21529_v19 = vld [vmem:[#allocation40_spill] sm:$0xff] }
0x1208   :  { %v20356_v1 = vpop.eup %14628 }
0x1209   :  { %11887 = vperm.xlu1 %14007, %v11801_v36   ;;  %11897 = vperm.xlu0 %14006, %v11803_v20   ;;  %v11523_v25 = vrot.slane %v20356_v1, %v21451_v8  ;;  %v11515_v55 = vrot.slane %v20356_v1, %v21449_v45  ;;  %v21527_v20 = vld [vmem:[#allocation39_spill] sm:$0xff] }
0x120a   :  { %v11416_v43 = vpop.xlane.xlu1 %11415 }
0x120b   :  { %14638 = vrcp.f32 %v11416_v43  ;;  %v11807_v0 = vmul.f32 %v19858_v38, %v11523_v25  ;;  %v11805_v38 = vmul.f32 %v19837_v53, %v11515_v55  ;;  %v21528_v43 = vld [vmem:[#allocation73_spill] sm:$0xff] }
0x120c   :  { %v20363_v7 = vpop.eup %14630 }
0x120d   :  { %11917 = vperm.xlu0 %14006, %v11807_v0   ;;  %v11555_v4 = vrot.slane %v20363_v7, %v21451_v8  ;;  %v20369_v27 = vpop.eup %14632  ;;  %v11547_v3 = vrot.slane %v20363_v7, %v21449_v45 }
0x120e   :  { %v11425_v62 = vpop.xlane.xlu0 %11424 }
0x120f   :  { %14640 = vrcp.f32 %v11425_v62  ;;  %v11815_v61 = vmul.f32 %v19877_v39, %v11555_v4  ;;  %v11813_v54 = vmul.f32 %v19860_v33, %v11547_v3  ;;  %v11619_v39 = vrot.slane %v20369_v27, %v21451_v8  ;;  %v21530_v3 = vld [vmem:[#allocation71_spill] sm:$0xff] }
0x1210   :  { %v20375_v30 = vpop.eup %14634  ;;  %v11611_v33 = vrot.slane %v20369_v27, %v21449_v45 }
0x1211   :  { %11957 = vperm.xlu1 %14007, %v11815_v61   ;;  %11907 = vperm.xlu0 %14006, %v11805_v38   ;;  %v11531_v51 = vrot.slane %v20375_v30, %v21449_v45  ;;  %v11831_v15 = vmul.f32 %v19903_v63, %v11619_v39  ;;  %v11539_v63 = vrot.slane %v20375_v30, %v21451_v8 }
0x1212   :  { %v11829_v40 = vmul.f32 %v19887_v14, %v11611_v33  ;;  %v21532_v33 = vld [vmem:[#allocation27_spill] sm:$0xff] }
0x1213   :  { %v11428_v49 = vpop.xlane.xlu0 %11427  ;;  %v11809_v53 = vmul.f32 %v19907_v34, %v11531_v51  ;;  %v11811_v11 = vmul.f32 %v19917_v12, %v11539_v63 }
0x1214   :  { %v20383_v18 = vpop.eup %14636  ;;  %14642 = vrcp.f32 %v11428_v49 }
0x1215   :  { %11892 = vperm.xlu1 %14007, %v11802_v10   ;;  %11947 = vperm.xlu0 %14006, %v11813_v54   ;;  %v11563_v26 = vrot.slane %v20383_v18, %v21449_v45  ;;  %v21531_v54 = vld [vmem:[#allocation88_spill] sm:$0xff] }
0x1217   :  { %v11817_v44 = vmul.f32 %v19927_v2, %v11563_v26  ;;  %v11571_v2 = vrot.slane %v20383_v18, %v21451_v8 }
0x1218   :  { %v20391_v37 = vpop.eup %14638 }
0x1219   :  { %11927 = vperm.xlu0 %14006, %v11809_v53   ;;  %12037 = vperm.xlu1 %14007, %v11831_v15   ;;  %v11579_v34 = vrot.slane %v20391_v37, %v21449_v45  ;;  %v11819_v16 = vmul.f32 %v19943_v13, %v11571_v2  ;;  %v21534_v2 = vld [vmem:[#allocation25_spill] sm:$0xff] }
0x121b   :  { %v11434_v24 = vpop.xlane.xlu0 %11433  ;;  %v11821_v58 = vmul.f32 %v19947_v48, %v11579_v34  ;;  %v11587_v48 = vrot.slane %v20391_v37, %v21451_v8 }
0x121c   :  { %v20399_v9 = vpop.eup %14640  ;;  %14644 = vrcp.f32 %v11434_v24 }
0x121d   :  { %11967 = vperm.xlu0 %14006, %v11817_v44   ;;  %12027 = vperm.xlu1 %14007, %v11829_v40   ;;  %v11627_v14 = vrot.slane %v20399_v9, %v21449_v45  ;;  %v11823_v22 = vmul.f32 %v21524_v28, %v11587_v48  ;;  %v11635_v29 = vrot.slane %v20399_v9, %v21451_v8  ;;  %v21533_v44 = vld [vmem:[#allocation41_spill] sm:$0xff] }
0x121e   :  { %v21536_v28 = vld [vmem:[#allocation93_spill] sm:$0xff] }
0x121f   :  { %v11833_v57 = vmul.f32 %v19967_v41, %v11627_v14  ;;  %v11835_v52 = vmul.f32 %v21526_v5, %v11635_v29  ;;  %v11615_v29 = vrot.slane %v20369_v27, %v21450_v6  ;;  %v21539_v5 = vld [vmem:[#allocation22_spill] sm:$0xff] }
0x1221   :  { %v20407_v60 = vpop.eup %14642  ;;  %11987 = vperm.xlu0 %14006, %v11821_v58   ;;  %11937 = vperm.xlu1 %14007, %v11811_v11  }
0x1222   :  { %v11643_v12 = vrot.slane %v20407_v60, %v21449_v45  ;;  %v11651_v36 = vrot.slane %v20407_v60, %v21451_v8 }
0x1223   :  { %v11419_v47 = vpop.xlane.xlu1 %11418 }
0x1224   :  { %14646 = vrcp.f32 %v11419_v47  ;;  %v11837_v35 = vmul.f32 %v21525_v23, %v11643_v12  ;;  %v11839_v0 = vmul.f32 %v21528_v43, %v11651_v36  ;;  %v21535_v47 = vld [vmem:[#allocation47_spill] sm:$0xff]  ;;  %v21537_v23 = vld [vmem:[#allocation48_spill] sm:$0xff]  ;;  %v11519_v43 = vrot.slane %v20356_v1, %v21450_v6 }
0x1225   :  { %11977 = vperm.xlu1 %14007, %v11819_v16   ;;  %12047 = vperm.xlu0 %14006, %v11833_v57  }
0x1229   :  { %v20419_v31 = vpop.eup %14644  ;;  %11997 = vperm.xlu1 %14007, %v11823_v22   ;;  %12067 = vperm.xlu0 %14006, %v11837_v35  }
0x122a   :  { %v11675_v13 = vrot.slane %v20419_v31, %v21449_v45  ;;  %v11683_v55 = vrot.slane %v20419_v31, %v21451_v8 }
0x122b   :  { %v11431_v41 = vpop.xlane.xlu0 %11430 }
0x122c   :  { %14648 = vrcp.f32 %v11431_v41  ;;  %v11845_v25 = vmul.f32 %v21527_v20, %v11675_v13  ;;  %v11847_v61 = vmul.f32 %v21529_v19, %v11683_v55  ;;  %v21538_v13 = vld [vmem:[#allocation26_spill] sm:$0xff]  ;;  %v21540_v20 = vld [vmem:[#allocation32_spill] sm:$0xff]  ;;  %v21541_v55 = vld [vmem:[#allocation91_spill] sm:$0xff] }
0x122d   :  { %12057 = vperm.xlu1 %14007, %v11835_v52   ;;  %v11830_v41 = vmul.f32 %v21538_v13, %v11615_v29  ;;  %v11479_v52 = vrot.slane %v20337_v50, %v21539_v5  ;;  %v11623_v50 = vrot.slane %v20399_v9, %v21539_v5  ;;  %v21554_v13 = vld [vmem:[#allocation24_spill] sm:$0xff] }
0x122e   :  { %12107 = vperm.xlu0 %14006, %v11845_v25  }
0x122f   :  { %v11796_v25 = vmul.f32 %v21540_v20, %v11479_v52  ;;  %v11671_v52 = vrot.slane %v20419_v31, %v21539_v5 }
0x1231   :  { %v20430_v4 = vpop.eup %14646  ;;  %12077 = vperm.xlu1 %14007, %v11839_v0  }
0x1232   :  { %v11595_v62 = vrot.slane %v20430_v4, %v21449_v45  ;;  %v11603_v38 = vrot.slane %v20430_v4, %v21451_v8 }
0x1234   :  { %v11825_v49 = vmul.f32 %v21530_v3, %v11595_v62  ;;  %v11827_v51 = vmul.f32 %v21531_v54, %v11603_v38  ;;  %v21543_v3 = vld [vmem:[#allocation67_spill] sm:$0xff]  ;;  %v21544_v54 = vld [vmem:[#allocation46_spill] sm:$0xff] }
0x1235   :  { %12117 = vperm.xlu1 %14007, %v11847_v61   ;;  %v21542_v61 = vld [vmem:[#allocation86_spill] sm:$0xff] }
0x1236   :  { %12007 = vperm.xlu0 %14006, %v11825_v49   ;;  %v11437_v10 = vpop.xlane.xlu0 %11436  ;;  %v11806_v38 = vmul.f32 %v21542_v61, %v11519_v43  ;;  %v21556_v43 = vld [vmem:[#allocation37_spill] sm:$0xff]  ;;  %v21558_v61 = vld [vmem:[#allocation95_spill] sm:$0xff] }
0x1237   :  { %14650 = vrcp.f32 %v11437_v10  ;;  %v11631_v10 = vrot.slane %v20399_v9, %v21450_v6  ;;  %v21547_v9 = vld [vmem:[#allocation42_spill] sm:$0xff] }
0x1239   :  { %v20439_v39 = vpop.eup %14648  ;;  %12017 = vperm.xlu1 %14007, %v11827_v51   ;;  %v11511_v51 = vrot.slane %v20356_v1, %v21539_v5  ;;  %v21548_v1 = vld [vmem:[#allocation64_spill] sm:$0xff] }
0x123a   :  { %v11667_v53 = vrot.slane %v20439_v39, %v21451_v8  ;;  %v11659_v15 = vrot.slane %v20439_v39, %v21449_v45  ;;  %v11663_v29 = vrot.slane %v20439_v39, %v21450_v6 }
0x123b   :  { %v11440_v26 = vpop.xlane.xlu0 %11439 }
0x123c   :  { %14652 = vrcp.f32 %v11440_v26  ;;  %v11843_v24 = vmul.f32 %v21532_v33, %v11667_v53  ;;  %v11841_v40 = vmul.f32 %v21533_v44, %v11659_v15  ;;  %v11495_v15 = vrot.slane %v20348_v42, %v21539_v5  ;;  %v21546_v26 = vld [vmem:[#allocation34_spill] sm:$0xff]  ;;  %v21549_v42 = vld [vmem:[#allocation87_spill] sm:$0xff] }
0x123d   :  { %v11804_v33 = vmul.f32 %v21546_v26, %v11511_v51  ;;  %v11575_v51 = vrot.slane %v20391_v37, %v21539_v5  ;;  %v21563_v26 = vld [vmem:[#allocation74_spill] sm:$0xff] }
0x123e   :  { %12097 = vperm.xlu1 %14007, %v11843_v24   ;;  %12087 = vperm.xlu0 %14006, %v11841_v40   ;;  %v11639_v24 = vrot.slane %v20407_v60, %v21539_v5  ;;  %v11800_v44 = vmul.f32 %v21547_v9, %v11495_v15  ;;  %v11607_v40 = vrot.slane %v20369_v27, %v21539_v5  ;;  %v21551_v27 = vld [vmem:[#allocation80_spill] sm:$0xff]  ;;  %v21562_v15 = vld [vmem:[#allocation78_spill] sm:$0xff]  ;;  %v21564_v9 = vld [vmem:[#allocation35_spill] sm:$0xff] }
0x1244   :  { %v20447_v34 = vpop.eup %14650 }
0x1245   :  { %v11699_v63 = vrot.slane %v20447_v34, %v21451_v8  ;;  %v11691_v58 = vrot.slane %v20447_v34, %v21449_v45 }
0x1246   :  { %v11443_v11 = vpop.xlane.xlu0 %11442 }
0x1247   :  { %14654 = vrcp.f32 %v11443_v11  ;;  %v11851_v14 = vmul.f32 %v21534_v2, %v11699_v63  ;;  %v11849_v16 = vmul.f32 %v21535_v47, %v11691_v58  ;;  %v11836_v63 = vmul.f32 %v21548_v1, %v11639_v24  ;;  %v21565_v1 = vld [vmem:[#allocation23_spill] sm:$0xff] }
0x1248   :  { %v11527_v58 = vrot.slane %v20375_v30, %v21539_v5  ;;  %v11828_v11 = vmul.f32 %v21549_v42, %v11607_v40  ;;  %v11647_v2 = vrot.slane %v20407_v60, %v21450_v6  ;;  %v21553_v60 = vld [vmem:[#allocation96_spill] sm:$0xff] }
0x1249   :  { %v20455_v57 = vpop.eup %14652  ;;  %12137 = vperm.xlu1 %14007, %v11851_v14   ;;  %12127 = vperm.xlu0 %14006, %v11849_v16   ;;  %v21550_v14 = vld [vmem:[#allocation94_spill] sm:$0xff]  ;;  %v11655_v16 = vrot.slane %v20439_v39, %v21539_v5  ;;  %v21557_v39 = vld [vmem:[#allocation89_spill] sm:$0xff] }
0x124a   :  { %v11715_v48 = vrot.slane %v20455_v57, %v21451_v8  ;;  %v11707_v12 = vrot.slane %v20455_v57, %v21449_v45  ;;  %v11808_v47 = vmul.f32 %v21550_v14, %v11527_v58 }
0x124c   :  { %v11855_v22 = vmul.f32 %v21536_v28, %v11715_v48  ;;  %v11853_v35 = vmul.f32 %v21537_v23, %v11707_v12  ;;  %v11838_v48 = vmul.f32 %v21551_v27, %v11647_v2  ;;  %v11535_v12 = vrot.slane %v20375_v30, %v21450_v6  ;;  %v21552_v28 = vld [vmem:[#allocation60_spill] sm:$0xff]  ;;  %v21555_v30 = vld [vmem:[#allocation45_spill] sm:$0xff] }
0x124d   :  { %v11543_v23 = vrot.slane %v20363_v7, %v21539_v5  ;;  %v11842_v20 = vmul.f32 %v21555_v30, %v11663_v29  ;;  %v21566_v2 = vld [vmem:[#allocation29_spill] sm:$0xff]  ;;  %v21570_v30 = vld [vmem:[#allocation66_spill] sm:$0xff] }
0x124e   :  { %12157 = vperm.xlu1 %14007, %v11855_v22   ;;  %12147 = vperm.xlu0 %14006, %v11853_v35   ;;  %v11840_v22 = vmul.f32 %v21552_v28, %v11655_v16  ;;  %v11810_v35 = vmul.f32 %v21553_v60, %v11535_v12  ;;  %v21567_v16 = vld [vmem:[#allocation44_spill] sm:$0xff] }
0x1252   :  { %12032 = vperm.xlu0 %14006, %v11830_v41   ;;  %v11812_v41 = vmul.f32 %v21554_v13, %v11543_v23  ;;  %v11599_v13 = vrot.slane %v20430_v4, %v21450_v6 }
0x1254   :  { %v20468_v36 = vpop.eup %14654 }
0x1255   :  { %v11731_v0 = vrot.slane %v20468_v36, %v21451_v8  ;;  %v11723_v19 = vrot.slane %v20468_v36, %v21449_v45  ;;  %v11832_v8 = vmul.f32 %v21544_v54, %v11623_v50  ;;  %v21545_v45 = vld [vmem:[#allocation36_spill] sm:$0xff]  ;;  %v11687_v50 = vrot.slane %v20447_v34, %v21539_v5  ;;  %v21560_v54 = vld [vmem:[#allocation30_spill] sm:$0xff] }
0x1256   :  { %11862 = vperm.xlu0 %14006, %v11796_v25   ;;  %v11834_v53 = vmul.f32 %v21545_v45, %v11631_v10  ;;  %v11551_v25 = vrot.slane %v20363_v7, %v21450_v6  ;;  %v21559_v7 = vld [vmem:[#allocation38_spill] sm:$0xff]  ;;  %v11567_v10 = vrot.slane %v20383_v18, %v21450_v6 }
0x1257   :  { %v11859_v62 = vmul.f32 %v21541_v55, %v11731_v0  ;;  %v11857_v49 = vmul.f32 %v21543_v3, %v11723_v19  ;;  %v11844_v0 = vmul.f32 %v21556_v43, %v11671_v52  ;;  %v11559_v55 = vrot.slane %v20383_v18, %v21539_v5  ;;  %v21572_v43 = vld [vmem:[#allocation72_spill] sm:$0xff] }
0x1258   :  { %v11679_v19 = vrot.slane %v20419_v31, %v21450_v6  ;;  %v21561_v31 = vld [vmem:[#allocation43_spill] sm:$0xff]  ;;  %v11703_v18 = vrot.slane %v20455_v57, %v21539_v5 }
0x1259   :  { %12177 = vperm.xlu1 %14007, %v11859_v62   ;;  %v11814_v62 = vmul.f32 %v21557_v39, %v11551_v25  ;;  %v11818_v45 = vmul.f32 %v21561_v31, %v11567_v10 }
0x125a   :  { %11912 = vperm.xlu0 %14006, %v11806_v38   ;;  %v11816_v38 = vmul.f32 %v21558_v61, %v11559_v55  ;;  %v11852_v14 = vmul.f32 %v21566_v2, %v11703_v18  ;;  %v11727_v55 = vrot.slane %v20468_v36, %v21450_v6  ;;  %v21573_v61 = vld [vmem:[#allocation82_spill] sm:$0xff] }
0x125d   :  { %12167 = vperm.xlu1 %14007, %v11857_v49   ;;  %v11846_v49 = vmul.f32 %v21559_v7, %v11679_v19  ;;  %v11719_v7 = vrot.slane %v20468_v36, %v21539_v5 }
0x125e   :  { %12042 = vperm.xlu0 %14006, %v11832_v8   ;;  %v11848_v8 = vmul.f32 %v21560_v54, %v11687_v50  ;;  %v21575_v54 = vld [vmem:[#allocation49_spill] sm:$0xff] }
0x1261   :  { %12052 = vperm.xlu1 %14007, %v11834_v53   ;;  %v11695_v53 = vrot.slane %v20447_v34, %v21450_v6  ;;  %v11583_v34 = vrot.slane %v20391_v37, %v21450_v6 }
0x1262   :  { %11902 = vperm.xlu0 %14006, %v11804_v33   ;;  %v8788_v33 = vsel %vm1353_vm2, %v21563_v26, %v21562_v15  ;;  %v21576_v26 = vld [vmem:[#allocation69_spill] sm:$0xff] }
0x1263   :  { %v20548_v40 = vsel %vm1370_vm3, %v8788_v33, %v21562_v15  ;;  %v11822_v27 = vmul.f32 %v21567_v16, %v11583_v34  ;;  %v11856_v33 = vmul.f32 %v21576_v26, %v11719_v7  ;;  %v21583_v7 = vld [vmem:[#allocation84_spill] sm:$0xff]  ;;  %v14206_v26 = vld [vmem:[#allocation8 + $0xf0] sm:$0xff]  }
0x1265   :  { %11882 = vperm.xlu1 %14007, %v11800_v44   ;;  %v11820_v44 = vmul.f32 %v21564_v9, %v11575_v51 }
0x1266   :  { %12062 = vperm.xlu0 %14006, %v11836_v63   ;;  %v11850_v63 = vmul.f32 %v21565_v1, %v11695_v53 }
0x1269   :  { %12022 = vperm.xlu1 %14007, %v11828_v11  }
0x126a   :  { %11922 = vperm.xlu0 %14006, %v11808_v47   ;;  %v11591_v47 = vrot.slane %v20430_v4, %v21539_v5 }
0x126d   :  { %12072 = vperm.xlu1 %14007, %v11838_v48   ;;  %v11711_v48 = vrot.slane %v20455_v57, %v21450_v6 }
0x126e   :  { %12082 = vperm.xlu0 %14006, %v11840_v22   ;;  %v21568_v22 = vld [vmem:[#allocation70_spill] sm:$0xff] }
0x126f   :  { %v11824_v23 = vmul.f32 %v21568_v22, %v11591_v47 }
0x1271   :  { %11932 = vperm.xlu1 %14007, %v11810_v35   ;;  %v21569_v35 = vld [vmem:[#allocation28_spill] sm:$0xff] }
0x1272   :  { %11942 = vperm.xlu0 %14006, %v11812_v41   ;;  %v11854_v29 = vmul.f32 %v21569_v35, %v11711_v48 }
0x1275   :  { %12092 = vperm.xlu1 %14007, %v11842_v20   ;;  %v21571_v20 = vld [vmem:[#allocation81_spill] sm:$0xff] }
0x1276   :  { %12102 = vperm.xlu0 %14006, %v11844_v0   ;;  %v8789_v57 = vsel %vm1353_vm2, %v21571_v20, %v21570_v30  ;;  %v11826_v0 = vmul.f32 %v21572_v43, %v11599_v13 }
0x1277   :  { %v20529_v3 = vpop.permute.xlu0 %11867  ;;  %v11878_v58 = vpop.permute.xlu1 %11877  ;;  %v20573_v39 = vsel %vm1370_vm3, %v8789_v57, %v21570_v30 }
0x1278   :  { %v12181_v36 = vmul.f32 %v20529_v3, %v20548_v40 }
0x1279   :  { %11952 = vperm.xlu1 %14007, %v11814_v62  }
0x127a   :  { %11962 = vperm.xlu0 %14006, %v11816_v38   ;;  %v21574_v38 = vld [vmem:[#allocation52_spill] sm:$0xff]  ;;  %v12251_v3 = vsel %vm2919_vm4, %v12181_v36, 0.0  ;;  %v14205_v36 = vld [vmem:[#allocation8 + $0xb8] sm:$0xff]  }
0x127b   :  { %v11873_v24 = vpop.permute.xlu0 %11872  ;;  %v8790_v50 = vsel %vm1353_vm2, %v21574_v38, %v21573_v61  ;;  %v12252_v35 = vrot.slane %v12251_v3, 4 }
0x127c   :  { %v12182_v42 = vmul.f32 %v11873_v24, %v20548_v40  ;;  %v20594_v5 = vsel %vm1370_vm3, %v8790_v50, %v21573_v61 }
0x127d   :  { %12112 = vperm.xlu1 %14007, %v11846_v49   ;;  %v12183_v49 = vmul.f32 %v11878_v58, %v20548_v40 }
0x127e   :  { %12122 = vperm.xlu0 %14006, %v11848_v8   ;;  %v12258_v12 = vsel %vm2919_vm4, %v12182_v42, 0.0  ;;  %v11858_v8 = vmul.f32 %v21575_v54, %v11727_v55  ;;  %v21586_v54 = vld [vmem:[#allocation58_spill] sm:$0xff] }
0x127f   :  { %v12259_v60 = vrot.slane %v12258_v12, 4  ;;  %v12265_v24 = vsel %vm2919_vm4, %v12183_v49, 0.0  ;;  %v21584_v49 = vld [vmem:[#allocation77_spill] sm:$0xff] }
0x1281   :  { %11972 = vperm.xlu1 %14007, %v11818_v45   ;;  %v12260_v25 = vadd.f32 %v12259_v60, %v12258_v12 }
0x1282   :  { %11982 = vperm.xlu0 %14006, %v11820_v44  }
0x1283   :  { %v12261_v6 = vrot.slane %v12260_v25, 2 }
0x1284   :  { %v11898_v11 = vpop.permute.xlu0 %11897  ;;  %v11888_v28 = vpop.permute.xlu1 %11887 }
0x1285   :  { %12132 = vperm.xlu1 %14007, %v11850_v63   ;;  %v12187_v51 = vmul.f32 %v11898_v11, %v20573_v39  ;;  %v12185_v53 = vmul.f32 %v11888_v28, %v20573_v39  ;;  %v12262_v9 = vadd.f32 %v12261_v6, %v12260_v25  ;;  %v12266_v11 = vrot.slane %v12265_v24, 4  ;;  %v21577_v28 = vld [vmem:[#allocation59_spill] sm:$0xff] }
0x1286   :  { %12142 = vperm.xlu0 %14006, %v11852_v14   ;;  %v8797_v6 = vsel %vm1353_vm2, %v21584_v49, %v21583_v7 }
0x1287   :  { %v12293_v1 = vsel %vm2919_vm4, %v12187_v51, 0.0  ;;  %v12279_v58 = vsel %vm2919_vm4, %v12185_v53, 0.0  ;;  %v12263_v2 = vrot.slane %v12262_v9, 1  ;;  %v12267_v13 = vadd.f32 %v12266_v11, %v12265_v24 }
0x1288   :  { %v11918_v37 = vpop.permute.xlu0 %11917  ;;  %v12294_v14 = vrot.slane %v12293_v1, 4  ;;  %v12253_v51 = vadd.f32 %v12252_v35, %v12251_v3  ;;  %v20648_v11 = vsel %vm1370_vm3, %v8797_v6, %v21583_v7  ;;  %v14208_v35 = vld [vmem:[#allocation8 + $0xe8] sm:$0xff]  }
0x1289   :  { %11992 = vperm.xlu1 %14007, %v11822_v27   ;;  %v12191_v44 = vmul.f32 %v11918_v37, %v20594_v5  ;;  %v12280_v27 = vrot.slane %v12279_v58, 4  ;;  %v21578_v37 = vld [vmem:[#allocation79_spill] sm:$0xff]  ;;  %v12264_v30 = vadd.f32 %v12263_v2, %v12262_v9  ;;  %v21587_v9 = vld [vmem:[#allocation62_spill] sm:$0xff]  ;;  %v21589_v2 = vld [vmem:[#allocation53_spill] sm:$0xff] }
0x128a   :  { %12002 = vperm.xlu0 %14006, %v11824_v23   ;;  %v8792_v22 = vsel %vm1353_vm2, %v21578_v37, %v21577_v28  ;;  %v12295_v20 = vadd.f32 %v12294_v14, %v12293_v1  ;;  %v21590_v14 = vld [vmem:[#allocation83_spill] sm:$0xff] }
0x128b   :  { %v12321_v47 = vsel %vm2919_vm4, %v12191_v44, 0.0  ;;  %v20619_v25 = vsel %vm1370_vm3, %v8792_v22, %v21577_v28  ;;  %v12281_v43 = vadd.f32 %v12280_v27, %v12279_v58  ;;  %v21588_v44 = vld [vmem:[#allocation63_spill] sm:$0xff]  ;;  %v14207_v27 = vld [vmem:[#allocation8 + $0xb0] sm:$0xff]   ;;  %v12254_v28 = vrot.slane %v12253_v51, 2 }
0x128c   :  { %v11958_v41 = vpop.permute.xlu1 %11957  ;;  %v11908_v52 = vpop.permute.xlu0 %11907  ;;  %21579 = vst [vmem:[#allocation50_spill] sm:$0xff] %v20619_v25 }
0x128d   :  { %12152 = vperm.xlu1 %14007, %v11854_v29   ;;  %v12189_v23 = vmul.f32 %v11908_v52, %v20594_v5  ;;  %v12322_v29 = vrot.slane %v12321_v47, 4  ;;  %v12199_v52 = vmul.f32 %v11958_v41, %v20619_v25  ;;  %v12296_v41 = vrot.slane %v12295_v20, 2 }
0x128e   :  { %v12282_v1 = vrot.slane %v12281_v43, 2 }
0x128f   :  { %v12307_v38 = vsel %vm2919_vm4, %v12189_v23, 0.0  ;;  %v12323_v53 = vadd.f32 %v12322_v29, %v12321_v47  ;;  %v8800_v47 = vsel %vm1353_vm2, %v21590_v14, %v21589_v2  ;;  %v14211_v14 = vld [vmem:[#allocation8 + $0xa0] sm:$0xff]  }
0x1290   :  { %v11893_v62 = vpop.permute.xlu1 %11892  ;;  %v20575_v19 = vpop.permute.xlu0 %11947  ;;  %v12308_v58 = vrot.slane %v12307_v38, 4  ;;  %v12283_v7 = vadd.f32 %v12282_v1, %v12281_v43 }
0x1291   :  { %v12186_v4 = vmul.f32 %v11893_v62, %v20573_v39  ;;  %12012 = vperm.xlu1 %14007, %v11826_v0   ;;  %v21580_v62 = vld [vmem:[#allocation51_spill] sm:$0xff]  ;;  %v12324_v37 = vrot.slane %v12323_v53, 2  ;;  %v12197_v22 = vmul.f32 %v20575_v19, %v20619_v25 }
0x1292   :  { %v12309_v49 = vadd.f32 %v12308_v58, %v12307_v38 }
0x1293   :  { %v12286_v10 = vsel %vm2919_vm4, %v12186_v4, 0.0  ;;  %v21581_v4 = vld [vmem:[#allocation57_spill] sm:$0xff]  ;;  %v12363_v43 = vsel %vm2919_vm4, %v12197_v22, 0.0 }
0x1294   :  { %v20587_v31 = vpop.permute.xlu1 %12037  ;;  %v20589_v45 = vpop.permute.xlu0 %11927  ;;  %v12287_v15 = vrot.slane %v12286_v10, 4  ;;  %v8796_v61 = vsel %vm1353_vm2, %v21581_v4, %v21580_v62  ;;  %v21591_v4 = vld [vmem:[#allocation56_spill] sm:$0xff] }
0x1295   :  { %12172 = vperm.xlu1 %14007, %v11858_v8   ;;  %v20639_v24 = vsel %vm1370_vm3, %v8796_v61, %v21580_v62  ;;  %v21592_v61 = vld [vmem:[#allocation61_spill] sm:$0xff] }
0x1296   :  { %v12288_v18 = vadd.f32 %v12287_v15, %v12286_v10  ;;  %v21585_v10 = vld [vmem:[#allocation68_spill] sm:$0xff]  ;;  %v14204_v15 = vld [vmem:[#allocation8 + $0xf8] sm:$0xff]   ;;  %v12215_v23 = vmul.f32 %v20587_v31, %v20639_v24  ;;  %v20672_v31 = vsel %vm1370_vm3, %v8800_v47, %v21589_v2 }
0x1297   :  { %v8791_v8 = vsel %vm1353_vm2, %v21586_v54, %v21585_v10  ;;  %13944 = vmatprep.subr.bf16.mxu0 %v14204_v15  ;;  %v12255_v54 = vadd.f32 %v12254_v28, %v12253_v51  ;;  %v14210_v15 = vld [vmem:[#allocation8 + $0xe0] sm:$0xff]  }
0x1298   :  { %v20602_v63 = vpop.permute.xlu1 %12027  ;;  %v20604_v34 = vpop.permute.xlu0 %11967  ;;  %v12289_v42 = vrot.slane %v12288_v18, 2  ;;  %v20652_v3 = vsel %vm1370_vm3, %v8791_v8, %v21585_v10  ;;  %13945 = vmatpush3.bf16.msra.mxu0 %v14205_v36  ;;  %v12325_v8 = vadd.f32 %v12324_v37, %v12323_v53  ;;  %v12489_v38 = vsel %vm2919_vm4, %v12215_v23, 0.0 }
0x1299   :  { %12162 = vperm.xlu1 %14007, %v11856_v33   ;;  %v12268_v33 = vrot.slane %v12267_v13, 2  ;;  %13946 = vmatprep.subr.bf16.mxu0 %v14206_v26  ;;  %v12213_v10 = vmul.f32 %v20602_v63, %v20639_v24  ;;  %v12490_v1 = vrot.slane %v12489_v38, 4  ;;  %v12256_v47 = vrot.slane %v12255_v54, 1 }
0x129a   :  { %v12290_v16 = vadd.f32 %v12289_v42, %v12288_v18  ;;  %v8798_v18 = vsel %vm1353_vm2, %v21588_v44, %v21587_v9  ;;  %v12310_v44 = vrot.slane %v12309_v49, 2  ;;  %v12193_v28 = vmul.f32 %v20589_v45, %v20652_v3  ;;  %v14213_v45 = vld [vmem:[#allocation8 + $0x98] sm:$0xff]  }
0x129b   :  { %v20664_v29 = vsel %vm1370_vm3, %v8798_v18, %v21587_v9  ;;  %v12364_v18 = vrot.slane %v12363_v43, 4  ;;  %v12475_v58 = vsel %vm2919_vm4, %v12213_v10, 0.0 }
0x129c   :  { %v20609_v48 = vpop.permute.xlu1 %11937  ;;  %v20611_v12 = vpop.permute.xlu0 %11987  ;;  %v12291_v60 = vrot.slane %v12290_v16, 1  ;;  %13947 = vmatpush3.bf16.msra.mxu0 %v14207_v27  ;;  %v12326_v27 = vrot.slane %v12325_v8, 1  ;;  %v12311_v10 = vadd.f32 %v12310_v44, %v12309_v49 }
0x129d   :  { %13948 = vmatprep.subr.bf16.mxu0 %v14208_v35 }
0x129e   :  { %v12292_v57 = vadd.f32 %v12291_v60, %v12290_v16  ;;  %v12377_v16 = vsel %vm2919_vm4, %v12199_v52, 0.0  ;;  %v8799_v52 = vsel %vm1353_vm2, %v21592_v61, %v21591_v4  ;;  %v12476_v61 = vrot.slane %v12475_v58, 4 }
0x129f   :  { %v12378_v19 = vrot.slane %v12377_v16, 4  ;;  %v20682_v36 = vsel %vm1370_vm3, %v8799_v52, %v21591_v4 }
0x12a0   :  { %v20621_v0 = vpop.permute.xlu1 %11977  ;;  %v12048_v55 = vpop.permute.xlu0 %12047  ;;  %v20629_v50 = vsel %vm3498_vm5, %v12292_v57, %v12264_v30  ;;  %v12269_v30 = vadd.f32 %v12268_v33, %v12267_v13  ;;  %v12297_v57 = vadd.f32 %v12296_v41, %v12295_v20  ;;  %v12284_v41 = vrot.slane %v12283_v7, 1 }
0x12a1   :  { %21582 = vst [vmem:[#allocation90_spill] sm:$0xff] %v20629_v50  ;;  %v12217_v62 = vmul.f32 %v12048_v55, %v20648_v11  ;;  %v14209_v55 = vld [vmem:[#allocation8 + $0xa8] sm:$0xff]   ;;  %v12379_v9 = vadd.f32 %v12378_v19, %v12377_v16  ;;  %v14212_v16 = vld [vmem:[#allocation8 + $0xd8] sm:$0xff]  }
0x12a2   :  { %v12270_v26 = vrot.slane %v12269_v30, 1  ;;  %v12298_v63 = vrot.slane %v12297_v57, 1  ;;  %13949 = vmatpush3.bf16.msra.mxu0 %v14209_v55 }
0x12a3   :  { %v12503_v33 = vsel %vm2919_vm4, %v12217_v62, 0.0  ;;  %13950 = vmatprep.subr.bf16.mxu0 %v14210_v15  ;;  %v12285_v62 = vadd.f32 %v12284_v41, %v12283_v7  ;;  %v12380_v4 = vrot.slane %v12379_v9, 2  ;;  %v12327_v15 = vadd.f32 %v12326_v27, %v12325_v8 }
0x12a4   :  { %v20644_v42 = vpop.permute.xlu1 %11997  ;;  %v12068_v60 = vpop.permute.xlu0 %12067  ;;  %v12504_v37 = vrot.slane %v12503_v33, 4  ;;  %v12271_v22 = vadd.f32 %v12270_v26, %v12269_v30  ;;  %v12299_v23 = vadd.f32 %v12298_v63, %v12297_v57  ;;  %v12335_v30 = vsel %vm2919_vm4, %v12193_v28, 0.0  ;;  %v14214_v63 = vld [vmem:[#allocation8 + $0xd0] sm:$0xff]  }
0x12a5   :  { %v12221_v13 = vmul.f32 %v12068_v60, %v20664_v29  ;;  %v12257_v7 = vadd.f32 %v12256_v47, %v12255_v54  ;;  %v20695_v49 = vadd.f32 %v12380_v4, %v12379_v9  ;;  %v12312_v8 = vrot.slane %v12311_v10, 1  ;;  %v14215_v54 = vld [vmem:[#allocation8 + $0x90] sm:$0xff]  }
0x12a6   :  { %13951 = vmatpush3.bf16.msra.mxu0 %v14211_v14  ;;  %v12505_v57 = vadd.f32 %v12504_v37, %v12503_v33  ;;  %v12808_v41 = vsel %vm3498_vm5, %v12299_v23, %v12271_v22  ;;  %v12336_v33 = vrot.slane %v12335_v30, 4  ;;  %v12195_v28 = vmul.f32 %v20609_v48, %v20652_v3 }
0x12a7   :  { %v12531_v2 = vsel %vm2919_vm4, %v12221_v13, 0.0  ;;  %v12365_v13 = vadd.f32 %v12364_v18, %v12363_v43  ;;  %13952 = vmatprep.subr.bf16.mxu0 %v14212_v16  ;;  %v12477_v43 = vadd.f32 %v12476_v61, %v12475_v58  ;;  %v20702_v47 = vsel %vm3498_vm5, %v12285_v62, %v12257_v7 }
0x12a8   :  { %v12058_v6 = vpop.permute.xlu1 %12057  ;;  %v12532_v52 = vrot.slane %v12531_v2, 4  ;;  %v12506_v9 = vrot.slane %v12505_v57, 2  ;;  %v20714_v62 = vadd.f32 %v12312_v8, %v12311_v10  ;;  %v12349_v10 = vsel %vm2919_vm4, %v12195_v28, 0.0 }
0x12a9   :  { %v12219_v20 = vmul.f32 %v12058_v6, %v20648_v11  ;;  %v12108_v19 = vpop.permute.xlu0 %12107  ;;  %v12478_v23 = vrot.slane %v12477_v43, 2 }
0x12aa   :  { %v12229_v50 = vmul.f32 %v12108_v19, %v20672_v31  ;;  %13953 = vmatpush3.bf16.msra.mxu0 %v14213_v45 }
0x12ab   :  { %v12517_v51 = vsel %vm2919_vm4, %v12219_v20, 0.0  ;;  %v12491_v20 = vadd.f32 %v12490_v1, %v12489_v38  ;;  %v12533_v38 = vadd.f32 %v12532_v52, %v12531_v2  ;;  %v12366_v1 = vrot.slane %v12365_v13, 2  ;;  %13954 = vmatprep.subr.bf16.mxu0 %v14214_v63 }
0x12ac   :  { %v12078_v53 = vpop.permute.xlu1 %12077  ;;  %v12518_v60 = vrot.slane %v12517_v51, 4  ;;  %v12201_v2 = vmul.f32 %v20604_v34, %v20295_v56  ;;  %v12587_v16 = vsel %vm2919_vm4, %v12229_v50, 0.0  ;;  %v20718_v52 = vadd.f32 %v12336_v33, %v12335_v30 }
0x12ad   :  { %v12223_v35 = vmul.f32 %v12078_v53, %v20664_v29  ;;  %v12492_v14 = vrot.slane %v12491_v20, 2  ;;  %v20716_v4 = vadd.f32 %v12366_v1, %v12365_v13  ;;  %v12588_v48 = vrot.slane %v12587_v16, 4 }
0x12ae   :  { %v12519_v53 = vadd.f32 %v12518_v60, %v12517_v51  ;;  %v20705_v51 = vsel %vm3500_vm7, %v12327_v15, %v12808_v41  ;;  %v12534_v60 = vrot.slane %v12533_v38, 2  ;;  %13955 = vmatpush3.bf16.msra.mxu0 %v14215_v54  ;;  %v20723_v45 = vsel %vm2919_vm4, %v12201_v2, 0.0 }
0x12af   :  { %v12545_v55 = vsel %vm2919_vm4, %v12223_v35, 0.0  ;;  %v12493_v61 = vadd.f32 %v12492_v14, %v12491_v20  ;;  %v12479_v20 = vadd.f32 %v12478_v23, %v12477_v43  ;;  %v12589_v33 = vadd.f32 %v12588_v48, %v12587_v16 }
0x12b0   :  { %v12118_v6 = vpop.permute.xlu1 %12117  ;;  %v12546_v26 = vrot.slane %v12545_v55, 4  ;;  %v12520_v37 = vrot.slane %v12519_v53, 2  ;;  %v12535_v30 = vadd.f32 %v12534_v60, %v12533_v38 }
0x12b1   :  { %v20699_v27 = vpop.permute.xlu0 %12007  ;;  %v12231_v58 = vmul.f32 %v12118_v6, %v20672_v31  ;;  %v12507_v6 = vadd.f32 %v12506_v9, %v12505_v57  ;;  %v12205_v57 = vmul.f32 %v20611_v12, %v20304_v59  ;;  %v12494_v1 = vrot.slane %v12493_v61, 1 }
0x12b2   :  { %v12547_v44 = vadd.f32 %v12546_v26, %v12545_v55  ;;  %v12521_v15 = vadd.f32 %v12520_v37, %v12519_v53  ;;  %v12350_v9 = vrot.slane %v12349_v10, 4  ;;  %v12203_v53 = vmul.f32 %v20621_v0, %v20295_v56 }
0x12b3   :  { %v12601_v55 = vsel %vm2919_vm4, %v12231_v58, 0.0  ;;  %v12508_v14 = vrot.slane %v12507_v6, 1  ;;  %v12536_v58 = vrot.slane %v12535_v30, 1  ;;  %v12338_v12 = vrot.slane %v20718_v52, 2 }
0x12b4   :  { %v20697_v18 = vpop.permute.xlu1 %12017  ;;  %v12548_v35 = vrot.slane %v12547_v44, 2  ;;  %v12602_v7 = vrot.slane %v12601_v55, 4  ;;  %v12522_v43 = vrot.slane %v12521_v15, 1  ;;  %v20735_v37 = vsel %vm2919_vm4, %v12205_v57, 0.0 }
0x12b5   :  { %v12509_v16 = vadd.f32 %v12508_v14, %v12507_v6  ;;  %v20737_v48 = vadd.f32 %v12350_v9, %v12349_v10  ;;  %v12405_v0 = vsel %vm2919_vm4, %v12203_v53, 0.0  ;;  %v12207_v10 = vmul.f32 %v20644_v42, %v20304_v59 }
0x12b6   :  { %v12549_v26 = vadd.f32 %v12548_v35, %v12547_v44  ;;  %v12480_v44 = vrot.slane %v12479_v20, 1  ;;  %v12603_v23 = vadd.f32 %v12602_v7, %v12601_v55  ;;  %v12495_v35 = vadd.f32 %v12494_v1, %v12493_v61 }
0x12b7   :  { %v12211_v42 = vmul.f32 %v20697_v18, %v20321_v32 }
0x12b8   :  { %v12550_v2 = vrot.slane %v12549_v26, 1  ;;  %v12604_v57 = vrot.slane %v12603_v23, 2 }
0x12b9   :  { %v12098_v19 = vpop.permute.xlu1 %12097  ;;  %v12088_v34 = vpop.permute.xlu0 %12087 }
0x12ba   :  { %v12227_v50 = vmul.f32 %v12098_v19, %v20682_v36  ;;  %v12225_v13 = vmul.f32 %v12088_v34, %v20682_v36  ;;  %v12590_v19 = vrot.slane %v12589_v33, 2 }
0x12bc   :  { %v12573_v63 = vsel %vm2919_vm4, %v12227_v50, 0.0  ;;  %v12559_v8 = vsel %vm2919_vm4, %v12225_v13, 0.0  ;;  %v12523_v50 = vadd.f32 %v12522_v43, %v12521_v15  ;;  %v12591_v7 = vadd.f32 %v12590_v19, %v12589_v33 }
0x12bd   :  { %v12574_v41 = vrot.slane %v12573_v63, 4  ;;  %v12560_v54 = vrot.slane %v12559_v8, 4  ;;  %v12605_v43 = vadd.f32 %v12604_v57, %v12603_v23  ;;  %v12433_v23 = vsel %vm2919_vm4, %v12207_v10, 0.0 }
0x12be   :  { %v12406_v19 = vrot.slane %v12405_v0, 4  ;;  %v12209_v10 = vmul.f32 %v20699_v27, %v20321_v32 }
0x12bf   :  { %v12575_v38 = vadd.f32 %v12574_v41, %v12573_v63  ;;  %v12561_v28 = vadd.f32 %v12560_v54, %v12559_v8  ;;  %v12481_v63 = vadd.f32 %v12480_v44, %v12479_v20  ;;  %v12537_v41 = vadd.f32 %v12536_v58, %v12535_v30 }
0x12c0   :  { %v12551_v8 = vadd.f32 %v12550_v2, %v12549_v26  ;;  %v12815_v20 = vsel %vm3498_vm5, %v12523_v50, %v12495_v35  ;;  %v12392_v35 = vrot.slane %v20723_v45, 4  ;;  %v12447_v27 = vsel %vm2919_vm4, %v12209_v10, 0.0 }
0x12c1   :  { %v12576_v60 = vrot.slane %v12575_v38, 2  ;;  %v12562_v34 = vrot.slane %v12561_v28, 2  ;;  %v12747_v6 = vsel %vm3498_vm5, %v12509_v16, %v12481_v63  ;;  %v12420_v16 = vrot.slane %v20735_v37, 4 }
0x12c2   :  { %v12816_v14 = vsel %vm3500_vm7, %v12551_v8, %v12815_v20  ;;  %v12592_v63 = vrot.slane %v12591_v7, 1 }
0x12c3   :  { %v12577_v13 = vadd.f32 %v12576_v60, %v12575_v38  ;;  %v12563_v54 = vadd.f32 %v12562_v34, %v12561_v28  ;;  %v12339_v60 = vadd.f32 %v12338_v12, %v20718_v52  ;;  %v12434_v52 = vrot.slane %v12433_v23, 4 }
0x12c4   :  { %v12138_v22 = vpop.permute.xlu1 %12137  ;;  %v12128_v56 = vpop.permute.xlu0 %12127  ;;  %v12461_v12 = vsel %vm2919_vm4, %v12211_v42, 0.0  ;;  %v12421_v20 = vadd.f32 %v12420_v16, %v20735_v37 }
0x12c5   :  { %v12578_v25 = vrot.slane %v12577_v13, 1  ;;  %v12235_v55 = vmul.f32 %v12138_v22, %v20318_v46  ;;  %v12233_v61 = vmul.f32 %v12128_v56, %v20318_v46  ;;  %v12564_v15 = vrot.slane %v12563_v54, 1 }
0x12c6   :  { %v12748_v56 = vsel %vm3500_vm7, %v12537_v41, %v12747_v6  ;;  %v12606_v41 = vrot.slane %v12605_v43, 1  ;;  %v12393_v6 = vadd.f32 %v12392_v35, %v20723_v45 }
0x12c7   :  { %v12579_v30 = vadd.f32 %v12578_v25, %v12577_v13  ;;  %v12629_v26 = vsel %vm2919_vm4, %v12235_v55, 0.0  ;;  %v12615_v1 = vsel %vm2919_vm4, %v12233_v61, 0.0  ;;  %v12565_v9 = vadd.f32 %v12564_v15, %v12563_v54 }
0x12c8   :  { %v12630_v22 = vrot.slane %v12629_v26, 4  ;;  %v12616_v53 = vrot.slane %v12615_v1, 4  ;;  %v12352_v13 = vrot.slane %v20737_v48, 2  ;;  %v12340_v61 = vrot.slane %v12339_v60, 1 }
0x12c9   :  { %v12817_v33 = vsel %vm3502_vm6, %v12579_v30, %v12816_v14  ;;  %v12158_v38 = vpop.permute.xlu1 %12157  ;;  %v12148_v44 = vpop.permute.xlu0 %12147  ;;  %v12749_v25 = vsel %vm3502_vm6, %v12565_v9, %v12748_v56  ;;  %v12407_v30 = vadd.f32 %v12406_v19, %v12405_v0  ;;  %v12593_v14 = vadd.f32 %v12592_v63, %v12591_v7 }
0x12ca   :  { %v12631_v58 = vadd.f32 %v12630_v22, %v12629_v26  ;;  %v12617_v2 = vadd.f32 %v12616_v53, %v12615_v1  ;;  %v12239_v28 = vmul.f32 %v12158_v38, %v20328_v21  ;;  %v12237_v8 = vmul.f32 %v12148_v44, %v20328_v21 }
0x12cb   :  { %v12607_v9 = vadd.f32 %v12606_v41, %v12605_v43  ;;  %v12462_v22 = vrot.slane %v12461_v12, 4  ;;  %v12353_v42 = vadd.f32 %v12352_v13, %v20737_v48  ;;  %v12435_v38 = vadd.f32 %v12434_v52, %v12433_v23 }
0x12cc   :  { %v12632_v18 = vrot.slane %v12631_v58, 2  ;;  %v12618_v34 = vrot.slane %v12617_v2, 2  ;;  %v12657_v50 = vsel %vm2919_vm4, %v12239_v28, 0.0  ;;  %v12643_v53 = vsel %vm2919_vm4, %v12237_v8, 0.0 }
0x12cd   :  { %v20762_v54 = vpop.permute.xlu0 %12032  ;;  %v12658_v15 = vrot.slane %v12657_v50, 4  ;;  %v12818_v37 = vsel %vm6033_vm9, %v12607_v9, %v12817_v33  ;;  %v12750_v0 = vsel %vm6033_vm9, %v12593_v14, %v12749_v25  ;;  %v12644_v7 = vrot.slane %v12643_v53, 4 }
0x12ce   :  { %v12633_v57 = vadd.f32 %v12632_v18, %v12631_v58  ;;  %v12619_v55 = vadd.f32 %v12618_v34, %v12617_v2  ;;  %v12394_v2 = vrot.slane %v12393_v6, 2  ;;  %v12422_v48 = vrot.slane %v12421_v20, 2 }
0x12cf   :  { %v12659_v58 = vadd.f32 %v12658_v15, %v12657_v50  ;;  %v12408_v16 = vrot.slane %v12407_v30, 2  ;;  %v12463_v23 = vadd.f32 %v12462_v22, %v12461_v12  ;;  %v21593_v33 = vrot.slane %v20695_v49, 1 }
0x12d0   :  { %v12634_v26 = vrot.slane %v12633_v57, 1  ;;  %v12620_v1 = vrot.slane %v12619_v55, 1  ;;  %v12741_v34 = vsel %vm3500_vm7, %v20714_v62, %v20702_v47  ;;  %v12368_v50 = vrot.slane %v20716_v4, 1 }
0x12d1   :  { %v20770_v56 = vpop.permute.xlu0 %11862  ;;  %v20788_v25 = vadd.f32 %v21593_v33, %v20695_v49  ;;  %v12448_v13 = vrot.slane %v12447_v27, 4  ;;  %v12354_v63 = vrot.slane %v12353_v42, 1  ;;  %v12436_v41 = vrot.slane %v12435_v38, 2 }
0x12d2   :  { %v12635_v45 = vadd.f32 %v12634_v26, %v12633_v57  ;;  %v12621_v44 = vadd.f32 %v12620_v1, %v12619_v55  ;;  %v12660_v8 = vrot.slane %v12659_v58, 2  ;;  %v12341_v12 = vadd.f32 %v12340_v61, %v12339_v60 }
0x12d3   :  { %v12395_v57 = vadd.f32 %v12394_v2, %v12393_v6  ;;  %v12645_v55 = vadd.f32 %v12644_v7, %v12643_v53  ;;  %v12423_v26 = vadd.f32 %v12422_v48, %v12421_v20  ;;  %v12409_v49 = vadd.f32 %v12408_v16, %v12407_v30 }
0x12d4   :  { %v12178_v43 = vpop.permute.xlu1 %12177  ;;  %v20777_v28 = vsel %vm6035_vm10, %v12635_v45, %v12818_v37  ;;  %v20780_v35 = vsel %vm6035_vm10, %v12621_v44, %v12750_v0  ;;  %v12464_v1 = vrot.slane %v12463_v23, 2  ;;  %v20797_v47 = vadd.f32 %v12368_v50, %v20716_v4  ;;  %v14216_v50 = vld [vmem:[#allocation8 + $0xc8] sm:$0xff]  }
0x12d5   :  { %v12243_v19 = vmul.f32 %v12178_v43, %v20335_v17  ;;  %v20783_v18 = vpop.permute.xlu0 %11912  ;;  %v12449_v62 = vadd.f32 %v12448_v13, %v12447_v27  ;;  %v12355_v44 = vadd.f32 %v12354_v63, %v12353_v42  ;;  %v12437_v37 = vadd.f32 %v12436_v41, %v12435_v38  ;;  %v14217_v13 = vld [vmem:[#allocation8 + $0x88] sm:$0xff]   ;;  %13956 = vmatprep.subr.bf16.mxu0 %v14216_v50 }
0x12d6   :  { %v12661_v60 = vadd.f32 %v12660_v8, %v12659_v58  ;;  %v12742_v6 = vsel %vm3502_vm6, %v12341_v12, %v12741_v34  ;;  %v12646_v20 = vrot.slane %v12645_v55, 2  ;;  %v12396_v2 = vrot.slane %v12395_v57, 1  ;;  %13957 = vmatpush3.bf16.msra.mxu0 %v14217_v13 }
0x12d7   :  { %v12685_v52 = vsel %vm2919_vm4, %v12243_v19, 0.0  ;;  %v12424_v7 = vrot.slane %v12423_v26, 1  ;;  %v12410_v43 = vrot.slane %v12409_v49, 1  ;;  %v12465_v4 = vadd.f32 %v12464_v1, %v12463_v23 }
0x12d8   :  { %v12686_v10 = vrot.slane %v12685_v52, 4  ;;  %v12168_v15 = vpop.permute.xlu1 %12167  ;;  %v12450_v27 = vrot.slane %v12449_v62, 2  ;;  %v12810_v38 = vsel %vm3502_vm6, %v12355_v44, %v20705_v51  ;;  %v12438_v58 = vrot.slane %v12437_v37, 1 }
0x12d9   :  { %v12241_v14 = vmul.f32 %v12168_v15, %v20335_v17  ;;  %v12043_v9 = vpop.permute.xlu0 %12042  ;;  %v12662_v33 = vrot.slane %v12661_v60, 1  ;;  %v12647_v63 = vadd.f32 %v12646_v20, %v12645_v55  ;;  %v12214_v23 = vmul.f32 %v20762_v54, %v20639_v24 }
0x12da   :  { %v12687_v22 = vadd.f32 %v12686_v10, %v12685_v52  ;;  %v12216_v45 = vmul.f32 %v12043_v9, %v20648_v11  ;;  %v12397_v12 = vadd.f32 %v12396_v2, %v12395_v57  ;;  %v12425_v10 = vadd.f32 %v12424_v7, %v12423_v26 }
0x12db   :  { %v12671_v61 = vsel %vm2919_vm4, %v12241_v14, 0.0  ;;  %v12466_v15 = vrot.slane %v12465_v4, 1  ;;  %v12411_v51 = vadd.f32 %v12410_v43, %v12409_v49  ;;  %v12451_v9 = vadd.f32 %v12450_v27, %v12449_v62 }
0x12dc   :  { %v12688_v30 = vrot.slane %v12687_v22, 2  ;;  %v12672_v53 = vrot.slane %v12671_v61, 4  ;;  %v12053_v0 = vpop.permute.xlu1 %12052  ;;  %v12496_v42 = vsel %vm2919_vm4, %v12216_v45, 0.0  ;;  %v12439_v55 = vadd.f32 %v12438_v58, %v12437_v37 }
0x12dd   :  { %v20802_v48 = vpop.permute.xlu0 %11902  ;;  %v12218_v34 = vmul.f32 %v12053_v0, %v20648_v11  ;;  %v12497_v1 = vrot.slane %v12496_v42, 4  ;;  %v12663_v45 = vadd.f32 %v12662_v33, %v12661_v60  ;;  %v12811_v44 = vsel %vm6033_vm9, %v20788_v25, %v12810_v38 }
0x12de   :  { %v12689_v16 = vadd.f32 %v12688_v30, %v12687_v22  ;;  %v12673_v19 = vadd.f32 %v12672_v53, %v12671_v61  ;;  %v12648_v61 = vrot.slane %v12647_v63, 1  ;;  %v12482_v57 = vsel %vm2919_vm4, %v12214_v23, 0.0 }
0x12df   :  { %v12510_v54 = vsel %vm2919_vm4, %v12218_v34, 0.0  ;;  %v12467_v49 = vadd.f32 %v12466_v15, %v12465_v4  ;;  %v12498_v53 = vadd.f32 %v12497_v1, %v12496_v42  ;;  %v12452_v37 = vrot.slane %v12451_v9, 1  ;;  %v14219_v42 = vld [vmem:[#allocation8 + $0x80] sm:$0xff]  }
0x12e0   :  { %v12690_v41 = vrot.slane %v12689_v16, 1  ;;  %v12674_v8 = vrot.slane %v12673_v19, 2  ;;  %v20810_v52 = vpop.permute.xlu1 %11882  ;;  %v12511_v60 = vrot.slane %v12510_v54, 4  ;;  %v12812_v43 = vsel %vm6035_vm10, %v12411_v51, %v12811_v44 }
0x12e1   :  { %v12063_v14 = vpop.permute.xlu0 %12062  ;;  %v12483_v25 = vrot.slane %v12482_v57, 4  ;;  %v12813_v27 = vsel %vm6037_vm11, %v12439_v55, %v12812_v43  ;;  %v12743_v4 = vsel %vm6033_vm9, %v20797_v47, %v12742_v6  ;;  %v12649_v38 = vadd.f32 %v12648_v61, %v12647_v63 }
0x12e2   :  { %v12675_v22 = vadd.f32 %v12674_v8, %v12673_v19  ;;  %v12220_v11 = vmul.f32 %v12063_v14, %v20664_v29  ;;  %v12691_v26 = vadd.f32 %v12690_v41, %v12689_v16  ;;  %v12820_v16 = vsel %vm6037_vm11, %v12663_v45, %v20777_v28  ;;  %v14218_v19 = vld [vmem:[#allocation8 + $0xc0] sm:$0xff]  }
0x12e3   :  { %v12499_v13 = vrot.slane %v12498_v53, 2  ;;  %v12814_v41 = vsel %vm6039_vm12, %v12467_v49, %v12813_v27  ;;  %13958 = vmatprep.subr.bf16.mxu0 %v14218_v19  ;;  %v12453_v28 = vadd.f32 %v12452_v37, %v12451_v9  ;;  %v12512_v15 = vadd.f32 %v12511_v60, %v12510_v54 }
0x12e4   :  { %v12524_v20 = vsel %vm2919_vm4, %v12220_v11, 0.0  ;;  %v12023_v30 = vpop.permute.xlu1 %12022  ;;  %v12676_v62 = vrot.slane %v12675_v22, 1  ;;  %v12821_v34 = vsel %vm6039_vm12, %v12691_v26, %v12820_v16  ;;  %v12744_v47 = vsel %vm6035_vm10, %v12397_v12, %v12743_v4  ;;  %13959 = vmatpush3.bf16.msra.mxu0 %v14219_v42 }
0x12e5   :  { %v12525_v0 = vrot.slane %v12524_v20, 4  ;;  %v20818_v2 = vpop.permute.xlu0 %11922  ;;  %v12212_v7 = vmul.f32 %v12023_v30, %v20639_v24  ;;  %v14018_v1 = vpack.i.bf16 %v12821_v34, %v12814_v41  ;;  %v12745_v14 = vsel %vm6037_vm11, %v12425_v10, %v12744_v47 }
0x12e6   :  { %v12677_v50 = vadd.f32 %v12676_v62, %v12675_v22  ;;  %v12484_v51 = vadd.f32 %v12483_v25, %v12482_v57  ;;  %v12752_v55 = vsel %vm6037_vm11, %v12649_v38, %v20780_v35  ;;  %v12500_v45 = vadd.f32 %v12499_v13, %v12498_v53 }
0x12e7   :  { %v12526_v58 = vadd.f32 %v12525_v0, %v12524_v20  ;;  %v12468_v33 = vsel %vm2919_vm4, %v12212_v7, 0.0  ;;  %14019 = vrot.lane.b32.xlu0 %v14018_v1, %s14860_s11  ;;  %v12513_v10 = vrot.slane %v12512_v15, 2  ;;  %v12746_v26 = vsel %vm6039_vm12, %v12453_v28, %v12745_v14 }
0x12e8   :  { %v12073_v24 = vpop.permute.xlu1 %12072  ;;  %v12469_v23 = vrot.slane %v12468_v33, 4  ;;  %v12753_v44 = vsel %vm6039_vm12, %v12677_v50, %v12752_v55  ;;  %v12485_v53 = vrot.slane %v12484_v51, 2  ;;  %v12501_v37 = vrot.slane %v12500_v45, 1 }
0x12e9   :  { %v12083_v8 = vpop.permute.xlu0 %12082  ;;  %v12222_v63 = vmul.f32 %v12073_v24, %v20664_v29  ;;  %v12527_v11 = vrot.slane %v12526_v58, 2  ;;  %v14023_v49 = vpack.i.bf16 %v12753_v44, %v12746_v26  ;;  %v12514_v25 = vadd.f32 %v12513_v10, %v12512_v15 }
0x12ea   :  { %v12470_v6 = vadd.f32 %v12469_v23, %v12468_v33  ;;  %v12224_v22 = vmul.f32 %v12083_v8, %v20682_v36  ;;  %v12486_v34 = vadd.f32 %v12485_v53, %v12484_v51  ;;  %v12502_v24 = vadd.f32 %v12501_v37, %v12500_v45 }
0x12eb   :  { %v12538_v12 = vsel %vm2919_vm4, %v12222_v63, 0.0  ;;  %v12528_v35 = vadd.f32 %v12527_v11, %v12526_v58  ;;  %14024 = vrot.lane.b32.xlu1 %v14023_v49, %s14860_s11  ;;  %v12515_v41 = vrot.slane %v12514_v25, 1  ;;  %s14826_s11 = scalar_lea.vmem %s13670_s30, 512 }
0x12ec   :  { %v20837_v9 = vpop.permute.xlu1 %11932  ;;  %v12471_v54 = vrot.slane %v12470_v6, 2  ;;  %v12539_v61 = vrot.slane %v12538_v12, 4  ;;  %v12552_v57 = vsel %vm2919_vm4, %v12224_v22, 0.0  ;;  %v12487_v63 = vrot.slane %v12486_v34, 1  ;;  %p14827_p7 = scmp.ne.s32.totalorder %s13670_s30, %s14826_s11  ;;  %p14832_p9 = scmp.lt.s32.totalorder %s14826_s11, %s14826_s11 }
0x12ed   :  { %v20841_v29 = vpop.permute.xlu0 %11942  ;;  %v12553_v30 = vrot.slane %v12552_v57, 4  ;;  %v12529_v42 = vrot.slane %v12528_v35, 1 }
0x12ee   :  { %v12472_v20 = vadd.f32 %v12471_v54, %v12470_v6  ;;  %v12540_v62 = vadd.f32 %v12539_v61, %v12538_v12  ;;  %v12516_v54 = vadd.f32 %v12515_v41, %v12514_v25  ;;  %p14833_p10 = por %p14832_p9, %p14831_p8 }
0x12ef   :  { %v12554_v7 = vadd.f32 %v12553_v30, %v12552_v57  ;;  %v12530_v1 = vadd.f32 %v12529_v42, %v12528_v35 }
0x12f0   :  { %v12093_v0 = vpop.permute.xlu1 %12092  ;;  %v12473_v60 = vrot.slane %v12472_v20, 1  ;;  %v12541_v27 = vrot.slane %v12540_v62, 2  ;;  %p14834_p11 = pnand %p14833_p10, %p14827_p7 }
0x12f1   :  { %v12103_v43 = vpop.permute.xlu0 %12102  ;;  %v12226_v16 = vmul.f32 %v12093_v0, %v20682_v36  ;;  %v12555_v19 = vrot.slane %v12554_v7, 2 }
0x12f2   :  { %v12474_v4 = vadd.f32 %v12473_v60, %v12472_v20  ;;  %v12542_v38 = vadd.f32 %v12541_v27, %v12540_v62  ;;  %v12228_v36 = vmul.f32 %v12103_v43, %v20672_v31  ;;  %v12488_v20 = vadd.f32 %v12487_v63, %v12486_v34 }
0x12f3   :  { %v12566_v33 = vsel %vm2919_vm4, %v12226_v16, 0.0  ;;  %v12556_v50 = vadd.f32 %v12555_v19, %v12554_v7 }
0x12f4   :  { %v20848_v58 = vpop.permute.xlu1 %11952  ;;  %v12567_v13 = vrot.slane %v12566_v33, 4  ;;  %v12715_v8 = vsel %vm3498_vm5, %v12502_v24, %v12474_v4  ;;  %v12543_v47 = vrot.slane %v12542_v38, 1  ;;  %v12580_v51 = vsel %vm2919_vm4, %v12228_v36, 0.0 }
0x12f5   :  { %v20850_v23 = vpop.permute.xlu0 %11962  ;;  %v12557_v28 = vrot.slane %v12556_v50, 1  ;;  %v12716_v55 = vsel %vm3500_vm7, %v12530_v1, %v12715_v8  ;;  %v12581_v45 = vrot.slane %v12580_v51, 4  ;;  %v12783_v0 = vsel %vm3498_vm5, %v12516_v54, %v12488_v20 }
0x12f6   :  { %v12568_v15 = vadd.f32 %v12567_v13, %v12566_v33  ;;  %v12544_v10 = vadd.f32 %v12543_v47, %v12542_v38 }
0x12f7   :  { %v12558_v14 = vadd.f32 %v12557_v28, %v12556_v50  ;;  %v12582_v61 = vadd.f32 %v12581_v45, %v12580_v51 }
0x12f8   :  { %v12113_v6 = vpop.permute.xlu1 %12112  ;;  %v12569_v11 = vrot.slane %v12568_v15, 2  ;;  %v12784_v60 = vsel %vm3500_vm7, %v12544_v10, %v12783_v0 }
0x12f9   :  { %v12123_v22 = vpop.permute.xlu0 %12122  ;;  %v12717_v12 = vsel %vm3502_vm6, %v12558_v14, %v12716_v55  ;;  %v12230_v57 = vmul.f32 %v12113_v6, %v20672_v31  ;;  %v12583_v49 = vrot.slane %v12582_v61, 2 }
0x12fa   :  { %v12570_v44 = vadd.f32 %v12569_v11, %v12568_v15  ;;  %v12232_v62 = vmul.f32 %v12123_v22, %v20318_v46 }
0x12fb   :  { %v12594_v35 = vsel %vm2919_vm4, %v12230_v57, 0.0  ;;  %v12584_v7 = vadd.f32 %v12583_v49, %v12582_v61 }
0x12fc   :  { %v20858_v26 = vpop.permute.xlu1 %11972  ;;  %v12571_v30 = vrot.slane %v12570_v44, 1  ;;  %v12595_v43 = vrot.slane %v12594_v35, 4  ;;  %v12608_v31 = vsel %vm2919_vm4, %v12232_v62, 0.0 }
0x12fd   :  { %v20863_v37 = vpop.permute.xlu0 %11982  ;;  %v12609_v16 = vrot.slane %v12608_v31, 4  ;;  %v12585_v38 = vrot.slane %v12584_v7, 1 }
0x12fe   :  { %v12572_v53 = vadd.f32 %v12571_v30, %v12570_v44  ;;  %v12596_v4 = vadd.f32 %v12595_v43, %v12594_v35 }
0x12ff   :  { %v12610_v19 = vadd.f32 %v12609_v16, %v12608_v31  ;;  %v12586_v8 = vadd.f32 %v12585_v38, %v12584_v7 }
0x1300   :  { %v12133_v25 = vpop.permute.xlu1 %12132  ;;  %v12785_v27 = vsel %vm3502_vm6, %v12572_v53, %v12784_v60  ;;  %v12597_v50 = vrot.slane %v12596_v4, 2 }
0x1301   :  { %v12234_v42 = vmul.f32 %v12133_v25, %v20318_v46  ;;  %v12611_v34 = vrot.slane %v12610_v19, 2  ;;  %v12143_v24 = vpop.permute.xlu0 %12142  ;;  %v12718_v11 = vsel %vm6033_vm9, %v12586_v8, %v12717_v12 }
0x1302   :  { %v12236_v15 = vmul.f32 %v12143_v24, %v20328_v21  ;;  %v12598_v47 = vadd.f32 %v12597_v50, %v12596_v4 }
0x1303   :  { %v12622_v13 = vsel %vm2919_vm4, %v12234_v42, 0.0  ;;  %v12612_v41 = vadd.f32 %v12611_v34, %v12610_v19 }
0x1304   :  { %v20869_v33 = vpop.permute.xlu1 %11992  ;;  %v12623_v28 = vrot.slane %v12622_v13, 4  ;;  %v12636_v63 = vsel %vm2919_vm4, %v12236_v15, 0.0  ;;  %v12599_v45 = vrot.slane %v12598_v47, 1 }
0x1305   :  { %v12613_v1 = vrot.slane %v12612_v41, 1  ;;  %v12637_v14 = vrot.slane %v12636_v63, 4 }
0x1306   :  { %v12624_v6 = vadd.f32 %v12623_v28, %v12622_v13  ;;  %v12600_v49 = vadd.f32 %v12599_v45, %v12598_v47  ;;  %v12180_v45 = vmul.f32 %v20770_v56, %v20548_v40 }
0x1307   :  { %v12614_v46 = vadd.f32 %v12613_v1, %v12612_v41  ;;  %v12638_v10 = vadd.f32 %v12637_v14, %v12636_v63 }
0x1308   :  { %v12153_v36 = vpop.permute.xlu1 %12152  ;;  %v12625_v51 = vrot.slane %v12624_v6, 2  ;;  %v12244_v40 = vsel %vm2919_vm4, %v12180_v45, 0.0 }
0x1309   :  { %v12719_v55 = vsel %vm6035_vm10, %v12614_v46, %v12718_v11  ;;  %v12238_v44 = vmul.f32 %v12153_v36, %v20328_v21  ;;  %v12639_v0 = vrot.slane %v12638_v10, 2  ;;  %v12786_v21 = vsel %vm6033_vm9, %v12600_v49, %v12785_v27  ;;  %v12003_v49 = vpop.permute.xlu0 %12002 }
0x130a   :  { %v12626_v54 = vadd.f32 %v12625_v51, %v12624_v6  ;;  %v12190_v11 = vmul.f32 %v20783_v18, %v20594_v5  ;;  %v12194_v51 = vmul.f32 %v20837_v9, %v20652_v3  ;;  %v12206_v18 = vmul.f32 %v20869_v33, %v20304_v59 }
0x130b   :  { %v12650_v20 = vsel %vm2919_vm4, %v12238_v44, 0.0  ;;  %v12640_v16 = vadd.f32 %v12639_v0, %v12638_v10  ;;  %v21594_v44 = vld [vmem:[#allocation50_spill] sm:$0xff] }
0x130c   :  { %v12013_v22 = vpop.permute.xlu1 %12012  ;;  %v12627_v61 = vrot.slane %v12626_v54, 1  ;;  %v12651_v35 = vrot.slane %v12650_v20, 4  ;;  %v12198_v10 = vmul.f32 %v20848_v58, %v21594_v44  ;;  %v12196_v33 = vmul.f32 %v20841_v29, %v21594_v44 }
0x130d   :  { %v12641_v41 = vrot.slane %v12640_v16, 1  ;;  %v12210_v9 = vmul.f32 %v12013_v22, %v20321_v32 }
0x130e   :  { %v12628_v62 = vadd.f32 %v12627_v61, %v12626_v54  ;;  %v12652_v53 = vadd.f32 %v12651_v35, %v12650_v20  ;;  %v12184_v54 = vmul.f32 %v20810_v52, %v20573_v39  ;;  %v21595_v61 = vld [vmem:[#allocation31_spill] sm:$0xff]  ;;  %v12342_v20 = vsel %vm2919_vm4, %v12194_v51, 0.0 }
0x130f   :  { %v12642_v27 = vadd.f32 %v12641_v41, %v12640_v16  ;;  %v12192_v39 = vmul.f32 %v20818_v2, %v20652_v3  ;;  %v12370_v52 = vsel %vm2919_vm4, %v12198_v10, 0.0  ;;  %v12343_v22 = vrot.slane %v12342_v20, 4 }
0x1310   :  { %v12173_v57 = vpop.permute.xlu1 %12172  ;;  %v12653_v31 = vrot.slane %v12652_v53, 2  ;;  %v12787_v19 = vsel %vm6035_vm10, %v12628_v62, %v12786_v21  ;;  %v12272_v56 = vsel %vm2919_vm4, %v12184_v54, 0.0  ;;  %v12200_v35 = vmul.f32 %v20850_v23, %v21595_v61 }
0x1311   :  { %v12242_v30 = vmul.f32 %v12173_v57, %v20335_v17  ;;  %v12720_v46 = vsel %vm6037_vm11, %v12642_v27, %v12719_v55  ;;  %v12202_v55 = vmul.f32 %v20858_v26, %v21595_v61  ;;  %v12314_v57 = vsel %vm2919_vm4, %v12190_v11, 0.0 }
0x1312   :  { %v12654_v42 = vadd.f32 %v12653_v31, %v12652_v53  ;;  %v12315_v58 = vrot.slane %v12314_v57, 4  ;;  %v12188_v26 = vmul.f32 %v20802_v48, %v20594_v5  ;;  %v12426_v62 = vsel %vm2919_vm4, %v12206_v18, 0.0 }
0x1313   :  { %v12678_v12 = vsel %vm2919_vm4, %v12242_v30, 0.0  ;;  %v12398_v30 = vsel %vm2919_vm4, %v12202_v55, 0.0  ;;  %v12273_v0 = vrot.slane %v12272_v56, 4  ;;  %v12371_v3 = vrot.slane %v12370_v52, 4 }
0x1314   :  { %v12679_v60 = vrot.slane %v12678_v12, 4  ;;  %v12163_v7 = vpop.permute.xlu1 %12162  ;;  %v12655_v24 = vrot.slane %v12654_v42, 1  ;;  %v12204_v2 = vmul.f32 %v20863_v37, %v20304_v59  ;;  %v12245_v5 = vrot.slane %v12244_v40, 4 }
0x1315   :  { %v12240_v43 = vmul.f32 %v12163_v7, %v20335_v17  ;;  %v12328_v48 = vsel %vm2919_vm4, %v12192_v39, 0.0  ;;  %v12399_v29 = vrot.slane %v12398_v30, 4  ;;  %v12208_v53 = vmul.f32 %v12003_v49, %v20321_v32 }
0x1316   :  { %v12680_v25 = vadd.f32 %v12679_v60, %v12678_v12  ;;  %v12656_v8 = vadd.f32 %v12655_v24, %v12654_v42  ;;  %v12454_v12 = vsel %vm2919_vm4, %v12210_v9, 0.0  ;;  %v12316_v60 = vadd.f32 %v12315_v58, %v12314_v57 }
0x1317   :  { %v12664_v4 = vsel %vm2919_vm4, %v12240_v43, 0.0  ;;  %v12300_v7 = vsel %vm2919_vm4, %v12188_v26, 0.0  ;;  %v12356_v23 = vsel %vm2919_vm4, %v12196_v33, 0.0  ;;  %v12427_v43 = vrot.slane %v12426_v62, 4 }
0x1318   :  { %v12681_v38 = vrot.slane %v12680_v25, 2  ;;  %v12665_v34 = vrot.slane %v12664_v4, 4  ;;  %v12788_v1 = vsel %vm6037_vm11, %v12656_v8, %v12787_v19  ;;  %v12344_v21 = vadd.f32 %v12343_v22, %v12342_v20 }
0x1319   :  { %v12384_v31 = vsel %vm2919_vm4, %v12200_v35, 0.0  ;;  %v12274_v16 = vadd.f32 %v12273_v0, %v12272_v56  ;;  %v12329_v59 = vrot.slane %v12328_v48, 4  ;;  %v12372_v37 = vadd.f32 %v12371_v3, %v12370_v52 }
0x131a   :  { %v12682_v50 = vadd.f32 %v12681_v38, %v12680_v25  ;;  %v12666_v13 = vadd.f32 %v12665_v34, %v12664_v4  ;;  %v12455_v25 = vrot.slane %v12454_v12, 4  ;;  %v12412_v4 = vsel %vm2919_vm4, %v12204_v2, 0.0 }
0x131b   :  { %v12301_v19 = vrot.slane %v12300_v7, 4  ;;  %v12357_v42 = vrot.slane %v12356_v23, 4  ;;  %v12400_v38 = vadd.f32 %v12399_v29, %v12398_v30  ;;  %v12440_v32 = vsel %vm2919_vm4, %v12208_v53, 0.0 }
0x131c   :  { %v12683_v28 = vrot.slane %v12682_v50, 1  ;;  %v12667_v15 = vrot.slane %v12666_v13, 2  ;;  %v12246_v34 = vadd.f32 %v12245_v5, %v12244_v40  ;;  %v12317_v24 = vrot.slane %v12316_v60, 2 }
0x131d   :  { %v12345_v41 = vrot.slane %v12344_v21, 2  ;;  %v12413_v8 = vrot.slane %v12412_v4, 4  ;;  %v12441_v27 = vrot.slane %v12440_v32, 4 }
0x131e   :  { %v12684_v17 = vadd.f32 %v12683_v28, %v12682_v50  ;;  %v12668_v36 = vadd.f32 %v12667_v15, %v12666_v13  ;;  %v12385_v50 = vrot.slane %v12384_v31, 4  ;;  %v12428_v13 = vadd.f32 %v12427_v43, %v12426_v62 }
0x131f   :  { %v12456_v28 = vadd.f32 %v12455_v25, %v12454_v12  ;;  %v12275_v15 = vrot.slane %v12274_v16, 2  ;;  %v12318_v11 = vadd.f32 %v12317_v24, %v12316_v60  ;;  %v12346_v54 = vadd.f32 %v12345_v41, %v12344_v21 }
0x1320   :  { %v12669_v47 = vrot.slane %v12668_v36, 1  ;;  %v20886_v6 = vsel %vm6039_vm12, %v12684_v17, %v12788_v1  ;;  %v12330_v17 = vadd.f32 %v12329_v59, %v12328_v48  ;;  %v12302_v1 = vadd.f32 %v12301_v19, %v12300_v7 }
0x1321   :  { %v12386_v51 = vadd.f32 %v12385_v50, %v12384_v31  ;;  %v12429_v45 = vrot.slane %v12428_v13, 2  ;;  %v12414_v44 = vadd.f32 %v12413_v8, %v12412_v4  ;;  %v12457_v10 = vrot.slane %v12456_v28, 2  ;;  %v21596_v4 = vld [vmem:[#allocation90_spill] sm:$0xff] }
0x1322   :  { %v12670_v63 = vadd.f32 %v12669_v47, %v12668_v36  ;;  %v12373_v36 = vrot.slane %v12372_v37, 2  ;;  %v12358_v47 = vadd.f32 %v12357_v42, %v12356_v23  ;;  %v12276_v61 = vadd.f32 %v12275_v15, %v12274_v16 }
0x1323   :  { %v12331_v55 = vrot.slane %v12330_v17, 2  ;;  %v12442_v18 = vadd.f32 %v12441_v27, %v12440_v32  ;;  %v12303_v20 = vrot.slane %v12302_v1, 2  ;;  %v12319_v39 = vrot.slane %v12318_v11, 1 }
0x1324   :  { %v20890_v14 = vsel %vm6039_vm12, %v12670_v63, %v12720_v46  ;;  %v12401_v63 = vrot.slane %v12400_v38, 2  ;;  %v12247_v46 = vrot.slane %v12246_v34, 2  ;;  %v12374_v57 = vadd.f32 %v12373_v36, %v12372_v37 }
0x1325   :  { %v12359_v9 = vrot.slane %v12358_v47, 2  ;;  %v12387_v52 = vrot.slane %v12386_v51, 2  ;;  %v12430_v58 = vadd.f32 %v12429_v45, %v12428_v13  ;;  %v12347_v26 = vrot.slane %v12346_v54, 1 }
0x1326   :  { %v12402_v40 = vadd.f32 %v12401_v63, %v12400_v38  ;;  %v12248_v56 = vadd.f32 %v12247_v46, %v12246_v34  ;;  %v12415_v33 = vrot.slane %v12414_v44, 2  ;;  %v12458_v30 = vadd.f32 %v12457_v10, %v12456_v28 }
0x1327   :  { %v12277_v49 = vrot.slane %v12276_v61, 1  ;;  %v12332_v22 = vadd.f32 %v12331_v55, %v12330_v17  ;;  %v12375_v35 = vrot.slane %v12374_v57, 1  ;;  %v12443_v62 = vrot.slane %v12442_v18, 2 }
0x1328   :  { %v12304_v0 = vadd.f32 %v12303_v20, %v12302_v1  ;;  %v12360_v3 = vadd.f32 %v12359_v9, %v12358_v47  ;;  %v12403_v2 = vrot.slane %v12402_v40, 1  ;;  %v12249_v12 = vrot.slane %v12248_v56, 1 }
0x1329   :  { %v12320_v5 = vadd.f32 %v12319_v39, %v12318_v11  ;;  %v12388_v48 = vadd.f32 %v12387_v52, %v12386_v51  ;;  %v12431_v29 = vrot.slane %v12430_v58, 1  ;;  %v12348_v53 = vadd.f32 %v12347_v26, %v12346_v54  ;;  %v14220_v26 = vld [vmem:[#allocation10 + $0x1e0] ss:$16 sps:$4 sm:$0xff]  }
0x132a   :  { %v12416_v60 = vadd.f32 %v12415_v33, %v12414_v44  ;;  %v12459_v7 = vrot.slane %v12458_v30, 1  ;;  %v12278_v23 = vadd.f32 %v12277_v49, %v12276_v61  ;;  %v12333_v43 = vrot.slane %v12332_v22, 1  ;;  %v14222_v33 = vld [vmem:[#allocation10 + $0x1e4] ss:$16 sps:$4 sm:$0xff]   ;;  %v14225_v49 = vld [vmem:[#allocation10 + $0x1ec] ss:$16 sps:$4 sm:$0xff]  }
0x132b   :  { %v12376_v21 = vadd.f32 %v12375_v35, %v12374_v57  ;;  %v12444_v31 = vadd.f32 %v12443_v62, %v12442_v18  ;;  %v12305_v25 = vrot.slane %v12304_v0, 1  ;;  %v12361_v16 = vrot.slane %v12360_v3, 1  ;;  %13214 = vmatprep.subr.bf16.mxu1 %v14222_v33  ;;  %v14231_v35 = vld [vmem:[#allocation10 + $0x1cc] ss:$16 sps:$4 sm:$0xff]   ;;  %13257 = vmatprep.subr.bf16.mxu0 %v14225_v49  ;;  %v14226_v62 = vld [vmem:[#allocation10 + $0x1c0] ss:$16 sps:$4 sm:$0xff]  }
0x132c   :  { %v12404_v59 = vadd.f32 %v12403_v2, %v12402_v40  ;;  %v12250_v37 = vadd.f32 %v12249_v12, %v12248_v56  ;;  %v12777_v19 = vsel %vm3500_vm7, %v12320_v5, %v21596_v4  ;;  %v12389_v42 = vrot.slane %v12388_v48, 1  ;;  %13215 = vmatpush1.bf16.msra.mxu1 %v14220_v26  ;;  %v21598_v5 = vld [vmem:[#allocation92_spill] sm:$0xff]  ;;  %v14241_v4 = vld [vmem:[#allocation10 + $0x188] ss:$16 sps:$4 sm:$0xff]  }
0x132d   :  { %v12432_v38 = vadd.f32 %v12431_v29, %v12430_v58  ;;  %v12778_v32 = vsel %vm3502_vm6, %v12348_v53, %v12777_v19  ;;  %v12417_v34 = vrot.slane %v12416_v60, 1  ;;  %v12460_v24 = vadd.f32 %v12459_v7, %v12458_v30  ;;  %v14223_v30 = vld [vmem:[#allocation10 + $0x1e8] ss:$16 sps:$4 sm:$0xff]   ;;  %v21599_v7 = vld [vmem:[#allocation76_spill] sm:$0xff]  ;;  %v14243_v19 = vld [vmem:[#allocation10 + $0x18c] ss:$16 sps:$4 sm:$0xff]  }
0x132e   :  { %v12708_v50 = vsel %vm3498_vm5, %v12278_v23, %v12250_v37  ;;  %v12334_v13 = vadd.f32 %v12333_v43, %v12332_v22  ;;  %v12779_v41 = vsel %vm6033_vm9, %v12376_v21, %v12778_v32  ;;  %v12445_v8 = vrot.slane %v12444_v31, 1  ;;  %v14228_v22 = vld [vmem:[#allocation10 + $0x1c4] ss:$16 sps:$4 sm:$0xff]   ;;  %v14232_v21 = vld [vmem:[#allocation10 + $0x1a0] ss:$16 sps:$4 sm:$0xff]   ;;  %v14276_v26 = vld [vmem:[#allocation11 + $0xd8] sm:$0xff]  }
0x132f   :  { %v12306_v28 = vadd.f32 %v12305_v25, %v12304_v0  ;;  %v12362_v15 = vadd.f32 %v12361_v16, %v12360_v3  ;;  %v12780_v36 = vsel %vm6035_vm10, %v12404_v59, %v12779_v41  ;;  %v12390_v27 = vadd.f32 %v12389_v42, %v12388_v48  ;;  %13216 = vmatprep.subr.bf16.mxu1 %v14228_v22  ;;  %v14229_v0 = vld [vmem:[#allocation10 + $0x1c8] ss:$16 sps:$4 sm:$0xff]   ;;  %v14237_v16 = vld [vmem:[#allocation10 + $0x1ac] ss:$16 sps:$4 sm:$0xff]   ;;  %v14238_v59 = vld [vmem:[#allocation10 + $0x180] ss:$16 sps:$4 sm:$0xff]  }
0x1330   :  { %v12781_v63 = vsel %vm6037_vm11, %v12432_v38, %v12780_v36  ;;  %v12418_v11 = vadd.f32 %v12417_v34, %v12416_v60  ;;  %v12446_v54 = vadd.f32 %v12445_v8, %v12444_v31  ;;  %13217 = vmatpush1.bf16.msra.mxu1 %v14226_v62  ;;  %v14234_v31 = vld [vmem:[#allocation10 + $0x1a4] ss:$16 sps:$4 sm:$0xff]   ;;  %v14235_v25 = vld [vmem:[#allocation10 + $0x1a8] ss:$16 sps:$4 sm:$0xff]   ;;  %v14249_v38 = vld [vmem:[#allocation10 + $0x16c] ss:$16 sps:$4 sm:$0xff]  }
0x1331   :  { %v12709_v46 = vsel %vm3500_vm7, %v12306_v28, %v12708_v50  ;;  %v12782_v51 = vsel %vm6039_vm12, %v12460_v24, %v12781_v63  ;;  %13218 = vmatprep.subr.bf16.mxu1 %v14234_v31  ;;  %v14240_v37 = vld [vmem:[#allocation10 + $0x184] ss:$16 sps:$4 sm:$0xff]   ;;  %v14244_v32 = vld [vmem:[#allocation10 + $0x160] ss:$16 sps:$4 sm:$0xff]   ;;  %v14247_v34 = vld [vmem:[#allocation10 + $0x168] ss:$16 sps:$4 sm:$0xff]  }
0x1332   :  { %v12710_v45 = vsel %vm3502_vm6, %v12334_v13, %v12709_v46  ;;  %v14246_v42 = vld [vmem:[#allocation10 + $0x164] ss:$16 sps:$4 sm:$0xff]   ;;  %v14255_v50 = vld [vmem:[#allocation10 + $0x14c] ss:$16 sps:$4 sm:$0xff]   ;;  %v14250_v13 = vld [vmem:[#allocation10 + $0x140] ss:$16 sps:$4 sm:$0xff]  }
0x1333   :  { %v12711_v61 = vsel %vm6033_vm9, %v12362_v15, %v12710_v45  ;;  %v14252_v24 = vld [vmem:[#allocation10 + $0x144] ss:$16 sps:$4 sm:$0xff]   ;;  %v14253_v41 = vld [vmem:[#allocation10 + $0x148] ss:$16 sps:$4 sm:$0xff]   ;;  %v14261_v28 = vld [vmem:[#allocation10 + $0x12c] ss:$16 sps:$4 sm:$0xff]  }
0x1334   :  { %v12712_v57 = vsel %vm6035_vm10, %v12390_v27, %v12711_v61  ;;  %13219 = vmatpush1.bf16.msra.mxu1 %v14232_v21  ;;  %v14258_v8 = vld [vmem:[#allocation10 + $0x124] ss:$16 sps:$4 sm:$0xff]   ;;  %v14256_v15 = vld [vmem:[#allocation10 + $0x120] ss:$16 sps:$4 sm:$0xff]   ;;  %v14267_v27 = vld [vmem:[#allocation10 + $0x10c] ss:$16 sps:$4 sm:$0xff]  }
0x1335   :  { %v12713_v40 = vsel %vm6037_vm11, %v12418_v11, %v12712_v57  ;;  %13220 = vmatprep.subr.bf16.mxu1 %v14240_v37  ;;  %v14264_v36 = vld [vmem:[#allocation10 + $0x104] ss:$16 sps:$4 sm:$0xff]   ;;  %v14277_v33 = vld [vmem:[#allocation11 + $0x98] sm:$0xff]   ;;  %v14280_v49 = vld [vmem:[#allocation11 + $0xc8] sm:$0xff]  }
0x1336   :  { %v12714_v56 = vsel %vm6039_vm12, %v12446_v54, %v12713_v40  ;;  %v14271_v40 = vld [vmem:[#allocation11 + $0xb0] sm:$0xff]   ;;  %v14281_v22 = vld [vmem:[#allocation11 + $0x88] sm:$0xff]   ;;  %v14283_v62 = vld [vmem:[#allocation11 + $0x80] sm:$0xff]  }
0x1338   :  { %13221 = vmatpush1.bf16.msra.mxu1 %v14238_v59 }
0x1339   :  { %13222 = vmatprep.subr.bf16.mxu1 %v14246_v42 }
0x133c   :  { %13223 = vmatpush1.bf16.msra.mxu1 %v14244_v32 }
0x133d   :  { %13224 = vmatprep.subr.bf16.mxu1 %v14252_v24 }
0x1340   :  { %13225 = vmatpush1.bf16.msra.mxu1 %v14250_v13 }
0x1341   :  { %13226 = vmatprep.subr.bf16.mxu1 %v14258_v8 }
0x1344   :  { %13227 = vmatpush1.bf16.msra.mxu1 %v14256_v15 }
0x1345   :  { %13228 = vmatprep.subr.bf16.mxu1 %v14264_v36 }
0x1359   :  { %v14020_v17 = vpop.permute.xlu0 %14019 }
0x135a   :  { %v14022_v1 = vunpack.i.h.bf16 %v14020_v17  ;;  %v14021_v47 = vunpack.i.l.bf16 %v14020_v17  ;;  %v14259_v17 = vld [vmem:[#allocation10 + $0x128] ss:$16 sps:$4 sm:$0xff]  }
0x135c   :  { %v12830_v44 = vsel %vm6154_vm13, %v12782_v51, %v14021_v47  ;;  %v12831_v10 = vsel %vm6154_vm13, %v20886_v6, %v14022_v1  ;;  %v21597_v6 = vmov 0   ;;  %v14262_v1 = vld [vmem:[#allocation10 + $0x100] ss:$16 sps:$4 sm:$0xff]   ;;  %v14265_v47 = vld [vmem:[#allocation10 + $0x108] ss:$16 sps:$4 sm:$0xff]  }
0x135d   :  { %v12833_v55 = vpack.c.bf16 %v12831_v10, %v12830_v44  ;;  %v14025_v18 = vpop.permute.xlu1 %14024  ;;  %13229 = vmatpush1.bf16.msra.mxu1 %v14262_v1 }
0x135e   :  { %v14027_v20 = vunpack.i.h.bf16 %v14025_v18  ;;  %v14026_v9 = vunpack.i.l.bf16 %v14025_v18  ;;  %v14268_v18 = vld [vmem:[#allocation11 + $0xf8] sm:$0xff]  }
0x135f   :  { %12995 = vmatprep.mubr.bf16.mxu0 %v12833_v55  ;;  %13966 = vmatprep.subr.bf16.mxu1 %v14268_v18 }
0x1360   :  { %v12828_v39 = vsel %vm6154_vm13, %v12714_v56, %v14026_v9  ;;  %v12829_v52 = vsel %vm6154_vm13, %v20890_v14, %v14027_v20  ;;  %v14269_v20 = vld [vmem:[#allocation11 + $0xb8] sm:$0xff]   ;;  %v14270_v9 = vld [vmem:[#allocation11 + $0xf0] sm:$0xff]   ;;  %v14272_v56 = vld [vmem:[#allocation11 + $0xe8] sm:$0xff]  }
0x1361   :  { %v12832_v58 = vpack.c.bf16 %v12829_v52, %v12828_v39  ;;  %v14273_v39 = vld [vmem:[#allocation11 + $0xa8] sm:$0xff]   ;;  %v14274_v52 = vld [vmem:[#allocation11 + $0xe0] sm:$0xff]  }
0x1363   :  { %12996 = vmatmul.mubr.bf16.vlgmr.msra.gmra.mxu0 %v12832_v58  ;;  %v14275_v58 = vld [vmem:[#allocation11 + $0xa0] sm:$0xff]  }
0x1364   :  { %13289 = vmatprep.mubr.bf16.mxu0 %v21597_v6  ;;  %13258 = vmatpush1.bf16.msra.mxu0 %v14223_v30  ;;  %v14279_v30 = vld [vmem:[#allocation11 + $0x90] sm:$0xff]  }
0x1365   :  { %13259 = vmatprep.subr.bf16.mxu0 %v14231_v35  ;;  %v14282_v35 = vld [vmem:[#allocation11 + $0xc0] sm:$0xff]  }
0x1368   :  { %13260 = vmatpush1.bf16.msra.mxu0 %v14229_v0 }
0x1369   :  { %13261 = vmatprep.subr.bf16.mxu0 %v14237_v16 }
0x136c   :  { %13262 = vmatpush1.bf16.msra.mxu0 %v14235_v25 }
0x136d   :  { %13263 = vmatprep.subr.bf16.mxu0 %v14243_v19 }
0x1370   :  { %13264 = vmatpush1.bf16.msra.mxu0 %v14241_v4 }
0x1371   :  { %13265 = vmatprep.subr.bf16.mxu0 %v14249_v38 }
0x1374   :  { %13266 = vmatpush1.bf16.msra.mxu0 %v14247_v34 }
0x1375   :  { %13267 = vmatprep.subr.bf16.mxu0 %v14255_v50 }
0x1378   :  { %13268 = vmatpush1.bf16.msra.mxu0 %v14253_v41 }
0x1379   :  { %13269 = vmatprep.subr.bf16.mxu0 %v14261_v28 }
0x137c   :  { %13270 = vmatpush1.bf16.msra.mxu0 %v14259_v17 }
0x137d   :  { %13271 = vmatprep.subr.bf16.mxu0 %v14267_v27 }
0x1380   :  { %13272 = vmatpush1.bf16.msra.mxu0 %v14265_v47  ;;  %v14284_v47 = vld [vmem:[#allocation13 + $0x70] ss:$8 sps:$4 sm:$0xff]  }
0x1423   :  { %v13960_v14 = vpop.f32.mrf.mxu0 }
0x1425   :  { %v13961_v3 = vpop.f32.mrf.mxu0 }
0x1426   :  { %v13962_v2 = vadd.f32 %v13961_v3, %v13960_v14 }
0x1427   :  { %v13963_v12 = vpop.f32.mrf.mxu0 }
0x1428   :  { %v20954_v48 = vadd.f32 %v13962_v2, %v21598_v5 }
0x1429   :  { %v13964_v29 = vpop.f32.mrf.mxu0 }
0x142a   :  { %v13965_v53 = vadd.f32 %v13964_v29, %v13963_v12  ;;  %v13006_v60 = vmul.f32 %v20954_v48, %v20954_v48 }
0x142c   :  { %v20959_v23 = vadd.f32 %v13965_v53, %v21599_v7  ;;  %13008 = vadd.xlane.f32.xlu0 %v13006_v60 }
0x142e   :  { %v13007_v43 = vmul.f32 %v20959_v23, %v20959_v23 }
0x1430   :  { %13010 = vadd.xlane.f32.xlu1 %v13007_v43 }
0x14b5   :  { %v13009_v63 = vpop.xlane.xlu0 %13008 }
0x14b6   :  { %v13012_v46 = vmul.f32 0.0078125, %v13009_v63  ;;  %v14286_v63 = vld [vmem:[#allocation13 + $0x74] ss:$8 sps:$4 sm:$0xff]  }
0x14b7   :  { %13617 = vmatprep.subr.bf16.mxu0 %v14286_v63 }
0x14b8   :  { %v13014_v11 = vadd.f32 1e-06, %v13012_v46  ;;  %v14289_v46 = vld [vmem:[#allocation13 + $0x64] ss:$8 sps:$4 sm:$0xff]  }
0x14b9   :  { %v13011_v51 = vpop.xlane.xlu1 %13010 }
0x14ba   :  { %v13013_v45 = vmul.f32 0.0078125, %v13011_v51  ;;  %14656 = vrsqrt.f32 %v13014_v11  ;;  %v14287_v11 = vld [vmem:[#allocation13 + $0x60] ss:$8 sps:$4 sm:$0xff]  }
0x14bc   :  { %v13015_v54 = vadd.f32 1e-06, %v13013_v45 }
0x14be   :  { %14658 = vrsqrt.f32 %v13015_v54 }
0x14c7   :  { %v14657_v44 = vpop.eup %14656 }
0x14c8   :  { %v13018_v61 = vmul.f32 %v14657_v44, %v20954_v48 }
0x14cb   :  { %v14659_v10 = vpop.eup %14658 }
0x14cc   :  { %v13019_v55 = vmul.f32 %v14659_v10, %v20959_v23 }
0x14ce   :  { %v13020_v57 = vpack.c.bf16 %v13019_v55, %v13018_v61 }
0x14d0   :  { %13247 = vmatmul.mubr.bf16.vlgmr.msra.gmra.mxu1 %v13020_v57  ;;  %13290 = vmatmul.mubr.bf16.vlgmr.msra.gmra.mxu0 %v13020_v57 }
0x14d1   :  { %13649 = vmatprep.mubr.bf16.mxu0 %v21597_v6  ;;  %13967 = vmatpush3.bf16.msra.mxu1 %v14269_v20  ;;  %v14278_v6 = vld [vmem:[#allocation11 + $0xd0] sm:$0xff]  }
0x14d2   :  { %13968 = vmatprep.subr.bf16.mxu1 %v14270_v9  ;;  %13618 = vmatpush1.bf16.msra.mxu0 %v14284_v47  ;;  %v14290_v9 = vld [vmem:[#allocation13 + $0x50] ss:$8 sps:$4 sm:$0xff]  }
0x14d3   :  { %13619 = vmatprep.subr.bf16.mxu0 %v14289_v46 }
0x14d5   :  { %13969 = vmatpush3.bf16.msra.mxu1 %v14271_v40  ;;  %v14292_v40 = vld [vmem:[#allocation13 + $0x54] ss:$8 sps:$4 sm:$0xff]  }
0x14d6   :  { %13970 = vmatprep.subr.bf16.mxu1 %v14272_v56  ;;  %13620 = vmatpush1.bf16.msra.mxu0 %v14287_v11  ;;  %v14293_v56 = vld [vmem:[#allocation13 + $0x40] ss:$8 sps:$4 sm:$0xff]  }
0x14d7   :  { %13621 = vmatprep.subr.bf16.mxu0 %v14292_v40 }
0x14d9   :  { %13971 = vmatpush3.bf16.msra.mxu1 %v14273_v39  ;;  %v14295_v39 = vld [vmem:[#allocation13 + $0x44] ss:$8 sps:$4 sm:$0xff]  }
0x14da   :  { %13972 = vmatprep.subr.bf16.mxu1 %v14274_v52  ;;  %13622 = vmatpush1.bf16.msra.mxu0 %v14290_v9  ;;  %v14298_v52 = vld [vmem:[#allocation13 + $0x34] ss:$8 sps:$4 sm:$0xff]  }
0x14db   :  { %13623 = vmatprep.subr.bf16.mxu0 %v14295_v39 }
0x14dd   :  { %13973 = vmatpush3.bf16.msra.mxu1 %v14275_v58  ;;  %v14296_v58 = vld [vmem:[#allocation13 + $0x30] ss:$8 sps:$4 sm:$0xff]  }
0x14de   :  { %13974 = vmatprep.subr.bf16.mxu1 %v14276_v26  ;;  %13624 = vmatpush1.bf16.msra.mxu0 %v14293_v56  ;;  %v14299_v26 = vld [vmem:[#allocation13 + $0x20] ss:$8 sps:$4 sm:$0xff]  }
0x14df   :  { %13625 = vmatprep.subr.bf16.mxu0 %v14298_v52 }
0x14e1   :  { %13975 = vmatpush3.bf16.msra.mxu1 %v14277_v33  ;;  %v14304_v33 = vld [vmem:[#allocation13 + $0x14] ss:$8 sps:$4 sm:$0xff]  }
0x14e2   :  { %13976 = vmatprep.subr.bf16.mxu1 %v14278_v6  ;;  %13626 = vmatpush1.bf16.msra.mxu0 %v14296_v58  ;;  %v14307_v6 = vld [vmem:[#allocation13 + $0x4] ss:$8 sps:$4 sm:$0xff]  }
0x14e5   :  { %13977 = vmatpush3.bf16.msra.mxu1 %v14279_v30  ;;  %v14305_v30 = vld [vmem:[#allocation13] ss:$8 sps:$4 sm:$0xff]  }
0x14e6   :  { %13978 = vmatprep.subr.bf16.mxu1 %v14280_v49 }
0x14e9   :  { %13979 = vmatpush3.bf16.msra.mxu1 %v14281_v22 }
0x14ea   :  { %13980 = vmatprep.subr.bf16.mxu1 %v14282_v35 }
0x14ed   :  { %13981 = vmatpush3.bf16.msra.mxu1 %v14283_v62 }
0x1590   :  { %v13248_v0 = vpop.f32.mrf.mxu1  ;;  %v13291_v37 = vpop.f32.mrf.mxu0 }
0x1591   :  { %v13864_v14 = vmul.f32 -1.442695, %v13248_v0 }
0x1592   :  { %v13250_v3 = vpop.f32.mrf.mxu1  ;;  %v13293_v4 = vpop.f32.mrf.mxu0 }
0x1593   :  { %14660 = vpow2.f32 %v13864_v14  ;;  %v13865_v2 = vmul.f32 -1.442695, %v13250_v3 }
0x1594   :  { %v13252_v12 = vpop.f32.mrf.mxu1  ;;  %v13295_v32 = vpop.f32.mrf.mxu0 }
0x1595   :  { %14662 = vpow2.f32 %v13865_v2  ;;  %v13866_v5 = vmul.f32 -1.442695, %v13252_v12 }
0x1596   :  { %v13254_v29 = vpop.f32.mrf.mxu1  ;;  %v13297_v28 = vpop.f32.mrf.mxu0 }
0x1597   :  { %14664 = vpow2.f32 %v13866_v5  ;;  %v13867_v53 = vmul.f32 -1.442695, %v13254_v29 }
0x1599   :  { %14666 = vpow2.f32 %v13867_v53 }
0x15a0   :  { %v14661_v60 = vpop.eup %14660 }
0x15a1   :  { %v13312_v43 = vadd.f32 1.0, %v14661_v60 }
0x15a2   :  { %v14663_v7 = vpop.eup %14662 }
0x15a3   :  { %v13313_v21 = vadd.f32 1.0, %v14663_v7 }
0x15a4   :  { %v14665_v31 = vpop.eup %14664 }
0x15a5   :  { %14668 = vrcp.f32 %v13313_v21  ;;  %v13314_v25 = vadd.f32 1.0, %v14665_v31 }
0x15a6   :  { %v14667_v16 = vpop.eup %14666  ;;  %14670 = vrcp.f32 %v13312_v43 }
0x15a7   :  { %14672 = vrcp.f32 %v13314_v25  ;;  %v13315_v59 = vadd.f32 1.0, %v14667_v16 }
0x15a9   :  { %14674 = vrcp.f32 %v13315_v59 }
0x15b2   :  { %v14669_v19 = vpop.eup %14668 }
0x15b3   :  { %v14671_v42 = vpop.eup %14670  ;;  %v13325_v34 = vmul.f32 %v14669_v19, %v13250_v3 }
0x15b4   :  { %v14673_v38 = vpop.eup %14672  ;;  %v13324_v13 = vmul.f32 %v14671_v42, %v13248_v0 }
0x15b5   :  { %v13326_v24 = vmul.f32 %v14673_v38, %v13252_v12  ;;  %v13329_v15 = vmul.f32 %v13325_v34, %v13293_v4 }
0x15b6   :  { %v14675_v50 = vpop.eup %14674  ;;  %v13328_v36 = vmul.f32 %v13324_v13, %v13291_v37 }
0x15b7   :  { %v13327_v41 = vmul.f32 %v14675_v50, %v13254_v29  ;;  %v13330_v8 = vmul.f32 %v13326_v24, %v13295_v32 }
0x15b9   :  { %v13331_v17 = vmul.f32 %v13327_v41, %v13297_v28  ;;  %v13332_v1 = vpack.c.bf16 %v13330_v8, %v13328_v36 }
0x15bb   :  { %v13333_v27 = vpack.c.bf16 %v13331_v17, %v13329_v15 }
0x15bd   :  { %13495 = vmatprep.mubr.bf16.mxu1 %v13333_v27 }
0x15be   :  { %13496 = vmatmul.mubr.bf16.vlgmr.msra.gmra.mxu1 %v13332_v1 }
0x167e   :  { %v13982_v51 = vpop.f32.mrf.mxu1 }
0x1680   :  { %v13983_v45 = vpop.f32.mrf.mxu1 }
0x1681   :  { %v13984_v54 = vadd.f32 %v13983_v45, %v13982_v51 }
0x1682   :  { %v13985_v44 = vpop.f32.mrf.mxu1 }
0x1683   :  { %v13504_v10 = vadd.f32 %v13984_v54, %v20954_v48  ;;  %v14301_v48 = vld [vmem:[#allocation13 + $0x24] ss:$8 sps:$4 sm:$0xff]  }
0x1684   :  { %v13986_v61 = vpop.f32.mrf.mxu1  ;;  %13627 = vmatprep.subr.bf16.mxu0 %v14301_v48 }
0x1685   :  { %v13987_v55 = vadd.f32 %v13986_v61, %v13985_v44  ;;  %v13506_v57 = vmul.f32 %v13504_v10, %v13504_v10  ;;  %13628 = vmatpush1.bf16.msra.mxu0 %v14299_v26 }
0x1686   :  { %13629 = vmatprep.subr.bf16.mxu0 %v14304_v33 }
0x1687   :  { %v13505_v18 = vadd.f32 %v13987_v55, %v20959_v23  ;;  %13508 = vadd.xlane.f32.xlu0 %v13506_v57  ;;  %v14302_v23 = vld [vmem:[#allocation13 + $0x10] ss:$8 sps:$4 sm:$0xff]  }
0x1689   :  { %v13507_v20 = vmul.f32 %v13505_v18, %v13505_v18  ;;  %13630 = vmatpush1.bf16.msra.mxu0 %v14302_v23 }
0x168a   :  { %13631 = vmatprep.subr.bf16.mxu0 %v14307_v6 }
0x168b   :  { %13510 = vadd.xlane.f32.xlu0 %v13507_v20 }
0x168d   :  { %13632 = vmatpush1.bf16.msra.mxu0 %v14305_v30 }
0x1710   :  { %v13509_v49 = vpop.xlane.xlu0 %13508 }
0x1711   :  { %v13512_v22 = vmul.f32 0.0078125, %v13509_v49 }
0x1713   :  { %v13514_v35 = vadd.f32 1e-06, %v13512_v22 }
0x1714   :  { %v13511_v62 = vpop.xlane.xlu0 %13510 }
0x1715   :  { %v13513_v0 = vmul.f32 0.0078125, %v13511_v62  ;;  %14676 = vrsqrt.f32 %v13514_v35 }
0x1717   :  { %v13515_v14 = vadd.f32 1e-06, %v13513_v0 }
0x1719   :  { %14678 = vrsqrt.f32 %v13515_v14 }
0x1722   :  { %v14677_v3 = vpop.eup %14676 }
0x1723   :  { %v13518_v12 = vmul.f32 %v14677_v3, %v13504_v10 }
0x1726   :  { %v14679_v2 = vpop.eup %14678 }
0x1727   :  { %v13519_v5 = vmul.f32 %v14679_v2, %v13505_v18 }
0x1729   :  { %v13520_v29 = vpack.c.bf16 %v13519_v5, %v13518_v12 }
0x172b   :  { %13650 = vmatmul.mubr.bf16.vlgmr.msra.gmra.mxu0 %v13520_v29 }
0x17eb   :  { %v13651_v53 = vpop.f32.mrf.mxu0 }
0x17ec   :  { %13660 = vst [vmem:[#allocation14] sm:$0xff] %v13651_v53 }
0x17ed   :  { %v13653_v60 = vpop.f32.mrf.mxu0 }
0x17ee   :  { %13661 = vst [vmem:[#allocation14 + $0x8] sm:$0xff] %v13653_v60 }
0x17ef   :  { %v13655_v7 = vpop.f32.mrf.mxu0 }
0x17f0   :  { %13662 = vst [vmem:[#allocation14 + $0x10] sm:$0xff] %v13655_v7 }
0x17f1   :  { %v13657_v43 = vpop.f32.mrf.mxu0 }
0x17f2   :  { %13663 = vst [vmem:[#allocation14 + $0x18] sm:$0xff] %v13657_v43 }
0x17f3   :  { %14837 = shalt.err (!%p14834_p11)
}
0x17f4   :  { %13675 = dma.vmem_to_hbm [thread:$0]  %s13670_s30, 512, %s20981_s7, [#allocation4], %s14865_s5, %s14865_s5, %s14866_s26  }
0x17f5   :  { %14854 = dma.done.wait [#allocation4], 512  }
0x17f6   :  { %14855 = vsyncadd [#allocation4], 4294966784 }
0x17f7   :  { %13679 = vsyncpa [#allocation3], 1 }
0x17f8   :  { %13680 = vsyncpa [#allocation6], 1 }
0x17f9   :  { %13681 = vsyncpa [#allocation9], 1 }
0x17fa   :  { %13682 = vsyncpa [#allocation12], 1 }
0x17fb   :  { %13683 = vsyncpa [#allocation4], 1 }

</bundles_post_ra>
